<compile_context>
chip_gen: v5e
topology: v5e:2x2
jax: 0.10.0
libtpu: 0.0.40
codegen_flags: <defaults>
</compile_context>

<pallas_src>
import jax
import jax.numpy as jnp
from jax import lax
from jax.experimental import pallas as pl
from jax.experimental.pallas import tpu as pltpu

BN_EPS = 1e-5
LANE = 128


def _round_up(v, m):
    return -(-v // m) * m


def _fill_padded_slab(pad_ref, y_bf16, H, W, C):
    """Direct stores of the bf16 bn+relu output into the interior of the
    (H+2, Wpad, C) slab plus zeroing of the 1-pixel halo.  The slab columns
    beyond W+2 are never read, so they are left untouched.  The full halo is
    rewritten every grid step (scratch VMEM is NOT zeroed between steps and is
    per-core under megacore parallel semantics)."""
    zrow = jnp.zeros((1, W + 2, C), y_bf16.dtype)
    zcol = jnp.zeros((H, 1, C), y_bf16.dtype)
    pad_ref[0:1, 0:W + 2, :] = zrow                     # top halo row
    pad_ref[H + 1:H + 2, 0:W + 2, :] = zrow             # bottom halo row
    pad_ref[1:H + 1, 0:1, :] = zcol                     # left halo column
    pad_ref[1:H + 1, W + 1:W + 2, :] = zcol             # right halo column
    pad_ref[1:H + 1, 1:W + 1, :] = y_bf16               # interior


def _conv3x3_accumulate(pad_ref, w_ref, H, W, Cin):
    """3x3 SAME conv as 9 accumulated MXU dots over static tap slices of the
    bf16 slab (no im2col concat).  Returns (H*W, Cout) f32."""
    acc = None
    for dh in range(3):
        for dw in range(3):
            k = dh * 3 + dw
            tap = pad_ref[dh:dh + H, dw:dw + W, :].reshape(H * W, Cin)
            part = jnp.dot(tap, w_ref[k * Cin:(k + 1) * Cin, :],
                           preferred_element_type=jnp.float32)
            acc = part if acc is None else acc + part
    return acc


def _pass1_kernel(x_ref, s1_ref, t1_ref, w1_ref, c1_ref, st_ref, pad_ref):
    # bn1 (precomputed scale/shift) + relu + conv1 + bn2 partial sums
    _, H, W, Cp = x_ref.shape
    Pp = w1_ref.shape[1]
    s1 = s1_ref[...].reshape(1, 1, Cp)
    t1 = t1_ref[...].reshape(1, 1, Cp)
    y = jnp.maximum(x_ref[0] * s1 + t1, 0.0).astype(jnp.bfloat16)   # f32 VPU -> bf16
    _fill_padded_slab(pad_ref, y, H, W, Cp)
    c1 = _conv3x3_accumulate(pad_ref, w1_ref, H, W, Cp)              # (H*W, Pp) f32
    c1_ref[...] = c1.astype(jnp.bfloat16).reshape(1, H, W, Pp)       # bf16 HBM intermediate
    # one-pass BN2 statistics from the f32 accumulator: per-image sum / sumsq
    st_ref[...] = jnp.concatenate(
        [jnp.sum(c1, axis=0, keepdims=True),
         jnp.sum(c1 * c1, axis=0, keepdims=True)], axis=0).reshape(1, 2, Pp)


def _pass2_kernel(c1_ref, x_ref, s2_ref, t2_ref, w2_ref, o_ref, pad_ref):
    # bn2 (precomputed scale/shift) + relu + conv2 + residual add
    _, H, W, Pp = c1_ref.shape
    s2 = s2_ref[...].reshape(1, 1, Pp)
    t2 = t2_ref[...].reshape(1, 1, Pp)
    y = jnp.maximum(c1_ref[0].astype(jnp.float32) * s2 + t2, 0.0).astype(jnp.bfloat16)
    _fill_padded_slab(pad_ref, y, H, W, Pp)
    c2 = _conv3x3_accumulate(pad_ref, w2_ref, H, W, Pp)              # (H*W, Pp) f32
    o_ref[...] = c2.reshape(1, H, W, Pp) + x_ref[...]                # + residual (f32)


def _pad_lanes(v, target):
    return jnp.pad(v, [(0, 0)] * (v.ndim - 1) + [(0, target - v.shape[-1])])


def _vmem_limit_bytes():
    """Per-generation scoped-VMEM cap with headroom: ~96 MiB on v5e/v6e (128 MiB
    physical), ~48 MiB on v7x (64 MiB per TC)."""
    try:
        cap = int(getattr(pltpu.get_tpu_info(), "vmem_capacity_bytes",
                          128 * 1024 * 1024))
    except Exception:
        cap = 128 * 1024 * 1024
    return int(max(32 * 1024 * 1024, min(96 * 1024 * 1024, (cap * 3) // 4)))


def basic_block_v2(x_nchw, params):
    """Forward of BasicBlockV2 (stride=1, downsample=None), training-mode BN."""
    N, C, H, W = x_nchw.shape
    P = params["conv1_w"].shape[0]
    assert P == C, "no downsample => inplanes must equal planes"
    # TODO(synk): stride>1 / downsample branch of BasicBlockV2 not implemented
    # (demo block uses stride=1, downsample=None); large feature maps on v7x
    # additionally want a halo-aware row-tile grid axis with the same slab pattern.
    Cp = _round_up(C, LANE)
    Pp = _round_up(P, LANE)
    Wpad = _round_up(W + 2, 16)        # bf16 sublane-aligned slab width
    f32 = jnp.float32
    cnt = N * H * W
    xf = x_nchw.astype(f32)

    # bn1 batch statistics from the UN-padded NCHW input (tiny XLA reduction,
    # subtract-mean-first to avoid cancellation)
    mean1 = jnp.mean(xf, axis=(0, 2, 3))                                   # (C,)
    var1 = jnp.mean((xf - mean1[None, :, None, None]) ** 2, axis=(0, 2, 3))
    s1 = params["bn1_gamma"].astype(f32) * lax.rsqrt(var1 + BN_EPS)
    t1 = params["bn1_beta"].astype(f32) - mean1 * s1
    s1p = _pad_lanes(s1, Cp).reshape(1, Cp)
    t1p = _pad_lanes(t1, Cp).reshape(1, Cp)

    # NCHW -> NHWC, pad channels to lane width (lane-dense VPU/MXU/stores)
    xp = _pad_lanes(jnp.transpose(xf, (0, 2, 3, 1)), Cp)

    # conv weights: (Cout, Cin, 3, 3) -> (kh, kw, Cin, Cout) -> (9*Cinp, Coutp) bf16
    def prep_w(w, cin_p, cout_p):
        w = jnp.transpose(w.astype(f32), (2, 3, 1, 0))
        w = jnp.pad(w, ((0, 0), (0, 0),
                        (0, cin_p - w.shape[2]), (0, cout_p - w.shape[3])))
        return w.reshape(9 * cin_p, cout_p).astype(jnp.bfloat16)

    w1 = prep_w(params["conv1_w"], Cp, Pp)
    w2 = prep_w(params["conv2_w"], Pp, Pp)

    cparams = pltpu.CompilerParams(
        dimension_semantics=("parallel",),      # shard the batch across TCs on v7x
        vmem_limit_bytes=_vmem_limit_bytes(),
    )
    img_spec = lambda c: pl.BlockSpec((1, H, W, c), lambda n: (n, 0, 0, 0))
    vec_spec = lambda c: pl.BlockSpec((1, c), lambda n: (0, 0))        # VMEM-resident
    w_spec = lambda ci, co: pl.BlockSpec((9 * ci, co), lambda n: (0, 0))

    # ---- pass 1: bn1 + relu + conv1 (bf16 intermediate) + per-image (sum, sumsq)
    c1, stats = pl.pallas_call(
        _pass1_kernel,
        out_shape=(jax.ShapeDtypeStruct((N, H, W, Pp), jnp.bfloat16),
                   jax.ShapeDtypeStruct((N, 2, Pp), f32)),
        grid=(N,),
        in_specs=[img_spec(Cp), vec_spec(Cp), vec_spec(Cp), w_spec(Cp, Pp)],
        out_specs=(img_spec(Pp), pl.BlockSpec((1, 2, Pp), lambda n: (n, 0, 0))),
        scratch_shapes=[pltpu.VMEM((H + 2, Wpad, Cp), jnp.bfloat16)],
        compiler_params=cparams,
    )(xp, s1p, t1p, w1)

    # ---- bn2 batch statistics from the f32 partial sums (tiny XLA reduction)
    tot = jnp.sum(stats, axis=0)                    # (2, Pp)
    mean2 = tot[0] / cnt
    var2 = jnp.maximum(tot[1] / cnt - mean2 * mean2, 0.0)
    g2 = _pad_lanes(params["bn2_gamma"].astype(f32), Pp)
    b2 = _pad_lanes(params["bn2_beta"].astype(f32), Pp)
    s2 = g2 * lax.rsqrt(var2 + BN_EPS)
    t2 = b2 - mean2 * s2

    # ---- pass 2: bn2 + relu + conv2 + residual (residual buffer aliased to output)
    out_p = pl.pallas_call(
        _pass2_kernel,
        out_shape=jax.ShapeDtypeStruct((N, H, W, Pp), f32),
        grid=(N,),
        in_specs=[img_spec(Pp), img_spec(Cp), vec_spec(Pp), vec_spec(Pp),
                  w_spec(Pp, Pp)],
        out_specs=img_spec(Pp),
        scratch_shapes=[pltpu.VMEM((H + 2, Wpad, Pp), jnp.bfloat16)],
        input_output_aliases={1: 0},                # xp (residual) -> output buffer
        compiler_params=cparams,
    )(c1, xp, s2.reshape(1, Pp), t2.reshape(1, Pp), w2)

    # drop lane padding, back to NCHW
    return jnp.transpose(out_p[..., :P], (0, 3, 1, 2))


def reference(x, params):
    """Pure-JAX reference of the PyTorch forward (training-mode BN, SAME conv)."""
    def bn(v, g, b):
        m = v.mean(axis=(0, 2, 3), keepdims=True)
        var = ((v - m) ** 2).mean(axis=(0, 2, 3), keepdims=True)
        return (v - m) / jnp.sqrt(var + BN_EPS) * g[None, :, None, None] \
            + b[None, :, None, None]

    out = jax.nn.relu(bn(x, params["bn1_gamma"], params["bn1_beta"]))
    residual = x
    out = lax.conv_general_dilated(out, params["conv1_w"], (1, 1), "SAME",
                                   dimension_numbers=("NCHW", "OIHW", "NCHW"))
    out = jax.nn.relu(bn(out, params["bn2_gamma"], params["bn2_beta"]))
    out = lax.conv_general_dilated(out, params["conv2_w"], (1, 1), "SAME",
                                   dimension_numbers=("NCHW", "OIHW", "NCHW"))
    return out + residual


if __name__ == "__main__":
    key = jax.random.PRNGKey(0)
    kx, k1, k2, kg1, kb1, kg2, kb2 = jax.random.split(key, 7)

    N, C, H, W = 2, 8, 16, 16   # inplanes = planes = 8, stride = 1, downsample = None
    planes = C

    x = jax.random.normal(kx, (N, C, H, W), jnp.float32)
    params = {
        "conv1_w": 0.1 * jax.random.normal(k1, (planes, C, 3, 3), jnp.float32),
        "conv2_w": 0.1 * jax.random.normal(k2, (planes, planes, 3, 3), jnp.float32),
        "bn1_gamma": 1.0 + 0.1 * jax.random.normal(kg1, (C,), jnp.float32),
        "bn1_beta": 0.1 * jax.random.normal(kb1, (C,), jnp.float32),
        "bn2_gamma": 1.0 + 0.1 * jax.random.normal(kg2, (planes,), jnp.float32),
        "bn2_beta": 0.1 * jax.random.normal(kb2, (planes,), jnp.float32),
    }

    out = jax.block_until_ready(jax.jit(basic_block_v2)(x, params))
    ref = reference(x, params)
    assert out.shape == ref.shape == (N, planes, H, W)

    # bf16 MXU operands + bf16 inter-pass intermediate => relaxed tolerance.
    max_err = float(jnp.max(jnp.abs(out - ref)))
    if max_err < 1e-1:
        print("KERNEL_OK")
    else:
        print(f"MISMATCH max_abs_err={max_err}")
</pallas_src>

<mosaic_0001>
module attributes {stable_mosaic.version = 11 : i64} {
  func.func @_pass1_kernel(%arg0: i32, %arg1: memref<1x16x16x128xf32, #tpu.memory_space<vmem>>, %arg2: memref<1x128xf32, #tpu.memory_space<vmem>>, %arg3: memref<1x128xf32, #tpu.memory_space<vmem>>, %arg4: memref<1152x128xbf16, #tpu.memory_space<vmem>>, %arg5: memref<1x16x16x128xbf16, #tpu.memory_space<vmem>>, %arg6: memref<1x2x128xf32, #tpu.memory_space<vmem>>, %arg7: memref<18x32x128xbf16, #tpu.memory_space<vmem>>) attributes {dimension_semantics = [#tpu.dimension_semantics<parallel>], iteration_bounds = array<i64: 2>, scalar_prefetch = 0 : i64, scratch_operands = 1 : i64, tpu.core_type = #tpu.core_type<tc>, window_params = [{transform_indices = @transform_0, window_bounds = array<i64: 1, 16, 16, 128>}, {pipeline_mode = #tpu.pipeline_mode<synchronous>, transform_indices = @transform_1, window_bounds = array<i64: 1, 128>}, {pipeline_mode = #tpu.pipeline_mode<synchronous>, transform_indices = @transform_2, window_bounds = array<i64: 1, 128>}, {pipeline_mode = #tpu.pipeline_mode<synchronous>, transform_indices = @transform_3, window_bounds = array<i64: 1152, 128>}, {transform_indices = @transform_4, window_bounds = array<i64: 1, 16, 16, 128>}, {transform_indices = @transform_5, window_bounds = array<i64: 1, 2, 128>}]} {
    %c0 = arith.constant 0 : index
    %c0_0 = arith.constant 0 : index
    %0 = vector.load %arg2[%c0, %c0_0] : memref<1x128xf32, #tpu.memory_space<vmem>>, vector<1x128xf32>
    %1 = vector.shape_cast %0 : vector<1x128xf32> to vector<1x1x128xf32>
    %c0_1 = arith.constant 0 : index
    %c0_2 = arith.constant 0 : index
    %2 = vector.load %arg3[%c0_1, %c0_2] : memref<1x128xf32, #tpu.memory_space<vmem>>, vector<1x128xf32>
    %3 = vector.shape_cast %2 : vector<1x128xf32> to vector<1x1x128xf32>
    %c0_3 = arith.constant 0 : index
    %c0_4 = arith.constant 0 : index
    %c0_5 = arith.constant 0 : index
    %c0_6 = arith.constant 0 : index
    %4 = vector.load %arg1[%c0_3, %c0_4, %c0_5, %c0_6] : memref<1x16x16x128xf32, #tpu.memory_space<vmem>>, vector<1x16x16x128xf32>
    %5 = vector.shape_cast %4 : vector<1x16x16x128xf32> to vector<16x16x128xf32>
    %6 = vector.broadcast %1 : vector<1x1x128xf32> to vector<16x16x128xf32>
    %7 = arith.mulf %5, %6 : vector<16x16x128xf32>
    %8 = vector.broadcast %3 : vector<1x1x128xf32> to vector<16x16x128xf32>
    %9 = arith.addf %7, %8 : vector<16x16x128xf32>
    %cst = arith.constant 0.000000e+00 : f32
    %10 = vector.broadcast %cst : f32 to vector<16x16x128xf32>
    %11 = arith.maximumf %9, %10 : vector<16x16x128xf32>
    %12 = arith.truncf %11 : vector<16x16x128xf32> to vector<16x16x128xbf16>
    %cst_7 = arith.constant 0.000000e+00 : bf16
    %13 = vector.broadcast %cst_7 : bf16 to vector<1x18x128xbf16>
    %cst_8 = arith.constant 0.000000e+00 : bf16
    %14 = vector.broadcast %cst_8 : bf16 to vector<16x1x128xbf16>
    %c0_9 = arith.constant 0 : index
    %c0_10 = arith.constant 0 : index
    %c0_11 = arith.constant 0 : index
    %15 = vector.load %arg7[%c0_9, %c0_10, %c0_11] : memref<18x32x128xbf16, #tpu.memory_space<vmem>>, vector<1x18x128xbf16>
    tpu.vector_store %arg7[%c0_9, %c0_10, %c0_11], %13 {strides = array<i32>} : memref<18x32x128xbf16, #tpu.memory_space<vmem>>, vector<1x18x128xbf16>,
    %c17 = arith.constant 17 : index
    %c0_12 = arith.constant 0 : index
    %c0_13 = arith.constant 0 : index
    %16 = vector.load %arg7[%c17, %c0_12, %c0_13] : memref<18x32x128xbf16, #tpu.memory_space<vmem>>, vector<1x18x128xbf16>
    tpu.vector_store %arg7[%c17, %c0_12, %c0_13], %13 {strides = array<i32>} : memref<18x32x128xbf16, #tpu.memory_space<vmem>>, vector<1x18x128xbf16>,
    %c1 = arith.constant 1 : index
    %c0_14 = arith.constant 0 : index
    %c0_15 = arith.constant 0 : index
    %17 = vector.load %arg7[%c1, %c0_14, %c0_15] : memref<18x32x128xbf16, #tpu.memory_space<vmem>>, vector<16x1x128xbf16>
    tpu.vector_store %arg7[%c1, %c0_14, %c0_15], %14 {strides = array<i32>} : memref<18x32x128xbf16, #tpu.memory_space<vmem>>, vector<16x1x128xbf16>,
    %c1_16 = arith.constant 1 : index
    %c17_17 = arith.constant 17 : index
    %c0_18 = arith.constant 0 : index
    %18 = vector.load %arg7[%c1_16, %c17_17, %c0_18] : memref<18x32x128xbf16, #tpu.memory_space<vmem>>, vector<16x1x128xbf16>
    tpu.vector_store %arg7[%c1_16, %c17_17, %c0_18], %14 {strides = array<i32>} : memref<18x32x128xbf16, #tpu.memory_space<vmem>>, vector<16x1x128xbf16>,
    %c1_19 = arith.constant 1 : index
    %c1_20 = arith.constant 1 : index
    %c0_21 = arith.constant 0 : index
    %19 = vector.load %arg7[%c1_19, %c1_20, %c0_21] : memref<18x32x128xbf16, #tpu.memory_space<vmem>>, vector<16x16x128xbf16>
    tpu.vector_store %arg7[%c1_19, %c1_20, %c0_21], %12 {strides = array<i32>} : memref<18x32x128xbf16, #tpu.memory_space<vmem>>, vector<16x16x128xbf16>,
    %c0_22 = arith.constant 0 : index
    %c0_23 = arith.constant 0 : index
    %c0_24 = arith.constant 0 : index
    %20 = vector.load %arg7[%c0_22, %c0_23, %c0_24] : memref<18x32x128xbf16, #tpu.memory_space<vmem>>, vector<16x16x128xbf16>
    %21 = vector.shape_cast %20 : vector<16x16x128xbf16> to vector<256x128xbf16>
    %c0_25 = arith.constant 0 : index
    %c0_26 = arith.constant 0 : index
    %22 = vector.load %arg4[%c0_25, %c0_26] : memref<1152x128xbf16, #tpu.memory_space<vmem>>, vector<128x128xbf16>
    %cst_27 = arith.constant dense<0.000000e+00> : vector<256x128xf32>
    %23 = tpu.matmul %21, %22, %cst_27 {dimension_numbers = #tpu.dot_dimension_numbers<[1], [0], [0], [1], [0, 0, 1, 1], [], []>} : vector<256x128xbf16>, vector<128x128xbf16>, vector<256x128xf32> -> vector<256x128xf32>
    %c0_28 = arith.constant 0 : index
    %c1_29 = arith.constant 1 : index
    %c0_30 = arith.constant 0 : index
    %24 = vector.load %arg7[%c0_28, %c1_29, %c0_30] : memref<18x32x128xbf16, #tpu.memory_space<vmem>>, vector<16x16x128xbf16>
    %25 = vector.shape_cast %24 : vector<16x16x128xbf16> to vector<256x128xbf16>
    %c128 = arith.constant 128 : index
    %c0_31 = arith.constant 0 : index
    %26 = vector.load %arg4[%c128, %c0_31] : memref<1152x128xbf16, #tpu.memory_space<vmem>>, vector<128x128xbf16>
    %cst_32 = arith.constant dense<0.000000e+00> : vector<256x128xf32>
    %27 = tpu.matmul %25, %26, %cst_32 {dimension_numbers = #tpu.dot_dimension_numbers<[1], [0], [0], [1], [0, 0, 1, 1], [], []>} : vector<256x128xbf16>, vector<128x128xbf16>, vector<256x128xf32> -> vector<256x128xf32>
    %28 = arith.addf %23, %27 : vector<256x128xf32>
    %c0_33 = arith.constant 0 : index
    %c2 = arith.constant 2 : index
    %c0_34 = arith.constant 0 : index
    %29 = vector.load %arg7[%c0_33, %c2, %c0_34] : memref<18x32x128xbf16, #tpu.memory_space<vmem>>, vector<16x16x128xbf16>
    %30 = vector.shape_cast %29 : vector<16x16x128xbf16> to vector<256x128xbf16>
    %c256 = arith.constant 256 : index
    %c0_35 = arith.constant 0 : index
    %31 = vector.load %arg4[%c256, %c0_35] : memref<1152x128xbf16, #tpu.memory_space<vmem>>, vector<128x128xbf16>
    %cst_36 = arith.constant dense<0.000000e+00> : vector<256x128xf32>
    %32 = tpu.matmul %30, %31, %cst_36 {dimension_numbers = #tpu.dot_dimension_numbers<[1], [0], [0], [1], [0, 0, 1, 1], [], []>} : vector<256x128xbf16>, vector<128x128xbf16>, vector<256x128xf32> -> vector<256x128xf32>
    %33 = arith.addf %28, %32 : vector<256x128xf32>
    %c1_37 = arith.constant 1 : index
    %c0_38 = arith.constant 0 : index
    %c0_39 = arith.constant 0 : index
    %34 = vector.load %arg7[%c1_37, %c0_38, %c0_39] : memref<18x32x128xbf16, #tpu.memory_space<vmem>>, vector<16x16x128xbf16>
    %35 = vector.shape_cast %34 : vector<16x16x128xbf16> to vector<256x128xbf16>
    %c384 = arith.constant 384 : index
    %c0_40 = arith.constant 0 : index
    %36 = vector.load %arg4[%c384, %c0_40] : memref<1152x128xbf16, #tpu.memory_space<vmem>>, vector<128x128xbf16>
    %cst_41 = arith.constant dense<0.000000e+00> : vector<256x128xf32>
    %37 = tpu.matmul %35, %36, %cst_41 {dimension_numbers = #tpu.dot_dimension_numbers<[1], [0], [0], [1], [0, 0, 1, 1], [], []>} : vector<256x128xbf16>, vector<128x128xbf16>, vector<256x128xf32> -> vector<256x128xf32>
    %38 = arith.addf %33, %37 : vector<256x128xf32>
    %c1_42 = arith.constant 1 : index
    %c1_43 = arith.constant 1 : index
    %c0_44 = arith.constant 0 : index
    %39 = vector.load %arg7[%c1_42, %c1_43, %c0_44] : memref<18x32x128xbf16, #tpu.memory_space<vmem>>, vector<16x16x128xbf16>
    %40 = vector.shape_cast %39 : vector<16x16x128xbf16> to vector<256x128xbf16>
    %c512 = arith.constant 512 : index
    %c0_45 = arith.constant 0 : index
    %41 = vector.load %arg4[%c512, %c0_45] : memref<1152x128xbf16, #tpu.memory_space<vmem>>, vector<128x128xbf16>
    %cst_46 = arith.constant dense<0.000000e+00> : vector<256x128xf32>
    %42 = tpu.matmul %40, %41, %cst_46 {dimension_numbers = #tpu.dot_dimension_numbers<[1], [0], [0], [1], [0, 0, 1, 1], [], []>} : vector<256x128xbf16>, vector<128x128xbf16>, vector<256x128xf32> -> vector<256x128xf32>
    %43 = arith.addf %38, %42 : vector<256x128xf32>
    %c1_47 = arith.constant 1 : index
    %c2_48 = arith.constant 2 : index
    %c0_49 = arith.constant 0 : index
    %44 = vector.load %arg7[%c1_47, %c2_48, %c0_49] : memref<18x32x128xbf16, #tpu.memory_space<vmem>>, vector<16x16x128xbf16>
    %45 = vector.shape_cast %44 : vector<16x16x128xbf16> to vector<256x128xbf16>
    %c640 = arith.constant 640 : index
    %c0_50 = arith.constant 0 : index
    %46 = vector.load %arg4[%c640, %c0_50] : memref<1152x128xbf16, #tpu.memory_space<vmem>>, vector<128x128xbf16>
    %cst_51 = arith.constant dense<0.000000e+00> : vector<256x128xf32>
    %47 = tpu.matmul %45, %46, %cst_51 {dimension_numbers = #tpu.dot_dimension_numbers<[1], [0], [0], [1], [0, 0, 1, 1], [], []>} : vector<256x128xbf16>, vector<128x128xbf16>, vector<256x128xf32> -> vector<256x128xf32>
    %48 = arith.addf %43, %47 : vector<256x128xf32>
    %c2_52 = arith.constant 2 : index
    %c0_53 = arith.constant 0 : index
    %c0_54 = arith.constant 0 : index
    %49 = vector.load %arg7[%c2_52, %c0_53, %c0_54] : memref<18x32x128xbf16, #tpu.memory_space<vmem>>, vector<16x16x128xbf16>
    %50 = vector.shape_cast %49 : vector<16x16x128xbf16> to vector<256x128xbf16>
    %c768 = arith.constant 768 : index
    %c0_55 = arith.constant 0 : index
    %51 = vector.load %arg4[%c768, %c0_55] : memref<1152x128xbf16, #tpu.memory_space<vmem>>, vector<128x128xbf16>
    %cst_56 = arith.constant dense<0.000000e+00> : vector<256x128xf32>
    %52 = tpu.matmul %50, %51, %cst_56 {dimension_numbers = #tpu.dot_dimension_numbers<[1], [0], [0], [1], [0, 0, 1, 1], [], []>} : vector<256x128xbf16>, vector<128x128xbf16>, vector<256x128xf32> -> vector<256x128xf32>
    %53 = arith.addf %48, %52 : vector<256x128xf32>
    %c2_57 = arith.constant 2 : index
    %c1_58 = arith.constant 1 : index
    %c0_59 = arith.constant 0 : index
    %54 = vector.load %arg7[%c2_57, %c1_58, %c0_59] : memref<18x32x128xbf16, #tpu.memory_space<vmem>>, vector<16x16x128xbf16>
    %55 = vector.shape_cast %54 : vector<16x16x128xbf16> to vector<256x128xbf16>
    %c896 = arith.constant 896 : index
    %c0_60 = arith.constant 0 : index
    %56 = vector.load %arg4[%c896, %c0_60] : memref<1152x128xbf16, #tpu.memory_space<vmem>>, vector<128x128xbf16>
    %cst_61 = arith.constant dense<0.000000e+00> : vector<256x128xf32>
    %57 = tpu.matmul %55, %56, %cst_61 {dimension_numbers = #tpu.dot_dimension_numbers<[1], [0], [0], [1], [0, 0, 1, 1], [], []>} : vector<256x128xbf16>, vector<128x128xbf16>, vector<256x128xf32> -> vector<256x128xf32>
    %58 = arith.addf %53, %57 : vector<256x128xf32>
    %c2_62 = arith.constant 2 : index
    %c2_63 = arith.constant 2 : index
    %c0_64 = arith.constant 0 : index
    %59 = vector.load %arg7[%c2_62, %c2_63, %c0_64] : memref<18x32x128xbf16, #tpu.memory_space<vmem>>, vector<16x16x128xbf16>
    %60 = vector.shape_cast %59 : vector<16x16x128xbf16> to vector<256x128xbf16>
    %c1024 = arith.constant 1024 : index
    %c0_65 = arith.constant 0 : index
    %61 = vector.load %arg4[%c1024, %c0_65] : memref<1152x128xbf16, #tpu.memory_space<vmem>>, vector<128x128xbf16>
    %cst_66 = arith.constant dense<0.000000e+00> : vector<256x128xf32>
    %62 = tpu.matmul %60, %61, %cst_66 {dimension_numbers = #tpu.dot_dimension_numbers<[1], [0], [0], [1], [0, 0, 1, 1], [], []>} : vector<256x128xbf16>, vector<128x128xbf16>, vector<256x128xf32> -> vector<256x128xf32>
    %63 = arith.addf %58, %62 : vector<256x128xf32>
    %64 = arith.truncf %63 : vector<256x128xf32> to vector<256x128xbf16>
    %65 = vector.shape_cast %64 : vector<256x128xbf16> to vector<1x16x16x128xbf16>
    %c0_67 = arith.constant 0 : index
    %c0_68 = arith.constant 0 : index
    %c0_69 = arith.constant 0 : index
    %c0_70 = arith.constant 0 : index
    %66 = vector.load %arg5[%c0_67, %c0_68, %c0_69, %c0_70] : memref<1x16x16x128xbf16, #tpu.memory_space<vmem>>, vector<1x16x16x128xbf16>
    tpu.vector_store %arg5[%c0_67, %c0_68, %c0_69, %c0_70], %65 {strides = array<i32>} : memref<1x16x16x128xbf16, #tpu.memory_space<vmem>>, vector<1x16x16x128xbf16>,
    %cst_71 = arith.constant dense<0.000000e+00> : vector<128xf32>
    %67 = vector.multi_reduction <add>, %63, %cst_71 [0] : vector<256x128xf32> to vector<128xf32>
    %68 = vector.shape_cast %67 : vector<128xf32> to vector<1x128xf32>
    %69 = arith.mulf %63, %63 : vector<256x128xf32>
    %cst_72 = arith.constant dense<0.000000e+00> : vector<128xf32>
    %70 = vector.multi_reduction <add>, %69, %cst_72 [0] : vector<256x128xf32> to vector<128xf32>
    %71 = vector.shape_cast %70 : vector<128xf32> to vector<1x128xf32>
    %72 = tpu.concatenate %68, %71 in 0 : vector<1x128xf32>, vector<1x128xf32> -> vector<2x128xf32>
    %73 = vector.shape_cast %72 : vector<2x128xf32> to vector<1x2x128xf32>
    %c0_73 = arith.constant 0 : index
    %c0_74 = arith.constant 0 : index
    %c0_75 = arith.constant 0 : index
    %74 = vector.load %arg6[%c0_73, %c0_74, %c0_75] : memref<1x2x128xf32, #tpu.memory_space<vmem>>, vector<1x2x128xf32>
    tpu.vector_store %arg6[%c0_73, %c0_74, %c0_75], %73 {strides = array<i32>} : memref<1x2x128xf32, #tpu.memory_space<vmem>>, vector<1x2x128xf32>,
    return
  }
  func.func @transform_0(%arg0: i32) -> (i32, i32, i32, i32) {
    %c0_i32 = arith.constant 0 : i32
    %c0_i32_0 = arith.constant 0 : i32
    %c0_i32_1 = arith.constant 0 : i32
    %c0_i32_2 = arith.constant 0 : i32
    return %arg0, %c0_i32, %c0_i32_0, %c0_i32_1 : i32, i32, i32, i32
  }
  func.func @transform_1(%arg0: i32) -> (i32, i32) {
    %c0_i32 = arith.constant 0 : i32
    %c0_i32_0 = arith.constant 0 : i32
    %c0_i32_1 = arith.constant 0 : i32
    return %c0_i32, %c0_i32_0 : i32, i32
  }
  func.func @transform_2(%arg0: i32) -> (i32, i32) {
    %c0_i32 = arith.constant 0 : i32
    %c0_i32_0 = arith.constant 0 : i32
    %c0_i32_1 = arith.constant 0 : i32
    return %c0_i32, %c0_i32_0 : i32, i32
  }
  func.func @transform_3(%arg0: i32) -> (i32, i32) {
    %c0_i32 = arith.constant 0 : i32
    %c0_i32_0 = arith.constant 0 : i32
    %c0_i32_1 = arith.constant 0 : i32
    return %c0_i32, %c0_i32_0 : i32, i32
  }
  func.func @transform_4(%arg0: i32) -> (i32, i32, i32, i32) {
    %c0_i32 = arith.constant 0 : i32
    %c0_i32_0 = arith.constant 0 : i32
    %c0_i32_1 = arith.constant 0 : i32
    %c0_i32_2 = arith.constant 0 : i32
    return %arg0, %c0_i32, %c0_i32_0, %c0_i32_1 : i32, i32, i32, i32
  }
  func.func @transform_5(%arg0: i32) -> (i32, i32, i32) {
    %c0_i32 = arith.constant 0 : i32
    %c0_i32_0 = arith.constant 0 : i32
    %c0_i32_1 = arith.constant 0 : i32
    return %arg0, %c0_i32, %c0_i32_0 : i32, i32, i32
  }
}

module attributes {stable_mosaic.version = 11 : i64} {
  func.func @_pass2_kernel(%arg0: i32, %arg1: memref<1x16x16x128xbf16, #tpu.memory_space<vmem>>, %arg2: memref<1x16x16x128xf32, #tpu.memory_space<vmem>>, %arg3: memref<1x128xf32, #tpu.memory_space<vmem>>, %arg4: memref<1x128xf32, #tpu.memory_space<vmem>>, %arg5: memref<1152x128xbf16, #tpu.memory_space<vmem>>, %arg6: memref<1x16x16x128xf32, #tpu.memory_space<vmem>>, %arg7: memref<18x32x128xbf16, #tpu.memory_space<vmem>>) attributes {dimension_semantics = [#tpu.dimension_semantics<parallel>], iteration_bounds = array<i64: 2>, scalar_prefetch = 0 : i64, scratch_operands = 1 : i64, tpu.core_type = #tpu.core_type<tc>, window_params = [{transform_indices = @transform_0, window_bounds = array<i64: 1, 16, 16, 128>}, {transform_indices = @transform_1, window_bounds = array<i64: 1, 16, 16, 128>}, {pipeline_mode = #tpu.pipeline_mode<synchronous>, transform_indices = @transform_2, window_bounds = array<i64: 1, 128>}, {pipeline_mode = #tpu.pipeline_mode<synchronous>, transform_indices = @transform_3, window_bounds = array<i64: 1, 128>}, {pipeline_mode = #tpu.pipeline_mode<synchronous>, transform_indices = @transform_4, window_bounds = array<i64: 1152, 128>}, {transform_indices = @transform_5, window_bounds = array<i64: 1, 16, 16, 128>}]} {
    %c0 = arith.constant 0 : index
    %c0_0 = arith.constant 0 : index
    %0 = vector.load %arg3[%c0, %c0_0] : memref<1x128xf32, #tpu.memory_space<vmem>>, vector<1x128xf32>
    %1 = vector.shape_cast %0 : vector<1x128xf32> to vector<1x1x128xf32>
    %c0_1 = arith.constant 0 : index
    %c0_2 = arith.constant 0 : index
    %2 = vector.load %arg4[%c0_1, %c0_2] : memref<1x128xf32, #tpu.memory_space<vmem>>, vector<1x128xf32>
    %3 = vector.shape_cast %2 : vector<1x128xf32> to vector<1x1x128xf32>
    %c0_3 = arith.constant 0 : index
    %c0_4 = arith.constant 0 : index
    %c0_5 = arith.constant 0 : index
    %c0_6 = arith.constant 0 : index
    %4 = vector.load %arg1[%c0_3, %c0_4, %c0_5, %c0_6] : memref<1x16x16x128xbf16, #tpu.memory_space<vmem>>, vector<1x16x16x128xbf16>
    %5 = vector.shape_cast %4 : vector<1x16x16x128xbf16> to vector<16x16x128xbf16>
    %6 = arith.extf %5 : vector<16x16x128xbf16> to vector<16x16x128xf32>
    %7 = vector.broadcast %1 : vector<1x1x128xf32> to vector<16x16x128xf32>
    %8 = arith.mulf %6, %7 : vector<16x16x128xf32>
    %9 = vector.broadcast %3 : vector<1x1x128xf32> to vector<16x16x128xf32>
    %10 = arith.addf %8, %9 : vector<16x16x128xf32>
    %cst = arith.constant 0.000000e+00 : f32
    %11 = vector.broadcast %cst : f32 to vector<16x16x128xf32>
    %12 = arith.maximumf %10, %11 : vector<16x16x128xf32>
    %13 = arith.truncf %12 : vector<16x16x128xf32> to vector<16x16x128xbf16>
    %cst_7 = arith.constant 0.000000e+00 : bf16
    %14 = vector.broadcast %cst_7 : bf16 to vector<1x18x128xbf16>
    %cst_8 = arith.constant 0.000000e+00 : bf16
    %15 = vector.broadcast %cst_8 : bf16 to vector<16x1x128xbf16>
    %c0_9 = arith.constant 0 : index
    %c0_10 = arith.constant 0 : index
    %c0_11 = arith.constant 0 : index
    %16 = vector.load %arg7[%c0_9, %c0_10, %c0_11] : memref<18x32x128xbf16, #tpu.memory_space<vmem>>, vector<1x18x128xbf16>
    tpu.vector_store %arg7[%c0_9, %c0_10, %c0_11], %14 {strides = array<i32>} : memref<18x32x128xbf16, #tpu.memory_space<vmem>>, vector<1x18x128xbf16>,
    %c17 = arith.constant 17 : index
    %c0_12 = arith.constant 0 : index
    %c0_13 = arith.constant 0 : index
    %17 = vector.load %arg7[%c17, %c0_12, %c0_13] : memref<18x32x128xbf16, #tpu.memory_space<vmem>>, vector<1x18x128xbf16>
    tpu.vector_store %arg7[%c17, %c0_12, %c0_13], %14 {strides = array<i32>} : memref<18x32x128xbf16, #tpu.memory_space<vmem>>, vector<1x18x128xbf16>,
    %c1 = arith.constant 1 : index
    %c0_14 = arith.constant 0 : index
    %c0_15 = arith.constant 0 : index
    %18 = vector.load %arg7[%c1, %c0_14, %c0_15] : memref<18x32x128xbf16, #tpu.memory_space<vmem>>, vector<16x1x128xbf16>
    tpu.vector_store %arg7[%c1, %c0_14, %c0_15], %15 {strides = array<i32>} : memref<18x32x128xbf16, #tpu.memory_space<vmem>>, vector<16x1x128xbf16>,
    %c1_16 = arith.constant 1 : index
    %c17_17 = arith.constant 17 : index
    %c0_18 = arith.constant 0 : index
    %19 = vector.load %arg7[%c1_16, %c17_17, %c0_18] : memref<18x32x128xbf16, #tpu.memory_space<vmem>>, vector<16x1x128xbf16>
    tpu.vector_store %arg7[%c1_16, %c17_17, %c0_18], %15 {strides = array<i32>} : memref<18x32x128xbf16, #tpu.memory_space<vmem>>, vector<16x1x128xbf16>,
    %c1_19 = arith.constant 1 : index
    %c1_20 = arith.constant 1 : index
    %c0_21 = arith.constant 0 : index
    %20 = vector.load %arg7[%c1_19, %c1_20, %c0_21] : memref<18x32x128xbf16, #tpu.memory_space<vmem>>, vector<16x16x128xbf16>
    tpu.vector_store %arg7[%c1_19, %c1_20, %c0_21], %13 {strides = array<i32>} : memref<18x32x128xbf16, #tpu.memory_space<vmem>>, vector<16x16x128xbf16>,
    %c0_22 = arith.constant 0 : index
    %c0_23 = arith.constant 0 : index
    %c0_24 = arith.constant 0 : index
    %21 = vector.load %arg7[%c0_22, %c0_23, %c0_24] : memref<18x32x128xbf16, #tpu.memory_space<vmem>>, vector<16x16x128xbf16>
    %22 = vector.shape_cast %21 : vector<16x16x128xbf16> to vector<256x128xbf16>
    %c0_25 = arith.constant 0 : index
    %c0_26 = arith.constant 0 : index
    %23 = vector.load %arg5[%c0_25, %c0_26] : memref<1152x128xbf16, #tpu.memory_space<vmem>>, vector<128x128xbf16>
    %cst_27 = arith.constant dense<0.000000e+00> : vector<256x128xf32>
    %24 = tpu.matmul %22, %23, %cst_27 {dimension_numbers = #tpu.dot_dimension_numbers<[1], [0], [0], [1], [0, 0, 1, 1], [], []>} : vector<256x128xbf16>, vector<128x128xbf16>, vector<256x128xf32> -> vector<256x128xf32>
    %c0_28 = arith.constant 0 : index
    %c1_29 = arith.constant 1 : index
    %c0_30 = arith.constant 0 : index
    %25 = vector.load %arg7[%c0_28, %c1_29, %c0_30] : memref<18x32x128xbf16, #tpu.memory_space<vmem>>, vector<16x16x128xbf16>
    %26 = vector.shape_cast %25 : vector<16x16x128xbf16> to vector<256x128xbf16>
    %c128 = arith.constant 128 : index
    %c0_31 = arith.constant 0 : index
    %27 = vector.load %arg5[%c128, %c0_31] : memref<1152x128xbf16, #tpu.memory_space<vmem>>, vector<128x128xbf16>
    %cst_32 = arith.constant dense<0.000000e+00> : vector<256x128xf32>
    %28 = tpu.matmul %26, %27, %cst_32 {dimension_numbers = #tpu.dot_dimension_numbers<[1], [0], [0], [1], [0, 0, 1, 1], [], []>} : vector<256x128xbf16>, vector<128x128xbf16>, vector<256x128xf32> -> vector<256x128xf32>
    %29 = arith.addf %24, %28 : vector<256x128xf32>
    %c0_33 = arith.constant 0 : index
    %c2 = arith.constant 2 : index
    %c0_34 = arith.constant 0 : index
    %30 = vector.load %arg7[%c0_33, %c2, %c0_34] : memref<18x32x128xbf16, #tpu.memory_space<vmem>>, vector<16x16x128xbf16>
    %31 = vector.shape_cast %30 : vector<16x16x128xbf16> to vector<256x128xbf16>
    %c256 = arith.constant 256 : index
    %c0_35 = arith.constant 0 : index
    %32 = vector.load %arg5[%c256, %c0_35] : memref<1152x128xbf16, #tpu.memory_space<vmem>>, vector<128x128xbf16>
    %cst_36 = arith.constant dense<0.000000e+00> : vector<256x128xf32>
    %33 = tpu.matmul %31, %32, %cst_36 {dimension_numbers = #tpu.dot_dimension_numbers<[1], [0], [0], [1], [0, 0, 1, 1], [], []>} : vector<256x128xbf16>, vector<128x128xbf16>, vector<256x128xf32> -> vector<256x128xf32>
    %34 = arith.addf %29, %33 : vector<256x128xf32>
    %c1_37 = arith.constant 1 : index
    %c0_38 = arith.constant 0 : index
    %c0_39 = arith.constant 0 : index
    %35 = vector.load %arg7[%c1_37, %c0_38, %c0_39] : memref<18x32x128xbf16, #tpu.memory_space<vmem>>, vector<16x16x128xbf16>
    %36 = vector.shape_cast %35 : vector<16x16x128xbf16> to vector<256x128xbf16>
    %c384 = arith.constant 384 : index
    %c0_40 = arith.constant 0 : index
    %37 = vector.load %arg5[%c384, %c0_40] : memref<1152x128xbf16, #tpu.memory_space<vmem>>, vector<128x128xbf16>
    %cst_41 = arith.constant dense<0.000000e+00> : vector<256x128xf32>
    %38 = tpu.matmul %36, %37, %cst_41 {dimension_numbers = #tpu.dot_dimension_numbers<[1], [0], [0], [1], [0, 0, 1, 1], [], []>} : vector<256x128xbf16>, vector<128x128xbf16>, vector<256x128xf32> -> vector<256x128xf32>
    %39 = arith.addf %34, %38 : vector<256x128xf32>
    %c1_42 = arith.constant 1 : index
    %c1_43 = arith.constant 1 : index
    %c0_44 = arith.constant 0 : index
    %40 = vector.load %arg7[%c1_42, %c1_43, %c0_44] : memref<18x32x128xbf16, #tpu.memory_space<vmem>>, vector<16x16x128xbf16>
    %41 = vector.shape_cast %40 : vector<16x16x128xbf16> to vector<256x128xbf16>
    %c512 = arith.constant 512 : index
    %c0_45 = arith.constant 0 : index
    %42 = vector.load %arg5[%c512, %c0_45] : memref<1152x128xbf16, #tpu.memory_space<vmem>>, vector<128x128xbf16>
    %cst_46 = arith.constant dense<0.000000e+00> : vector<256x128xf32>
    %43 = tpu.matmul %41, %42, %cst_46 {dimension_numbers = #tpu.dot_dimension_numbers<[1], [0], [0], [1], [0, 0, 1, 1], [], []>} : vector<256x128xbf16>, vector<128x128xbf16>, vector<256x128xf32> -> vector<256x128xf32>
    %44 = arith.addf %39, %43 : vector<256x128xf32>
    %c1_47 = arith.constant 1 : index
    %c2_48 = arith.constant 2 : index
    %c0_49 = arith.constant 0 : index
    %45 = vector.load %arg7[%c1_47, %c2_48, %c0_49] : memref<18x32x128xbf16, #tpu.memory_space<vmem>>, vector<16x16x128xbf16>
    %46 = vector.shape_cast %45 : vector<16x16x128xbf16> to vector<256x128xbf16>
    %c640 = arith.constant 640 : index
    %c0_50 = arith.constant 0 : index
    %47 = vector.load %arg5[%c640, %c0_50] : memref<1152x128xbf16, #tpu.memory_space<vmem>>, vector<128x128xbf16>
    %cst_51 = arith.constant dense<0.000000e+00> : vector<256x128xf32>
    %48 = tpu.matmul %46, %47, %cst_51 {dimension_numbers = #tpu.dot_dimension_numbers<[1], [0], [0], [1], [0, 0, 1, 1], [], []>} : vector<256x128xbf16>, vector<128x128xbf16>, vector<256x128xf32> -> vector<256x128xf32>
    %49 = arith.addf %44, %48 : vector<256x128xf32>
    %c2_52 = arith.constant 2 : index
    %c0_53 = arith.constant 0 : index
    %c0_54 = arith.constant 0 : index
    %50 = vector.load %arg7[%c2_52, %c0_53, %c0_54] : memref<18x32x128xbf16, #tpu.memory_space<vmem>>, vector<16x16x128xbf16>
    %51 = vector.shape_cast %50 : vector<16x16x128xbf16> to vector<256x128xbf16>
    %c768 = arith.constant 768 : index
    %c0_55 = arith.constant 0 : index
    %52 = vector.load %arg5[%c768, %c0_55] : memref<1152x128xbf16, #tpu.memory_space<vmem>>, vector<128x128xbf16>
    %cst_56 = arith.constant dense<0.000000e+00> : vector<256x128xf32>
    %53 = tpu.matmul %51, %52, %cst_56 {dimension_numbers = #tpu.dot_dimension_numbers<[1], [0], [0], [1], [0, 0, 1, 1], [], []>} : vector<256x128xbf16>, vector<128x128xbf16>, vector<256x128xf32> -> vector<256x128xf32>
    %54 = arith.addf %49, %53 : vector<256x128xf32>
    %c2_57 = arith.constant 2 : index
    %c1_58 = arith.constant 1 : index
    %c0_59 = arith.constant 0 : index
    %55 = vector.load %arg7[%c2_57, %c1_58, %c0_59] : memref<18x32x128xbf16, #tpu.memory_space<vmem>>, vector<16x16x128xbf16>
    %56 = vector.shape_cast %55 : vector<16x16x128xbf16> to vector<256x128xbf16>
    %c896 = arith.constant 896 : index
    %c0_60 = arith.constant 0 : index
    %57 = vector.load %arg5[%c896, %c0_60] : memref<1152x128xbf16, #tpu.memory_space<vmem>>, vector<128x128xbf16>
    %cst_61 = arith.constant dense<0.000000e+00> : vector<256x128xf32>
    %58 = tpu.matmul %56, %57, %cst_61 {dimension_numbers = #tpu.dot_dimension_numbers<[1], [0], [0], [1], [0, 0, 1, 1], [], []>} : vector<256x128xbf16>, vector<128x128xbf16>, vector<256x128xf32> -> vector<256x128xf32>
    %59 = arith.addf %54, %58 : vector<256x128xf32>
    %c2_62 = arith.constant 2 : index
    %c2_63 = arith.constant 2 : index
    %c0_64 = arith.constant 0 : index
    %60 = vector.load %arg7[%c2_62, %c2_63, %c0_64] : memref<18x32x128xbf16, #tpu.memory_space<vmem>>, vector<16x16x128xbf16>
    %61 = vector.shape_cast %60 : vector<16x16x128xbf16> to vector<256x128xbf16>
    %c1024 = arith.constant 1024 : index
    %c0_65 = arith.constant 0 : index
    %62 = vector.load %arg5[%c1024, %c0_65] : memref<1152x128xbf16, #tpu.memory_space<vmem>>, vector<128x128xbf16>
    %cst_66 = arith.constant dense<0.000000e+00> : vector<256x128xf32>
    %63 = tpu.matmul %61, %62, %cst_66 {dimension_numbers = #tpu.dot_dimension_numbers<[1], [0], [0], [1], [0, 0, 1, 1], [], []>} : vector<256x128xbf16>, vector<128x128xbf16>, vector<256x128xf32> -> vector<256x128xf32>
    %64 = arith.addf %59, %63 : vector<256x128xf32>
    %65 = vector.shape_cast %64 : vector<256x128xf32> to vector<1x16x16x128xf32>
    %c0_67 = arith.constant 0 : index
    %c0_68 = arith.constant 0 : index
    %c0_69 = arith.constant 0 : index
    %c0_70 = arith.constant 0 : index
    %66 = vector.load %arg2[%c0_67, %c0_68, %c0_69, %c0_70] : memref<1x16x16x128xf32, #tpu.memory_space<vmem>>, vector<1x16x16x128xf32>
    %67 = arith.addf %65, %66 : vector<1x16x16x128xf32>
    %c0_71 = arith.constant 0 : index
    %c0_72 = arith.constant 0 : index
    %c0_73 = arith.constant 0 : index
    %c0_74 = arith.constant 0 : index
    %68 = vector.load %arg6[%c0_71, %c0_72, %c0_73, %c0_74] : memref<1x16x16x128xf32, #tpu.memory_space<vmem>>, vector<1x16x16x128xf32>
    tpu.vector_store %arg6[%c0_71, %c0_72, %c0_73, %c0_74], %67 {strides = array<i32>} : memref<1x16x16x128xf32, #tpu.memory_space<vmem>>, vector<1x16x16x128xf32>,
    return
  }
  func.func @transform_0(%arg0: i32) -> (i32, i32, i32, i32) {
    %c0_i32 = arith.constant 0 : i32
    %c0_i32_0 = arith.constant 0 : i32
    %c0_i32_1 = arith.constant 0 : i32
    %c0_i32_2 = arith.constant 0 : i32
    return %arg0, %c0_i32, %c0_i32_0, %c0_i32_1 : i32, i32, i32, i32
  }
  func.func @transform_1(%arg0: i32) -> (i32, i32, i32, i32) {
    %c0_i32 = arith.constant 0 : i32
    %c0_i32_0 = arith.constant 0 : i32
    %c0_i32_1 = arith.constant 0 : i32
    %c0_i32_2 = arith.constant 0 : i32
    return %arg0, %c0_i32, %c0_i32_0, %c0_i32_1 : i32, i32, i32, i32
  }
  func.func @transform_2(%arg0: i32) -> (i32, i32) {
    %c0_i32 = arith.constant 0 : i32
    %c0_i32_0 = arith.constant 0 : i32
    %c0_i32_1 = arith.constant 0 : i32
    return %c0_i32, %c0_i32_0 : i32, i32
  }
  func.func @transform_3(%arg0: i32) -> (i32, i32) {
    %c0_i32 = arith.constant 0 : i32
    %c0_i32_0 = arith.constant 0 : i32
    %c0_i32_1 = arith.constant 0 : i32
    return %c0_i32, %c0_i32_0 : i32, i32
  }
  func.func @transform_4(%arg0: i32) -> (i32, i32) {
    %c0_i32 = arith.constant 0 : i32
    %c0_i32_0 = arith.constant 0 : i32
    %c0_i32_1 = arith.constant 0 : i32
    return %c0_i32, %c0_i32_0 : i32, i32
  }
  func.func @transform_5(%arg0: i32) -> (i32, i32, i32, i32) {
    %c0_i32 = arith.constant 0 : i32
    %c0_i32_0 = arith.constant 0 : i32
    %c0_i32_1 = arith.constant 0 : i32
    %c0_i32_2 = arith.constant 0 : i32
    return %arg0, %c0_i32, %c0_i32_0, %c0_i32_1 : i32, i32, i32, i32
  }
}

</mosaic_0001>

<bundles_post_ra>
// kernel: basic_block_v2.2
= control target key start
LH: loop header
LB: loop body
LE: loop exit
PB: predicated region body
PF: predicated region fallthrough
CT: control target
= control target key end

     0   :  { %s6252_s18 = smov 0   ;;  %s7803_s0 = inlined_call_operand.vmem [shape: f32[2,16,16,128], index: 0, kind: input, shape index: {}]   ;;  %s7804_s1 = inlined_call_operand.vmem [shape: f32[1,128], index: 1, kind: input, shape index: {}]   ;;  %s7805_s2 = inlined_call_operand.vmem [shape: f32[1,128], index: 2, kind: input, shape index: {}]   ;;  %s7806_s3 = inlined_call_operand.vmem [shape: bf16[1152,128], index: 3, kind: input, shape index: {}]   ;;  %s7807_s4 = inlined_call_operand.vmem [shape: bf16[2,16,16,128], index: 4, kind: output, shape index: {0}]   ;;  %s7808_s5 = inlined_call_operand.vmem [shape: f32[2,2,128], index: 5, kind: output, shape index: {1}]  }
   0x1 LB: > { %s5361_s19 = sadd.s32 4294967295, %s6219_s18   ;;  %p5365_p0 = scmp.ge.s32.totalorder %s6219_s18, 1  ;;  %s6219_s18 = sphi %s6252_s18, %s16_s18  }
   0x2   : > { %p190_p1 = scmp.lt.s32.totalorder %s6219_s18, 3 }
   0x4   : > { %p191_p2 = pnand %p5365_p0, %p190_p1 }
   0x6   : > { %194 = sbr.rel (%p191_p2) target bundleno = 861 (0x35d), region = 36 }
   0xb   : > { %v5934_v0 = vld [vmem:[%s7806_s3 + $0x78] sm:$0xff]  ;;  %p222_p3 = scmp.lt.s32.totalorder %s5361_s19, 1  ;;  %vm413_vm0 = vcmask 1040384   ;;  %vm414_vm1 = vsmask.f32 256  ;;  %v5933_v1 = vld [vmem:[%s7806_s3 + $0x70] sm:$0xff] }
   0xc   : > { %6118 = vmatpush.bf16.msra.mxu1 %v5934_v0  ;;  %6119 = vmatpush.bf16.msra.mxu2 %v5934_v0  ;;  %v6271_v2 = vld [vmem:[%s7804_s1] ss:$0 sm:$0xff]  ;;  %vm6276_vm2 = vmand %vm413_vm0, %vm414_vm1  ;;  %vm464_vm3 = vsmask.f32 7938  ;;  %v475_v8 = vld [vmem:[#allocation2 + $0x48] sm:$0x1] }
   0xd   : > { %s7840_s19 = smov (!%p222_p3, %s5361_s19), 1  ;;  %6120 = vmatpush.bf16.msra.mxu3 %v5934_v0  ;;  %1529 = vmatpush.bf16.msra.mxu0 %v5934_v0  ;;  %v425_v4 = vld [vmem:[#allocation2 + $0x40] sm:$0x1]  ;;  %vm6294_vm4 = vmand %vm413_vm0, %vm464_vm3  ;;  %v5932_v9 = vld [vmem:[%s7806_s3 + $0x68] sm:$0xff]  ;;  %vm836_vm5 = vcmask 1043456   ;;  %v6221_v18 = vmov 0  }
   0xe   : > { %s5901_s26 = sshll.u32 %s7840_s19, 8  ;;  %v6288_v5 = vld [vmem:[%s7805_s2] ss:$0 sm:$0xff]  ;;  %v426_v6 = vsel %vm6276_vm2, 0, %v425_v4  ;;  %v476_v12 = vsel %vm6294_vm4, 0, %v475_v8  ;;  %v5930_v45 = vld [vmem:[%s7806_s3 + $0x58] sm:$0xff]  ;;  %vm6356_vm10 = vmand %vm836_vm5, %vm464_vm3 }
   0xf   : > { %s6283_s29 = scalar_lea.vmem %s7803_s0, %s5901_s26  ;;  %427 = vst [vmem:[#allocation2 + $0x40] sm:$0x1] %v426_v6  ;;  %v5931_v15 = vld [vmem:[%s7806_s3 + $0x60] sm:$0xff]  ;;  %v487_v24 = vld [vmem:[#allocation2 + $0x88] sm:$0x1]  ;;  %v5929_v53 = vld [vmem:[%s7806_s3 + $0x50] sm:$0xff] }
  0x10   : > { %6121 = vmatpush.bf16.msra.mxu1 %v5933_v1  ;;  %6122 = vmatpush.bf16.msra.mxu2 %v5933_v1  ;;  %v245_v10 = vld [vmem:[%s6283_s29 + $0x30] sm:$0xff]  ;;  %v246_v11 = vld [vmem:[%s6283_s29 + $0x38] sm:$0xff]  ;;  %477 = vst [vmem:[#allocation2 + $0x48] sm:$0x1] %v476_v12  ;;  %v437_v23 = vld [vmem:[#allocation2 + $0x80] sm:$0x1] }
  0x11   : > { %6123 = vmatpush.bf16.msra.mxu3 %v5933_v1  ;;  %1530 = vmatpush.bf16.msra.mxu0 %v5933_v1  ;;  %v280_v13 = vmul.f32 %v6271_v2, %v245_v10  ;;  %v281_v14 = vmul.f32 %v6271_v2, %v246_v11  ;;  %v253_v16 = vld [vmem:[%s6283_s29 + $0x70] sm:$0xff]  ;;  %v254_v17 = vld [vmem:[%s6283_s29 + $0x78] sm:$0xff]  ;;  %405 = vst [vmem:[#allocation2] sm:$0xf] %v6221_v18  ;;  %v438_v26 = vsel %vm6276_vm2, 0, %v437_v23  ;;  %v488_v27 = vsel %vm6294_vm4, 0, %v487_v24 }
  0x12   : > { %v288_v21 = vmul.f32 %v6271_v2, %v253_v16  ;;  %v289_v22 = vmul.f32 %v6271_v2, %v254_v17  ;;  %v261_v25 = vld [vmem:[%s6283_s29 + $0xb0] sm:$0xff]  ;;  %v262_v28 = vld [vmem:[%s6283_s29 + $0xb8] sm:$0xff]  ;;  %v449_v30 = vld [vmem:[#allocation2 + $0xc0] sm:$0x1]  ;;  %439 = vst [vmem:[#allocation2 + $0x80] sm:$0x1] %v438_v26 }
  0x13   : > { %v315_v19 = vadd.f32 %v6288_v5, %v280_v13  ;;  %v316_v20 = vadd.f32 %v6288_v5, %v281_v14  ;;  %v296_v29 = vmul.f32 %v6271_v2, %v261_v25  ;;  %v247_v31 = vld [vmem:[%s6283_s29 + $0x40] sm:$0xff]  ;;  %v499_v36 = vld [vmem:[#allocation2 + $0xc8] sm:$0x1]  ;;  %489 = vst [vmem:[#allocation2 + $0x88] sm:$0x1] %v488_v27  ;;  %v297_v37 = vmul.f32 %v6271_v2, %v262_v28  ;;  %s5902_s24 = sshll.u32 %s7840_s19, 7 }
  0x14   : > { %6124 = vmatpush.bf16.msra.mxu1 %v5932_v9  ;;  %6125 = vmatpush.bf16.msra.mxu2 %v5932_v9  ;;  %v323_v34 = vadd.f32 %v6288_v5, %v288_v21  ;;  %v324_v35 = vadd.f32 %v6288_v5, %v289_v22  ;;  %v450_v39 = vsel %vm6276_vm2, 0, %v449_v30  ;;  %v500_v40 = vsel %vm6294_vm4, 0, %v499_v36  ;;  %406 = vst [vmem:[#allocation2 + $0x4] sm:$0xf] %v6221_v18  ;;  %v248_v27 = vld [vmem:[%s6283_s29 + $0x48] sm:$0xff]  ;;  %s7593_s27 = scalar_lea.vmem %s7807_s4, %s5902_s24  ;;  %s5370_s28 = sshll.u32 %s7840_s19, 1 }
  0x15   : > { %6126 = vmatpush.bf16.msra.mxu3 %v5932_v9  ;;  %1531 = vmatpush.bf16.msra.mxu0 %v5932_v9  ;;  %v347_v32 = vmax.f32 %v315_v19, 0.0  ;;  %v348_v33 = vmax.f32 %v316_v20, 0.0  ;;  %v331_v38 = vadd.f32 %v6288_v5, %v296_v29  ;;  %451 = vst [vmem:[#allocation2 + $0xc0] sm:$0x1] %v450_v39  ;;  %vm514_vm6 = vsmask.f32 4368  ;;  %s235_s7 = scalar_lea.vmem %s7808_s5, %s5370_s28 }
  0x16   : > { %v355_v43 = vmax.f32 %v323_v34, 0.0  ;;  %v356_v44 = vmax.f32 %v324_v35, 0.0  ;;  %v332_v46 = vadd.f32 %v6288_v5, %v297_v37  ;;  %501 = vst [vmem:[#allocation2 + $0xc8] sm:$0x1] %v500_v40  ;;  %v6338_v48 = vmul.f32 %v6271_v2, %v247_v31  ;;  %v859_v54 = vld [vmem:[#allocation2 + $0x40] sm:$0xf]  ;;  %vm6349_vm7 = vmor %vm414_vm1, %vm514_vm6 }
  0x17   : > { %v379_v41 = vpack.c.bf16 %v347_v32, %v347_v32  ;;  %v380_v42 = vpack.c.bf16 %v348_v33, %v348_v33  ;;  %v363_v47 = vmax.f32 %v331_v38, 0.0  ;;  %407 = vst [vmem:[#allocation2 + $0x8] sm:$0x1] %v6221_v18  ;;  %vm1014_vm8 = vsmask.f32 3328 }
  0x18   : > { %6127 = vmatpush.bf16.msra.mxu1 %v5931_v15  ;;  %6128 = vmatpush.bf16.msra.mxu2 %v5931_v15  ;;  %v387_v55 = vpack.c.bf16 %v355_v43, %v355_v43  ;;  %v388_v56 = vpack.c.bf16 %v356_v44, %v356_v44  ;;  %v364_v57 = vmax.f32 %v332_v46, 0.0  ;;  %v950_v59 = vld [vmem:[#allocation2] sm:$0xf]  ;;  %vm1015_vm9 = vsmask.f32 7440 }
  0x19   : > { %6129 = vmatpush.bf16.msra.mxu3 %v5931_v15  ;;  %1532 = vmatpush.bf16.msra.mxu0 %v5931_v15  ;;  %v568_v49 = vshrl.u32 %v379_v41, 16  ;;  %v571_v50 = vshll.u32 %v379_v41, 16  ;;  %v576_v51 = vshrl.u32 %v380_v42, 16  ;;  %v579_v52 = vshll.u32 %v380_v42, 16  ;;  %409 = vst [vmem:[#allocation2 + $0x110] sm:$0xf] %v6221_v18  ;;  %vm6393_vm11 = vmor %vm1014_vm8, %vm1015_vm9 }
  0x1a   : > { %v6344_v58 = vpack.c.bf16 %v363_v47, %v363_v47  ;;  %v1018_v63 = vshrl.u32 %v950_v59, 16  ;;  %v1021_v0 = vshll.u32 %v950_v59, 16  ;;  %v863_v4 = vld [vmem:[#allocation2 + $0x48] sm:$0x1]  ;;  %v636_v6 = vshrl.u32 %v387_v55, 16  ;;  %v255_v47 = vld [vmem:[%s6283_s29 + $0x80] sm:$0xff] }
  0x1b   : > { %v570_v61 = vrot.slane %v568_v49, 7  ;;  %v578_v62 = vrot.slane %v576_v51, 7  ;;  %v639_v8 = vshll.u32 %v387_v55, 16  ;;  %v644_v9 = vshrl.u32 %v388_v56, 16  ;;  %410 = vst [vmem:[#allocation2 + $0x114] sm:$0xf] %v6221_v18 }
  0x1c   : > { %6130 = vmatpush.bf16.msra.mxu1 %v5930_v45  ;;  %6131 = vmatpush.bf16.msra.mxu2 %v5930_v45  ;;  %v647_v10 = vshll.u32 %v388_v56, 16  ;;  %v5928_v15 = vld [vmem:[%s7806_s3 + $0x48] sm:$0xff]  ;;  %v638_v16 = vrot.slane %v636_v6, 7  ;;  %v887_v19 = vld [vmem:[#allocation2 + $0x80] sm:$0xf]  ;;  %v396_v20 = vpack.c.bf16 %v364_v57, %v364_v57  ;;  %v704_v21 = vshrl.u32 %v6344_v58, 16 }
  0x1d   : > { %6132 = vmatpush.bf16.msra.mxu3 %v5930_v45  ;;  %1533 = vmatpush.bf16.msra.mxu0 %v5930_v45  ;;  %v573_v11 = vor.u32 %v571_v50, %v570_v61  ;;  %v574_v12 = vrot.slane %v570_v61, 4  ;;  %v581_v13 = vor.u32 %v579_v52, %v578_v62  ;;  %v583_v14 = vrot.slane %v578_v62, 4  ;;  %v891_v25 = vld [vmem:[#allocation2 + $0x88] sm:$0x1]  ;;  %411 = vst [vmem:[#allocation2 + $0x118] sm:$0x1] %v6221_v18 }
  0x1e   : > { %v646_v17 = vrot.slane %v644_v9, 7  ;;  %v707_v26 = vshll.u32 %v6344_v58, 16  ;;  %v641_v28 = vor.u32 %v639_v8, %v638_v16  ;;  %v642_v29 = vrot.slane %v638_v16, 4  ;;  %v915_v32 = vld [vmem:[#allocation2 + $0xc0] sm:$0xf]  ;;  %v5942_v57 = vld [vmem:[%s7806_s3 + $0xb8] sm:$0xff] }
  0x1f   : > { %v582_v22 = vsel %vm6349_vm7, %v574_v12, %v581_v13  ;;  %v860_v23 = vsel %vm6356_vm10, %v573_v11, %v859_v54  ;;  %v864_v24 = vsel %vm6276_vm2, %v583_v14, %v863_v4  ;;  %v951_v33 = vld [vmem:[#allocation2 + $0x4] sm:$0xf]  ;;  %v706_v34 = vrot.slane %v704_v21, 7  ;;  %v998_v41 = vld [vmem:[#allocation2 + $0x8] sm:$0x1]  ;;  %v5966_v4 = vld [vmem:[%s7806_s3 + $0xf8] sm:$0xff] }
  0x20   : > { %6133 = vmatpush.bf16.msra.mxu1 %v5929_v53  ;;  %6134 = vmatpush.bf16.msra.mxu2 %v5929_v53  ;;  %861 = vst [vmem:[#allocation2 + $0x40] sm:$0xf] %v860_v23  ;;  %v649_v30 = vor.u32 %v647_v10, %v646_v17  ;;  %v651_v31 = vrot.slane %v646_v17, 4  ;;  %v712_v35 = vshrl.u32 %v396_v20, 16  ;;  %v715_v36 = vshll.u32 %v396_v20, 16  ;;  %v5927_v18 = vld [vmem:[%s7806_s3 + $0x40] sm:$0xff] }
  0x21   : > { %6135 = vmatpush.bf16.msra.mxu3 %v5929_v53  ;;  %1534 = vmatpush.bf16.msra.mxu0 %v5929_v53  ;;  %862 = vst [vmem:[#allocation2 + $0x44] sm:$0xf] %v582_v22  ;;  %v1020_v37 = vrot.slane %v1018_v63, 4  ;;  %v888_v39 = vsel %vm6356_vm10, %v641_v28, %v887_v19  ;;  %v1023_v42 = vrot.slane %v1021_v0, 5  ;;  %v709_v43 = vor.u32 %v707_v26, %v706_v34  ;;  %v919_v49 = vld [vmem:[#allocation2 + $0xc8] sm:$0x1] }
  0x22   : > { %865 = vst [vmem:[#allocation2 + $0x48] sm:$0x1] %v864_v24  ;;  %v650_v38 = vsel %vm6349_vm7, %v642_v29, %v649_v30  ;;  %v892_v40 = vsel %vm6276_vm2, %v651_v31, %v891_v25  ;;  %v710_v44 = vrot.slane %v706_v34, 4  ;;  %v714_v45 = vrot.slane %v712_v35, 7  ;;  %v256_v59 = vld [vmem:[%s6283_s29 + $0x88] sm:$0xff]  ;;  %v5926_v11 = vld [vmem:[%s7806_s3 + $0x38] sm:$0xff] }
  0x23   : > { %889 = vst [vmem:[#allocation2 + $0x80] sm:$0xf] %v888_v39  ;;  %v1027_v46 = vshll.u32 %v951_v33, 16  ;;  %v1024_v50 = vor.u32 %v1023_v42, %v1020_v37  ;;  %v1031_v51 = vshrl.u32 %v951_v33, 16  ;;  %v1037_v52 = vshll.u32 %v998_v41, 16  ;;  %v5974_v12 = vld [vmem:[%s7806_s3 + $0x138] sm:$0xff] }
  0x24   : > { %6136 = vmatpush.bf16.msra.mxu1 %v5928_v15  ;;  %6137 = vmatpush.bf16.msra.mxu2 %v5928_v15  ;;  %890 = vst [vmem:[#allocation2 + $0x84] sm:$0xf] %v650_v38  ;;  %v283_v53 = vmul.f32 %v6271_v2, %v248_v27  ;;  %v717_v54 = vor.u32 %v715_v36, %v714_v45  ;;  %v719_v55 = vrot.slane %v714_v45, 4  ;;  %v5941_v20 = vld [vmem:[%s7806_s3 + $0xb0] sm:$0xff]  ;;  %vm1899_vm12 = vcmask 1042432  }
  0x25   : > { %6138 = vmatpush.bf16.msra.mxu3 %v5928_v15  ;;  %1535 = vmatpush.bf16.msra.mxu0 %v5928_v15  ;;  %893 = vst [vmem:[#allocation2 + $0x88] sm:$0x1] %v892_v40  ;;  %v916_v56 = vsel %vm6356_vm10, %v709_v43, %v915_v32  ;;  %v1029_v58 = vrot.slane %v1027_v46, 5  ;;  %v1025_v62 = vrot.slane %v1024_v50, 4  ;;  %v1033_v63 = vrot.slane %v1031_v51, 4  ;;  %v5965_v21 = vld [vmem:[%s7806_s3 + $0xf0] sm:$0xff] }
  0x26   : > { %917 = vst [vmem:[#allocation2 + $0xc0] sm:$0xf] %v916_v56  ;;  %v6397_v0 = vrot.slane %v1037_v52, 5  ;;  %v6404_v6 = vadd.f32 %v6288_v5, %v6338_v48  ;;  %v718_v9 = vsel %vm6349_vm7, %v710_v44, %v717_v54  ;;  %v920_v10 = vsel %vm6276_vm2, %v719_v55, %v919_v49  ;;  %v5925_v26 = vld [vmem:[%s7806_s3 + $0x30] sm:$0xff] }
  0x27   : > { %v958_v8 = vld [vmem:[#allocation2 + $0x40] sm:$0xf]  ;;  %v6417_v13 = vadd.f32 %v6288_v5, %v283_v53  ;;  %v6420_v48 = vmul.f32 %v6271_v2, %v255_v47  ;;  %918 = vst [vmem:[#allocation2 + $0xc4] sm:$0xf] %v718_v9  ;;  %v1030_v17 = vsel %vm6393_vm11, %v1025_v62, %v1029_v58  ;;  %v1034_v19 = vor.u32 %v1033_v63, %v1029_v58 }
  0x28   : > { %6139 = vmatpush.bf16.msra.mxu1 %v5927_v18  ;;  %6140 = vmatpush.bf16.msra.mxu2 %v5927_v18  ;;  %v959_v14 = vld [vmem:[#allocation2 + $0x44] sm:$0xf]  ;;  %v1114_v15 = vshrl.u32 %v958_v8, 16  ;;  %v1117_v16 = vshll.u32 %v958_v8, 16  ;;  %921 = vst [vmem:[#allocation2 + $0xc8] sm:$0x1] %v920_v10  ;;  %v6430_v25 = vunpack.c.l.b16 %v1030_v17  ;;  %v6436_v27 = vmul.f32 %v6271_v2, %v256_v59 }
  0x29   : > { %6141 = vmatpush.bf16.msra.mxu3 %v5927_v18  ;;  %1536 = vmatpush.bf16.msra.mxu0 %v5927_v18  ;;  %v1002_v22 = vld [vmem:[#allocation2 + $0x48] sm:$0x1]  ;;  %v1123_v23 = vshll.u32 %v959_v14, 16  ;;  %v1127_v24 = vshrl.u32 %v959_v14, 16  ;;  %v1035_v32 = vrot.slane %v1034_v19, 4  ;;  %vm1900_vm13 = vcmask 1046532  }
  0x2a   : > { %v1116_v28 = vrot.slane %v1114_v15, 4  ;;  %v1119_v29 = vrot.slane %v1117_v16, 5  ;;  %v1133_v30 = vshll.u32 %v1002_v22, 16  ;;  %v966_v31 = vld [vmem:[#allocation2 + $0x80] sm:$0xf]  ;;  %vm6820_vm14 = vmor %vm1899_vm12, %vm1900_vm13 }
  0x2b   : > { %v1125_v33 = vrot.slane %v1123_v23, 5  ;;  %v1129_v34 = vrot.slane %v1127_v24, 4  ;;  %v967_v35 = vld [vmem:[#allocation2 + $0x84] sm:$0xf]  ;;  %v1210_v36 = vshrl.u32 %v966_v31, 16  ;;  %v1213_v37 = vshll.u32 %v966_v31, 16 }
  0x2c   : > { %2142 = vmatpush.bf16.msrb.mxu2 %v5942_v57  ;;  %1762 = vmatpush.bf16.msrb.mxu1 %v5926_v11  ;;  %v1120_v18 = vor.u32 %v1119_v29, %v1116_v28  ;;  %v1135_v38 = vrot.slane %v1133_v30, 5  ;;  %v1006_v39 = vld [vmem:[#allocation2 + $0x88] sm:$0x1]  ;;  %v1219_v40 = vshll.u32 %v967_v35, 16  ;;  %v1223_v41 = vshrl.u32 %v967_v35, 16 }
  0x2d   : > { %2455 = vmatpush.bf16.msrb.mxu3 %v5966_v4  ;;  %3136 = vmatpush.bf16.msrb.mxu0 %v5974_v12  ;;  %v1130_v42 = vor.u32 %v1129_v34, %v1125_v33  ;;  %v1212_v43 = vrot.slane %v1210_v36, 4  ;;  %v1215_v44 = vrot.slane %v1213_v37, 5  ;;  %v1229_v45 = vshll.u32 %v1006_v39, 16  ;;  %v974_v46 = vld [vmem:[#allocation2 + $0xc0] sm:$0xf] }
  0x2e   : > { %v1121_v47 = vrot.slane %v1120_v18, 4  ;;  %v1221_v49 = vrot.slane %v1219_v40, 5  ;;  %v1225_v50 = vrot.slane %v1223_v41, 4  ;;  %v1306_v51 = vshrl.u32 %v974_v46, 16  ;;  %v975_v55 = vld [vmem:[#allocation2 + $0xc4] sm:$0xf] }
  0x2f   : > { %v1131_v52 = vrot.slane %v1130_v42, 4  ;;  %v1216_v53 = vor.u32 %v1215_v44, %v1212_v43  ;;  %v1231_v54 = vrot.slane %v1229_v45, 5  ;;  %v1309_v56 = vshll.u32 %v974_v46, 16  ;;  %v1010_v59 = vld [vmem:[#allocation2 + $0xc8] sm:$0x1]  ;;  %v263_v46 = vld [vmem:[%s6283_s29 + $0xc0] sm:$0xff] }
  0x30   : > { %2143 = vmatpush.bf16.msrb.mxu2 %v5941_v20  ;;  %1763 = vmatpush.bf16.msrb.mxu1 %v5925_v26  ;;  %v1126_v57 = vsel %vm6393_vm11, %v1121_v47, %v1125_v33  ;;  %v1226_v58 = vor.u32 %v1225_v50, %v1221_v49  ;;  %v1308_v62 = vrot.slane %v1306_v51, 4  ;;  %v1315_v63 = vshll.u32 %v975_v55, 16  ;;  %v478_v28 = vld [vmem:[#allocation2 + $0x58] sm:$0x1]  ;;  %v440_v34 = vld [vmem:[#allocation2 + $0x90] sm:$0x1] }
  0x31   : > { %2456 = vmatpush.bf16.msrb.mxu3 %v5965_v21  ;;  %v1136_v4 = vsel %vm6393_vm11, %v1131_v52, %v1135_v38  ;;  %v1425_v8 = vunpack.c.l.b16 %v1126_v57  ;;  %v1217_v9 = vrot.slane %v1216_v53, 4  ;;  %v1311_v10 = vrot.slane %v1309_v56, 5  ;;  %v428_v21 = vld [vmem:[#allocation2 + $0x50] sm:$0x1]  ;;  %v264_v47 = vld [vmem:[%s6283_s29 + $0xc8] sm:$0xff] }
  0x32   : > { %v1426_v11 = vunpack.c.l.b16 %v1136_v4  ;;  %v1227_v12 = vrot.slane %v1226_v58, 4  ;;  %v1317_v14 = vrot.slane %v1315_v63, 5  ;;  %v1319_v15 = vshrl.u32 %v975_v55, 16 }
  0x33   : > { %v1222_v16 = vsel %vm6393_vm11, %v1217_v9, %v1221_v49  ;;  %v1312_v17 = vor.u32 %v1311_v10, %v1308_v62  ;;  %v1325_v19 = vshll.u32 %v1010_v59, 16  ;;  %v1040_v20 = vsel %vm6393_vm11, %v1035_v32, %v6397_v0  ;;  %v490_v32 = vld [vmem:[#allocation2 + $0x98] sm:$0x1]  ;;  %v452_v49 = vld [vmem:[#allocation2 + $0xd0] sm:$0x1]  ;;  %v239_v62 = vld [vmem:[%s6283_s29] sm:$0xff] }
  0x34   : > { %v1453_v22 = vpack.c.b16 %v1426_v11, %v1425_v8  ;;  %v1232_v23 = vsel %vm6393_vm11, %v1227_v12, %v1231_v54  ;;  %v1433_v24 = vunpack.c.l.b16 %v1222_v16  ;;  %v1321_v26 = vrot.slane %v1319_v15, 4  ;;  %v502_v10 = vld [vmem:[#allocation2 + $0xd8] sm:$0x1]  ;;  %v240_v11 = vld [vmem:[%s6283_s29 + $0x8] sm:$0xff]  ;;  %v249_v12 = vld [vmem:[%s6283_s29 + $0x50] sm:$0xff] }
  0x35   : > { %v1434_v29 = vunpack.c.l.b16 %v1232_v23  ;;  %v1313_v30 = vrot.slane %v1312_v17, 4  ;;  %v1327_v31 = vrot.slane %v1325_v19, 5  ;;  %v1418_v33 = vunpack.c.l.b16 %v1040_v20 }
  0x36   : > { %1557 = vmatmul.bf16.vlgmr.msra.gmra.mxu1 %v1453_v22  ;;  %v1322_v35 = vor.u32 %v1321_v26, %v1317_v14  ;;  %v349_v36 = vmax.f32 %v6404_v6, 0.0  ;;  %v350_v37 = vmax.f32 %v6417_v13, 0.0  ;;  %v429_v0 = vsel %vm6276_vm2, 0, %v428_v21 }
  0x37   : > { %v1457_v18 = vpack.c.b16 %v1434_v29, %v1433_v24  ;;  %v1318_v38 = vsel %vm6393_vm11, %v1313_v30, %v1317_v14  ;;  %v1449_v39 = vpack.c.b16 %v1418_v33, %v6430_v25  ;;  %430 = vst [vmem:[#allocation2 + $0x50] sm:$0x1] %v429_v0  ;;  %v479_v40 = vsel %vm6294_vm4, 0, %v478_v28 }
  0x38   : > { %v1323_v41 = vrot.slane %v1322_v35, 4  ;;  %v1441_v6 = vunpack.c.l.b16 %v1318_v38  ;;  %v381_v42 = vpack.c.bf16 %v349_v36, %v349_v36  ;;  %v382_v13 = vpack.c.bf16 %v350_v37, %v350_v37  ;;  %480 = vst [vmem:[#allocation2 + $0x58] sm:$0x1] %v479_v40 }
  0x39   : > { %1577 = vmatmul.bf16.vlgmr.msra.gmra.mxu2 %v1457_v18  ;;  %1537 = vmatmul.bf16.vlgmr.msra.gmra.mxu0 %v1449_v39  ;;  %v325_v43 = vadd.f32 %v6288_v5, %v6420_v48  ;;  %v326_v44 = vadd.f32 %v6288_v5, %v6436_v27  ;;  %v441_v25 = vsel %vm6276_vm2, 0, %v440_v34  ;;  %v491_v45 = vsel %vm6294_vm4, 0, %v490_v32 }
  0x3a   : > { %v1328_v50 = vsel %vm6393_vm11, %v1323_v41, %v1327_v31  ;;  %v585_v51 = vshrl.u32 %v381_v42, 16  ;;  %v588_v52 = vshll.u32 %v381_v42, 16  ;;  %v593_v53 = vshrl.u32 %v382_v13, 16  ;;  %442 = vst [vmem:[#allocation2 + $0x90] sm:$0x1] %v441_v25 }
  0x3b   : > { %v1442_v48 = vunpack.c.l.b16 %v1328_v50  ;;  %v596_v27 = vshll.u32 %v382_v13, 16  ;;  %v357_v54 = vmax.f32 %v325_v43, 0.0  ;;  %v358_v55 = vmax.f32 %v326_v44, 0.0  ;;  %492 = vst [vmem:[#allocation2 + $0x98] sm:$0x1] %v491_v45 }
  0x3c   : > { %v587_v56 = vrot.slane %v585_v51, 7  ;;  %v595_v57 = vrot.slane %v593_v53, 7  ;;  %v298_v58 = vmul.f32 %v6271_v2, %v263_v46  ;;  %v299_v59 = vmul.f32 %v6271_v2, %v264_v47  ;;  %v6484_v31 = vld [vmem:[#allocation2 + $0x10] sm:$0x1]  ;;  %v466_v45 = vld [vmem:[#allocation2 + $0x18] sm:$0x1] }
  0x3d   : > { %v1461_v63 = vpack.c.b16 %v1442_v48, %v1441_v6  ;;  %v389_v4 = vpack.c.bf16 %v357_v54, %v357_v54  ;;  %v390_v8 = vpack.c.bf16 %v358_v55, %v358_v55  ;;  %v453_v9 = vsel %vm6276_vm2, 0, %v452_v49  ;;  %v250_v46 = vld [vmem:[%s6283_s29 + $0x58] sm:$0xff]  ;;  %v5940_v51 = vld [vmem:[%s7806_s3 + $0xa8] sm:$0xff]  ;;  %v257_v53 = vld [vmem:[%s6283_s29 + $0x90] sm:$0xff] }
  0x3e   : > { %v590_v14 = vor.u32 %v588_v52, %v587_v56  ;;  %v591_v15 = vrot.slane %v587_v56, 4  ;;  %v598_v16 = vor.u32 %v596_v27, %v595_v57  ;;  %v600_v17 = vrot.slane %v595_v57, 4  ;;  %v866_v19 = vld [vmem:[#allocation2 + $0x50] sm:$0xf]  ;;  %454 = vst [vmem:[#allocation2 + $0xd0] sm:$0x1] %v453_v9  ;;  %2144 = vmatpush.bf16.msrb.mxu2 %v5940_v51 }
  0x3f   : > { %1597 = vmatmul.bf16.vlgmr.msra.gmra.mxu3 %v1461_v63  ;;  %v870_v20 = vld [vmem:[#allocation2 + $0x58] sm:$0x1]  ;;  %v653_v21 = vshrl.u32 %v389_v4, 16  ;;  %v656_v22 = vshll.u32 %v389_v4, 16  ;;  %v661_v23 = vshrl.u32 %v390_v8, 16  ;;  %v664_v24 = vshll.u32 %v390_v8, 16 }
  0x40   : > { %v599_v26 = vsel %vm6349_vm7, %v591_v15, %v598_v16  ;;  %v867_v28 = vsel %vm6356_vm10, %v590_v14, %v866_v19  ;;  %v871_v29 = vsel %vm6276_vm2, %v600_v17, %v870_v20  ;;  %v333_v30 = vadd.f32 %v6288_v5, %v298_v58 }
  0x41   : > { %868 = vst [vmem:[#allocation2 + $0x50] sm:$0xf] %v867_v28  ;;  %v655_v33 = vrot.slane %v653_v21, 7  ;;  %v663_v34 = vrot.slane %v661_v23, 7  ;;  %v894_v35 = vld [vmem:[#allocation2 + $0x90] sm:$0xf]  ;;  %v334_v36 = vadd.f32 %v6288_v5, %v299_v59  ;;  %v274_v37 = vmul.f32 %v6271_v2, %v239_v62 }
  0x42   : > { %869 = vst [vmem:[#allocation2 + $0x54] sm:$0xf] %v599_v26  ;;  %v898_v0 = vld [vmem:[#allocation2 + $0x98] sm:$0x1]  ;;  %v365_v32 = vmax.f32 %v333_v30, 0.0  ;;  %v503_v18 = vsel %vm6294_vm4, 0, %v502_v10  ;;  %v275_v38 = vmul.f32 %v6271_v2, %v240_v11  ;;  %v284_v39 = vmul.f32 %v6271_v2, %v249_v12 }
  0x43   : > { %872 = vst [vmem:[#allocation2 + $0x58] sm:$0x1] %v871_v29  ;;  %v658_v40 = vor.u32 %v656_v22, %v655_v33  ;;  %v659_v41 = vrot.slane %v655_v33, 4  ;;  %v666_v6 = vor.u32 %v664_v24, %v663_v34  ;;  %v668_v42 = vrot.slane %v663_v34, 4 }
  0x44   : > { %v366_v13 = vmax.f32 %v334_v36, 0.0  ;;  %v397_v43 = vpack.c.bf16 %v365_v32, %v365_v32  ;;  %504 = vst [vmem:[#allocation2 + $0xd8] sm:$0x1] %v503_v18  ;;  %v309_v44 = vadd.f32 %v6288_v5, %v274_v37  ;;  %v310_v25 = vadd.f32 %v6288_v5, %v275_v38 }
  0x45   : > { %v667_v47 = vsel %vm6349_vm7, %v659_v41, %v666_v6  ;;  %v895_v49 = vsel %vm6356_vm10, %v658_v40, %v894_v35  ;;  %v899_v50 = vsel %vm6276_vm2, %v668_v42, %v898_v0  ;;  %v417_v52 = vsel %vm6276_vm2, 0, %v6484_v31  ;;  %v922_v56 = vld [vmem:[#allocation2 + $0xd0] sm:$0xf] }
  0x46   : > { %896 = vst [vmem:[#allocation2 + $0x90] sm:$0xf] %v895_v49  ;;  %v398_v48 = vpack.c.bf16 %v366_v13, %v366_v13  ;;  %v721_v27 = vshrl.u32 %v397_v43, 16  ;;  %v724_v54 = vshll.u32 %v397_v43, 16  ;;  %v341_v55 = vmax.f32 %v309_v44, 0.0 }
  0x47   : > { %897 = vst [vmem:[#allocation2 + $0x94] sm:$0xf] %v667_v47  ;;  %v342_v57 = vmax.f32 %v310_v25, 0.0  ;;  %v467_v58 = vsel %vm6294_vm4, 0, %v466_v45  ;;  %v285_v59 = vmul.f32 %v6271_v2, %v250_v46  ;;  %v6512_v62 = vadd.f32 %v6288_v5, %v284_v39 }
  0x48   : > { %v960_v63 = vld [vmem:[#allocation2 + $0x50] sm:$0xf]  ;;  %900 = vst [vmem:[#allocation2 + $0x98] sm:$0x1] %v899_v50  ;;  %v723_v4 = vrot.slane %v721_v27, 7  ;;  %v729_v8 = vshrl.u32 %v398_v48, 16  ;;  %v6514_v9 = vpack.c.bf16 %v341_v55, %v341_v55  ;;  %v6517_v10 = vmul.f32 %v6271_v2, %v257_v53 }
  0x49   : > { %v961_v11 = vld [vmem:[#allocation2 + $0x54] sm:$0xf]  ;;  %v1138_v12 = vshrl.u32 %v960_v63, 16  ;;  %v1141_v14 = vshll.u32 %v960_v63, 16  ;;  %v732_v15 = vshll.u32 %v398_v48, 16  ;;  %v6519_v16 = vpack.c.bf16 %v342_v57, %v342_v57  ;;  %v5964_v53 = vld [vmem:[%s7806_s3 + $0xe8] sm:$0xff] }
  0x4a   : > { %v1003_v17 = vld [vmem:[#allocation2 + $0x58] sm:$0x1]  ;;  %v1147_v19 = vshll.u32 %v961_v11, 16  ;;  %v1151_v20 = vshrl.u32 %v961_v11, 16  ;;  %v726_v21 = vor.u32 %v724_v54, %v723_v4  ;;  %v727_v22 = vrot.slane %v723_v4, 4  ;;  %v5973_v48 = vld [vmem:[%s7806_s3 + $0x130] sm:$0xff]  ;;  %2457 = vmatpush.bf16.msrb.mxu3 %v5964_v53 }
  0x4b   : > { %v1140_v23 = vrot.slane %v1138_v12, 4  ;;  %v1143_v24 = vrot.slane %v1141_v14, 5  ;;  %v1157_v26 = vshll.u32 %v1003_v17, 16  ;;  %v731_v28 = vrot.slane %v729_v8, 7  ;;  %v926_v33 = vld [vmem:[#allocation2 + $0xd8] sm:$0x1]  ;;  %3137 = vmatpush.bf16.msrb.mxu0 %v5973_v48 }
  0x4c   : > { %v1149_v29 = vrot.slane %v1147_v19, 5  ;;  %v1153_v30 = vrot.slane %v1151_v20, 4  ;;  %v923_v31 = vsel %vm6356_vm10, %v726_v21, %v922_v56  ;;  %418 = vst [vmem:[#allocation2 + $0x10] sm:$0x1] %v417_v52  ;;  %v517_v34 = vshrl.u32 %v6514_v9, 16  ;;  %v5924_v27 = vld [vmem:[%s7806_s3 + $0x28] sm:$0xff] }
  0x4d   : > { %v1144_v35 = vor.u32 %v1143_v24, %v1140_v23  ;;  %v1159_v36 = vrot.slane %v1157_v26, 5  ;;  %v968_v37 = vld [vmem:[#allocation2 + $0x90] sm:$0xf]  ;;  %v734_v0 = vor.u32 %v732_v15, %v731_v28  ;;  %v736_v32 = vrot.slane %v731_v28, 4  ;;  %924 = vst [vmem:[#allocation2 + $0xd0] sm:$0xf] %v923_v31  ;;  %1764 = vmatpush.bf16.msrb.mxu1 %v5924_v27 }
  0x4e   : > { %v1154_v18 = vor.u32 %v1153_v30, %v1149_v29  ;;  %v969_v38 = vld [vmem:[#allocation2 + $0x94] sm:$0xf]  ;;  %v1234_v39 = vshrl.u32 %v968_v37, 16  ;;  %v1237_v40 = vshll.u32 %v968_v37, 16  ;;  %468 = vst [vmem:[#allocation2 + $0x18] sm:$0x1] %v467_v58  ;;  %v6525_v41 = vadd.f32 %v6288_v5, %v285_v59 }
  0x4f   : > { %v1145_v6 = vrot.slane %v1144_v35, 4  ;;  %v1007_v42 = vld [vmem:[#allocation2 + $0x98] sm:$0x1]  ;;  %v1243_v13 = vshll.u32 %v969_v38, 16  ;;  %v1247_v43 = vshrl.u32 %v969_v38, 16  ;;  %v735_v44 = vsel %vm6349_vm7, %v727_v22, %v734_v0  ;;  %v5939_v58 = vld [vmem:[%s7806_s3 + $0xa0] sm:$0xff] }
  0x50   : > { %v1155_v25 = vrot.slane %v1154_v18, 4  ;;  %v1236_v45 = vrot.slane %v1234_v39, 4  ;;  %v1239_v46 = vrot.slane %v1237_v40, 5  ;;  %v1253_v47 = vshll.u32 %v1007_v42, 16  ;;  %925 = vst [vmem:[#allocation2 + $0xd4] sm:$0xf] %v735_v44  ;;  %2145 = vmatpush.bf16.msrb.mxu2 %v5939_v58 }
  0x51   : > { %v1150_v49 = vsel %vm6393_vm11, %v1145_v6, %v1149_v29  ;;  %v1245_v50 = vrot.slane %v1243_v13, 5  ;;  %v1249_v51 = vrot.slane %v1247_v43, 4  ;;  %v927_v52 = vsel %vm6276_vm2, %v736_v32, %v926_v33  ;;  %v5963_v11 = vld [vmem:[%s7806_s3 + $0xe0] sm:$0xff]  ;;  %v5972_v12 = vld [vmem:[%s7806_s3 + $0x128] sm:$0xff] }
  0x52   : > { %v1160_v54 = vsel %vm6393_vm11, %v1155_v25, %v1159_v36  ;;  %v1427_v55 = vunpack.c.l.b16 %v1150_v49  ;;  %v1240_v56 = vor.u32 %v1239_v46, %v1236_v45  ;;  %v1255_v57 = vrot.slane %v1253_v47, 5  ;;  %928 = vst [vmem:[#allocation2 + $0xd8] sm:$0x1] %v927_v52  ;;  %v5923_v14 = vld [vmem:[%s7806_s3 + $0x20] sm:$0xff]  ;;  %2458 = vmatpush.bf16.msrb.mxu3 %v5963_v11  ;;  %3138 = vmatpush.bf16.msrb.mxu0 %v5972_v12  ;;  %v481_v43 = vld [vmem:[#allocation2 + $0x68] sm:$0x1] }
  0x53   : > { %v1428_v59 = vunpack.c.l.b16 %v1160_v54  ;;  %v1250_v63 = vor.u32 %v1249_v51, %v1245_v50  ;;  %v519_v4 = vrot.slane %v517_v34, 7  ;;  %v520_v8 = vshll.u32 %v6514_v9, 16  ;;  %v838_v31 = vld [vmem:[#allocation2 + $0x10] sm:$0xf]  ;;  %1765 = vmatpush.bf16.msrb.mxu1 %v5923_v14  ;;  %v431_v38 = vld [vmem:[#allocation2 + $0x60] sm:$0x1] }
  0x54   : > { %v1241_v15 = vrot.slane %v1240_v56, 4  ;;  %v976_v17 = vld [vmem:[#allocation2 + $0xd0] sm:$0xf]  ;;  %v525_v19 = vshrl.u32 %v6519_v16, 16  ;;  %v528_v9 = vshll.u32 %v6519_v16, 16  ;;  %v351_v20 = vmax.f32 %v6512_v62, 0.0 }
  0x55   : > { %v1454_v21 = vpack.c.b16 %v1428_v59, %v1427_v55  ;;  %v1251_v22 = vrot.slane %v1250_v63, 4  ;;  %v1330_v23 = vshrl.u32 %v976_v17, 16  ;;  %v1333_v24 = vshll.u32 %v976_v17, 16  ;;  %v842_v18 = vld [vmem:[#allocation2 + $0x18] sm:$0x1]  ;;  %v265_v63 = vld [vmem:[%s6283_s29 + $0xd0] sm:$0xff] }
  0x56   : > { %v1246_v26 = vsel %vm6393_vm11, %v1241_v15, %v1245_v50  ;;  %v522_v28 = vor.u32 %v520_v8, %v519_v4  ;;  %v523_v29 = vrot.slane %v519_v4, 4  ;;  %v527_v30 = vrot.slane %v525_v19, 7  ;;  %v258_v52 = vld [vmem:[%s6283_s29 + $0x98] sm:$0xff]  ;;  %v443_v53 = vld [vmem:[#allocation2 + $0xa0] sm:$0x1] }
  0x57   : > { %1562 = vmatmul.bf16.gmra.mxu1 %v1454_v21  ;;  %v1256_v33 = vsel %vm6393_vm11, %v1251_v22, %v1255_v57  ;;  %v1435_v16 = vunpack.c.l.b16 %v1246_v26  ;;  %v977_v34 = vld [vmem:[#allocation2 + $0xd4] sm:$0xf]  ;;  %v1332_v35 = vrot.slane %v1330_v23, 4  ;;  %v1335_v36 = vrot.slane %v1333_v24, 5  ;;  %v493_v55 = vld [vmem:[#allocation2 + $0xa8] sm:$0x1] }
  0x58   : > { %v1436_v62 = vunpack.c.l.b16 %v1256_v33  ;;  %v1339_v37 = vshll.u32 %v977_v34, 16  ;;  %v1343_v0 = vshrl.u32 %v977_v34, 16  ;;  %v530_v32 = vor.u32 %v528_v9, %v527_v30  ;;  %v266_v22 = vld [vmem:[%s6283_s29 + $0xd8] sm:$0xff]  ;;  %v6592_v23 = vld [vmem:[%s7804_s1] ss:$0 sm:$0xff] }
  0x59   : > { %v1011_v39 = vld [vmem:[#allocation2 + $0xd8] sm:$0x1]  ;;  %v1336_v40 = vor.u32 %v1335_v36, %v1332_v35  ;;  %v532_v6 = vrot.slane %v527_v30, 4  ;;  %v839_v42 = vsel %vm6356_vm10, %v522_v28, %v838_v31  ;;  %v352_v13 = vmax.f32 %v6525_v41, 0.0  ;;  %v6598_v28 = vld [vmem:[%s7805_s2] ss:$0 sm:$0xff] }
  0x5a   : > { %v1458_v44 = vpack.c.b16 %v1436_v62, %v1435_v16  ;;  %v1341_v25 = vrot.slane %v1339_v37, 5  ;;  %v1345_v45 = vrot.slane %v1343_v0, 4  ;;  %v1349_v46 = vshll.u32 %v1011_v39, 16  ;;  %840 = vst [vmem:[#allocation2 + $0x10] sm:$0xf] %v839_v42 }
  0x5b   : > { %v1337_v47 = vrot.slane %v1336_v40, 4  ;;  %v531_v49 = vsel %vm6349_vm7, %v523_v29, %v530_v32  ;;  %v843_v50 = vsel %vm6276_vm2, %v532_v6, %v842_v18  ;;  %v383_v51 = vpack.c.bf16 %v351_v20, %v351_v20  ;;  %v455_v40 = vld [vmem:[#allocation2 + $0xe0] sm:$0x1] }
  0x5c   : > { %1582 = vmatmul.bf16.gmra.mxu2 %v1458_v44  ;;  %v1346_v48 = vor.u32 %v1345_v45, %v1341_v25  ;;  %v1351_v41 = vrot.slane %v1349_v46, 5  ;;  %841 = vst [vmem:[#allocation2 + $0x14] sm:$0xf] %v531_v49  ;;  %v384_v27 = vpack.c.bf16 %v352_v13, %v352_v13  ;;  %v432_v54 = vsel %vm6276_vm2, 0, %v431_v38 }
  0x5d   : > { %v1342_v56 = vsel %vm6393_vm11, %v1337_v47, %v1341_v25  ;;  %844 = vst [vmem:[#allocation2 + $0x18] sm:$0x1] %v843_v50  ;;  %v482_v57 = vsel %vm6294_vm4, 0, %v481_v43  ;;  %v602_v58 = vshrl.u32 %v383_v51, 16  ;;  %v605_v59 = vshll.u32 %v383_v51, 16 }
  0x5e   : > { %v1347_v4 = vrot.slane %v1346_v48, 4  ;;  %v1443_v8 = vunpack.c.l.b16 %v1342_v56  ;;  %433 = vst [vmem:[#allocation2 + $0x60] sm:$0x1] %v432_v54  ;;  %v610_v11 = vshrl.u32 %v384_v27, 16  ;;  %v613_v12 = vshll.u32 %v384_v27, 16 }
  0x5f   : > { %483 = vst [vmem:[#allocation2 + $0x68] sm:$0x1] %v482_v57  ;;  %v604_v14 = vrot.slane %v602_v58, 7  ;;  %v293_v15 = vmul.f32 %v6271_v2, %v258_v52  ;;  %v327_v17 = vadd.f32 %v6288_v5, %v6517_v10  ;;  %v444_v19 = vsel %vm6276_vm2, 0, %v443_v53  ;;  %v505_v25 = vld [vmem:[#allocation2 + $0xe8] sm:$0x1] }
  0x60   : > { %v1352_v9 = vsel %vm6393_vm11, %v1347_v4, %v1351_v41  ;;  %v612_v20 = vrot.slane %v610_v11, 7  ;;  %445 = vst [vmem:[#allocation2 + $0xa0] sm:$0x1] %v444_v19  ;;  %v494_v21 = vsel %vm6294_vm4, 0, %v493_v55  ;;  %v300_v2 = vmul.f32 %v6592_v23, %v265_v63 }
  0x61   : > { %v1444_v5 = vunpack.c.l.b16 %v1352_v9  ;;  %v952_v10 = vld [vmem:[#allocation2 + $0x10] sm:$0xf]  ;;  %v607_v24 = vor.u32 %v605_v59, %v604_v14  ;;  %v608_v26 = vrot.slane %v604_v14, 4  ;;  %v328_v29 = vadd.f32 %v6598_v28, %v293_v15  ;;  %495 = vst [vmem:[#allocation2 + $0xa8] sm:$0x1] %v494_v21 }
  0x62   : > { %v1042_v30 = vshrl.u32 %v952_v10, 16  ;;  %v1045_v31 = vshll.u32 %v952_v10, 16  ;;  %v615_v33 = vor.u32 %v613_v12, %v612_v20  ;;  %v617_v16 = vrot.slane %v612_v20, 4  ;;  %v241_v14 = vld [vmem:[%s6283_s29 + $0x10] sm:$0xff] }
  0x63   : > { %v1462_v34 = vpack.c.b16 %v1444_v5, %v1443_v8  ;;  %v6601_v35 = vld [vmem:[#allocation2 + $0x14] sm:$0xf]  ;;  %v359_v36 = vmax.f32 %v327_v17, 0.0  ;;  %v360_v62 = vmax.f32 %v328_v29, 0.0  ;;  %v301_v37 = vmul.f32 %v6592_v23, %v266_v22 }
  0x64   : > { %v6604_v0 = vld [vmem:[#allocation2 + $0x18] sm:$0x1]  ;;  %v1044_v32 = vrot.slane %v1042_v30, 4  ;;  %v1047_v18 = vrot.slane %v1045_v31, 5  ;;  %v1051_v38 = vshll.u32 %v6601_v35, 16  ;;  %v1055_v39 = vshrl.u32 %v6601_v35, 16 }
  0x65   : > { %1602 = vmatmul.bf16.gmra.mxu3 %v1462_v34  ;;  %v1061_v6 = vshll.u32 %v6604_v0, 16  ;;  %v616_v42 = vsel %vm6349_vm7, %v608_v26, %v615_v33  ;;  %v873_v13 = vld [vmem:[#allocation2 + $0x60] sm:$0xf]  ;;  %v391_v43 = vpack.c.bf16 %v359_v36, %v359_v36  ;;  %v392_v44 = vpack.c.bf16 %v360_v62, %v360_v62  ;;  %v242_v62 = vld [vmem:[%s6283_s29 + $0x18] sm:$0xff] }
  0x66   : > { %v1048_v45 = vor.u32 %v1047_v18, %v1044_v32  ;;  %v1053_v46 = vrot.slane %v1051_v38, 5  ;;  %v1057_v47 = vrot.slane %v1055_v39, 4  ;;  %v874_v49 = vsel %vm6356_vm10, %v607_v24, %v873_v13  ;;  %876 = vst [vmem:[#allocation2 + $0x64] sm:$0xf] %v616_v42  ;;  %v877_v50 = vld [vmem:[#allocation2 + $0x68] sm:$0x1] }
  0x67   : > { %v1063_v51 = vrot.slane %v1061_v6, 5  ;;  %875 = vst [vmem:[#allocation2 + $0x60] sm:$0xf] %v874_v49  ;;  %v878_v52 = vsel %vm6276_vm2, %v617_v16, %v877_v50  ;;  %v670_v53 = vshrl.u32 %v391_v43, 16  ;;  %v673_v48 = vshll.u32 %v391_v43, 16 }
  0x68   : > { %v1049_v41 = vrot.slane %v1048_v45, 4  ;;  %v1058_v27 = vor.u32 %v1057_v47, %v1053_v46  ;;  %879 = vst [vmem:[#allocation2 + $0x68] sm:$0x1] %v878_v52  ;;  %v678_v54 = vshrl.u32 %v392_v44, 16  ;;  %v681_v55 = vshll.u32 %v392_v44, 16  ;;  %v5938_v52 = vld [vmem:[%s7806_s3 + $0x98] sm:$0xff] }
  0x69   : > { %v672_v56 = vrot.slane %v670_v53, 7  ;;  %v901_v57 = vld [vmem:[#allocation2 + $0xa0] sm:$0xf]  ;;  %v335_v58 = vadd.f32 %v6598_v28, %v300_v2  ;;  %v336_v59 = vadd.f32 %v6598_v28, %v301_v37  ;;  %v456_v63 = vsel %vm6276_vm2, 0, %v455_v40  ;;  %v905_v9 = vld [vmem:[#allocation2 + $0xa8] sm:$0x1]  ;;  %2146 = vmatpush.bf16.msrb.mxu2 %v5938_v52 }
  0x6a   : > { %v1054_v4 = vsel %vm6393_vm11, %v1049_v41, %v1053_v46  ;;  %v1059_v8 = vrot.slane %v1058_v27, 4  ;;  %v680_v11 = vrot.slane %v678_v54, 7  ;;  %457 = vst [vmem:[#allocation2 + $0xe0] sm:$0x1] %v456_v63  ;;  %v506_v12 = vsel %vm6294_vm4, 0, %v505_v25  ;;  %v5922_v52 = vld [vmem:[%s7806_s3 + $0x18] sm:$0xff] }
  0x6b   : > { %v1419_v15 = vunpack.c.l.b16 %v1054_v4  ;;  %v675_v17 = vor.u32 %v673_v48, %v672_v56  ;;  %v676_v19 = vrot.slane %v672_v56, 4  ;;  %v367_v20 = vmax.f32 %v335_v58, 0.0  ;;  %507 = vst [vmem:[#allocation2 + $0xe8] sm:$0x1] %v506_v12  ;;  %v419_v46 = vld [vmem:[#allocation2 + $0x20] sm:$0x1]  ;;  %1766 = vmatpush.bf16.msrb.mxu1 %v5922_v52 }
  0x6c   : > { %v1064_v21 = vsel %vm6393_vm11, %v1059_v8, %v1063_v51  ;;  %v683_v22 = vor.u32 %v681_v55, %v680_v11  ;;  %v685_v2 = vrot.slane %v680_v11, 4  ;;  %v368_v5 = vmax.f32 %v336_v59, 0.0  ;;  %v496_v52 = vld [vmem:[#allocation2 + $0xb8] sm:$0x1] }
  0x6d   : > { %v1420_v10 = vunpack.c.l.b16 %v1064_v21  ;;  %v963_v24 = vld [vmem:[#allocation2 + $0x64] sm:$0xf]  ;;  %v902_v26 = vsel %vm6356_vm10, %v675_v17, %v901_v57  ;;  %v399_v29 = vpack.c.bf16 %v367_v20, %v367_v20  ;;  %v276_v30 = vmul.f32 %v6592_v23, %v241_v14 }
  0x6e   : > { %v962_v31 = vld [vmem:[#allocation2 + $0x60] sm:$0xf]  ;;  %v1171_v33 = vshll.u32 %v963_v24, 16  ;;  %v1175_v16 = vshrl.u32 %v963_v24, 16  ;;  %v684_v34 = vsel %vm6349_vm7, %v676_v19, %v683_v22  ;;  %903 = vst [vmem:[#allocation2 + $0xa0] sm:$0xf] %v902_v26  ;;  %v906_v36 = vsel %vm6276_vm2, %v685_v2, %v905_v9 }
  0x6f   : > { %v1450_v37 = vpack.c.b16 %v1420_v10, %v1419_v15  ;;  %v1004_v32 = vld [vmem:[#allocation2 + $0x68] sm:$0x1]  ;;  %v1162_v18 = vshrl.u32 %v962_v31, 16  ;;  %v1165_v38 = vshll.u32 %v962_v31, 16  ;;  %904 = vst [vmem:[#allocation2 + $0xa4] sm:$0xf] %v684_v34  ;;  %v400_v39 = vpack.c.bf16 %v368_v5, %v368_v5 }
  0x70   : > { %v1173_v40 = vrot.slane %v1171_v33, 5  ;;  %v1177_v6 = vrot.slane %v1175_v16, 4  ;;  %v1181_v42 = vshll.u32 %v1004_v32, 16  ;;  %907 = vst [vmem:[#allocation2 + $0xa8] sm:$0x1] %v906_v36  ;;  %v738_v13 = vshrl.u32 %v399_v29, 16 }
  0x71   : > { %1542 = vmatmul.bf16.gmra.mxu0 %v1450_v37  ;;  %v1164_v43 = vrot.slane %v1162_v18, 4  ;;  %v1167_v44 = vrot.slane %v1165_v38, 5  ;;  %v741_v25 = vshll.u32 %v399_v29, 16  ;;  %v746_v45 = vshrl.u32 %v400_v39, 16  ;;  %v929_v41 = vld [vmem:[#allocation2 + $0xe0] sm:$0xf] }
  0x72   : > { %v1178_v47 = vor.u32 %v1177_v6, %v1173_v40  ;;  %v1183_v49 = vrot.slane %v1181_v42, 5  ;;  %v740_v50 = vrot.slane %v738_v13, 7  ;;  %v749_v51 = vshll.u32 %v400_v39, 16  ;;  %v933_v9 = vld [vmem:[#allocation2 + $0xe8] sm:$0x1]  ;;  %v251_v31 = vld [vmem:[%s6283_s29 + $0x60] sm:$0xff] }
  0x73   : > { %v1168_v53 = vor.u32 %v1167_v44, %v1164_v43  ;;  %v748_v48 = vrot.slane %v746_v45, 7  ;;  %v277_v27 = vmul.f32 %v6592_v23, %v242_v62  ;;  %v311_v54 = vadd.f32 %v6598_v28, %v276_v30  ;;  %v469_v30 = vld [vmem:[#allocation2 + $0x28] sm:$0x1]  ;;  %v434_v37 = vld [vmem:[#allocation2 + $0x70] sm:$0x1] }
  0x74   : > { %v1179_v55 = vrot.slane %v1178_v47, 4  ;;  %v743_v56 = vor.u32 %v741_v25, %v740_v50  ;;  %v744_v57 = vrot.slane %v740_v50, 4  ;;  %v420_v58 = vsel %vm6276_vm2, 0, %v419_v46  ;;  %v252_v62 = vld [vmem:[%s6283_s29 + $0x68] sm:$0xff]  ;;  %v5962_v50 = vld [vmem:[%s7806_s3 + $0xd8] sm:$0xff] }
  0x75   : > { %v1169_v59 = vrot.slane %v1168_v53, 4  ;;  %v970_v63 = vld [vmem:[#allocation2 + $0xa0] sm:$0xf]  ;;  %v751_v4 = vor.u32 %v749_v51, %v748_v48  ;;  %v753_v8 = vrot.slane %v748_v48, 4  ;;  %v312_v11 = vadd.f32 %v6598_v28, %v277_v27  ;;  %421 = vst [vmem:[#allocation2 + $0x20] sm:$0x1] %v420_v58  ;;  %2459 = vmatpush.bf16.msrb.mxu3 %v5962_v50 }
  0x76   : > { %v1184_v12 = vsel %vm6393_vm11, %v1179_v55, %v1183_v49  ;;  %v971_v14 = vld [vmem:[#allocation2 + $0xa4] sm:$0xf]  ;;  %v1258_v15 = vshrl.u32 %v970_v63, 16  ;;  %v1261_v17 = vshll.u32 %v970_v63, 16  ;;  %v930_v19 = vsel %vm6356_vm10, %v743_v56, %v929_v41  ;;  %v5937_v56 = vld [vmem:[%s7806_s3 + $0x90] sm:$0xff] }
  0x77   : > { %v1174_v20 = vsel %vm6393_vm11, %v1169_v59, %v1173_v40  ;;  %v1430_v21 = vunpack.c.l.b16 %v1184_v12  ;;  %v1008_v22 = vld [vmem:[#allocation2 + $0xa8] sm:$0x1]  ;;  %v1267_v2 = vshll.u32 %v971_v14, 16  ;;  %v1271_v5 = vshrl.u32 %v971_v14, 16  ;;  %931 = vst [vmem:[#allocation2 + $0xe0] sm:$0xf] %v930_v19  ;;  %2147 = vmatpush.bf16.msrb.mxu2 %v5937_v56 }
  0x78   : > { %v1429_v10 = vunpack.c.l.b16 %v1174_v20  ;;  %v1260_v24 = vrot.slane %v1258_v15, 4  ;;  %v1263_v26 = vrot.slane %v1261_v17, 5  ;;  %v1277_v29 = vshll.u32 %v1008_v22, 16  ;;  %v259_v40 = vld [vmem:[%s6283_s29 + $0xa0] sm:$0xff] }
  0x79   : > { %v1269_v33 = vrot.slane %v1267_v2, 5  ;;  %v1273_v16 = vrot.slane %v1271_v5, 4  ;;  %v752_v34 = vsel %vm6349_vm7, %v744_v57, %v751_v4  ;;  %v934_v36 = vsel %vm6276_vm2, %v753_v8, %v933_v9  ;;  %v5971_v51 = vld [vmem:[%s7806_s3 + $0x120] sm:$0xff]  ;;  %v5961_v8 = vld [vmem:[%s7806_s3 + $0xd0] sm:$0xff] }
  0x7a   : > { %v1455_v32 = vpack.c.b16 %v1430_v21, %v1429_v10  ;;  %v1264_v18 = vor.u32 %v1263_v26, %v1260_v24  ;;  %v1279_v38 = vrot.slane %v1277_v29, 5  ;;  %932 = vst [vmem:[#allocation2 + $0xe4] sm:$0xf] %v752_v34  ;;  %v343_v39 = vmax.f32 %v311_v54, 0.0  ;;  %3139 = vmatpush.bf16.msrb.mxu0 %v5971_v51  ;;  %v5921_v9 = vld [vmem:[%s7806_s3 + $0x10] sm:$0xff]  ;;  %2460 = vmatpush.bf16.msrb.mxu3 %v5961_v8 }
  0x7b   : > { %v1274_v6 = vor.u32 %v1273_v16, %v1269_v33  ;;  %935 = vst [vmem:[#allocation2 + $0xe8] sm:$0x1] %v934_v36  ;;  %v344_v42 = vmax.f32 %v312_v11, 0.0  ;;  %v470_v13 = vsel %vm6294_vm4, 0, %v469_v30  ;;  %v286_v43 = vmul.f32 %v6592_v23, %v251_v31  ;;  %v5970_v11 = vld [vmem:[%s7806_s3 + $0x118] sm:$0xff]  ;;  %1767 = vmatpush.bf16.msrb.mxu1 %v5921_v9  ;;  %v268_v9 = vld [vmem:[%s6283_s29 + $0xe8] sm:$0xff] }
  0x7c   : > { %1567 = vmatmul.bf16.gmra.mxu1 %v1455_v32  ;;  %v1265_v44 = vrot.slane %v1264_v18, 4  ;;  %v375_v25 = vpack.c.bf16 %v343_v39, %v343_v39  ;;  %471 = vst [vmem:[#allocation2 + $0x28] sm:$0x1] %v470_v13  ;;  %v287_v45 = vmul.f32 %v6592_v23, %v252_v62  ;;  %v435_v46 = vsel %vm6276_vm2, 0, %v434_v37  ;;  %v845_v19 = vld [vmem:[#allocation2 + $0x20] sm:$0xf] }
  0x7d   : > { %v1275_v47 = vrot.slane %v1274_v6, 4  ;;  %v376_v49 = vpack.c.bf16 %v344_v42, %v344_v42  ;;  %v321_v53 = vadd.f32 %v6598_v28, %v286_v43  ;;  %436 = vst [vmem:[#allocation2 + $0x70] sm:$0x1] %v435_v46  ;;  %v6672_v48 = vmul.f32 %v6592_v23, %v259_v40  ;;  %v484_v36 = vld [vmem:[#allocation2 + $0x78] sm:$0x1] }
  0x7e   : > { %v1270_v41 = vsel %vm6393_vm11, %v1265_v44, %v1269_v33  ;;  %v978_v27 = vld [vmem:[#allocation2 + $0xe0] sm:$0xf]  ;;  %v534_v54 = vshrl.u32 %v375_v25, 16  ;;  %v537_v55 = vshll.u32 %v375_v25, 16  ;;  %v322_v57 = vadd.f32 %v6598_v28, %v287_v45  ;;  %3140 = vmatpush.bf16.msrb.mxu0 %v5970_v11  ;;  %v260_v45 = vld [vmem:[%s6283_s29 + $0xa8] sm:$0xff] }
  0x7f   : > { %v1280_v58 = vsel %vm6393_vm11, %v1275_v47, %v1279_v38  ;;  %v1437_v59 = vunpack.c.l.b16 %v1270_v41  ;;  %v1354_v63 = vshrl.u32 %v978_v27, 16  ;;  %v1357_v4 = vshll.u32 %v978_v27, 16  ;;  %v446_v46 = vld [vmem:[#allocation2 + $0xb0] sm:$0x1] }
  0x80   : > { %v1438_v12 = vunpack.c.l.b16 %v1280_v58  ;;  %v536_v14 = vrot.slane %v534_v54, 7  ;;  %v542_v15 = vshrl.u32 %v376_v49, 16  ;;  %v545_v17 = vshll.u32 %v376_v49, 16 }
  0x81   : > { %v979_v20 = vld [vmem:[#allocation2 + $0xe4] sm:$0xf]  ;;  %v1356_v21 = vrot.slane %v1354_v63, 4  ;;  %v1359_v22 = vrot.slane %v1357_v4, 5  ;;  %v353_v2 = vmax.f32 %v321_v53, 0.0  ;;  %v354_v5 = vmax.f32 %v322_v57, 0.0 }
  0x82   : > { %v1459_v10 = vpack.c.b16 %v1438_v12, %v1437_v59  ;;  %v1012_v24 = vld [vmem:[#allocation2 + $0xe8] sm:$0x1]  ;;  %v1363_v26 = vshll.u32 %v979_v20, 16  ;;  %v1367_v29 = vshrl.u32 %v979_v20, 16  ;;  %v539_v30 = vor.u32 %v537_v55, %v536_v14  ;;  %v267_v55 = vld [vmem:[%s6283_s29 + $0xe0] sm:$0xff] }
  0x83   : > { %v1360_v31 = vor.u32 %v1359_v22, %v1356_v21  ;;  %v1373_v33 = vshll.u32 %v1012_v24, 16  ;;  %v540_v16 = vrot.slane %v536_v14, 4  ;;  %v544_v34 = vrot.slane %v542_v15, 7  ;;  %v849_v18 = vld [vmem:[#allocation2 + $0x28] sm:$0x1] }
  0x84   : > { %1587 = vmatmul.bf16.gmra.mxu2 %v1459_v10  ;;  %v1365_v62 = vrot.slane %v1363_v26, 5  ;;  %v1369_v37 = vrot.slane %v1367_v29, 4  ;;  %v846_v32 = vsel %vm6356_vm10, %v539_v30, %v845_v19  ;;  %v385_v38 = vpack.c.bf16 %v353_v2, %v353_v2  ;;  %v880_v57 = vld [vmem:[#allocation2 + $0x70] sm:$0xf]  ;;  %v243_v29 = vld [vmem:[%s6283_s29 + $0x20] sm:$0xff] }
  0x85   : > { %v1361_v39 = vrot.slane %v1360_v31, 4  ;;  %v1375_v40 = vrot.slane %v1373_v33, 5  ;;  %v547_v6 = vor.u32 %v545_v17, %v544_v34  ;;  %v549_v42 = vrot.slane %v544_v34, 4  ;;  %847 = vst [vmem:[#allocation2 + $0x20] sm:$0xf] %v846_v32 }
  0x86   : > { %v1370_v13 = vor.u32 %v1369_v37, %v1365_v62  ;;  %v386_v43 = vpack.c.bf16 %v354_v5, %v354_v5  ;;  %v485_v44 = vsel %vm6294_vm4, 0, %v484_v36  ;;  %v619_v25 = vshrl.u32 %v385_v38, 16  ;;  %v6178_v7 = vld [vmem:[#allocation2 + $0xe8] sm:$0x1] }
  0x87   : > { %v1366_v47 = vsel %vm6393_vm11, %v1361_v39, %v1365_v62  ;;  %v548_v49 = vsel %vm6349_vm7, %v540_v16, %v547_v6  ;;  %v850_v50 = vsel %vm6276_vm2, %v549_v42, %v849_v18  ;;  %486 = vst [vmem:[#allocation2 + $0x78] sm:$0x1] %v485_v44  ;;  %v622_v51 = vshll.u32 %v385_v38, 16 }
  0x88   : > { %v1371_v53 = vrot.slane %v1370_v13, 4  ;;  %v1445_v41 = vunpack.c.l.b16 %v1366_v47  ;;  %848 = vst [vmem:[#allocation2 + $0x24] sm:$0xf] %v548_v49  ;;  %v621_v27 = vrot.slane %v619_v25, 7  ;;  %v627_v54 = vshrl.u32 %v386_v43, 16 }
  0x89   : > { %851 = vst [vmem:[#allocation2 + $0x28] sm:$0x1] %v850_v50  ;;  %v630_v56 = vshll.u32 %v386_v43, 16  ;;  %v295_v58 = vmul.f32 %v6592_v23, %v260_v45  ;;  %v329_v59 = vadd.f32 %v6598_v28, %v6672_v48  ;;  %v447_v63 = vsel %vm6276_vm2, 0, %v446_v46  ;;  %v458_v45 = vld [vmem:[#allocation2 + $0xf0] sm:$0x1] }
  0x8a   : > { %v1376_v4 = vsel %vm6393_vm11, %v1371_v53, %v1375_v40  ;;  %v624_v8 = vor.u32 %v622_v51, %v621_v27  ;;  %v625_v11 = vrot.slane %v621_v27, 4  ;;  %v629_v12 = vrot.slane %v627_v54, 7  ;;  %448 = vst [vmem:[#allocation2 + $0xb0] sm:$0x1] %v447_v63 }
  0x8b   : > { %v1446_v14 = vunpack.c.l.b16 %v1376_v4  ;;  %v330_v15 = vadd.f32 %v6598_v28, %v295_v58  ;;  %v361_v17 = vmax.f32 %v329_v59, 0.0  ;;  %v497_v19 = vsel %vm6294_vm4, 0, %v496_v52 }
  0x8c   : > { %v954_v48 = vld [vmem:[#allocation2 + $0x20] sm:$0xf]  ;;  %v632_v20 = vor.u32 %v630_v56, %v629_v12  ;;  %v634_v21 = vrot.slane %v629_v12, 4  ;;  %v881_v22 = vsel %vm6356_vm10, %v624_v8, %v880_v57  ;;  %498 = vst [vmem:[#allocation2 + $0xb8] sm:$0x1] %v497_v19  ;;  %v302_v2 = vmul.f32 %v6592_v23, %v267_v55 }
  0x8d   : > { %v1463_v5 = vpack.c.b16 %v1446_v14, %v1445_v41  ;;  %v1066_v10 = vshrl.u32 %v954_v48, 16  ;;  %v1069_v24 = vshll.u32 %v954_v48, 16  ;;  %882 = vst [vmem:[#allocation2 + $0x70] sm:$0xf] %v881_v22  ;;  %v362_v26 = vmax.f32 %v330_v15, 0.0 }
  0x8e   : > { %v633_v30 = vsel %vm6349_vm7, %v625_v11, %v632_v20  ;;  %v884_v31 = vld [vmem:[#allocation2 + $0x78] sm:$0x1]  ;;  %v393_v33 = vpack.c.bf16 %v361_v17, %v361_v17  ;;  %v303_v16 = vmul.f32 %v6592_v23, %v268_v9  ;;  %v6722_v34 = vadd.f32 %v6598_v28, %v302_v2 }
  0x8f   : > { %1607 = vmatmul.bf16.gmra.mxu3 %v1463_v5  ;;  %v6724_v36 = vld [vmem:[#allocation2 + $0x24] sm:$0xf]  ;;  %v1068_v62 = vrot.slane %v1066_v10, 4  ;;  %v1071_v37 = vrot.slane %v1069_v24, 5  ;;  %883 = vst [vmem:[#allocation2 + $0x74] sm:$0xf] %v633_v30  ;;  %v885_v32 = vsel %vm6276_vm2, %v634_v21, %v884_v31  ;;  %v394_v18 = vpack.c.bf16 %v362_v26, %v362_v26 }
  0x90   : > { %v6728_v38 = vld [vmem:[#allocation2 + $0x28] sm:$0x1]  ;;  %v1075_v39 = vshll.u32 %v6724_v36, 16  ;;  %v1079_v40 = vshrl.u32 %v6724_v36, 16  ;;  %886 = vst [vmem:[#allocation2 + $0x78] sm:$0x1] %v885_v32  ;;  %v338_v6 = vadd.f32 %v6598_v28, %v303_v16  ;;  %v6734_v42 = vmul.f32 %v6592_v23, %v243_v29 }
  0x91   : > { %v1072_v13 = vor.u32 %v1071_v37, %v1068_v62  ;;  %v1085_v43 = vshll.u32 %v6728_v38, 16  ;;  %v687_v44 = vshrl.u32 %v393_v33, 16  ;;  %v690_v25 = vshll.u32 %v393_v33, 16  ;;  %v908_v8 = vld [vmem:[#allocation2 + $0xb0] sm:$0xf]  ;;  %v244_v26 = vld [vmem:[%s6283_s29 + $0x28] sm:$0xff] }
  0x92   : > { %v1077_v46 = vrot.slane %v1075_v39, 5  ;;  %v1081_v47 = vrot.slane %v1079_v40, 4  ;;  %v695_v49 = vshrl.u32 %v394_v18, 16  ;;  %v698_v50 = vshll.u32 %v394_v18, 16  ;;  %v508_v16 = vld [vmem:[#allocation2 + $0xf8] sm:$0x1] }
  0x93   : > { %v1073_v51 = vrot.slane %v1072_v13, 4  ;;  %v1087_v52 = vrot.slane %v1085_v43, 5  ;;  %v689_v53 = vrot.slane %v687_v44, 7  ;;  %v369_v41 = vmax.f32 %v6722_v34, 0.0  ;;  %v912_v19 = vld [vmem:[#allocation2 + $0xb8] sm:$0x1] }
  0x94   : > { %v1082_v27 = vor.u32 %v1081_v47, %v1077_v46  ;;  %v964_v54 = vld [vmem:[#allocation2 + $0x70] sm:$0xf]  ;;  %v697_v55 = vrot.slane %v695_v49, 7  ;;  %v370_v56 = vmax.f32 %v338_v6, 0.0  ;;  %v459_v57 = vsel %vm6276_vm2, 0, %v458_v45  ;;  %v5936_v18 = vld [vmem:[%s7806_s3 + $0x88] sm:$0xff] }
  0x95   : > { %v1078_v58 = vsel %vm6393_vm11, %v1073_v51, %v1077_v46  ;;  %v1186_v59 = vshrl.u32 %v964_v54, 16  ;;  %v1189_v63 = vshll.u32 %v964_v54, 16  ;;  %v692_v4 = vor.u32 %v690_v25, %v689_v53  ;;  %460 = vst [vmem:[#allocation2 + $0xf0] sm:$0x1] %v459_v57  ;;  %v422_v39 = vld [vmem:[#allocation2 + $0x30] sm:$0x1]  ;;  %2148 = vmatpush.bf16.msrb.mxu2 %v5936_v18 }
  0x96   : > { %v1083_v11 = vrot.slane %v1082_v27, 4  ;;  %v1421_v12 = vunpack.c.l.b16 %v1078_v58  ;;  %v6742_v14 = vld [vmem:[#allocation2 + $0x74] sm:$0xf]  ;;  %v693_v15 = vrot.slane %v689_v53, 4  ;;  %v700_v17 = vor.u32 %v698_v50, %v697_v55  ;;  %v472_v44 = vld [vmem:[#allocation2 + $0x38] sm:$0x1] }
  0x97   : > { %v6744_v9 = vld [vmem:[#allocation2 + $0x78] sm:$0x1]  ;;  %v1188_v48 = vrot.slane %v1186_v59, 4  ;;  %v1191_v20 = vrot.slane %v1189_v63, 5  ;;  %v1195_v21 = vshll.u32 %v6742_v14, 16  ;;  %v1199_v22 = vshrl.u32 %v6742_v14, 16 }
  0x98   : > { %v1088_v2 = vsel %vm6393_vm11, %v1083_v11, %v1087_v52  ;;  %v1205_v5 = vshll.u32 %v6744_v9, 16  ;;  %v701_v10 = vsel %vm6349_vm7, %v693_v15, %v700_v17  ;;  %v702_v24 = vrot.slane %v697_v55, 4  ;;  %v5969_v18 = vld [vmem:[%s7806_s3 + $0x110] sm:$0xff] }
  0x99   : > { %v1422_v29 = vunpack.c.l.b16 %v1088_v2  ;;  %v1192_v30 = vor.u32 %v1191_v20, %v1188_v48  ;;  %v1197_v31 = vrot.slane %v1195_v21, 5  ;;  %v1201_v33 = vrot.slane %v1199_v22, 4  ;;  %911 = vst [vmem:[#allocation2 + $0xb4] sm:$0xf] %v701_v10  ;;  %3141 = vmatpush.bf16.msrb.mxu0 %v5969_v18  ;;  %v5903_v18 = vld [vmem:[#allocation2] sm:$0xff] }
  0x9a   : > { %v1207_v34 = vrot.slane %v1205_v5, 5  ;;  %v909_v62 = vsel %vm6356_vm10, %v692_v4, %v908_v8  ;;  %v913_v37 = vsel %vm6276_vm2, %v702_v24, %v912_v19  ;;  %v401_v32 = vpack.c.bf16 %v369_v41, %v369_v41 }
  0x9b   : > { %v1451_v40 = vpack.c.b16 %v1422_v29, %v1421_v12  ;;  %v1193_v6 = vrot.slane %v1192_v30, 4  ;;  %v1202_v13 = vor.u32 %v1201_v33, %v1197_v31  ;;  %910 = vst [vmem:[#allocation2 + $0xb0] sm:$0xf] %v909_v62  ;;  %v402_v43 = vpack.c.bf16 %v370_v56, %v370_v56 }
  0x9c   : > { %914 = vst [vmem:[#allocation2 + $0xb8] sm:$0x1] %v913_v37  ;;  %v509_v25 = vsel %vm6294_vm4, 0, %v508_v16  ;;  %v755_v45 = vshrl.u32 %v401_v32, 16  ;;  %v758_v46 = vshll.u32 %v401_v32, 16  ;;  %v279_v47 = vmul.f32 %v6592_v23, %v244_v26  ;;  %v5960_v32 = vld [vmem:[%s7806_s3 + $0xc8] sm:$0xff] }
  0x9d   : > { %1547 = vmatmul.bf16.gmra.mxu0 %v1451_v40  ;;  %v1198_v49 = vsel %vm6393_vm11, %v1193_v6, %v1197_v31  ;;  %v1203_v50 = vrot.slane %v1202_v13, 4  ;;  %510 = vst [vmem:[#allocation2 + $0xf8] sm:$0x1] %v509_v25  ;;  %v763_v51 = vshrl.u32 %v402_v43, 16  ;;  %v766_v52 = vshll.u32 %v402_v43, 16  ;;  %2461 = vmatpush.bf16.msrb.mxu3 %v5960_v32 }
  0x9e   : > { %v1431_v53 = vunpack.c.l.b16 %v1198_v49  ;;  %v757_v41 = vrot.slane %v755_v45, 7  ;;  %v313_v27 = vadd.f32 %v6598_v28, %v6734_v42  ;;  %v314_v54 = vadd.f32 %v6598_v28, %v279_v47  ;;  %v936_v23 = vld [vmem:[#allocation2 + $0xf0] sm:$0xf]  ;;  %v5935_v47 = vld [vmem:[%s7806_s3 + $0x80] sm:$0xff] }
  0x9f   : > { %v1208_v55 = vsel %vm6393_vm11, %v1203_v50, %v1207_v34  ;;  %v765_v56 = vrot.slane %v763_v51, 7  ;;  %v423_v57 = vsel %vm6276_vm2, 0, %v422_v39  ;;  %v473_v58 = vsel %vm6294_vm4, 0, %v472_v44  ;;  %2149 = vmatpush.bf16.msrb.mxu2 %v5935_v47 }
  0xa0   : > { %v1432_v59 = vunpack.c.l.b16 %v1208_v55  ;;  %v973_v63 = vld [vmem:[#allocation2 + $0xb4] sm:$0xf]  ;;  %v760_v4 = vor.u32 %v758_v46, %v757_v41  ;;  %v761_v8 = vrot.slane %v757_v41, 4  ;;  %v345_v11 = vmax.f32 %v313_v27, 0.0  ;;  %424 = vst [vmem:[#allocation2 + $0x30] sm:$0x1] %v423_v57 }
  0xa1   : > { %v1291_v42 = vshll.u32 %v973_v63, 16  ;;  %v1295_v12 = vshrl.u32 %v973_v63, 16  ;;  %v768_v28 = vor.u32 %v766_v52, %v765_v56  ;;  %v770_v15 = vrot.slane %v765_v56, 4  ;;  %474 = vst [vmem:[#allocation2 + $0x38] sm:$0x1] %v473_v58  ;;  %v5920_v46 = vld [vmem:[%s7806_s3 + $0x8] sm:$0xff] }
  0xa2   : > { %v1456_v17 = vpack.c.b16 %v1432_v59, %v1431_v53  ;;  %v972_v19 = vld [vmem:[#allocation2 + $0xb0] sm:$0xf]  ;;  %v937_v48 = vsel %vm6356_vm10, %v760_v4, %v936_v23  ;;  %v346_v20 = vmax.f32 %v314_v54, 0.0  ;;  %v377_v21 = vpack.c.bf16 %v345_v11, %v345_v11  ;;  %v5959_v52 = vld [vmem:[%s7806_s3 + $0xc0] sm:$0xff]  ;;  %v5968_v53 = vld [vmem:[%s7806_s3 + $0x108] sm:$0xff]  ;;  %1768 = vmatpush.bf16.msrb.mxu1 %v5920_v46 }
  0xa3   : > { %v1009_v22 = vld [vmem:[#allocation2 + $0xb8] sm:$0x1]  ;;  %v1282_v2 = vshrl.u32 %v972_v19, 16  ;;  %v1285_v5 = vshll.u32 %v972_v19, 16  ;;  %v1293_v10 = vrot.slane %v1291_v42, 5  ;;  %v1297_v24 = vrot.slane %v1295_v12, 4  ;;  %2462 = vmatpush.bf16.msrb.mxu3 %v5959_v52  ;;  %3142 = vmatpush.bf16.msrb.mxu0 %v5968_v53 }
  0xa4   : > { %1572 = vmatmul.bf16.gmra.mxu1 %v1456_v17  ;;  %v1301_v26 = vshll.u32 %v1009_v22, 16  ;;  %v769_v29 = vsel %vm6349_vm7, %v761_v8, %v768_v28  ;;  %938 = vst [vmem:[#allocation2 + $0xf0] sm:$0xf] %v937_v48  ;;  %v940_v30 = vld [vmem:[#allocation2 + $0xf8] sm:$0x1]  ;;  %v378_v31 = vpack.c.bf16 %v346_v20, %v346_v20  ;;  %v551_v33 = vshrl.u32 %v377_v21, 16 }
  0xa5   : > { %v1284_v16 = vrot.slane %v1282_v2, 4  ;;  %v1287_v34 = vrot.slane %v1285_v5, 5  ;;  %v1298_v62 = vor.u32 %v1297_v24, %v1293_v10  ;;  %939 = vst [vmem:[#allocation2 + $0xf4] sm:$0xf] %v769_v29  ;;  %v941_v37 = vsel %vm6276_vm2, %v770_v15, %v940_v30  ;;  %v5919_v54 = vld [vmem:[%s7806_s3] sm:$0xff]  ;;  %v6006_v20 = vld [vmem:[%s7806_s3 + $0x1b8] sm:$0xff] }
  0xa6   : > { %v1303_v39 = vrot.slane %v1301_v26, 5  ;;  %942 = vst [vmem:[#allocation2 + $0xf8] sm:$0x1] %v941_v37  ;;  %v553_v40 = vrot.slane %v551_v33, 7  ;;  %v554_v6 = vshll.u32 %v377_v21, 16  ;;  %v559_v13 = vshrl.u32 %v378_v31, 16  ;;  %1769 = vmatpush.bf16.msrb.mxu1 %v5919_v54  ;;  %3875 = vmatpush.bf16.msra.mxu2 %v6006_v20 }
  0xa7   : > { %v1288_v43 = vor.u32 %v1287_v34, %v1284_v16  ;;  %v1299_v44 = vrot.slane %v1298_v62, 4  ;;  %v562_v25 = vshll.u32 %v378_v31, 16  ;;  %v852_v45 = vld [vmem:[#allocation2 + $0x30] sm:$0xf]  ;;  %v5967_v59 = vld [vmem:[%s7806_s3 + $0x100] sm:$0xff] }
  0xa8   : > { %v556_v49 = vor.u32 %v554_v6, %v553_v40  ;;  %v557_v50 = vrot.slane %v553_v40, 4  ;;  %v561_v51 = vrot.slane %v559_v13, 7  ;;  %v856_v58 = vld [vmem:[#allocation2 + $0x38] sm:$0x1]  ;;  %v1851_v63 = vld [vmem:[#allocation2] sm:$0xe]  ;;  %3143 = vmatpush.bf16.msrb.mxu0 %v5967_v59 }
  0xa9   : > { %v1289_v41 = vrot.slane %v1288_v43, 4  ;;  %v1304_v27 = vsel %vm6393_vm11, %v1299_v44, %v1303_v39  ;;  %v5499_v11 = vrot.slane %v1851_v63, 9  ;;  %v6155_v42 = vld [vmem:[#allocation2 + $0x4] sm:$0xf]  ;;  %v6156_v34 = vld [vmem:[#allocation2 + $0x8] sm:$0x1] }
  0xaa   : > { %v1440_v55 = vunpack.c.l.b16 %v1304_v27  ;;  %v564_v56 = vor.u32 %v562_v25, %v561_v51  ;;  %v566_v23 = vrot.slane %v561_v51, 4  ;;  %v853_v57 = vsel %vm6356_vm10, %v556_v49, %v852_v45  ;;  %v2576_v37 = vld [vmem:[#allocation2 + $0x10] sm:$0xf]  ;;  %v2577_v6 = vld [vmem:[#allocation2 + $0x14] sm:$0xf]  ;;  %v5982_v51 = vld [vmem:[%s7806_s3 + $0x178] sm:$0xff] }
  0xab   : > { %v1294_v4 = vsel %vm6393_vm11, %v1289_v41, %v1293_v10  ;;  %v980_v8 = vld [vmem:[#allocation2 + $0xf0] sm:$0xf]  ;;  %854 = vst [vmem:[#allocation2 + $0x30] sm:$0xf] %v853_v57  ;;  %v1904_v12 = vrot.slane %v6155_v42, 5  ;;  %v1907_v62 = vrot.slane %v6156_v34, 5  ;;  %3561 = vmatpush.bf16.msra.mxu1 %v5982_v51 }
  0xac   : > { %v1439_v28 = vunpack.c.l.b16 %v1294_v4  ;;  %v981_v15 = vld [vmem:[#allocation2 + $0xf4] sm:$0xf]  ;;  %v1378_v17 = vshrl.u32 %v980_v8, 16  ;;  %v1381_v19 = vshll.u32 %v980_v8, 16  ;;  %v565_v48 = vsel %vm6349_vm7, %v557_v50, %v564_v56  ;;  %v6014_v50 = vld [vmem:[%s7806_s3 + $0x1f8] sm:$0xff] }
  0xad   : > { %v1013_v21 = vld [vmem:[#allocation2 + $0xf8] sm:$0x1]  ;;  %v1387_v22 = vshll.u32 %v981_v15, 16  ;;  %v1391_v2 = vshrl.u32 %v981_v15, 16  ;;  %855 = vst [vmem:[#allocation2 + $0x34] sm:$0xf] %v565_v48  ;;  %v857_v5 = vsel %vm6276_vm2, %v566_v23, %v856_v58  ;;  %v1905_v44 = vsel %vm6820_vm14, %v5499_v11, %v1904_v12  ;;  %4556 = vmatpush.bf16.msra.mxu3 %v6014_v50 }
  0xae   : > { %v1460_v10 = vpack.c.b16 %v1440_v55, %v1439_v28  ;;  %v1380_v24 = vrot.slane %v1378_v17, 4  ;;  %v1383_v26 = vrot.slane %v1381_v19, 5  ;;  %v1397_v29 = vshll.u32 %v1013_v21, 16  ;;  %858 = vst [vmem:[#allocation2 + $0x38] sm:$0x1] %v857_v5  ;;  %v6022_v55 = vld [vmem:[%s7806_s3 + $0x238] sm:$0xff] }
  0xaf   : > { %v1389_v30 = vrot.slane %v1387_v22, 5  ;;  %v1393_v31 = vrot.slane %v1391_v2, 4  ;;  %v1906_v16 = vrot.slane %v1904_v12, 4  ;;  %v2625_v25 = vshrl.u32 %v2576_v37, 16  ;;  %4981 = vmatpush.bf16.msra.mxu0 %v6022_v55  ;;  %v2579_v51 = vld [vmem:[#allocation2 + $0x20] sm:$0xf] }
  0xb0   : > { %1592 = vmatmul.bf16.gmra.mxu2 %v1460_v10  ;;  %v1384_v32 = vor.u32 %v1383_v26, %v1380_v24  ;;  %v1399_v40 = vrot.slane %v1397_v29, 5  ;;  %v2628_v41 = vshll.u32 %v2576_v37, 16  ;;  %v2634_v27 = vshll.u32 %v2577_v6, 16  ;;  %v2578_v26 = vld [vmem:[#allocation2 + $0x18] sm:$0x1] }
  0xb1   : > { %v1394_v39 = vor.u32 %v1393_v31, %v1389_v30  ;;  %v1908_v49 = vsel %vm6820_vm14, %v1906_v16, %v1907_v62  ;;  %v2638_v54 = vshrl.u32 %v2577_v6, 16  ;;  %v2030_v12 = vunpack.c.l.b16 %v1905_v44  ;;  %v1852_v31 = vld [vmem:[#allocation2 + $0x10] sm:$0xe]  ;;  %v2619_v1 = vld [vmem:[#allocation2 + $0xf4] sm:$0xf] }
  0xb2   : > { %v1385_v13 = vrot.slane %v1384_v32, 4  ;;  %v956_v43 = vld [vmem:[#allocation2 + $0x30] sm:$0xf]  ;;  %v2031_v19 = vunpack.c.l.b16 %v1908_v49  ;;  %v2627_v20 = vrot.slane %v2625_v25, 4  ;;  %v2630_v21 = vrot.slane %v2628_v41, 5 }
  0xb3   : > { %v1395_v45 = vrot.slane %v1394_v39, 4  ;;  %v1090_v46 = vshrl.u32 %v956_v43, 16  ;;  %v1093_v47 = vshll.u32 %v956_v43, 16  ;;  %v2636_v5 = vrot.slane %v2634_v27, 5  ;;  %v5904_v6 = vld [vmem:[#allocation2 + $0x10] sm:$0xff] }
  0xb4   : > { %v1390_v52 = vsel %vm6393_vm11, %v1385_v13, %v1389_v30  ;;  %v6836_v53 = vld [vmem:[#allocation2 + $0x34] sm:$0xf]  ;;  %1770 = vmatmul.bf16.vlgmr.msrb.gmra.mxu1 %v5903_v18  ;;  %v2640_v10 = vrot.slane %v2638_v54, 4  ;;  %v2062_v30 = vpack.c.b16 %v2031_v19, %v2030_v12  ;;  %v1911_v34 = vrot.slane %v6601_v35, 5  ;;  %v2580_v27 = vld [vmem:[#allocation2 + $0x24] sm:$0xf] }
  0xb5   : > { %v1400_v56 = vsel %vm6393_vm11, %v1395_v45, %v1399_v40  ;;  %v1447_v23 = vunpack.c.l.b16 %v1390_v52  ;;  %v6843_v57 = vld [vmem:[#allocation2 + $0x38] sm:$0x1]  ;;  %v1092_v58 = vrot.slane %v1090_v46, 4  ;;  %v1095_v59 = vrot.slane %v1093_v47, 5  ;;  %v1853_v47 = vld [vmem:[#allocation2 + $0x20] sm:$0xe] }
  0xb6   : > { %v1448_v63 = vunpack.c.l.b16 %v1400_v56  ;;  %v1099_v4 = vshll.u32 %v6836_v53, 16  ;;  %v1103_v8 = vshrl.u32 %v6836_v53, 16  ;;  %v1109_v11 = vshll.u32 %v6843_v57, 16  ;;  %v5943_v54 = vld [vmem:[#allocation2 + $0x10] sm:$0xff] }
  0xb7   : > { %v1096_v42 = vor.u32 %v1095_v59, %v1092_v58  ;;  %v2631_v37 = vor.u32 %v2630_v21, %v2627_v20  ;;  %v2641_v32 = vor.u32 %v2640_v10, %v2636_v5  ;;  %v2644_v18 = vshll.u32 %v2578_v26, 16 }
  0xb8   : > { %v1464_v28 = vpack.c.b16 %v1448_v63, %v1447_v23  ;;  %v1101_v15 = vrot.slane %v1099_v4, 5  ;;  %v1105_v17 = vrot.slane %v1103_v8, 4  ;;  %v1111_v2 = vrot.slane %v1109_v11, 5 }
  0xb9   : > { %v1097_v48 = vrot.slane %v1096_v42, 4  ;;  %v5500_v40 = vrot.slane %v1852_v31, 9  ;;  %v1913_v43 = vrot.slane %v1911_v34, 4  ;;  %v1914_v44 = vrot.slane %v6604_v0, 5  ;;  %v2583_v31 = vld [vmem:[#allocation2 + $0x34] sm:$0xf] }
  0xba   : > { %1612 = vmatmul.bf16.gmra.mxu3 %v1464_v28  ;;  %v1106_v22 = vor.u32 %v1105_v17, %v1101_v15  ;;  %v2632_v25 = vrot.slane %v2631_v37, 4  ;;  %v2642_v45 = vrot.slane %v2641_v32, 4  ;;  %v2646_v46 = vrot.slane %v2644_v18, 5  ;;  %v6005_v28 = vld [vmem:[%s7806_s3 + $0x1b0] sm:$0xff] }
  0xbb   : > { %v1102_v24 = vsel %vm6393_vm11, %v1097_v48, %v1101_v15  ;;  %v1912_v35 = vsel %vm6820_vm14, %v5500_v40, %v1911_v34  ;;  %v1918_v49 = vrot.slane %v6724_v36, 5  ;;  %v1921_v50 = vrot.slane %v6728_v38, 5  ;;  %3876 = vmatpush.bf16.msra.mxu2 %v6005_v28  ;;  %v5981_v34 = vld [vmem:[%s7806_s3 + $0x170] sm:$0xff] }
  0xbc   : > { %v1107_v29 = vrot.slane %v1106_v22, 4  ;;  %v1423_v16 = vunpack.c.l.b16 %v1102_v24  ;;  %v5501_v52 = vrot.slane %v1853_v47, 9  ;;  %v1915_v41 = vsel %vm6820_vm14, %v1913_v43, %v1914_v44  ;;  %3562 = vmatpush.bf16.msra.mxu1 %v5981_v34 }
  0xbd   : > { %v1920_v0 = vrot.slane %v1918_v49, 4  ;;  %v2637_v55 = vsel %vm6393_vm11, %v2632_v25, %v2636_v5  ;;  %v2647_v56 = vsel %vm6393_vm11, %v2642_v45, %v2646_v46  ;;  %v2032_v23 = vunpack.c.l.b16 %v1912_v35 }
  0xbe   : > { %v1112_v62 = vsel %vm6393_vm11, %v1107_v29, %v1111_v2  ;;  %v1919_v36 = vsel %vm6820_vm14, %v5501_v52, %v1918_v49  ;;  %v2649_v38 = vshrl.u32 %v2579_v51, 16  ;;  %v2652_v58 = vshll.u32 %v2579_v51, 16  ;;  %v2581_v2 = vld [vmem:[#allocation2 + $0x28] sm:$0x1]  ;;  %v5905_v29 = vld [vmem:[#allocation2 + $0x20] sm:$0xff] }
  0xbf   : > { %v1424_v39 = vunpack.c.l.b16 %v1112_v62  ;;  %v1922_v59 = vsel %vm6820_vm14, %v1920_v0, %v1921_v50  ;;  %v2034_v63 = vunpack.c.l.b16 %v1919_v36  ;;  %v2033_v4 = vunpack.c.l.b16 %v1915_v41  ;;  %v6021_v62 = vld [vmem:[%s7806_s3 + $0x230] sm:$0xff]  ;;  %v2584_v51 = vld [vmem:[#allocation2 + $0x38] sm:$0x1] }
  0xc0   : > { %2150 = vmatmul.bf16.vlgmr.msrb.gmra.mxu2 %v2062_v30  ;;  %v2658_v8 = vshll.u32 %v2580_v27, 16  ;;  %v2662_v11 = vshrl.u32 %v2580_v27, 16  ;;  %v2035_v42 = vunpack.c.l.b16 %v1922_v59  ;;  %v3024_v15 = vunpack.c.l.b16 %v2637_v55  ;;  %v2582_v30 = vld [vmem:[#allocation2 + $0x30] sm:$0xf]  ;;  %4982 = vmatpush.bf16.msra.mxu0 %v6021_v62  ;;  %v1855_v62 = vld [vmem:[#allocation2 + $0x40] sm:$0xe] }
  0xc1   : > { %v1452_v13 = vpack.c.b16 %v1424_v39, %v1423_v16  ;;  %v3025_v17 = vunpack.c.l.b16 %v2647_v56  ;;  %v2651_v19 = vrot.slane %v2649_v38, 4  ;;  %v2063_v48 = vpack.c.b16 %v2033_v4, %v2032_v23  ;;  %v6013_v16 = vld [vmem:[%s7806_s3 + $0x1f0] sm:$0xff]  ;;  %v5944_v39 = vld [vmem:[#allocation2 + $0x20] sm:$0xff] }
  0xc2   : > { %v2064_v12 = vpack.c.b16 %v2035_v42, %v2034_v63  ;;  %v2654_v20 = vrot.slane %v2652_v58, 5  ;;  %v2660_v21 = vrot.slane %v2658_v8, 5  ;;  %v2664_v22 = vrot.slane %v2662_v11, 4  ;;  %4557 = vmatpush.bf16.msra.mxu3 %v6013_v16  ;;  %v5906_v56 = vld [vmem:[#allocation2 + $0x30] sm:$0xff]  ;;  %v2585_v4 = vld [vmem:[#allocation2 + $0x40] sm:$0xf] }
  0xc3   : > { %1552 = vmatmul.bf16.gmra.mxu0 %v1452_v13  ;;  %v3056_v5 = vpack.c.b16 %v3025_v17, %v3024_v15  ;;  %v2668_v26 = vshll.u32 %v2581_v2, 16  ;;  %v2673_v40 = vshrl.u32 %v2582_v30, 16  ;;  %v2682_v13 = vshll.u32 %v2583_v31, 16  ;;  %v2586_v8 = vld [vmem:[#allocation2 + $0x44] sm:$0xf]  ;;  %v5945_v42 = vld [vmem:[#allocation2 + $0x30] sm:$0xff]  ;;  %v6894_v2 = vpop.f32.mrf.mxu1 }
  0xc4   : > { %1775 = vmatmul.bf16.gmra.mxu1 %v5904_v6  ;;  %v2655_v10 = vor.u32 %v2654_v20, %v2651_v19  ;;  %v2665_v24 = vor.u32 %v2664_v22, %v2660_v21  ;;  %v2676_v6 = vshll.u32 %v2582_v30, 16  ;;  %v2686_v43 = vshrl.u32 %v2583_v31, 16  ;;  %v2587_v31 = vld [vmem:[#allocation2 + $0x48] sm:$0x1]  ;;  %v6157_v16 = vld [vmem:[#allocation2 + $0x44] sm:$0xf] }
  0xc5   : > { %v2670_v18 = vrot.slane %v2668_v26, 5  ;;  %v2675_v45 = vrot.slane %v2673_v40, 4  ;;  %v2684_v35 = vrot.slane %v2682_v13, 5  ;;  %v1925_v52 = vrot.slane %v6836_v53, 5  ;;  %v5907_v40 = vld [vmem:[#allocation2 + $0x40] sm:$0xff] }
  0xc6   : > { %v2656_v37 = vrot.slane %v2655_v10, 4  ;;  %v2666_v32 = vrot.slane %v2665_v24, 4  ;;  %v2678_v46 = vrot.slane %v2676_v6, 5  ;;  %v2688_v47 = vrot.slane %v2686_v43, 4  ;;  %v6158_v43 = vld [vmem:[#allocation2 + $0x48] sm:$0x1] }
  0xc7   : > { %v2692_v0 = vshll.u32 %v2584_v51, 16  ;;  %v1927_v36 = vrot.slane %v1925_v52, 4  ;;  %v1928_v38 = vrot.slane %v6843_v57, 5  ;;  %v2697_v28 = vshrl.u32 %v2585_v4, 16 }
  0xc8   : > { %v2661_v44 = vsel %vm6393_vm11, %v2656_v37, %v2660_v21  ;;  %v2671_v25 = vsel %vm6393_vm11, %v2666_v32, %v2670_v18  ;;  %v2679_v41 = vor.u32 %v2678_v46, %v2675_v45  ;;  %v2689_v27 = vor.u32 %v2688_v47, %v2684_v35  ;;  %v5980_v47 = vld [vmem:[%s7806_s3 + $0x168] sm:$0xff] }
  0xc9   : > { %v3026_v49 = vunpack.c.l.b16 %v2661_v44  ;;  %v3027_v50 = vunpack.c.l.b16 %v2671_v25  ;;  %v2694_v63 = vrot.slane %v2692_v0, 5  ;;  %v1929_v11 = vsel %vm6820_vm14, %v1927_v36, %v1928_v38  ;;  %3563 = vmatpush.bf16.msra.mxu1 %v5980_v47  ;;  %v5946_v0 = vld [vmem:[#allocation2 + $0x40] sm:$0xff]  ;;  %v6918_v36 = vpop.f32.mrf.mxu2 }
  0xca   : > { %2463 = vmatmul.bf16.vlgmr.msrb.gmra.mxu3 %v5943_v54  ;;  %v1854_v54 = vld [vmem:[#allocation2 + $0x30] sm:$0xe]  ;;  %v2680_v58 = vrot.slane %v2679_v41, 4  ;;  %v2690_v59 = vrot.slane %v2689_v27, 4  ;;  %v2700_v15 = vshll.u32 %v2585_v4, 16  ;;  %v2706_v17 = vshll.u32 %v2586_v8, 16 }
  0xcb   : > { %v3057_v55 = vpack.c.b16 %v3027_v50, %v3026_v49  ;;  %v5502_v23 = vrot.slane %v1854_v54, 9  ;;  %v2710_v19 = vshrl.u32 %v2586_v8, 16  ;;  %v2037_v20 = vunpack.c.l.b16 %v1929_v11  ;;  %v6020_v49 = vld [vmem:[%s7806_s3 + $0x228] sm:$0xff]  ;;  %v2588_v50 = vld [vmem:[#allocation2 + $0x50] sm:$0xf]  ;;  %v6908_v51 = vpop.f32.mrf.mxu1 }
  0xcc   : > { %v2695_v57 = vsel %vm6393_vm11, %v2690_v59, %v2694_v63  ;;  %v2699_v10 = vrot.slane %v2697_v28, 4  ;;  %v2702_v24 = vrot.slane %v2700_v15, 5  ;;  %v2708_v26 = vrot.slane %v2706_v17, 5  ;;  %v2589_v27 = vld [vmem:[#allocation2 + $0x54] sm:$0xf]  ;;  %4983 = vmatpush.bf16.msra.mxu0 %v6020_v49 }
  0xcd   : > { %v1926_v53 = vsel %vm6820_vm14, %v5502_v23, %v1925_v52  ;;  %v3029_v22 = vunpack.c.l.b16 %v2695_v57  ;;  %v1932_v34 = vrot.slane %v6157_v16, 5  ;;  %v5503_v6 = vrot.slane %v1855_v62, 9  ;;  %v2590_v15 = vld [vmem:[#allocation2 + $0x58] sm:$0x1]  ;;  %v6159_v17 = vld [vmem:[#allocation2 + $0x54] sm:$0xf] }
  0xce   : > { %v2703_v32 = vor.u32 %v2702_v24, %v2699_v10  ;;  %v1935_v44 = vrot.slane %v6158_v43, 5  ;;  %v2724_v23 = vshll.u32 %v2588_v50, 16  ;;  %v2730_v59 = vshll.u32 %v2589_v27, 16  ;;  %v6922_v10 = vpop.f32.mrf.mxu3  ;;  %v5908_v24 = vld [vmem:[#allocation2 + $0x50] sm:$0xff]  ;;  %v2592_v62 = vld [vmem:[#allocation2 + $0x64] sm:$0xf] }
  0xcf   : > { %v1934_v13 = vrot.slane %v1932_v34, 4  ;;  %v1933_v52 = vsel %vm6820_vm14, %v5503_v6, %v1932_v34  ;;  %v2734_v63 = vshrl.u32 %v2589_v27, 16  ;;  %v2591_v34 = vld [vmem:[#allocation2 + $0x60] sm:$0xf]  ;;  %v5947_v43 = vld [vmem:[#allocation2 + $0x50] sm:$0xff] }
  0xd0   : > { %2155 = vmatmul.bf16.gmra.mxu2 %v2063_v48  ;;  %v2036_v48 = vunpack.c.l.b16 %v1926_v53  ;;  %v2704_v25 = vrot.slane %v2703_v32, 4  ;;  %v2038_v38 = vunpack.c.l.b16 %v1933_v52 }
  0xd1   : > { %v1936_v41 = vsel %vm6820_vm14, %v1934_v13, %v1935_v44  ;;  %v2736_v57 = vrot.slane %v2734_v63, 4  ;;  %v2745_v44 = vshrl.u32 %v2591_v34, 16 }
  0xd2   : > { %v2065_v30 = vpack.c.b16 %v2037_v20, %v2036_v48  ;;  %v2709_v54 = vsel %vm6393_vm11, %v2704_v25, %v2708_v26  ;;  %v1856_v48 = vld [vmem:[#allocation2 + $0x50] sm:$0xe]  ;;  %v2748_v25 = vshll.u32 %v2591_v34, 16 }
  0xd3   : > { %3144 = vmatmul.bf16.vlgmr.msrb.gmra.mxu0 %v3056_v5  ;;  %v6004_v5 = vld [vmem:[%s7806_s3 + $0x1a8] sm:$0xff]  ;;  %v3030_v4 = vunpack.c.l.b16 %v2709_v54  ;;  %v2594_v34 = vld [vmem:[#allocation2 + $0x70] sm:$0xf] }
  0xd4   : > { %1780 = vmatmul.bf16.gmra.mxu1 %v5905_v29  ;;  %v2712_v29 = vrot.slane %v2710_v19, 4  ;;  %3877 = vmatpush.bf16.msra.mxu2 %v6004_v5  ;;  %v6920_v28 = vpop.f32.mrf.mxu1  ;;  %v1939_v19 = vrot.slane %v6159_v17, 5  ;;  %v2740_v5 = vshll.u32 %v2590_v15, 16  ;;  %v2750_v27 = vrot.slane %v2748_v25, 5  ;;  %v5909_v17 = vld [vmem:[#allocation2 + $0x60] sm:$0xff] }
  0xd5   : > { %v2772_v25 = vshll.u32 %v2594_v34, 16 }
  0xd6   : > { %v2713_v18 = vor.u32 %v2712_v29, %v2708_v26  ;;  %v6924_v26 = vpop.f32.mrf.mxu2  ;;  %v5504_v29 = vrot.slane %v1856_v48, 9  ;;  %v6938_v52 = vpop.f32.mrf.mxu3 }
  0xd8   : > { %v2714_v45 = vrot.slane %v2713_v18, 4  ;;  %v1940_v6 = vsel %vm6820_vm14, %v5504_v29, %v1939_v19  ;;  %v6011_v29 = vld [vmem:[%s7806_s3 + $0x1e0] sm:$0xff] }
  0xd9   : > { %v2040_v49 = vunpack.c.l.b16 %v1940_v6  ;;  %v5948_v6 = vld [vmem:[#allocation2 + $0x60] sm:$0xff] }
  0xda   : > { %2468 = vmatmul.bf16.gmra.mxu3 %v5944_v39  ;;  %v2716_v39 = vshll.u32 %v2587_v31, 16  ;;  %v6160_v31 = vld [vmem:[#allocation2 + $0x58] sm:$0x1] }
  0xdb   : > { %v1942_v16 = vrot.slane %v6160_v31, 5  ;;  %v6019_v31 = vld [vmem:[%s7806_s3 + $0x220] sm:$0xff] }
  0xdc   : > { %v2718_v46 = vrot.slane %v2716_v39, 5  ;;  %v2742_v39 = vrot.slane %v2740_v5, 5  ;;  %4984 = vmatpush.bf16.msra.mxu0 %v6019_v31 }
  0xe0   : > { %2160 = vmatmul.bf16.gmra.mxu2 %v2064_v12  ;;  %v2685_v12 = vsel %vm6393_vm11, %v2680_v58, %v2684_v35  ;;  %v6012_v35 = vld [vmem:[%s7806_s3 + $0x1e8] sm:$0xff]  ;;  %v2039_v58 = vunpack.c.l.b16 %v1936_v41  ;;  %v2747_v41 = vrot.slane %v2745_v44, 4  ;;  %v2769_v44 = vshrl.u32 %v2594_v34, 16  ;;  %v2598_v34 = vld [vmem:[#allocation2 + $0x84] sm:$0xf] }
  0xe1   : > { %v3028_v21 = vunpack.c.l.b16 %v2685_v12  ;;  %4558 = vmatpush.bf16.msra.mxu3 %v6012_v35  ;;  %v2732_v12 = vrot.slane %v2730_v59, 5 }
  0xe2   : > { %v2066_v11 = vpack.c.b16 %v2039_v58, %v2038_v38  ;;  %v2593_v38 = vld [vmem:[#allocation2 + $0x68] sm:$0x1]  ;;  %v6943_v58 = vpop.f32.mrf.mxu2 }
  0xe3   : > { %3149 = vmatmul.bf16.gmra.mxu0 %v3057_v55  ;;  %v3058_v37 = vpack.c.b16 %v3029_v22, %v3028_v21  ;;  %v2719_v55 = vsel %vm6393_vm11, %v2714_v45, %v2718_v46  ;;  %v2737_v22 = vor.u32 %v2736_v57, %v2732_v12  ;;  %v2754_v45 = vshll.u32 %v2592_v62, 16  ;;  %v1857_v57 = vld [vmem:[#allocation2 + $0x60] sm:$0xe] }
  0xe4   : > { %1785 = vmatmul.bf16.gmra.mxu1 %v5906_v56  ;;  %v2721_v56 = vshrl.u32 %v2588_v50, 16  ;;  %v3031_v8 = vunpack.c.l.b16 %v2719_v55  ;;  %v2758_v46 = vshrl.u32 %v2592_v62, 16  ;;  %v6003_v55 = vld [vmem:[%s7806_s3 + $0x1a0] sm:$0xff]  ;;  %v2595_v62 = vld [vmem:[#allocation2 + $0x74] sm:$0xf] }
  0xe5   : > { %v2738_v18 = vrot.slane %v2737_v22, 4  ;;  %3878 = vmatpush.bf16.msra.mxu2 %v6003_v55  ;;  %4559 = vmatpush.bf16.msra.mxu3 %v6011_v29  ;;  %v2774_v55 = vrot.slane %v2772_v25, 5  ;;  %v2597_v29 = vld [vmem:[#allocation2 + $0x80] sm:$0xf]  ;;  %v2802_v25 = vshll.u32 %v2598_v34, 16 }
  0xe6   : > { %v2723_v53 = vrot.slane %v2721_v56, 4  ;;  %v3059_v20 = vpack.c.b16 %v3031_v8, %v3030_v4  ;;  %v2760_v54 = vrot.slane %v2758_v46, 4  ;;  %v6161_v4 = vld [vmem:[#allocation2 + $0x64] sm:$0xf]  ;;  %v2782_v46 = vshrl.u32 %v2595_v62, 16 }
  0xe7   : > { %v2743_v47 = vsel %vm6393_vm11, %v2738_v18, %v2742_v39  ;;  %v1946_v8 = vrot.slane %v6161_v4, 5 }
  0xe9   : > { %v1948_v48 = vrot.slane %v1946_v8, 4 }
  0xea   : > { %2473 = vmatmul.bf16.gmra.mxu3 %v5945_v42  ;;  %v2726_v42 = vrot.slane %v2724_v23, 5  ;;  %v3033_v23 = vunpack.c.l.b16 %v2743_v47 }
  0xec   : > { %v2727_v21 = vor.u32 %v2726_v42, %v2723_v53 }
  0xee   : > { %v2728_v32 = vrot.slane %v2727_v21, 4 }
  0xf0   : > { %2165 = vmatmul.bf16.gmra.mxu2 %v2065_v30  ;;  %v1941_v30 = vrot.slane %v1939_v19, 4  ;;  %v2733_v35 = vsel %vm6393_vm11, %v2728_v32, %v2732_v12  ;;  %v2764_v12 = vshll.u32 %v2593_v38, 16  ;;  %v5505_v19 = vrot.slane %v1857_v57, 9  ;;  %v6960_v32 = vpop.f32.mrf.mxu2  ;;  %v2596_v38 = vld [vmem:[#allocation2 + $0x78] sm:$0x1] }
  0xf1   : > { %v3032_v56 = vunpack.c.l.b16 %v2733_v35  ;;  %v2788_v57 = vshll.u32 %v2596_v38, 16  ;;  %v2599_v38 = vld [vmem:[#allocation2 + $0x88] sm:$0x1] }
  0xf2   : > { %v1943_v13 = vsel %vm6820_vm14, %v1941_v30, %v1942_v16  ;;  %v5979_v30 = vld [vmem:[%s7806_s3 + $0x160] sm:$0xff]  ;;  %v6958_v16 = vpop.f32.mrf.mxu3  ;;  %v1947_v18 = vsel %vm6820_vm14, %v5505_v19, %v1946_v8  ;;  %v1858_v8 = vld [vmem:[#allocation2 + $0x70] sm:$0xe] }
  0xf3   : > { %3154 = vmatmul.bf16.gmra.mxu0 %v3058_v37  ;;  %v6926_v37 = vpop.f32.mrf.mxu0  ;;  %v2041_v50 = vunpack.c.l.b16 %v1943_v13  ;;  %v3060_v15 = vpack.c.b16 %v3033_v23, %v3032_v56  ;;  %3564 = vmatpush.bf16.msra.mxu1 %v5979_v30  ;;  %v2784_v56 = vrot.slane %v2782_v46, 4 }
  0xf4   : > { %1790 = vmatmul.bf16.gmra.mxu1 %v5907_v40  ;;  %v6928_v40 = vpop.f32.mrf.mxu1 }
  0xf5   : > { %v2067_v59 = vpack.c.b16 %v2041_v50, %v2040_v49  ;;  %v2042_v49 = vunpack.c.l.b16 %v1947_v18 }
  0xfa   : > { %2478 = vmatmul.bf16.gmra.mxu3 %v5946_v0  ;;  %v2756_v0 = vrot.slane %v2754_v45, 5  ;;  %v2778_v45 = vshll.u32 %v2595_v62, 16  ;;  %v6975_v4 = vpop.f32.mrf.mxu3  ;;  %v5949_v62 = vld [vmem:[#allocation2 + $0x70] sm:$0xff] }
  0xfb   : > { %v6947_v53 = vpop.f32.mrf.mxu0 }
  0xfc   : > { %v6945_v63 = vpop.f32.mrf.mxu1  ;;  %v2761_v42 = vor.u32 %v2760_v54, %v2756_v0  ;;  %v2771_v54 = vrot.slane %v2769_v44, 4 }
  0xfe   : > { %v2762_v5 = vrot.slane %v2761_v42, 4  ;;  %v2775_v42 = vor.u32 %v2774_v55, %v2771_v54 }
 0x100   : > { %2170 = vmatmul.bf16.gmra.mxu2 %v2066_v11  ;;  %v2751_v11 = vor.u32 %v2750_v27, %v2747_v41 }
 0x102   : > { %v2752_v22 = vrot.slane %v2751_v11, 4 }
 0x103   : > { %3159 = vmatmul.bf16.gmra.mxu0 %v3059_v20  ;;  %v6162_v20 = vld [vmem:[#allocation2 + $0x68] sm:$0x1]  ;;  %v6972_v47 = vpop.f32.mrf.mxu0 }
 0x104   : > { %1795 = vmatmul.bf16.gmra.mxu1 %v5908_v24  ;;  %v1949_v21 = vrot.slane %v6162_v20, 5  ;;  %v2766_v24 = vrot.slane %v2764_v12, 5  ;;  %v2757_v13 = vsel %vm6393_vm11, %v2752_v22, %v2756_v0  ;;  %v6970_v35 = vpop.f32.mrf.mxu1  ;;  %v2780_v0 = vrot.slane %v2778_v45, 5 }
 0x105   : > { %v3034_v41 = vunpack.c.l.b16 %v2757_v13  ;;  %v2806_v45 = vshrl.u32 %v2598_v34, 16 }
 0x106   : > { %v1950_v39 = vsel %vm6820_vm14, %v1948_v48, %v1949_v21  ;;  %v2785_v12 = vor.u32 %v2784_v56, %v2780_v0  ;;  %v5506_v48 = vrot.slane %v1858_v8, 9  ;;  %v1956_v21 = vrot.slane %v6744_v9, 5 }
 0x107   : > { %v2043_v50 = vunpack.c.l.b16 %v1950_v39  ;;  %v2793_v39 = vshrl.u32 %v2597_v29, 16  ;;  %v2804_v56 = vrot.slane %v2802_v25, 5 }
 0x109   : > { %v2068_v23 = vpack.c.b16 %v2043_v50, %v2042_v49 }
 0x10a   : > { %2483 = vmatmul.bf16.gmra.mxu3 %v5947_v43  ;;  %v2767_v43 = vsel %vm6393_vm11, %v2762_v5, %v2766_v24  ;;  %v2786_v5 = vrot.slane %v2785_v12, 4  ;;  %v2790_v24 = vrot.slane %v2788_v57, 5 }
 0x10b   : > { %v3035_v27 = vunpack.c.l.b16 %v2767_v43  ;;  %v6982_v22 = vpop.f32.mrf.mxu0 }
 0x10c   : > { %v2791_v9 = vsel %vm6393_vm11, %v2786_v5, %v2790_v24  ;;  %v6164_v24 = vld [vmem:[#allocation2 + $0x88] sm:$0x1] }
 0x10d   : > { %v3061_v11 = vpack.c.b16 %v3035_v27, %v3034_v41  ;;  %v3037_v41 = vunpack.c.l.b16 %v2791_v9  ;;  %v2795_v27 = vrot.slane %v2793_v39, 4  ;;  %v6010_v9 = vld [vmem:[%s7806_s3 + $0x1d8] sm:$0xff] }
 0x10e   : > { %v5978_v39 = vld [vmem:[%s7806_s3 + $0x158] sm:$0xff]  ;;  %4560 = vmatpush.bf16.msra.mxu3 %v6010_v9 }
 0x10f   : > { %3565 = vmatpush.bf16.msra.mxu1 %v5978_v39 }
 0x110   : > { %2175 = vmatmul.bf16.gmra.mxu2 %v2067_v59  ;;  %v1953_v59 = vrot.slane %v6742_v14, 5  ;;  %v2776_v14 = vrot.slane %v2775_v42, 4 }
 0x112   : > { %v1955_v20 = vrot.slane %v1953_v59, 4  ;;  %v1954_v30 = vsel %vm6820_vm14, %v5506_v48, %v1953_v59  ;;  %v2781_v18 = vsel %vm6393_vm11, %v2776_v14, %v2780_v0  ;;  %v6992_v13 = vpop.f32.mrf.mxu3  ;;  %v6163_v59 = vld [vmem:[#allocation2 + $0x84] sm:$0xf] }
 0x113   : > { %3164 = vmatmul.bf16.gmra.mxu0 %v3060_v15  ;;  %v6977_v15 = vpop.f32.mrf.mxu2  ;;  %v2044_v43 = vunpack.c.l.b16 %v1954_v30  ;;  %v3036_v50 = vunpack.c.l.b16 %v2781_v18  ;;  %v1960_v8 = vrot.slane %v6163_v59, 5  ;;  %v5911_v48 = vld [vmem:[#allocation2 + $0x80] sm:$0xff]  ;;  %v2601_v18 = vld [vmem:[#allocation2 + $0x94] sm:$0xf] }
 0x114   : > { %1800 = vmatmul.bf16.gmra.mxu1 %v5909_v17  ;;  %v5910_v17 = vld [vmem:[#allocation2 + $0x70] sm:$0xff]  ;;  %v1957_v31 = vsel %vm6820_vm14, %v1955_v20, %v1956_v21  ;;  %v6002_v20 = vld [vmem:[%s7806_s3 + $0x198] sm:$0xff] }
 0x115   : > { %v2045_v44 = vunpack.c.l.b16 %v1957_v31  ;;  %v3062_v42 = vpack.c.b16 %v3037_v41, %v3036_v50  ;;  %v1962_v5 = vrot.slane %v1960_v8, 4  ;;  %3879 = vmatpush.bf16.msra.mxu2 %v6002_v20  ;;  %v2600_v31 = vld [vmem:[#allocation2 + $0x90] sm:$0xf]  ;;  %v5950_v50 = vld [vmem:[#allocation2 + $0x80] sm:$0xff] }
 0x116   : > { %v2817_v41 = vshrl.u32 %v2600_v31, 16 }
 0x117   : > { %v2069_v55 = vpack.c.b16 %v2045_v44, %v2044_v43 }
 0x11a   : > { %2488 = vmatmul.bf16.gmra.mxu3 %v5948_v6  ;;  %v2796_v6 = vshll.u32 %v2597_v29, 16  ;;  %v6998_v54 = vpop.f32.mrf.mxu0  ;;  %v1963_v29 = vrot.slane %v6164_v24, 5  ;;  %v7004_v34 = vpop.f32.mrf.mxu3 }
 0x11b   : > { %v6994_v46 = vpop.f32.mrf.mxu2  ;;  %7821 = vst [vmem:[#allocation3_spill] sm:$0xff] %v7004_v34 }
 0x11c   : > { %v2798_v0 = vrot.slane %v2796_v6, 5  ;;  %v1964_v25 = vsel %vm6820_vm14, %v1962_v5, %v1963_v29  ;;  %v6165_v29 = vld [vmem:[#allocation2 + $0x94] sm:$0xf] }
 0x11e   : > { %v2799_v12 = vor.u32 %v2798_v0, %v2795_v27  ;;  %v2820_v27 = vshll.u32 %v2600_v31, 16  ;;  %v2830_v0 = vshrl.u32 %v2601_v18, 16  ;;  %v1967_v31 = vrot.slane %v6165_v29, 5 }
 0x120   : > { %2180 = vmatmul.bf16.gmra.mxu2 %v2068_v23  ;;  %v2808_v23 = vrot.slane %v2806_v45, 4  ;;  %v2800_v6 = vrot.slane %v2799_v12, 4  ;;  %v2819_v12 = vrot.slane %v2817_v41, 4  ;;  %v1969_v41 = vrot.slane %v1967_v31, 4 }
 0x121   : > { %v6979_v19 = vpop.f32.mrf.mxu1 }
 0x122   : > { %v2809_v57 = vor.u32 %v2808_v23, %v2804_v56  ;;  %v7018_v45 = vpop.f32.mrf.mxu0  ;;  %v2805_v23 = vsel %vm6393_vm11, %v2800_v6, %v2804_v56  ;;  %v2602_v56 = vld [vmem:[#allocation2 + $0x98] sm:$0x1]  ;;  %v1860_v6 = vld [vmem:[#allocation2 + $0x90] sm:$0xe] }
 0x123   : > { %3169 = vmatmul.bf16.gmra.mxu0 %v3061_v11  ;;  %v1859_v11 = vld [vmem:[#allocation2 + $0x80] sm:$0xe]  ;;  %v3038_v20 = vunpack.c.l.b16 %v2805_v23  ;;  %v2836_v39 = vshll.u32 %v2602_v56, 16  ;;  %v5951_v56 = vld [vmem:[#allocation2 + $0x90] sm:$0xff] }
 0x124   : > { %1805 = vmatmul.bf16.gmra.mxu1 %v5910_v17  ;;  %v2812_v17 = vshll.u32 %v2599_v38, 16  ;;  %v5507_v14 = vrot.slane %v1859_v11, 9  ;;  %v2810_v43 = vrot.slane %v2809_v57, 4  ;;  %v6018_v11 = vld [vmem:[%s7806_s3 + $0x218] sm:$0xff]  ;;  %v2822_v57 = vrot.slane %v2820_v27, 5 }
 0x125   : > { %4985 = vmatpush.bf16.msra.mxu0 %v6018_v11  ;;  %v6166_v27 = vld [vmem:[#allocation2 + $0x98] sm:$0x1] }
 0x126   : > { %v2814_v44 = vrot.slane %v2812_v17, 5 }
 0x128   : > { %v2815_v38 = vsel %vm6393_vm11, %v2810_v43, %v2814_v44 }
 0x129   : > { %v6996_v49 = vpop.f32.mrf.mxu1 }
 0x12a   : > { %2493 = vmatmul.bf16.gmra.mxu3 %v5949_v62 }
 0x130   : > { %2185 = vmatmul.bf16.gmra.mxu2 %v2069_v55  ;;  %v2826_v55 = vshll.u32 %v2601_v18, 16  ;;  %v2823_v18 = vor.u32 %v2822_v57, %v2819_v12  ;;  %v2603_v12 = vld [vmem:[#allocation2 + $0xa0] sm:$0xf]  ;;  %v2604_v57 = vld [vmem:[#allocation2 + $0xa4] sm:$0xf] }
 0x131   : > { %v1771_v21 = vpop.f32.mrf.mxu1  ;;  %v2841_v29 = vshrl.u32 %v2603_v12, 16 }
 0x132   : > { %v1772_v30 = vadd.f32 %v1771_v21, %v6926_v37  ;;  %v1961_v37 = vsel %vm6820_vm14, %v5507_v14, %v1960_v8  ;;  %v2047_v8 = vunpack.c.l.b16 %v1964_v25  ;;  %v2828_v17 = vrot.slane %v2826_v55, 5 }
 0x133   : > { %3174 = vmatmul.bf16.gmra.mxu0 %v3062_v42  ;;  %v7006_v62 = vpop.f32.mrf.mxu2  ;;  %v2046_v59 = vunpack.c.l.b16 %v1961_v37  ;;  %v3039_v21 = vunpack.c.l.b16 %v2815_v38  ;;  %v5912_v37 = vld [vmem:[#allocation2 + $0x90] sm:$0xff]  ;;  %v1970_v55 = vrot.slane %v6166_v27, 5  ;;  %v2838_v38 = vrot.slane %v2836_v39, 5 }
 0x134   : > { %1810 = vmatmul.bf16.gmra.mxu1 %v5911_v48  ;;  %v2832_v48 = vrot.slane %v2830_v0, 4  ;;  %v2824_v0 = vrot.slane %v2823_v18, 4  ;;  %v2850_v18 = vshll.u32 %v2604_v57, 16 }
 0x135   : > { %v2070_v5 = vpack.c.b16 %v2047_v8, %v2046_v59  ;;  %v3063_v43 = vpack.c.b16 %v3039_v21, %v3038_v20  ;;  %v1971_v21 = vsel %vm6820_vm14, %v1969_v41, %v1970_v55 }
 0x136   : > { %v2833_v9 = vor.u32 %v2832_v48, %v2828_v17  ;;  %v2852_v55 = vrot.slane %v2850_v18, 5 }
 0x138   : > { %v2834_v23 = vrot.slane %v2833_v9, 4  ;;  %v2854_v9 = vshrl.u32 %v2604_v57, 16  ;;  %v6167_v57 = vld [vmem:[#allocation2 + $0xa4] sm:$0xf] }
 0x139   : > { %v1773_v42 = vpop.f32.mrf.mxu1 }
 0x13a   : > { %2498 = vmatmul.bf16.gmra.mxu3 %v5950_v50  ;;  %v5508_v50 = vrot.slane %v1860_v6, 9 }
 0x13b   : > { %v7027_v14 = vpop.f32.mrf.mxu2 }
 0x13c   : > { %v1968_v20 = vsel %vm6820_vm14, %v5508_v50, %v1967_v31  ;;  %v1774_v50 = vadd.f32 %v1773_v42, %v6947_v53  ;;  %v5913_v53 = vld [vmem:[#allocation2 + $0xa0] sm:$0xff]  ;;  %v6001_v42 = vld [vmem:[%s7806_s3 + $0x190] sm:$0xff] }
 0x13d   : > { %v7029_v24 = vpop.f32.mrf.mxu3  ;;  %v2048_v6 = vunpack.c.l.b16 %v1968_v20  ;;  %3880 = vmatpush.bf16.msra.mxu2 %v6001_v42 }
 0x13e   : > { %7822 = vst [vmem:[#allocation4_spill] sm:$0xff] %v7029_v24 }
 0x140   : > { %v7031_v44 = vpop.f32.mrf.mxu0  ;;  %2190 = vmatmul.bf16.gmra.mxu2 %v2070_v5  ;;  %v2829_v5 = vsel %vm6393_vm11, %v2824_v0, %v2828_v17  ;;  %v2843_v17 = vrot.slane %v2841_v29, 4  ;;  %v2856_v0 = vrot.slane %v2854_v9, 4  ;;  %v6168_v9 = vld [vmem:[#allocation2 + $0xa8] sm:$0x1] }
 0x141   : > { %v1776_v25 = vpop.f32.mrf.mxu1  ;;  %v3040_v31 = vunpack.c.l.b16 %v2829_v5 }
 0x142   : > { %v1777_v59 = vadd.f32 %v1776_v25, %v6972_v47  ;;  %v2839_v47 = vsel %vm6393_vm11, %v2834_v23, %v2838_v38 }
 0x143   : > { %3179 = vmatmul.bf16.gmra.mxu0 %v3063_v43  ;;  %v2151_v8 = vpop.f32.mrf.mxu2  ;;  %v2049_v43 = vunpack.c.l.b16 %v1971_v21  ;;  %v3041_v25 = vunpack.c.l.b16 %v2839_v47  ;;  %v1861_v21 = vld [vmem:[#allocation2 + $0xa0] sm:$0xe] }
 0x144   : > { %v2231_v11 = vadd.f32 %v2151_v8, %v1772_v30  ;;  %1815 = vmatmul.bf16.gmra.mxu1 %v5912_v37  ;;  %v2844_v30 = vshll.u32 %v2603_v12, 16  ;;  %v2605_v8 = vld [vmem:[#allocation2 + $0xa8] sm:$0x1] }
 0x145   : > { %v7034_v48 = vpop.f32.mrf.mxu3  ;;  %v2071_v38 = vpack.c.b16 %v2049_v43, %v2048_v6  ;;  %v3064_v24 = vpack.c.b16 %v3041_v25, %v3040_v31  ;;  %v2860_v5 = vshll.u32 %v2605_v8, 16  ;;  %v1977_v6 = vrot.slane %v6168_v9, 5 }
 0x146   : > { %7823 = vst [vmem:[#allocation5_spill] sm:$0xff] %v7034_v48  ;;  %v2846_v27 = vrot.slane %v2844_v30, 5  ;;  %v1974_v48 = vrot.slane %v6167_v57, 5  ;;  %v5509_v30 = vrot.slane %v1861_v21, 9  ;;  %v5952_v57 = vld [vmem:[#allocation2 + $0xa0] sm:$0xff] }
 0x148   : > { %v7044_v39 = vpop.f32.mrf.mxu0  ;;  %v2847_v34 = vor.u32 %v2846_v27, %v2843_v17  ;;  %v1976_v18 = vrot.slane %v1974_v48, 4  ;;  %v6009_v17 = vld [vmem:[%s7806_s3 + $0x1d0] sm:$0xff] }
 0x149   : > { %v7046_v37 = vpop.f32.mrf.mxu1  ;;  %v5977_v27 = vld [vmem:[%s7806_s3 + $0x150] sm:$0xff]  ;;  %4561 = vmatpush.bf16.msra.mxu3 %v6009_v17 }
 0x14a   : > { %2503 = vmatmul.bf16.gmra.mxu3 %v5951_v56  ;;  %v2857_v56 = vor.u32 %v2856_v0, %v2852_v55  ;;  %v2848_v31 = vrot.slane %v2847_v34, 4  ;;  %v1978_v34 = vsel %vm6820_vm14, %v1976_v18, %v1977_v6  ;;  %3566 = vmatpush.bf16.msra.mxu1 %v5977_v27 }
 0x14b   : > { %v2153_v41 = vpop.f32.mrf.mxu2 }
 0x14c   : > { %v2232_v23 = vadd.f32 %v2153_v41, %v1774_v50  ;;  %v2858_v25 = vrot.slane %v2857_v56, 4  ;;  %v2862_v50 = vrot.slane %v2860_v5, 5 }
 0x14d   : > { %v2464_v12 = vpop.f32.mrf.mxu3 }
 0x14e   : > { %v2544_v20 = vadd.f32 %v2464_v12, %v2231_v11 }
 0x150   : > { %v3145_v47 = vpop.f32.mrf.mxu0  ;;  %2195 = vmatmul.bf16.gmra.mxu2 %v2071_v38  ;;  %v2606_v38 = vld [vmem:[#allocation2 + $0xb0] sm:$0xf] }
 0x151   : > { %v1781_v29 = vpop.f32.mrf.mxu1  ;;  %v7052_v43 = vadd.f32 %v3145_v47, %v2544_v20  ;;  %v2853_v20 = vsel %vm6393_vm11, %v2848_v31, %v2852_v55  ;;  %v2865_v21 = vshrl.u32 %v2606_v38, 16  ;;  %v2868_v56 = vshll.u32 %v2606_v38, 16 }
 0x152   : > { %v7055_v11 = vadd.f32 %v1781_v29, %v6998_v54  ;;  %v1975_v54 = vsel %vm6820_vm14, %v5509_v30, %v1974_v48  ;;  %v6017_v29 = vld [vmem:[%s7806_s3 + $0x210] sm:$0xff]  ;;  %v1779_v55 = vadd.f32 %v7046_v37, %v6982_v22  ;;  %v3042_v9 = vunpack.c.l.b16 %v2853_v20 }
 0x153   : > { %3184 = vmatmul.bf16.gmra.mxu0 %v3064_v24  ;;  %v2156_v41 = vpop.f32.mrf.mxu2  ;;  %v2607_v24 = vld [vmem:[#allocation2 + $0xb4] sm:$0xf]  ;;  %v2050_v47 = vunpack.c.l.b16 %v1975_v54  ;;  %v2608_v54 = vld [vmem:[#allocation2 + $0xb8] sm:$0x1] }
 0x154   : > { %v2233_v0 = vadd.f32 %v2156_v41, %v1777_v59  ;;  %1820 = vmatmul.bf16.gmra.mxu1 %v5913_v53  ;;  %v2863_v59 = vsel %vm6393_vm11, %v2858_v25, %v2862_v50  ;;  %v2051_v53 = vunpack.c.l.b16 %v1978_v34  ;;  %v2874_v48 = vshll.u32 %v2607_v24, 16  ;;  %4986 = vmatpush.bf16.msra.mxu0 %v6017_v29  ;;  %v6169_v34 = vld [vmem:[#allocation2 + $0xb4] sm:$0xf] }
 0x155   : > { %v2466_v8 = vpop.f32.mrf.mxu3  ;;  %v2878_v42 = vshrl.u32 %v2607_v24, 16  ;;  %v3043_v6 = vunpack.c.l.b16 %v2863_v59  ;;  %v2867_v25 = vrot.slane %v2865_v21, 4  ;;  %v2870_v50 = vrot.slane %v2868_v56, 5  ;;  %v5914_v59 = vld [vmem:[#allocation2 + $0xb0] sm:$0xff] }
 0x156   : > { %v2545_v12 = vadd.f32 %v2466_v8, %v2232_v23  ;;  %v2072_v17 = vpack.c.b16 %v2051_v53, %v2050_v47  ;;  %v2876_v27 = vrot.slane %v2874_v48, 5  ;;  %v1981_v24 = vrot.slane %v6169_v34, 5 }
 0x157   : > { %v2880_v38 = vrot.slane %v2878_v42, 4  ;;  %v3065_v22 = vpack.c.b16 %v3043_v6, %v3042_v9  ;;  %v2884_v20 = vshll.u32 %v2608_v54, 16  ;;  %v2609_v42 = vld [vmem:[#allocation2 + $0xc0] sm:$0xf] }
 0x158   : > { %v3147_v5 = vpop.f32.mrf.mxu0  ;;  %v1983_v56 = vrot.slane %v1981_v24, 4  ;;  %v2889_v54 = vshrl.u32 %v2609_v42, 16  ;;  %v2892_v34 = vshll.u32 %v2609_v42, 16 }
 0x159   : > { %v1783_v30 = vpop.f32.mrf.mxu1  ;;  %v7074_v23 = vadd.f32 %v3147_v5, %v2545_v12  ;;  %v2881_v5 = vor.u32 %v2880_v38, %v2876_v27  ;;  %v2886_v6 = vrot.slane %v2884_v20, 5 }
 0x15a   : > { %2508 = vmatmul.bf16.gmra.mxu3 %v5952_v57  ;;  %v7079_v18 = vadd.f32 %v1783_v30, %v7018_v45  ;;  %v1862_v57 = vld [vmem:[#allocation2 + $0xb0] sm:$0xe]  ;;  %v2871_v45 = vor.u32 %v2870_v50, %v2867_v25  ;;  %v6170_v30 = vld [vmem:[#allocation2 + $0xb8] sm:$0x1]  ;;  %v2610_v25 = vld [vmem:[#allocation2 + $0xc4] sm:$0xf] }
 0x15b   : > { %v2158_v31 = vpop.f32.mrf.mxu2  ;;  %v5510_v21 = vrot.slane %v1862_v57, 9  ;;  %v1984_v47 = vrot.slane %v6170_v30, 5  ;;  %v2882_v9 = vrot.slane %v2881_v5, 4  ;;  %v2902_v57 = vshrl.u32 %v2610_v25, 16 }
 0x15c   : > { %v2234_v41 = vadd.f32 %v2158_v31, %v1779_v55  ;;  %v2872_v55 = vrot.slane %v2871_v45, 4 }
 0x15d   : > { %v2469_v8 = vpop.f32.mrf.mxu3  ;;  %v1985_v38 = vsel %vm6820_vm14, %v1983_v56, %v1984_v47 }
 0x15e   : > { %v2546_v12 = vadd.f32 %v2469_v8, %v2233_v0  ;;  %v2053_v5 = vunpack.c.l.b16 %v1985_v38  ;;  %v1863_v38 = vld [vmem:[#allocation2 + $0xc0] sm:$0xe] }
 0x160   : > { %v3150_v37 = vpop.f32.mrf.mxu0  ;;  %2200 = vmatmul.bf16.gmra.mxu2 %v2072_v17  ;;  %v1982_v17 = vsel %vm6820_vm14, %v5510_v21, %v1981_v24 }
 0x161   : > { %v1786_v29 = vpop.f32.mrf.mxu1  ;;  %v7081_v53 = vadd.f32 %v3150_v37, %v2546_v12  ;;  %v2898_v12 = vshll.u32 %v2610_v25, 16  ;;  %v2877_v37 = vsel %vm6393_vm11, %v2872_v55, %v2876_v27  ;;  %v2052_v45 = vunpack.c.l.b16 %v1982_v17  ;;  %v2611_v55 = vld [vmem:[#allocation2 + $0xc8] sm:$0x1] }
 0x162   : > { %v7084_v48 = vadd.f32 %v1786_v29, %v7031_v44  ;;  %v5953_v44 = vld [vmem:[#allocation2 + $0xb0] sm:$0xff]  ;;  %v3044_v21 = vunpack.c.l.b16 %v2877_v37  ;;  %v6172_v37 = vld [vmem:[#allocation2 + $0xc8] sm:$0x1] }
 0x163   : > { %3189 = vmatmul.bf16.gmra.mxu0 %v3065_v22  ;;  %v2161_v0 = vpop.f32.mrf.mxu2  ;;  %v2900_v47 = vrot.slane %v2898_v12, 5  ;;  %v2073_v42 = vpack.c.b16 %v2053_v5, %v2052_v45  ;;  %v6000_v12 = vld [vmem:[%s7806_s3 + $0x188] sm:$0xff] }
 0x164   : > { %v2235_v31 = vadd.f32 %v2161_v0, %v7055_v11  ;;  %1825 = vmatmul.bf16.gmra.mxu1 %v5914_v59  ;;  %v2887_v11 = vsel %vm6393_vm11, %v2882_v9, %v2886_v6  ;;  %v2891_v59 = vrot.slane %v2889_v54, 4  ;;  %v2904_v0 = vrot.slane %v2902_v57, 4  ;;  %v6171_v6 = vld [vmem:[#allocation2 + $0xc4] sm:$0xf]  ;;  %3881 = vmatpush.bf16.msra.mxu2 %v6000_v12  ;;  %v6016_v12 = vld [vmem:[%s7806_s3 + $0x208] sm:$0xff] }
 0x165   : > { %v2471_v50 = vpop.f32.mrf.mxu3  ;;  %v3045_v56 = vunpack.c.l.b16 %v2887_v11  ;;  %v1988_v25 = vrot.slane %v6171_v6, 5  ;;  %v2908_v54 = vshll.u32 %v2611_v55, 16  ;;  %v1991_v11 = vrot.slane %v6172_v37, 5  ;;  %4987 = vmatpush.bf16.msra.mxu0 %v6016_v12 }
 0x166   : > { %v2547_v8 = vadd.f32 %v2471_v50, %v2234_v41  ;;  %v2894_v41 = vrot.slane %v2892_v34, 5  ;;  %v5915_v34 = vld [vmem:[#allocation2 + $0xc0] sm:$0xff] }
 0x168   : > { %v3152_v22 = vpop.f32.mrf.mxu0  ;;  %v2895_v17 = vor.u32 %v2894_v41, %v2891_v59  ;;  %v2612_v41 = vld [vmem:[#allocation2 + $0xd0] sm:$0xf] }
 0x169   : > { %v1788_v20 = vpop.f32.mrf.mxu1  ;;  %v7095_v24 = vadd.f32 %v3152_v22, %v2547_v8  ;;  %v3066_v8 = vpack.c.b16 %v3045_v56, %v3044_v21  ;;  %v1990_v22 = vrot.slane %v1988_v25, 4  ;;  %v6008_v21 = vld [vmem:[%s7806_s3 + $0x1c8] sm:$0xff] }
 0x16a   : > { %2513 = vmatmul.bf16.gmra.mxu3 %v5953_v44  ;;  %v7098_v29 = vadd.f32 %v1788_v20, %v7044_v39  ;;  %v2905_v44 = vor.u32 %v2904_v0, %v2900_v47  ;;  %v2910_v20 = vrot.slane %v2908_v54, 5  ;;  %v5976_v56 = vld [vmem:[%s7806_s3 + $0x148] sm:$0xff]  ;;  %v2613_v0 = vld [vmem:[#allocation2 + $0xd4] sm:$0xf] }
 0x16b   : > { %7824 = vst [vmem:[#allocation6_spill] sm:$0xff] %v7095_v24  ;;  %v2163_v30 = vpop.f32.mrf.mxu2  ;;  %4562 = vmatpush.bf16.msra.mxu3 %v6008_v21  ;;  %3567 = vmatpush.bf16.msra.mxu1 %v5976_v56  ;;  %v2926_v54 = vshrl.u32 %v2613_v0, 16  ;;  %v2614_v21 = vld [vmem:[#allocation2 + $0xd8] sm:$0x1]  ;;  %v6173_v56 = vld [vmem:[#allocation2 + $0xd4] sm:$0xf] }
 0x16c   : > { %v2236_v27 = vadd.f32 %v2163_v30, %v7079_v18  ;;  %v5511_v18 = vrot.slane %v1863_v38, 9  ;;  %v2906_v5 = vrot.slane %v2905_v44, 4  ;;  %v2916_v38 = vshll.u32 %v2612_v41, 16 }
 0x16d   : > { %v2474_v9 = vpop.f32.mrf.mxu3  ;;  %v2922_v44 = vshll.u32 %v2613_v0, 16  ;;  %v1995_v0 = vrot.slane %v6173_v56, 5 }
 0x16e   : > { %v2548_v50 = vadd.f32 %v2474_v9, %v2235_v31  ;;  %v2896_v31 = vrot.slane %v2895_v17, 4  ;;  %v1989_v55 = vsel %vm6820_vm14, %v5511_v18, %v1988_v25  ;;  %v1992_v9 = vsel %vm6820_vm14, %v1990_v22, %v1991_v11 }
 0x16f   : > { %v2913_v17 = vshrl.u32 %v2612_v41, 16  ;;  %v2055_v25 = vunpack.c.l.b16 %v1992_v9  ;;  %v2918_v11 = vrot.slane %v2916_v38, 5  ;;  %v1997_v12 = vrot.slane %v1995_v0, 4 }
 0x170   : > { %v3155_v39 = vpop.f32.mrf.mxu0  ;;  %2205 = vmatmul.bf16.gmra.mxu2 %v2073_v42 }
 0x171   : > { %v7104_v57 = vpop.f32.mrf.mxu1  ;;  %v7106_v45 = vadd.f32 %v3155_v39, %v2548_v50  ;;  %v5954_v50 = vld [vmem:[#allocation2 + $0xc0] sm:$0xff] }
 0x173   : > { %7825 = vst [vmem:[#allocation7_spill] sm:$0xff] %v7106_v45  ;;  %3194 = vmatmul.bf16.gmra.mxu0 %v3066_v8  ;;  %v2166_v59 = vpop.f32.mrf.mxu2  ;;  %v2901_v8 = vsel %vm6393_vm11, %v2896_v31, %v2900_v47  ;;  %v2915_v47 = vrot.slane %v2913_v17, 4  ;;  %v269_v17 = vld [vmem:[%s6283_s29 + $0xf0] sm:$0xff] }
 0x174   : > { %v2237_v30 = vadd.f32 %v2166_v59, %v7084_v48  ;;  %1830 = vmatmul.bf16.gmra.mxu1 %v5915_v34  ;;  %v2911_v48 = vsel %vm6393_vm11, %v2906_v5, %v2910_v20  ;;  %v2054_v34 = vunpack.c.l.b16 %v1989_v55  ;;  %v3046_v22 = vunpack.c.l.b16 %v2901_v8  ;;  %v1864_v55 = vld [vmem:[#allocation2 + $0xd0] sm:$0xe]  ;;  %v270_v8 = vld [vmem:[%s6283_s29 + $0xf8] sm:$0xff] }
 0x175   : > { %v2476_v42 = vpop.f32.mrf.mxu3  ;;  %v3047_v37 = vunpack.c.l.b16 %v2911_v48  ;;  %v7130_v5 = vrot.slane %v2922_v44, 5  ;;  %v2928_v20 = vrot.slane %v2926_v54, 4  ;;  %v2932_v48 = vshll.u32 %v2614_v21, 16  ;;  %v6174_v44 = vld [vmem:[%s7804_s1] ss:$0 sm:$0xff] }
 0x176   : > { %v2549_v6 = vadd.f32 %v2476_v42, %v2236_v27  ;;  %v2074_v41 = vpack.c.b16 %v2055_v25, %v2054_v34  ;;  %v304_v54 = vmul.f32 %v6174_v44, %v269_v17  ;;  %v5916_v34 = vld [vmem:[#allocation2 + $0xd0] sm:$0xff]  ;;  %v5512_v25 = vrot.slane %v1864_v55, 9 }
 0x177   : > { %v3067_v9 = vpack.c.b16 %v3047_v37, %v3046_v22  ;;  %v2929_v38 = vor.u32 %v2928_v20, %v7130_v5  ;;  %v6176_v37 = vld [vmem:[%s7805_s2] ss:$0 sm:$0xff]  ;;  %v1792_v21 = vadd.f32 %v7104_v57, %v6894_v2  ;;  %v2616_v57 = vld [vmem:[#allocation2 + $0xe4] sm:$0xf] }
 0x178   : > { %v3157_v39 = vpop.f32.mrf.mxu0 }
 0x179   : > { %v7126_v18 = vpop.f32.mrf.mxu1  ;;  %v7128_v27 = vadd.f32 %v3157_v39, %v2549_v6 }
 0x17a   : > { %2518 = vmatmul.bf16.gmra.mxu3 %v5954_v50  ;;  %v2919_v50 = vor.u32 %v2918_v11, %v2915_v47  ;;  %v339_v47 = vadd.f32 %v6176_v37, %v304_v54 }
 0x17b   : > { %7826 = vst [vmem:[#allocation8_spill] sm:$0xff] %v7128_v27  ;;  %v2168_v31 = vpop.f32.mrf.mxu2  ;;  %v2615_v27 = vld [vmem:[#allocation2 + $0xe0] sm:$0xf] }
 0x17c   : > { %v2238_v59 = vadd.f32 %v2168_v31, %v7098_v29  ;;  %v305_v29 = vmul.f32 %v6174_v44, %v270_v8  ;;  %v2920_v56 = vrot.slane %v2919_v50, 4  ;;  %v371_v17 = vmax.f32 %v339_v47, 0.0  ;;  %v461_v44 = vld [vmem:[#allocation2 + $0x100] sm:$0x1] }
 0x17d   : > { %v2479_v42 = vpop.f32.mrf.mxu3  ;;  %v462_v54 = vsel %vm6276_vm2, 0, %v461_v44  ;;  %v2940_v47 = vshll.u32 %v2615_v27, 16 }
 0x17e   : > { %v2550_v6 = vadd.f32 %v2479_v42, %v2237_v30  ;;  %v6175_v30 = vld [vmem:[#allocation2 + $0xd8] sm:$0x1]  ;;  %v340_v11 = vadd.f32 %v6176_v37, %v305_v29  ;;  %v2934_v42 = vrot.slane %v2932_v48, 5  ;;  %463 = vst [vmem:[#allocation2 + $0x100] sm:$0x1] %v462_v54  ;;  %v2925_v48 = vsel %vm6393_vm11, %v2920_v56, %v7130_v5 }
 0x17f   : > { %v1998_v22 = vrot.slane %v6175_v30, 5  ;;  %v2937_v37 = vshrl.u32 %v2615_v27, 16  ;;  %v1794_v5 = vadd.f32 %v7126_v18, %v6908_v51 }
 0x180   : > { %v3160_v39 = vpop.f32.mrf.mxu0  ;;  %2210 = vmatmul.bf16.gmra.mxu2 %v2074_v41  ;;  %v2930_v41 = vrot.slane %v2929_v38, 4  ;;  %v372_v8 = vmax.f32 %v340_v11, 0.0  ;;  %v5955_v38 = vld [vmem:[#allocation2 + $0xd0] sm:$0xff] }
 0x181   : > { %v7139_v31 = vpop.f32.mrf.mxu1  ;;  %v7144_v20 = vadd.f32 %v3160_v39, %v2550_v6  ;;  %v1996_v6 = vsel %vm6820_vm14, %v5512_v25, %v1995_v0  ;;  %v1999_v2 = vsel %vm6820_vm14, %v1997_v12, %v1998_v22  ;;  %v2946_v12 = vshll.u32 %v2616_v57, 16 }
 0x182   : > { %v404_v39 = vpack.c.bf16 %v372_v8, %v372_v8  ;;  %v2056_v25 = vunpack.c.l.b16 %v1996_v6  ;;  %v2950_v22 = vshrl.u32 %v2616_v57, 16  ;;  %v2939_v27 = vrot.slane %v2937_v37, 4 }
 0x183   : > { %7827 = vst [vmem:[#allocation9_spill] sm:$0xff] %v7144_v20  ;;  %3199 = vmatmul.bf16.gmra.mxu0 %v3067_v9  ;;  %v2171_v55 = vpop.f32.mrf.mxu2  ;;  %v403_v9 = vpack.c.bf16 %v371_v17, %v371_v17  ;;  %v2942_v8 = vrot.slane %v2940_v47, 5  ;;  %v7165_v57 = vrot.slane %v2946_v12, 5  ;;  %v511_v20 = vld [vmem:[#allocation2 + $0x108] sm:$0x1] }
 0x184   : > { %v2239_v30 = vadd.f32 %v2171_v55, %v1792_v21  ;;  %1835 = vmatmul.bf16.gmra.mxu1 %v5916_v34  ;;  %v2935_v34 = vsel %vm6393_vm11, %v2930_v41, %v2934_v42  ;;  %v2057_v21 = vunpack.c.l.b16 %v1999_v2  ;;  %v3048_v55 = vunpack.c.l.b16 %v2925_v48  ;;  %v2617_v2 = vld [vmem:[#allocation2 + $0xe8] sm:$0x1] }
 0x185   : > { %v2481_v29 = vpop.f32.mrf.mxu3  ;;  %v772_v11 = vshrl.u32 %v403_v9, 16  ;;  %v3049_v44 = vunpack.c.l.b16 %v2935_v34  ;;  %v780_v41 = vshrl.u32 %v404_v39, 16  ;;  %v775_v54 = vshll.u32 %v403_v9, 16 }
 0x186   : > { %v2551_v50 = vadd.f32 %v2481_v29, %v2238_v59  ;;  %v2075_v6 = vpack.c.b16 %v2057_v21, %v2056_v25  ;;  %v2952_v48 = vrot.slane %v2950_v22, 4  ;;  %v2943_v24 = vor.u32 %v2942_v8, %v2939_v27  ;;  %v5917_v22 = vld [vmem:[#allocation2 + $0xe0] sm:$0xff]  ;;  %v2618_v27 = vld [vmem:[#allocation2 + $0xf0] sm:$0xf] }
 0x187   : > { %v774_v56 = vrot.slane %v772_v11, 7  ;;  %v3068_v45 = vpack.c.b16 %v3049_v44, %v3048_v55  ;;  %v782_v11 = vrot.slane %v780_v41, 7  ;;  %v783_v47 = vshll.u32 %v404_v39, 16  ;;  %v5999_v55 = vld [vmem:[%s7806_s3 + $0x180] sm:$0xff] }
 0x188   : > { %v3162_v0 = vpop.f32.mrf.mxu0  ;;  %v512_v9 = vsel %vm6294_vm4, 0, %v511_v20  ;;  %v2953_v21 = vor.u32 %v2952_v48, %v7165_v57  ;;  %v2956_v12 = vshll.u32 %v2617_v2, 16  ;;  %v2005_v20 = vrot.slane %v6178_v7, 5  ;;  %3882 = vmatpush.bf16.msra.mxu2 %v5999_v55 }
 0x189   : > { %v7159_v17 = vpop.f32.mrf.mxu1  ;;  %v7161_v59 = vadd.f32 %v3162_v0, %v2551_v50  ;;  %v1865_v0 = vld [vmem:[#allocation2 + $0xe0] sm:$0xe]  ;;  %v777_v18 = vor.u32 %v775_v54, %v774_v56  ;;  %v778_v37 = vrot.slane %v774_v56, 4  ;;  %513 = vst [vmem:[#allocation2 + $0x108] sm:$0x1] %v512_v9  ;;  %v785_v56 = vor.u32 %v783_v47, %v782_v11 }
 0x18a   : > { %2523 = vmatmul.bf16.gmra.mxu3 %v5955_v38  ;;  %v6177_v38 = vld [vmem:[#allocation2 + $0xe4] sm:$0xf]  ;;  %v2944_v8 = vrot.slane %v2943_v24, 4  ;;  %v2954_v48 = vrot.slane %v2953_v21, 4  ;;  %v2964_v60 = vshll.u32 %v2618_v27, 16  ;;  %v2974_v47 = vshrl.u32 %v2619_v1, 16 }
 0x18b   : > { %7828 = vst [vmem:[#allocation10_spill] sm:$0xff] %v7161_v59  ;;  %v2173_v42 = vpop.f32.mrf.mxu2  ;;  %v2002_v34 = vrot.slane %v6177_v38, 5  ;;  %v943_v59 = vld [vmem:[#allocation2 + $0x100] sm:$0xf]  ;;  %v786_v2 = vsel %vm6349_vm7, %v778_v37, %v785_v56  ;;  %v2961_v38 = vshrl.u32 %v2618_v27, 16  ;;  %v2970_v37 = vshll.u32 %v2619_v1, 16 }
 0x18c   : > { %v2240_v29 = vadd.f32 %v2173_v42, %v1794_v5  ;;  %v5513_v5 = vrot.slane %v1865_v0, 9  ;;  %v1797_v42 = vadd.f32 %v7139_v31, %v6920_v28  ;;  %v787_v31 = vrot.slane %v782_v11, 4  ;;  %946 = vst [vmem:[#allocation2 + $0x104] sm:$0xf] %v786_v2  ;;  %v6179_v1 = vld [vmem:[#allocation2 + $0xf4] sm:$0xf] }
 0x18d   : > { %v2484_v50 = vpop.f32.mrf.mxu3  ;;  %v2004_v39 = vrot.slane %v2002_v34, 4  ;;  %v2949_v11 = vsel %vm6393_vm11, %v2944_v8, %v7165_v57  ;;  %v1799_v57 = vadd.f32 %v7159_v17, %v6928_v40  ;;  %v2972_v7 = vrot.slane %v2970_v37, 5  ;;  %v2620_v8 = vld [vmem:[#allocation2 + $0xf8] sm:$0x1]  ;;  %v1866_v2 = vld [vmem:[#allocation2 + $0xf0] sm:$0xe] }
 0x18e   : > { %v2552_v51 = vadd.f32 %v2484_v50, %v2239_v30  ;;  %v944_v30 = vsel %vm6356_vm10, %v777_v18, %v943_v59  ;;  %v6007_v59 = vld [vmem:[%s7806_s3 + $0x1c0] sm:$0xff]  ;;  %v2958_v50 = vrot.slane %v2956_v12, 5  ;;  %v3050_v56 = vunpack.c.l.b16 %v2949_v11  ;;  %v5918_v17 = vld [vmem:[#allocation2 + $0xf0] sm:$0xff] }
 0x18f   : > { %945 = vst [vmem:[#allocation2 + $0x100] sm:$0xf] %v944_v30  ;;  %v2006_v0 = vsel %vm6820_vm14, %v2004_v39, %v2005_v20  ;;  %4563 = vmatpush.bf16.msra.mxu3 %v6007_v59  ;;  %v5956_v18 = vld [vmem:[#allocation2 + $0xe0] sm:$0xff]  ;;  %v2966_v39 = vrot.slane %v2964_v60, 5  ;;  %v2976_v20 = vrot.slane %v2974_v47, 4  ;;  %v2009_v59 = vrot.slane %v6179_v1, 5 }
 0x190   : > { %v3165_v25 = vpop.f32.mrf.mxu0  ;;  %2215 = vmatmul.bf16.gmra.mxu2 %v2075_v6  ;;  %v5975_v6 = vld [vmem:[%s7806_s3 + $0x140] sm:$0xff]  ;;  %v947_v9 = vld [vmem:[#allocation2 + $0x108] sm:$0x1]  ;;  %v2059_v12 = vunpack.c.l.b16 %v2006_v0  ;;  %v5514_v0 = vrot.slane %v1866_v2, 9 }
 0x191   : > { %v7175_v44 = vpop.f32.mrf.mxu1  ;;  %v7177_v41 = vadd.f32 %v3165_v25, %v2552_v51  ;;  %3568 = vmatpush.bf16.msra.mxu1 %v5975_v6 }
 0x192   : > { %v1802_v47 = vadd.f32 %v7175_v44, %v6945_v63  ;;  %v5957_v63 = vld [vmem:[#allocation2 + $0xf0] sm:$0xff] }
 0x193   : > { %3204 = vmatmul.bf16.gmra.mxu0 %v3068_v45  ;;  %v2176_v54 = vpop.f32.mrf.mxu2  ;;  %v2003_v45 = vsel %vm6820_vm14, %v5513_v5, %v2002_v34  ;;  %v2959_v34 = vsel %vm6393_vm11, %v2954_v48, %v2958_v50  ;;  %v2963_v5 = vrot.slane %v2961_v38, 4  ;;  %v2011_v38 = vrot.slane %v2009_v59, 4 }
 0x194   : > { %v2241_v28 = vadd.f32 %v2176_v54, %v1797_v42  ;;  %1840 = vmatmul.bf16.gmra.mxu1 %v5917_v22  ;;  %v2058_v21 = vunpack.c.l.b16 %v2003_v45  ;;  %v6015_v22 = vld [vmem:[%s7806_s3 + $0x200] sm:$0xff]  ;;  %v3051_v42 = vunpack.c.l.b16 %v2959_v34 }
 0x195   : > { %v2486_v24 = vpop.f32.mrf.mxu3  ;;  %4988 = vmatpush.bf16.msra.mxu0 %v6015_v22  ;;  %v2967_v50 = vor.u32 %v2966_v39, %v2963_v5 }
 0x196   : > { %v2553_v51 = vadd.f32 %v2486_v24, %v2240_v29  ;;  %v948_v29 = vsel %vm6276_vm2, %v787_v31, %v947_v9  ;;  %v2076_v54 = vpack.c.b16 %v2059_v12, %v2058_v21  ;;  %v2977_v31 = vor.u32 %v2976_v20, %v2972_v7  ;;  %v2621_v34 = vld [vmem:[#allocation2 + $0x100] sm:$0xf]  ;;  %v6181_v21 = vld [vmem:[#allocation2 + $0x14] sm:$0xf] }
 0x197   : > { %949 = vst [vmem:[#allocation2 + $0x108] sm:$0x1] %v948_v29  ;;  %v2980_v24 = vshll.u32 %v2620_v8, 16  ;;  %v3069_v45 = vpack.c.b16 %v3051_v42, %v3050_v56  ;;  %v2968_v11 = vrot.slane %v2967_v50, 4  ;;  %v3323_v12 = vrot.slane %v6181_v21, 5 }
 0x198   : > { %v3167_v25 = vpop.f32.mrf.mxu0  ;;  %v2010_v29 = vsel %vm6820_vm14, %v5514_v0, %v2009_v59  ;;  %v2985_v42 = vshrl.u32 %v2621_v34, 16  ;;  %v6182_v59 = vld [vmem:[#allocation2 + $0x18] sm:$0x1]  ;;  %v3996_v0 = vld [vmem:[#allocation2 + $0x20] sm:$0xf] }
 0x199   : > { %v7203_v55 = vpop.f32.mrf.mxu1  ;;  %v7205_v30 = vadd.f32 %v3167_v25, %v2553_v51  ;;  %v6180_v51 = vld [vmem:[#allocation2 + $0xf8] sm:$0x1]  ;;  %v2982_v9 = vrot.slane %v2980_v24, 5  ;;  %v2973_v44 = vsel %vm6393_vm11, %v2968_v11, %v2972_v7  ;;  %v3326_v2 = vrot.slane %v6182_v59, 5  ;;  %v3257_v24 = vld [vmem:[#allocation2 + $0x10] sm:$0xe] }
 0x19a   : > { %2528 = vmatmul.bf16.gmra.mxu3 %v5956_v18  ;;  %v2012_v18 = vrot.slane %v6180_v51, 5 }
 0x19b   : > { %v2178_v27 = vpop.f32.mrf.mxu2 }
 0x19c   : > { %v2242_v3 = vadd.f32 %v2178_v27, %v1799_v57  ;;  %v2013_v5 = vsel %vm6820_vm14, %v2011_v38, %v2012_v18  ;;  %v2622_v57 = vld [vmem:[#allocation2 + $0x104] sm:$0xf]  ;;  %v2060_v27 = vunpack.c.l.b16 %v2010_v29  ;;  %v2987_v18 = vrot.slane %v2985_v42, 4 }
 0x19d   : > { %v2489_v6 = vpop.f32.mrf.mxu3  ;;  %v2061_v8 = vunpack.c.l.b16 %v2013_v5  ;;  %v2994_v1 = vshll.u32 %v2622_v57, 16  ;;  %v2998_v50 = vshrl.u32 %v2622_v57, 16  ;;  %v4045_v57 = vshrl.u32 %v3996_v0, 16 }
 0x19e   : > { %v2554_v48 = vadd.f32 %v2489_v6, %v2241_v28  ;;  %v2978_v28 = vrot.slane %v2977_v31, 4  ;;  %v3325_v6 = vrot.slane %v3323_v12, 4  ;;  %v2623_v5 = vld [vmem:[#allocation2 + $0x108] sm:$0x1] }
 0x19f   : > { %v2077_v51 = vpack.c.b16 %v2061_v8, %v2060_v27  ;;  %v2996_v11 = vrot.slane %v2994_v1, 5 }
 0x1a0   : > { %v3170_v40 = vpop.f32.mrf.mxu0  ;;  %2220 = vmatmul.bf16.gmra.mxu2 %v2076_v54  ;;  %v2983_v56 = vsel %vm6393_vm11, %v2978_v28, %v2982_v9  ;;  %v2988_v54 = vshll.u32 %v2621_v34, 16  ;;  %v7227_v28 = vld [vmem:[#allocation2 + $0x24] sm:$0xf]  ;;  %v3327_v21 = vsel %vm6820_vm14, %v3325_v6, %v3326_v2  ;;  %v4047_v6 = vrot.slane %v4045_v57, 4 }
 0x1a1   : > { %v7209_v60 = vpop.f32.mrf.mxu1  ;;  %v7211_v37 = vadd.f32 %v3170_v40, %v2554_v48  ;;  %v3053_v7 = vunpack.c.l.b16 %v2983_v56  ;;  %v1804_v40 = vadd.f32 %v7203_v55, %v6970_v35  ;;  %v3450_v55 = vunpack.c.l.b16 %v3327_v21 }
 0x1a3   : > { %3209 = vmatmul.bf16.gmra.mxu0 %v3069_v45  ;;  %v2181_v25 = vpop.f32.mrf.mxu2  ;;  %v3052_v45 = vunpack.c.l.b16 %v2973_v44  ;;  %v4058_v44 = vshrl.u32 %v7227_v28, 16 }
 0x1a4   : > { %v2243_v22 = vadd.f32 %v2181_v25, %v1802_v47  ;;  %1845 = vmatmul.bf16.gmra.mxu1 %v5918_v17  ;;  %v5675_v17 = vrot.slane %v3257_v24, 9  ;;  %v2990_v47 = vrot.slane %v2988_v54, 5  ;;  %v3000_v25 = vrot.slane %v2998_v50, 4 }
 0x1a5   : > { %v2491_v39 = vpop.f32.mrf.mxu3  ;;  %v3070_v56 = vpack.c.b16 %v3053_v7, %v3052_v45  ;;  %v3004_v54 = vshll.u32 %v2623_v5, 16  ;;  %v4060_v24 = vrot.slane %v4058_v44, 4 }
 0x1a6   : > { %v2555_v20 = vadd.f32 %v2491_v39, %v2242_v3  ;;  %v3324_v34 = vsel %vm6820_vm14, %v5675_v17, %v3323_v12  ;;  %v4048_v39 = vshll.u32 %v3996_v0, 16  ;;  %v2991_v8 = vor.u32 %v2990_v47, %v2987_v18 }
 0x1a7   : > { %v3449_v35 = vunpack.c.l.b16 %v3324_v34  ;;  %v3001_v12 = vor.u32 %v3000_v25, %v2996_v11  ;;  %v3006_v17 = vrot.slane %v3004_v54, 5  ;;  %v5958_v25 = vld [vmem:[#allocation2 + $0x100] sm:$0xff]  ;;  %v3999_v54 = vld [vmem:[#allocation2 + $0x30] sm:$0xf] }
 0x1a8   : > { %v3172_v48 = vpop.f32.mrf.mxu0  ;;  %v4050_v59 = vrot.slane %v4048_v39, 5  ;;  %v2992_v7 = vrot.slane %v2991_v8, 4 }
 0x1a9   : > { %v1808_v31 = vpop.f32.mrf.mxu1  ;;  %v7223_v3 = vadd.f32 %v3172_v48, %v2555_v20  ;;  %v3481_v42 = vpack.c.b16 %v3450_v55, %v3449_v35  ;;  %v7241_v48 = vld [vmem:[#allocation2 + $0x28] sm:$0x1] }
 0x1aa   : > { %2533 = vmatmul.bf16.gmra.mxu3 %v5957_v63  ;;  %v4054_v63 = vshll.u32 %v7227_v28, 16  ;;  %v4064_v18 = vshll.u32 %v7241_v48, 16  ;;  %v1809_v35 = vadd.f32 %v1808_v31, %v6996_v49 }
 0x1ab   : > { %v2183_v38 = vpop.f32.mrf.mxu2 }
 0x1ac   : > { %v2244_v9 = vadd.f32 %v2183_v38, %v1804_v40  ;;  %v4056_v50 = vrot.slane %v4054_v63, 5  ;;  %v3002_v40 = vrot.slane %v3001_v12, 4  ;;  %v4066_v57 = vrot.slane %v4064_v18, 5  ;;  %v4677_v18 = vld [vmem:[#allocation2 + $0x20] sm:$0xe] }
 0x1ad   : > { %v2494_v29 = vpop.f32.mrf.mxu3 }
 0x1ae   : > { %v2556_v20 = vadd.f32 %v2494_v29, %v2243_v22  ;;  %v1807_v22 = vadd.f32 %v7209_v60, %v6979_v19  ;;  %v4061_v34 = vor.u32 %v4060_v24, %v4056_v50  ;;  %v2997_v19 = vsel %vm6393_vm11, %v2992_v7, %v2996_v11  ;;  %v6183_v29 = vld [vmem:[#allocation2 + $0x24] sm:$0xf] }
 0x1af   : > { %v3007_v60 = vsel %vm6393_vm11, %v3002_v40, %v3006_v17  ;;  %v3330_v5 = vrot.slane %v6183_v29, 5  ;;  %v4743_v7 = vrot.slane %v7227_v28, 5  ;;  %v5851_v28 = vrot.slane %v4677_v18, 9 }
 0x1b0   : > { %v3175_v27 = vpop.f32.mrf.mxu0  ;;  %2225 = vmatmul.bf16.gmra.mxu2 %v2077_v51  ;;  %v4051_v51 = vor.u32 %v4050_v59, %v4047_v6  ;;  %v3055_v8 = vunpack.c.l.b16 %v3007_v60  ;;  %v5983_v59 = vld [vmem:[#allocation2 + $0x20] sm:$0xff] }
 0x1b1   : > { %v7235_v1 = vpop.f32.mrf.mxu1  ;;  %v7237_v2 = vadd.f32 %v3175_v27, %v2556_v20  ;;  %v3258_v20 = vld [vmem:[#allocation2 + $0x20] sm:$0xe]  ;;  %v3054_v27 = vunpack.c.l.b16 %v2997_v19 }
 0x1b2   : > { %v4052_v55 = vrot.slane %v4051_v51, 4  ;;  %v5676_v44 = vrot.slane %v3258_v20, 9  ;;  %v4746_v20 = vrot.slane %v7241_v48, 5 }
 0x1b3   : > { %3214 = vmatmul.bf16.gmra.mxu0 %v3070_v56  ;;  %v2186_v45 = vpop.f32.mrf.mxu2  ;;  %v3332_v56 = vrot.slane %v3330_v5, 4 }
 0x1b4   : > { %v2245_v0 = vadd.f32 %v2186_v45, %v1807_v22  ;;  %3569 = vmatmul.bf16.vlgmr.msra.gmra.mxu1 %v3481_v42  ;;  %v6184_v42 = vld [vmem:[#allocation2 + $0x28] sm:$0x1]  ;;  %v3331_v49 = vsel %vm6820_vm14, %v5676_v44, %v3330_v5  ;;  %v7257_v22 = vld [vmem:[#allocation2 + $0x34] sm:$0xf]  ;;  %v4057_v45 = vsel %vm6393_vm11, %v4052_v55, %v4056_v50 }
 0x1b5   : > { %v2496_v38 = vpop.f32.mrf.mxu3  ;;  %v3333_v11 = vrot.slane %v6184_v42, 5  ;;  %v3451_v40 = vunpack.c.l.b16 %v3331_v49  ;;  %v4082_v19 = vshrl.u32 %v7257_v22, 16  ;;  %v4444_v29 = vunpack.c.l.b16 %v4057_v45  ;;  %v6185_v45 = vld [vmem:[#allocation2 + $0x34] sm:$0xf] }
 0x1b6   : > { %v2557_v47 = vadd.f32 %v2496_v38, %v2244_v9  ;;  %v4062_v9 = vrot.slane %v4061_v34, 4  ;;  %v3071_v34 = vpack.c.b16 %v3055_v8, %v3054_v27  ;;  %v7275_v8 = vld [vmem:[#allocation2 + $0x38] sm:$0x1]  ;;  %v4744_v49 = vsel %vm6820_vm14, %v5851_v28, %v4743_v7 }
 0x1b7   : > { %v3334_v31 = vsel %vm6820_vm14, %v3332_v56, %v3333_v11  ;;  %v4084_v11 = vrot.slane %v4082_v19, 4  ;;  %v6186_v19 = vld [vmem:[#allocation2 + $0x38] sm:$0x1] }
 0x1b8   : > { %v3177_v21 = vpop.f32.mrf.mxu0  ;;  %v3452_v17 = vunpack.c.l.b16 %v3334_v31  ;;  %v4067_v51 = vsel %vm6393_vm11, %v4062_v9, %v4066_v57  ;;  %v1812_v57 = vadd.f32 %v7235_v1, %v6918_v36  ;;  %v4088_v31 = vshll.u32 %v7275_v8, 16 }
 0x1b9   : > { %v7249_v39 = vpop.f32.mrf.mxu1  ;;  %v7251_v63 = vadd.f32 %v3177_v21, %v2557_v47  ;;  %v4069_v47 = vshrl.u32 %v3999_v54, 16  ;;  %v4078_v21 = vshll.u32 %v7257_v22, 16  ;;  %v4445_v5 = vunpack.c.l.b16 %v4067_v51 }
 0x1ba   : > { %2538 = vmatmul.bf16.gmra.mxu3 %v5958_v25  ;;  %v4072_v25 = vshll.u32 %v3999_v54, 16  ;;  %v3482_v50 = vpack.c.b16 %v3452_v17, %v3451_v40  ;;  %v3337_v40 = vrot.slane %v6185_v45, 5  ;;  %v4002_v17 = vld [vmem:[#allocation2 + $0x40] sm:$0xf]  ;;  %v4090_v28 = vrot.slane %v4088_v31, 5 }
 0x1bb   : > { %v2188_v12 = vpop.f32.mrf.mxu2  ;;  %v4071_v9 = vrot.slane %v4069_v47, 4  ;;  %v7273_v42 = vrot.slane %v4078_v21, 5  ;;  %v4476_v54 = vpack.c.b16 %v4445_v5, %v4444_v29  ;;  %v7289_v29 = vld [vmem:[#allocation2 + $0x44] sm:$0xf] }
 0x1bc   : > { %v2246_v6 = vadd.f32 %v2188_v12, %v1809_v35  ;;  %v4745_v35 = vrot.slane %v4743_v7, 4  ;;  %v4074_v44 = vrot.slane %v4072_v25, 5  ;;  %v3259_v7 = vld [vmem:[#allocation2 + $0x30] sm:$0xe]  ;;  %v3339_v21 = vrot.slane %v3337_v40, 4 }
 0x1bd   : > { %v2499_v24 = vpop.f32.mrf.mxu3  ;;  %v4085_v48 = vor.u32 %v4084_v11, %v7273_v42 }
 0x1be   : > { %v2558_v38 = vadd.f32 %v2499_v24, %v2245_v0  ;;  %v4747_v36 = vsel %vm6820_vm14, %v4745_v35, %v4746_v20  ;;  %v4075_v1 = vor.u32 %v4074_v44, %v4071_v9  ;;  %v4750_v35 = vrot.slane %v7257_v22, 5  ;;  %v4678_v20 = vld [vmem:[#allocation2 + $0x30] sm:$0xe] }
 0x1bf   : > { %v4870_v51 = vunpack.c.l.b16 %v4747_v36  ;;  %v4086_v5 = vrot.slane %v4085_v48, 4  ;;  %v5852_v31 = vrot.slane %v4678_v20, 9 }
 0x1c0   : > { %v3180_v60 = vpop.f32.mrf.mxu0  ;;  %3883 = vmatmul.bf16.vlgmr.msra.gmra.mxu2 %v5983_v59  ;;  %v4076_v25 = vrot.slane %v4075_v1, 4  ;;  %v4752_v45 = vrot.slane %v4750_v35, 4 }
 0x1c1   : > { %v7266_v55 = vpop.f32.mrf.mxu1  ;;  %v7268_v0 = vadd.f32 %v3180_v60, %v2558_v38  ;;  %v4869_v38 = vunpack.c.l.b16 %v4744_v49  ;;  %v3340_v60 = vrot.slane %v6186_v19, 5  ;;  %v4106_v49 = vshrl.u32 %v7289_v29, 16 }
 0x1c2   : > { %v4081_v1 = vsel %vm6393_vm11, %v4076_v25, %v7273_v42  ;;  %v4091_v48 = vsel %vm6393_vm11, %v4086_v5, %v4090_v28  ;;  %v1817_v42 = vadd.f32 %v7266_v55, %v6943_v58  ;;  %v4751_v5 = vsel %vm6820_vm14, %v5852_v31, %v4750_v35  ;;  %v6188_v31 = vld [vmem:[#allocation2 + $0x48] sm:$0x1] }
 0x1c3   : > { %3219 = vmatmul.bf16.gmra.mxu0 %v3071_v34  ;;  %v2191_v56 = vpop.f32.mrf.mxu2  ;;  %v5677_v34 = vrot.slane %v3259_v7, 9  ;;  %v3341_v44 = vsel %vm6820_vm14, %v3339_v21, %v3340_v60  ;;  %v4901_v22 = vpack.c.b16 %v4870_v51, %v4869_v38  ;;  %v4108_v38 = vrot.slane %v4106_v49, 4  ;;  %v7310_v60 = vld [vmem:[#allocation2 + $0x48] sm:$0x1] }
 0x1c4   : > { %v2247_v27 = vadd.f32 %v2191_v56, %v1812_v57  ;;  %3574 = vmatmul.bf16.gmra.mxu1 %v3482_v50  ;;  %v4093_v57 = vshrl.u32 %v4002_v17, 16  ;;  %v4096_v56 = vshll.u32 %v4002_v17, 16  ;;  %v4446_v25 = vunpack.c.l.b16 %v4081_v1 }
 0x1c5   : > { %v2501_v12 = vpop.f32.mrf.mxu3  ;;  %v3338_v9 = vsel %vm6820_vm14, %v5677_v34, %v3337_v40  ;;  %v4753_v40 = vrot.slane %v7275_v8, 5  ;;  %v4447_v21 = vunpack.c.l.b16 %v4091_v48  ;;  %v4112_v58 = vshll.u32 %v7310_v60, 16 }
 0x1c6   : > { %v2559_v59 = vadd.f32 %v2501_v12, %v2246_v6  ;;  %v1814_v6 = vadd.f32 %v7249_v39, %v6924_v26  ;;  %v5984_v39 = vld [vmem:[#allocation2 + $0x30] sm:$0xff]  ;;  %v3453_v12 = vunpack.c.l.b16 %v3338_v9  ;;  %v4098_v34 = vrot.slane %v4096_v56, 5 }
 0x1c7   : > { %v4754_v28 = vsel %vm6820_vm14, %v4752_v45, %v4753_v40  ;;  %v4477_v9 = vpack.c.b16 %v4447_v21, %v4446_v25 }
 0x1c8   : > { %v3182_v24 = vpop.f32.mrf.mxu0  ;;  %v4872_v56 = vunpack.c.l.b16 %v4754_v28  ;;  %v4679_v28 = vld [vmem:[#allocation2 + $0x40] sm:$0xe] }
 0x1c9   : > { %v7285_v18 = vpop.f32.mrf.mxu1  ;;  %v7287_v47 = vadd.f32 %v3182_v24, %v2559_v59  ;;  %v4102_v59 = vshll.u32 %v7289_v29, 16 }
 0x1ca   : > { %4564 = vmatmul.bf16.vlgmr.msra.gmra.mxu3 %v4476_v54  ;;  %v3454_v54 = vunpack.c.l.b16 %v3341_v44  ;;  %v4871_v44 = vunpack.c.l.b16 %v4751_v5 }
 0x1cb   : > { %v2193_v50 = vpop.f32.mrf.mxu2 }
 0x1cc   : > { %v2248_v26 = vadd.f32 %v2193_v50, %v1814_v6  ;;  %v3483_v17 = vpack.c.b16 %v3454_v54, %v3453_v12  ;;  %v4095_v6 = vrot.slane %v4093_v57, 4  ;;  %v1819_v54 = vadd.f32 %v7285_v18, %v6960_v32  ;;  %v4005_v18 = vld [vmem:[#allocation2 + $0x50] sm:$0xf] }
 0x1cd   : > { %v2504_v11 = vpop.f32.mrf.mxu3 }
 0x1ce   : > { %v2560_v36 = vadd.f32 %v2504_v11, %v2247_v27  ;;  %v4104_v27 = vrot.slane %v4102_v59, 5  ;;  %v4099_v57 = vor.u32 %v4098_v34, %v4095_v6  ;;  %v6187_v11 = vld [vmem:[#allocation2 + $0x44] sm:$0xf]  ;;  %v7327_v34 = vld [vmem:[#allocation2 + $0x54] sm:$0xf] }
 0x1cf   : > { %v3344_v12 = vrot.slane %v6187_v11, 5 }
 0x1d0   : > { %v3185_v24 = vpop.f32.mrf.mxu0  ;;  %3888 = vmatmul.bf16.gmra.mxu2 %v5984_v39  ;;  %v4109_v39 = vor.u32 %v4108_v38, %v4104_v27  ;;  %v4100_v59 = vrot.slane %v4099_v57, 4  ;;  %v4902_v38 = vpack.c.b16 %v4872_v56, %v4871_v44  ;;  %v4757_v57 = vrot.slane %v7289_v29, 5 }
 0x1d1   : > { %v7304_v7 = vpop.f32.mrf.mxu1  ;;  %v7306_v51 = vadd.f32 %v3185_v24, %v2560_v36  ;;  %v3260_v36 = vld [vmem:[#allocation2 + $0x40] sm:$0xe]  ;;  %v3346_v48 = vrot.slane %v3344_v12, 4  ;;  %v3347_v24 = vrot.slane %v6188_v31, 5 }
 0x1d2   : > { %v4110_v49 = vrot.slane %v4109_v39, 4  ;;  %v5678_v1 = vrot.slane %v3260_v36, 9  ;;  %v4117_v39 = vshrl.u32 %v4005_v18, 16  ;;  %v4759_v29 = vrot.slane %v4757_v57, 4 }
 0x1d3   : > { %4989 = vmatmul.bf16.vlgmr.msra.gmra.mxu0 %v4901_v22  ;;  %v2196_v19 = vpop.f32.mrf.mxu2  ;;  %v3348_v32 = vsel %vm6820_vm14, %v3346_v48, %v3347_v24  ;;  %v7343_v24 = vld [vmem:[#allocation2 + $0x58] sm:$0x1] }
 0x1d4   : > { %v2249_v50 = vadd.f32 %v2196_v19, %v1817_v42  ;;  %3579 = vmatmul.bf16.gmra.mxu1 %v3483_v17  ;;  %v5985_v17 = vld [vmem:[#allocation2 + $0x40] sm:$0xff]  ;;  %v3345_v6 = vsel %vm6820_vm14, %v5678_v1, %v3344_v12  ;;  %v3456_v21 = vunpack.c.l.b16 %v3348_v32  ;;  %v1822_v12 = vadd.f32 %v7304_v7, %v6977_v15 }
 0x1d5   : > { %v2506_v8 = vpop.f32.mrf.mxu3  ;;  %v3455_v25 = vunpack.c.l.b16 %v3345_v6  ;;  %v4119_v36 = vrot.slane %v4117_v39, 4 }
 0x1d6   : > { %v2561_v20 = vadd.f32 %v2506_v8, %v2248_v26  ;;  %v4114_v26 = vrot.slane %v4112_v58, 5  ;;  %v4105_v8 = vsel %vm6393_vm11, %v4100_v59, %v4104_v27  ;;  %v4130_v58 = vshrl.u32 %v7327_v34, 16 }
 0x1d7   : > { %v3484_v44 = vpack.c.b16 %v3456_v21, %v3455_v25  ;;  %v4448_v56 = vunpack.c.l.b16 %v4105_v8  ;;  %v4760_v59 = vrot.slane %v7310_v60, 5  ;;  %v4008_v21 = vld [vmem:[#allocation2 + $0x60] sm:$0xf] }
 0x1d8   : > { %v3187_v55 = vpop.f32.mrf.mxu0  ;;  %v4115_v5 = vsel %vm6393_vm11, %v4110_v49, %v4114_v26  ;;  %v4132_v48 = vrot.slane %v4130_v58, 4 }
 0x1d9   : > { %v7319_v35 = vpop.f32.mrf.mxu1  ;;  %v7321_v22 = vadd.f32 %v3187_v55, %v2561_v20  ;;  %v4120_v20 = vshll.u32 %v4005_v18, 16  ;;  %v4761_v7 = vsel %vm6820_vm14, %v4759_v29, %v4760_v59  ;;  %v4136_v18 = vshll.u32 %v7343_v24, 16  ;;  %v5986_v59 = vld [vmem:[#allocation2 + $0x50] sm:$0xff] }
 0x1da   : > { %4569 = vmatmul.bf16.gmra.mxu3 %v4477_v9  ;;  %v4126_v9 = vshll.u32 %v7327_v34, 16  ;;  %v4874_v8 = vunpack.c.l.b16 %v4761_v7 }
 0x1db   : > { %v2198_v45 = vpop.f32.mrf.mxu2  ;;  %v4122_v26 = vrot.slane %v4120_v20, 5 }
 0x1dc   : > { %v2250_v40 = vadd.f32 %v2198_v45, %v1819_v54  ;;  %v4449_v54 = vunpack.c.l.b16 %v4115_v5  ;;  %v4128_v1 = vrot.slane %v4126_v9, 5  ;;  %v6190_v9 = vld [vmem:[#allocation2 + $0x58] sm:$0x1] }
 0x1dd   : > { %v2509_v42 = vpop.f32.mrf.mxu3  ;;  %v4123_v60 = vor.u32 %v4122_v26, %v4119_v36  ;;  %v3354_v58 = vrot.slane %v6190_v9, 5  ;;  %v7375_v9 = vld [vmem:[#allocation2 + $0x68] sm:$0x1] }
 0x1de   : > { %v2562_v19 = vadd.f32 %v2509_v42, %v2249_v50  ;;  %v5853_v50 = vrot.slane %v4679_v28, 9  ;;  %v4478_v6 = vpack.c.b16 %v4449_v54, %v4448_v56  ;;  %v4133_v32 = vor.u32 %v4132_v48, %v4128_v1  ;;  %v6189_v42 = vld [vmem:[#allocation2 + $0x54] sm:$0xf]  ;;  %v3261_v28 = vld [vmem:[#allocation2 + $0x50] sm:$0xe] }
 0x1df   : > { %v3351_v25 = vrot.slane %v6189_v42, 5  ;;  %v5679_v39 = vrot.slane %v3261_v28, 9  ;;  %v4124_v56 = vrot.slane %v4123_v60, 4  ;;  %v4141_v54 = vshrl.u32 %v4008_v21, 16 }
 0x1e0   : > { %v3190_v55 = vpop.f32.mrf.mxu0  ;;  %3893 = vmatmul.bf16.gmra.mxu2 %v5985_v17  ;;  %v4758_v15 = vsel %vm6820_vm14, %v5853_v50, %v4757_v57  ;;  %v1824_v57 = vadd.f32 %v7319_v35, %v6994_v46  ;;  %v4134_v50 = vrot.slane %v4133_v32, 4  ;;  %v4144_v46 = vshll.u32 %v4008_v21, 16 }
 0x1e1   : > { %v7336_v11 = vpop.f32.mrf.mxu1  ;;  %v7338_v27 = vadd.f32 %v3190_v55, %v2562_v19  ;;  %v4873_v19 = vunpack.c.l.b16 %v4758_v15  ;;  %v3353_v20 = vrot.slane %v3351_v25, 4  ;;  %v7354_v55 = vld [vmem:[#allocation2 + $0x64] sm:$0xf]  ;;  %v4129_v7 = vsel %vm6393_vm11, %v4124_v56, %v4128_v1 }
 0x1e2   : > { %v4143_v42 = vrot.slane %v4141_v54, 4  ;;  %v4146_v28 = vrot.slane %v4144_v46, 5  ;;  %v1827_v1 = vadd.f32 %v7336_v11, %v7006_v62  ;;  %v4160_v62 = vshll.u32 %v7375_v9, 16 }
 0x1e3   : > { %4994 = vmatmul.bf16.gmra.mxu0 %v4902_v38  ;;  %v2201_v49 = vpop.f32.mrf.mxu2  ;;  %v3355_v36 = vsel %vm6820_vm14, %v3353_v20, %v3354_v58  ;;  %v4903_v15 = vpack.c.b16 %v4874_v8, %v4873_v19  ;;  %v4450_v8 = vunpack.c.l.b16 %v4129_v7 }
 0x1e4   : > { %v2251_v31 = vadd.f32 %v2201_v49, %v1822_v12  ;;  %3584 = vmatmul.bf16.gmra.mxu1 %v3484_v44  ;;  %v4138_v12 = vrot.slane %v4136_v18, 5  ;;  %v3352_v49 = vsel %vm6820_vm14, %v5679_v39, %v3351_v25  ;;  %v3458_v48 = vunpack.c.l.b16 %v3355_v36  ;;  %v4680_v25 = vld [vmem:[#allocation2 + $0x50] sm:$0xe] }
 0x1e5   : > { %v2511_v45 = vpop.f32.mrf.mxu3  ;;  %v3457_v26 = vunpack.c.l.b16 %v3352_v49  ;;  %v4764_v18 = vrot.slane %v7327_v34, 5  ;;  %v5854_v34 = vrot.slane %v4680_v25, 9 }
 0x1e6   : > { %v2563_v17 = vadd.f32 %v2511_v45, %v2250_v40  ;;  %v4150_v45 = vshll.u32 %v7354_v55, 16  ;;  %v4139_v60 = vsel %vm6393_vm11, %v4134_v50, %v4138_v12  ;;  %v4147_v12 = vor.u32 %v4146_v28, %v4143_v42  ;;  %v4011_v28 = vld [vmem:[#allocation2 + $0x70] sm:$0xf] }
 0x1e7   : > { %v4451_v39 = vunpack.c.l.b16 %v4139_v60  ;;  %v4766_v58 = vrot.slane %v4764_v18, 4  ;;  %v4765_v36 = vsel %vm6820_vm14, %v5854_v34, %v4764_v18  ;;  %v4681_v34 = vld [vmem:[#allocation2 + $0x60] sm:$0xe] }
 0x1e8   : > { %v3192_v38 = vpop.f32.mrf.mxu0 }
 0x1e9   : > { %v1828_v5 = vpop.f32.mrf.mxu1  ;;  %v7350_v40 = vadd.f32 %v3192_v38, %v2563_v17  ;;  %v4154_v17 = vshrl.u32 %v7354_v55, 16  ;;  %v3485_v38 = vpack.c.b16 %v3458_v48, %v3457_v26  ;;  %v4479_v49 = vpack.c.b16 %v4451_v39, %v4450_v8  ;;  %v7393_v8 = vld [vmem:[#allocation2 + $0x74] sm:$0xf] }
 0x1ea   : > { %4574 = vmatmul.bf16.gmra.mxu3 %v4478_v6  ;;  %v4148_v48 = vrot.slane %v4147_v12, 4 }
 0x1eb   : > { %v2203_v44 = vpop.f32.mrf.mxu2 }
 0x1ec   : > { %v2252_v29 = vadd.f32 %v2203_v44, %v1824_v57  ;;  %v7369_v57 = vrot.slane %v4150_v45, 5  ;;  %v4767_v44 = vrot.slane %v7343_v24, 5  ;;  %v1829_v24 = vadd.f32 %v1828_v5, %v7027_v14 }
 0x1ed   : > { %v2514_v35 = vpop.f32.mrf.mxu3 }
 0x1ee   : > { %v2564_v6 = vadd.f32 %v2514_v35, %v2251_v31  ;;  %v4156_v31 = vrot.slane %v4154_v17, 4  ;;  %v4768_v46 = vsel %vm6820_vm14, %v4766_v58, %v4767_v44  ;;  %v6191_v35 = vld [vmem:[#allocation2 + $0x64] sm:$0xf]  ;;  %v4771_v58 = vrot.slane %v7354_v55, 5 }
 0x1ef   : > { %v3358_v26 = vrot.slane %v6191_v35, 5  ;;  %v4876_v42 = vunpack.c.l.b16 %v4768_v46  ;;  %v5855_v35 = vrot.slane %v4681_v34, 9 }
 0x1f0   : > { %v3195_v32 = vpop.f32.mrf.mxu0  ;;  %3898 = vmatmul.bf16.gmra.mxu2 %v5986_v59  ;;  %v4157_v54 = vor.u32 %v4156_v31, %v7369_v57  ;;  %v4773_v55 = vrot.slane %v4771_v58, 4 }
 0x1f1   : > { %v7367_v21 = vpop.f32.mrf.mxu1  ;;  %v7371_v19 = vadd.f32 %v3195_v32, %v2564_v6  ;;  %v3262_v6 = vld [vmem:[#allocation2 + $0x60] sm:$0xe]  ;;  %v3360_v60 = vrot.slane %v3358_v26, 4  ;;  %v6192_v32 = vld [vmem:[#allocation2 + $0x68] sm:$0x1] }
 0x1f2   : > { %v4158_v45 = vrot.slane %v4157_v54, 4  ;;  %v5680_v7 = vrot.slane %v3262_v6, 9  ;;  %v3361_v18 = vrot.slane %v6192_v32, 5  ;;  %v4774_v6 = vrot.slane %v7375_v9, 5 }
 0x1f3   : > { %4999 = vmatmul.bf16.gmra.mxu0 %v4903_v15  ;;  %v2206_v20 = vpop.f32.mrf.mxu2  ;;  %v4162_v15 = vrot.slane %v4160_v62, 5 }
 0x1f4   : > { %v2253_v56 = vadd.f32 %v2206_v20, %v1827_v1  ;;  %3589 = vmatmul.bf16.gmra.mxu1 %v3485_v38  ;;  %v4875_v38 = vunpack.c.l.b16 %v4765_v36  ;;  %v5987_v1 = vld [vmem:[#allocation2 + $0x60] sm:$0xff]  ;;  %v3359_v14 = vsel %vm6820_vm14, %v5680_v7, %v3358_v26  ;;  %v3362_v5 = vsel %vm6820_vm14, %v3360_v60, %v3361_v18 }
 0x1f5   : > { %v2516_v50 = vpop.f32.mrf.mxu3  ;;  %v4153_v20 = vsel %vm6393_vm11, %v4148_v48, %v7369_v57  ;;  %v3459_v44 = vunpack.c.l.b16 %v3359_v14  ;;  %v4163_v54 = vsel %vm6393_vm11, %v4158_v45, %v4162_v15  ;;  %v4178_v36 = vshrl.u32 %v7393_v8, 16 }
 0x1f6   : > { %v2565_v59 = vadd.f32 %v2516_v50, %v2252_v29  ;;  %v3460_v50 = vunpack.c.l.b16 %v3362_v5  ;;  %v4904_v62 = vpack.c.b16 %v4876_v42, %v4875_v38  ;;  %v4452_v26 = vunpack.c.l.b16 %v4153_v20  ;;  %v7412_v42 = vld [vmem:[#allocation2 + $0x78] sm:$0x1]  ;;  %v6193_v20 = vld [vmem:[#allocation2 + $0x74] sm:$0xf] }
 0x1f7   : > { %v1832_v45 = vadd.f32 %v7367_v21, %v6922_v10  ;;  %v4180_v18 = vrot.slane %v4178_v36, 4  ;;  %v4775_v10 = vsel %vm6820_vm14, %v4773_v55, %v4774_v6  ;;  %v4184_v5 = vshll.u32 %v7412_v42, 16  ;;  %v6194_v36 = vld [vmem:[#allocation2 + $0x78] sm:$0x1]  ;;  %v4682_v6 = vld [vmem:[#allocation2 + $0x70] sm:$0xe] }
 0x1f8   : > { %v3197_v11 = vpop.f32.mrf.mxu0  ;;  %v3486_v57 = vpack.c.b16 %v3460_v50, %v3459_v44  ;;  %v3365_v34 = vrot.slane %v6193_v20, 5  ;;  %v4014_v44 = vld [vmem:[#allocation2 + $0x80] sm:$0xf]  ;;  %v4778_v55 = vrot.slane %v7393_v8, 5 }
 0x1f9   : > { %v7385_v17 = vpop.f32.mrf.mxu1  ;;  %v7387_v29 = vadd.f32 %v3197_v11, %v2565_v59  ;;  %v4165_v59 = vshrl.u32 %v4011_v28, 16  ;;  %v4174_v11 = vshll.u32 %v7393_v8, 16 }
 0x1fa   : > { %4579 = vmatmul.bf16.gmra.mxu3 %v4479_v49  ;;  %v4168_v49 = vshll.u32 %v4011_v28, 16  ;;  %v4772_v28 = vsel %vm6820_vm14, %v5855_v35, %v4771_v58  ;;  %v7426_v35 = vld [vmem:[#allocation2 + $0x84] sm:$0xf]  ;;  %v4780_v20 = vrot.slane %v4778_v55, 4 }
 0x1fb   : > { %v2208_v25 = vpop.f32.mrf.mxu2  ;;  %v4167_v15 = vrot.slane %v4165_v59, 4  ;;  %v7410_v32 = vrot.slane %v4174_v11, 5  ;;  %v4877_v50 = vunpack.c.l.b16 %v4772_v28  ;;  %v3367_v11 = vrot.slane %v3365_v34, 4 }
 0x1fc   : > { %v2254_v31 = vadd.f32 %v2208_v25, %v1829_v24  ;;  %v4453_v24 = vunpack.c.l.b16 %v4163_v54  ;;  %v4170_v7 = vrot.slane %v4168_v49, 5  ;;  %v1834_v54 = vadd.f32 %v7385_v17, %v6938_v52  ;;  %v5988_v17 = vld [vmem:[#allocation2 + $0x70] sm:$0xff] }
 0x1fd   : > { %v2519_v39 = vpop.f32.mrf.mxu3  ;;  %v4181_v9 = vor.u32 %v4180_v18, %v7410_v32 }
 0x1fe   : > { %v2566_v12 = vadd.f32 %v2519_v39, %v2253_v56  ;;  %v4480_v14 = vpack.c.b16 %v4453_v24, %v4452_v26  ;;  %v4171_v21 = vor.u32 %v4170_v7, %v4167_v15  ;;  %v4186_v24 = vrot.slane %v4184_v5, 5 }
 0x1ff   : > { %v4182_v26 = vrot.slane %v4181_v9, 4  ;;  %v5856_v5 = vrot.slane %v4682_v6, 9 }
 0x200   : > { %v3200_v46 = vpop.f32.mrf.mxu0  ;;  %3903 = vmatmul.bf16.gmra.mxu2 %v5987_v1  ;;  %v4172_v49 = vrot.slane %v4171_v21, 4 }
 0x201   : > { %v7403_v48 = vpop.f32.mrf.mxu1  ;;  %v7405_v56 = vadd.f32 %v3200_v46, %v2566_v12  ;;  %v4878_v12 = vunpack.c.l.b16 %v4775_v10  ;;  %v3368_v46 = vrot.slane %v6194_v36, 5  ;;  %v4187_v9 = vsel %vm6393_vm11, %v4182_v26, %v4186_v24 }
 0x202   : > { %v4177_v21 = vsel %vm6393_vm11, %v4172_v49, %v7410_v32  ;;  %v1837_v32 = vadd.f32 %v7403_v48, %v6958_v16  ;;  %v4779_v26 = vsel %vm6820_vm14, %v5856_v5, %v4778_v55  ;;  %v6196_v5 = vld [vmem:[#allocation2 + $0x88] sm:$0x1] }
 0x203   : > { %5004 = vmatmul.bf16.gmra.mxu0 %v4904_v62  ;;  %v2211_v60 = vpop.f32.mrf.mxu2  ;;  %v3369_v7 = vsel %vm6820_vm14, %v3367_v11, %v3368_v46  ;;  %v4905_v8 = vpack.c.b16 %v4878_v12, %v4877_v50  ;;  %v4454_v49 = vunpack.c.l.b16 %v4177_v21  ;;  %v4455_v11 = vunpack.c.l.b16 %v4187_v9  ;;  %v7447_v46 = vld [vmem:[#allocation2 + $0x88] sm:$0x1] }
 0x204   : > { %v2255_v38 = vadd.f32 %v2211_v60, %v1832_v45  ;;  %3594 = vmatmul.bf16.gmra.mxu1 %v3486_v57  ;;  %v4189_v45 = vshrl.u32 %v4014_v44, 16  ;;  %v4192_v60 = vshll.u32 %v4014_v44, 16  ;;  %v3462_v28 = vunpack.c.l.b16 %v3369_v7 }
 0x205   : > { %v2521_v25 = vpop.f32.mrf.mxu3  ;;  %v4208_v16 = vshll.u32 %v7447_v46, 16  ;;  %v4879_v7 = vunpack.c.l.b16 %v4779_v26 }
 0x206   : > { %v2567_v1 = vadd.f32 %v2521_v25, %v2254_v31  ;;  %v3263_v31 = vld [vmem:[#allocation2 + $0x70] sm:$0xe] }
 0x207   : > { %v5681_v62 = vrot.slane %v3263_v31, 9 }
 0x208   : > { %v3202_v39 = vpop.f32.mrf.mxu0 }
 0x209   : > { %v7422_v58 = vpop.f32.mrf.mxu1  ;;  %v7424_v59 = vadd.f32 %v3202_v39, %v2567_v1  ;;  %v3366_v15 = vsel %vm6820_vm14, %v5681_v62, %v3365_v34  ;;  %v4198_v1 = vshll.u32 %v7426_v35, 16  ;;  %v4781_v34 = vrot.slane %v7412_v42, 5 }
 0x20a   : > { %4584 = vmatmul.bf16.gmra.mxu3 %v4480_v14  ;;  %v3461_v25 = vunpack.c.l.b16 %v3366_v15  ;;  %v4202_v14 = vshrl.u32 %v7426_v35, 16  ;;  %v4194_v62 = vrot.slane %v4192_v60, 5  ;;  %v4481_v15 = vpack.c.b16 %v4455_v11, %v4454_v49 }
 0x20b   : > { %v2213_v57 = vpop.f32.mrf.mxu2  ;;  %v4782_v24 = vsel %vm6820_vm14, %v4780_v20, %v4781_v34 }
 0x20c   : > { %v2256_v52 = vadd.f32 %v2213_v57, %v1834_v54  ;;  %v3487_v44 = vpack.c.b16 %v3462_v28, %v3461_v25  ;;  %v4191_v54 = vrot.slane %v4189_v45, 4  ;;  %v4204_v50 = vrot.slane %v4202_v14, 4 }
 0x20d   : > { %v2524_v18 = vpop.f32.mrf.mxu3  ;;  %v4880_v60 = vunpack.c.l.b16 %v4782_v24  ;;  %v1839_v28 = vadd.f32 %v7422_v58, %v6975_v4  ;;  %v4017_v58 = vld [vmem:[#allocation2 + $0x90] sm:$0xf]  ;;  %v4683_v24 = vld [vmem:[#allocation2 + $0x80] sm:$0xe] }
 0x20e   : > { %v2568_v10 = vadd.f32 %v2524_v18, %v2255_v38  ;;  %v4200_v38 = vrot.slane %v4198_v1, 5  ;;  %v4195_v45 = vor.u32 %v4194_v62, %v4191_v54  ;;  %v6195_v18 = vld [vmem:[#allocation2 + $0x84] sm:$0xf]  ;;  %v7464_v62 = vld [vmem:[#allocation2 + $0x94] sm:$0xf] }
 0x20f   : > { %v3372_v25 = vrot.slane %v6195_v18, 5 }
 0x210   : > { %v3205_v39 = vpop.f32.mrf.mxu0  ;;  %3908 = vmatmul.bf16.gmra.mxu2 %v5988_v17  ;;  %v4205_v17 = vor.u32 %v4204_v50, %v4200_v38  ;;  %v4196_v1 = vrot.slane %v4195_v45, 4  ;;  %v4906_v50 = vpack.c.b16 %v4880_v60, %v4879_v7  ;;  %v4785_v45 = vrot.slane %v7426_v35, 5 }
 0x211   : > { %v7441_v31 = vpop.f32.mrf.mxu1  ;;  %v7443_v12 = vadd.f32 %v3205_v39, %v2568_v10  ;;  %v3264_v10 = vld [vmem:[#allocation2 + $0x80] sm:$0xe]  ;;  %v3374_v9 = vrot.slane %v3372_v25, 4  ;;  %v3375_v39 = vrot.slane %v6196_v5, 5 }
 0x212   : > { %v4206_v14 = vrot.slane %v4205_v17, 4  ;;  %v5682_v21 = vrot.slane %v3264_v10, 9  ;;  %v4213_v17 = vshrl.u32 %v4017_v58, 16  ;;  %v4787_v35 = vrot.slane %v4785_v45, 4 }
 0x213   : > { %5009 = vmatmul.bf16.gmra.mxu0 %v4905_v8  ;;  %v2216_v36 = vpop.f32.mrf.mxu2  ;;  %v3376_v4 = vsel %vm6820_vm14, %v3374_v9, %v3375_v39  ;;  %v7480_v39 = vld [vmem:[#allocation2 + $0x98] sm:$0x1] }
 0x214   : > { %v2257_v57 = vadd.f32 %v2216_v36, %v1837_v32  ;;  %3599 = vmatmul.bf16.gmra.mxu1 %v3487_v44  ;;  %v5989_v44 = vld [vmem:[#allocation2 + $0x80] sm:$0xff]  ;;  %v3373_v54 = vsel %vm6820_vm14, %v5682_v21, %v3372_v25  ;;  %v3464_v11 = vunpack.c.l.b16 %v3376_v4  ;;  %v1842_v25 = vadd.f32 %v7441_v31, %v6992_v13 }
 0x215   : > { %v2526_v42 = vpop.f32.mrf.mxu3  ;;  %v3463_v49 = vunpack.c.l.b16 %v3373_v54  ;;  %v4215_v10 = vrot.slane %v4213_v17, 4  ;;  %v7829_v17 = vld [vmem:[#allocation3_spill] sm:$0xff] }
 0x216   : > { %v2569_v6 = vadd.f32 %v2526_v42, %v2256_v52  ;;  %v4210_v52 = vrot.slane %v4208_v16, 5  ;;  %v4201_v42 = vsel %vm6393_vm11, %v4196_v1, %v4200_v38  ;;  %v4226_v16 = vshrl.u32 %v7464_v62, 16 }
 0x217   : > { %v3488_v7 = vpack.c.b16 %v3464_v11, %v3463_v49  ;;  %v4456_v60 = vunpack.c.l.b16 %v4201_v42  ;;  %v4788_v1 = vrot.slane %v7447_v46, 5  ;;  %v4020_v11 = vld [vmem:[#allocation2 + $0xa0] sm:$0xf] }
 0x218   : > { %v3207_v48 = vpop.f32.mrf.mxu0  ;;  %v4211_v26 = vsel %vm6393_vm11, %v4206_v14, %v4210_v52  ;;  %v4228_v9 = vrot.slane %v4226_v16, 4  ;;  %v6198_v16 = vld [vmem:[#allocation2 + $0x98] sm:$0x1] }
 0x219   : > { %v7456_v55 = vpop.f32.mrf.mxu1  ;;  %v7458_v8 = vadd.f32 %v3207_v48, %v2569_v6  ;;  %v4216_v6 = vshll.u32 %v4017_v58, 16  ;;  %v4789_v31 = vsel %vm6820_vm14, %v4787_v35, %v4788_v1  ;;  %v4232_v58 = vshll.u32 %v7480_v39, 16 }
 0x21a   : > { %4589 = vmatmul.bf16.gmra.mxu3 %v4481_v15  ;;  %v4222_v15 = vshll.u32 %v7464_v62, 16  ;;  %v4882_v42 = vunpack.c.l.b16 %v4789_v31  ;;  %v4237_v35 = vshrl.u32 %v4020_v11, 16 }
 0x21b   : > { %v2218_v20 = vpop.f32.mrf.mxu2  ;;  %v4218_v52 = vrot.slane %v4216_v6, 5 }
 0x21c   : > { %v2258_v34 = vadd.f32 %v2218_v20, %v1839_v28  ;;  %v4457_v28 = vunpack.c.l.b16 %v4211_v26  ;;  %v4224_v21 = vrot.slane %v4222_v15, 5 }
 0x21d   : > { %v2529_v32 = vpop.f32.mrf.mxu3  ;;  %v4219_v46 = vor.u32 %v4218_v52, %v4215_v10 }
 0x21e   : > { %v2570_v36 = vadd.f32 %v2529_v32, %v2257_v57  ;;  %v5857_v57 = vrot.slane %v4683_v24, 9  ;;  %v4482_v54 = vpack.c.b16 %v4457_v28, %v4456_v60  ;;  %v4229_v4 = vor.u32 %v4228_v9, %v4224_v21  ;;  %v6197_v32 = vld [vmem:[#allocation2 + $0x94] sm:$0xf]  ;;  %v3265_v24 = vld [vmem:[#allocation2 + $0x90] sm:$0xe] }
 0x21f   : > { %v3379_v49 = vrot.slane %v6197_v32, 5  ;;  %v5683_v6 = vrot.slane %v3265_v24, 9  ;;  %v4234_v28 = vrot.slane %v4232_v58, 5  ;;  %v4792_v32 = vrot.slane %v7464_v62, 5  ;;  %v4684_v24 = vld [vmem:[#allocation2 + $0x90] sm:$0xe] }
 0x220   : > { %v3210_v48 = vpop.f32.mrf.mxu0  ;;  %3913 = vmatmul.bf16.gmra.mxu2 %v5989_v44  ;;  %v4786_v13 = vsel %vm6820_vm14, %v5857_v57, %v4785_v45  ;;  %v1844_v45 = vadd.f32 %v7456_v55, %v7829_v17  ;;  %v4220_v57 = vrot.slane %v4219_v46, 4  ;;  %v4240_v55 = vshll.u32 %v4020_v11, 16 }
 0x221   : > { %v7473_v18 = vpop.f32.mrf.mxu1  ;;  %v7475_v38 = vadd.f32 %v3210_v48, %v2570_v36  ;;  %v4881_v36 = vunpack.c.l.b16 %v4786_v13  ;;  %v3381_v15 = vrot.slane %v3379_v49, 4  ;;  %v3382_v48 = vrot.slane %v6198_v16, 5 }
 0x222   : > { %v3380_v10 = vsel %vm6820_vm14, %v5683_v6, %v3379_v49  ;;  %v4239_v11 = vrot.slane %v4237_v35, 4  ;;  %v5858_v62 = vrot.slane %v4684_v24, 9 }
 0x223   : > { %5014 = vmatmul.bf16.gmra.mxu0 %v4906_v50  ;;  %v2221_v14 = vpop.f32.mrf.mxu2  ;;  %v3383_v52 = vsel %vm6820_vm14, %v3381_v15, %v3382_v48  ;;  %v4907_v46 = vpack.c.b16 %v4882_v42, %v4881_v36  ;;  %v7830_v36 = vld [vmem:[#allocation4_spill] sm:$0xff] }
 0x224   : > { %v2259_v5 = vadd.f32 %v2221_v14, %v1842_v25  ;;  %3604 = vmatmul.bf16.gmra.mxu1 %v3488_v7  ;;  %v7491_v7 = vld [vmem:[#allocation2 + $0xa4] sm:$0xf]  ;;  %v4230_v25 = vrot.slane %v4229_v4, 4  ;;  %v5990_v14 = vld [vmem:[#allocation2 + $0x90] sm:$0xff]  ;;  %v4225_v4 = vsel %vm6393_vm11, %v4220_v57, %v4224_v21  ;;  %v1847_v21 = vadd.f32 %v7473_v18, %v7830_v36 }
 0x225   : > { %v2531_v20 = vpop.f32.mrf.mxu3  ;;  %v4250_v13 = vshrl.u32 %v7491_v7, 16  ;;  %v4458_v42 = vunpack.c.l.b16 %v4225_v4  ;;  %v4794_v57 = vrot.slane %v4792_v32, 4 }
 0x226   : > { %v2571_v44 = vadd.f32 %v2531_v20, %v2258_v34  ;;  %v3465_v20 = vunpack.c.l.b16 %v3380_v10  ;;  %v4235_v58 = vsel %vm6393_vm11, %v4230_v25, %v4234_v28  ;;  %v4795_v25 = vrot.slane %v7480_v39, 5 }
 0x227   : > { %v4252_v15 = vrot.slane %v4250_v13, 4  ;;  %v4459_v16 = vunpack.c.l.b16 %v4235_v58 }
 0x228   : > { %v3212_v50 = vpop.f32.mrf.mxu0 }
 0x229   : > { %v1848_v26 = vpop.f32.mrf.mxu1  ;;  %v7487_v34 = vadd.f32 %v3212_v50, %v2571_v44  ;;  %v3466_v44 = vunpack.c.l.b16 %v3383_v52 }
 0x22a   : > { %4594 = vmatmul.bf16.gmra.mxu3 %v4482_v54  ;;  %v4246_v54 = vshll.u32 %v7491_v7, 16 }
 0x22b   : > { %v2223_v60 = vpop.f32.mrf.mxu2  ;;  %v3489_v49 = vpack.c.b16 %v3466_v44, %v3465_v20  ;;  %v4793_v20 = vsel %vm6820_vm14, %v5858_v62, %v4792_v32  ;;  %v4796_v44 = vsel %vm6820_vm14, %v4794_v57, %v4795_v25  ;;  %v7527_v57 = vld [vmem:[#allocation2 + $0xb4] sm:$0xf] }
 0x22c   : > { %v2260_v1 = vadd.f32 %v2223_v60, %v1844_v45  ;;  %v4242_v45 = vrot.slane %v4240_v55, 5  ;;  %v4248_v6 = vrot.slane %v4246_v54, 5  ;;  %v7510_v60 = vld [vmem:[#allocation2 + $0xa8] sm:$0x1]  ;;  %v4483_v55 = vpack.c.b16 %v4459_v16, %v4458_v42  ;;  %v6199_v54 = vld [vmem:[#allocation2 + $0xa4] sm:$0xf] }
 0x22d   : > { %v2534_v9 = vpop.f32.mrf.mxu3  ;;  %v3386_v13 = vrot.slane %v6199_v54, 5  ;;  %v4884_v36 = vunpack.c.l.b16 %v4796_v44  ;;  %v4023_v42 = vld [vmem:[#allocation2 + $0xb0] sm:$0xf] }
 0x22e   : > { %v2572_v31 = vadd.f32 %v2534_v9, %v2259_v5  ;;  %v4253_v10 = vor.u32 %v4252_v15, %v4248_v6  ;;  %v4256_v9 = vshll.u32 %v7510_v60, 16  ;;  %v4883_v15 = vunpack.c.l.b16 %v4793_v20 }
 0x22f   : > { %v3388_v24 = vrot.slane %v3386_v13, 4  ;;  %v4261_v20 = vshrl.u32 %v4023_v42, 16  ;;  %v4264_v44 = vshll.u32 %v4023_v42, 16 }
 0x230   : > { %v3215_v50 = vpop.f32.mrf.mxu0  ;;  %3918 = vmatmul.bf16.gmra.mxu2 %v5990_v14  ;;  %v4243_v14 = vor.u32 %v4242_v45, %v4239_v11  ;;  %v4254_v4 = vrot.slane %v4253_v10, 4  ;;  %v6200_v45 = vld [vmem:[#allocation2 + $0xa8] sm:$0x1]  ;;  %v4908_v54 = vpack.c.b16 %v4884_v36, %v4883_v15 }
 0x231   : > { %v7504_v17 = vpop.f32.mrf.mxu1  ;;  %v7506_v5 = vadd.f32 %v3215_v50, %v2572_v31  ;;  %v7831_v31 = vld [vmem:[#allocation5_spill] sm:$0xff]  ;;  %v3266_v50 = vld [vmem:[#allocation2 + $0xa0] sm:$0xe]  ;;  %v3389_v32 = vrot.slane %v6200_v45, 5  ;;  %v4266_v45 = vrot.slane %v4264_v44, 5 }
 0x232   : > { %v1849_v39 = vadd.f32 %v1848_v26, %v7831_v31  ;;  %v5684_v11 = vrot.slane %v3266_v50, 9  ;;  %v4274_v31 = vshrl.u32 %v7527_v57, 16 }
 0x233   : > { %5019 = vmatmul.bf16.gmra.mxu0 %v4907_v46  ;;  %v2226_v48 = vpop.f32.mrf.mxu2  ;;  %v4244_v46 = vrot.slane %v4243_v14, 4  ;;  %v3390_v62 = vsel %vm6820_vm14, %v3388_v24, %v3389_v32  ;;  %v4799_v14 = vrot.slane %v7491_v7, 5 }
 0x234   : > { %v2261_v28 = vadd.f32 %v2226_v48, %v1847_v21  ;;  %3609 = vmatmul.bf16.gmra.mxu1 %v3489_v49  ;;  %v4258_v49 = vrot.slane %v4256_v9, 5  ;;  %v5991_v48 = vld [vmem:[#allocation2 + $0xa0] sm:$0xff]  ;;  %v3387_v26 = vsel %vm6820_vm14, %v5684_v11, %v3386_v13  ;;  %v4270_v13 = vshll.u32 %v7527_v57, 16 }
 0x235   : > { %v2536_v35 = vpop.f32.mrf.mxu3  ;;  %v3467_v10 = vunpack.c.l.b16 %v3387_v26  ;;  %v4801_v24 = vrot.slane %v4799_v14, 4  ;;  %v4276_v36 = vrot.slane %v4274_v31, 4 }
 0x236   : > { %v2573_v52 = vadd.f32 %v2536_v35, %v2260_v1  ;;  %v4249_v35 = vsel %vm6393_vm11, %v4244_v46, %v4248_v6  ;;  %v4259_v9 = vsel %vm6393_vm11, %v4254_v4, %v4258_v49  ;;  %v4802_v4 = vrot.slane %v7510_v60, 5 }
 0x237   : > { %v4460_v6 = vunpack.c.l.b16 %v4249_v35  ;;  %v4461_v46 = vunpack.c.l.b16 %v4259_v9  ;;  %v4263_v49 = vrot.slane %v4261_v20, 4  ;;  %v4272_v15 = vrot.slane %v4270_v13, 5 }
 0x238   : > { %v3217_v18 = vpop.f32.mrf.mxu0  ;;  %v3650_v20 = vadd.f32 %v7504_v17, %v7052_v43  ;;  %v5992_v17 = vld [vmem:[#allocation2 + $0xb0] sm:$0xff] }
 0x239   : > { %v7519_v58 = vpop.f32.mrf.mxu1  ;;  %v7521_v1 = vadd.f32 %v3217_v18, %v2573_v52  ;;  %v3468_v52 = vunpack.c.l.b16 %v3390_v62  ;;  %v4685_v18 = vld [vmem:[#allocation2 + $0xa0] sm:$0xe]  ;;  %v4484_v62 = vpack.c.b16 %v4461_v46, %v4460_v6  ;;  %v4267_v35 = vor.u32 %v4266_v45, %v4263_v49  ;;  %v6202_v46 = vld [vmem:[#allocation2 + $0xb8] sm:$0x1] }
 0x23a   : > { %4599 = vmatmul.bf16.gmra.mxu3 %v4483_v55  ;;  %v5859_v7 = vrot.slane %v4685_v18, 9  ;;  %v4277_v60 = vor.u32 %v4276_v36, %v4272_v15  ;;  %v4026_v18 = vld [vmem:[#allocation2 + $0xc0] sm:$0xf]  ;;  %v4686_v36 = vld [vmem:[#allocation2 + $0xb0] sm:$0xe] }
 0x23b   : > { %v2228_v21 = vpop.f32.mrf.mxu2  ;;  %v3490_v50 = vpack.c.b16 %v3468_v52, %v3467_v10  ;;  %v4285_v45 = vshrl.u32 %v4026_v18, 16  ;;  %v4288_v43 = vshll.u32 %v4026_v18, 16  ;;  %v3651_v18 = vadd.f32 %v7519_v58, %v7074_v23 }
 0x23c   : > { %v2262_v16 = vadd.f32 %v2228_v21, %v1849_v39  ;;  %v7541_v21 = vld [vmem:[#allocation2 + $0xb8] sm:$0x1] }
 0x23d   : > { %v2539_v25 = vpop.f32.mrf.mxu3  ;;  %v4280_v10 = vshll.u32 %v7541_v21, 16 }
 0x23e   : > { %v2574_v55 = vadd.f32 %v2539_v25, %v2261_v28  ;;  %v4803_v25 = vsel %vm6820_vm14, %v4801_v24, %v4802_v4  ;;  %v4278_v4 = vrot.slane %v4277_v60, 4 }
 0x23f   : > { %v4282_v49 = vrot.slane %v4280_v10, 5 }
 0x240   : > { %v3220_v39 = vpop.f32.mrf.mxu0  ;;  %3923 = vmatmul.bf16.gmra.mxu2 %v5991_v48  ;;  %v4800_v48 = vsel %vm6820_vm14, %v5859_v7, %v4799_v14  ;;  %v7552_v14 = vld [vmem:[#allocation2 + $0xc4] sm:$0xf]  ;;  %v3396_v7 = vrot.slane %v6202_v46, 5 }
 0x241   : > { %v7536_v11 = vpop.f32.mrf.mxu1  ;;  %v7538_v28 = vadd.f32 %v3220_v39, %v2574_v55  ;;  %v6201_v55 = vld [vmem:[#allocation2 + $0xb4] sm:$0xf]  ;;  %v4885_v44 = vunpack.c.l.b16 %v4800_v48  ;;  %v4268_v39 = vrot.slane %v4267_v35, 4 }
 0x242   : > { %v3393_v9 = vrot.slane %v6201_v55, 5 }
 0x243   : > { %5024 = vmatmul.bf16.gmra.mxu0 %v4908_v54  ;;  %v3884_v32 = vpop.f32.mrf.mxu2  ;;  %v4886_v54 = vunpack.c.l.b16 %v4803_v25 }
 0x244   : > { %3614 = vmatmul.bf16.gmra.mxu1 %v3490_v50  ;;  %v3395_v6 = vrot.slane %v3393_v9, 4  ;;  %v3964_v25 = vadd.f32 %v3884_v32, %v3650_v20  ;;  %v4290_v20 = vrot.slane %v4288_v43, 5 }
 0x245   : > { %v2541_v42 = vpop.f32.mrf.mxu3  ;;  %v4909_v55 = vpack.c.b16 %v4886_v54, %v4885_v44  ;;  %v4809_v54 = vrot.slane %v7541_v21, 5 }
 0x246   : > { %v2575_v26 = vadd.f32 %v2541_v42, %v2262_v16  ;;  %v3267_v16 = vld [vmem:[#allocation2 + $0xb0] sm:$0xe]  ;;  %v3397_v48 = vsel %vm6820_vm14, %v3395_v6, %v3396_v7  ;;  %v4287_v6 = vrot.slane %v4285_v45, 4 }
 0x247   : > { %v5685_v50 = vrot.slane %v3267_v16, 9  ;;  %v3470_v10 = vunpack.c.l.b16 %v3397_v48  ;;  %v4283_v16 = vsel %vm6393_vm11, %v4278_v4, %v4282_v49  ;;  %v7574_v4 = vld [vmem:[#allocation2 + $0xc8] sm:$0x1] }
 0x248   : > { %v3222_v52 = vpop.f32.mrf.mxu0  ;;  %v4291_v43 = vor.u32 %v4290_v20, %v4287_v6 }
 0x249   : > { %v7550_v13 = vpop.f32.mrf.mxu1  ;;  %v7554_v31 = vadd.f32 %v3222_v52, %v2575_v26  ;;  %v3394_v42 = vsel %vm6820_vm14, %v5685_v50, %v3393_v9  ;;  %v4294_v26 = vshll.u32 %v7552_v14, 16  ;;  %v4806_v52 = vrot.slane %v7527_v57, 5 }
 0x24a   : > { %4604 = vmatmul.bf16.gmra.mxu3 %v4484_v62  ;;  %v4298_v62 = vshrl.u32 %v7552_v14, 16  ;;  %v3469_v60 = vunpack.c.l.b16 %v3394_v42  ;;  %v4273_v9 = vsel %vm6393_vm11, %v4268_v39, %v4272_v15  ;;  %v5860_v50 = vrot.slane %v4686_v36, 9 }
 0x24b   : > { %7832 = vst [vmem:[#allocation3_spill] sm:$0xff] %v7554_v31  ;;  %v3886_v24 = vpop.f32.mrf.mxu2  ;;  %v7569_v7 = vrot.slane %v4294_v26, 5  ;;  %v4808_v44 = vrot.slane %v4806_v52, 4  ;;  %v4462_v15 = vunpack.c.l.b16 %v4273_v9  ;;  %v4463_v39 = vunpack.c.l.b16 %v4283_v16  ;;  %v4029_v16 = vld [vmem:[#allocation2 + $0xd0] sm:$0xf] }
 0x24c   : > { %v3491_v32 = vpack.c.b16 %v3470_v10, %v3469_v60  ;;  %v4300_v57 = vrot.slane %v4298_v62, 4  ;;  %v3965_v58 = vadd.f32 %v3886_v24, %v3651_v18  ;;  %v4807_v45 = vsel %vm6820_vm14, %v5860_v50, %v4806_v52  ;;  %v6203_v18 = vld [vmem:[#allocation2 + $0xc4] sm:$0xf] }
 0x24d   : > { %v4565_v35 = vpop.f32.mrf.mxu3  ;;  %v4810_v21 = vsel %vm6820_vm14, %v4808_v44, %v4809_v54  ;;  %v4304_v24 = vshll.u32 %v7574_v4, 16  ;;  %v4485_v62 = vpack.c.b16 %v4463_v39, %v4462_v15  ;;  %v4292_v10 = vrot.slane %v4291_v43, 4  ;;  %v6204_v54 = vld [vmem:[#allocation2 + $0xc8] sm:$0x1] }
 0x24e   : > { %v4645_v42 = vadd.f32 %v4565_v35, %v3964_v25  ;;  %v3652_v25 = vadd.f32 %v7536_v11, %v7081_v53  ;;  %v4887_v35 = vunpack.c.l.b16 %v4807_v45  ;;  %v4888_v52 = vunpack.c.l.b16 %v4810_v21 }
 0x24f   : > { %v3400_v9 = vrot.slane %v6203_v18, 5  ;;  %v4309_v43 = vshrl.u32 %v4029_v16, 16 }
 0x250   : > { %v4990_v46 = vpop.f32.mrf.mxu0  ;;  %3928 = vmatmul.bf16.gmra.mxu2 %v5992_v17  ;;  %v4301_v17 = vor.u32 %v4300_v57, %v7569_v7  ;;  %v3268_v57 = vld [vmem:[#allocation2 + $0xc0] sm:$0xe] }
 0x251   : > { %v7572_v23 = vpop.f32.mrf.mxu1  ;;  %v5070_v36 = vadd.f32 %v4990_v46, %v4645_v42  ;;  %v4306_v46 = vrot.slane %v4304_v24, 5  ;;  %v7588_v42 = vld [vmem:[#allocation2 + $0xd4] sm:$0xf]  ;;  %v5686_v11 = vrot.slane %v3268_v57, 9  ;;  %v3402_v44 = vrot.slane %v3400_v9, 4 }
 0x253   : > { %5029 = vmatmul.bf16.gmra.mxu0 %v4909_v55  ;;  %v3889_v49 = vpop.f32.mrf.mxu2  ;;  %v4302_v55 = vrot.slane %v4301_v17, 4  ;;  %v5203_v50 = vmul.f32 %v5070_v36, %v5070_v36  ;;  %v5993_v17 = vld [vmem:[#allocation2 + $0xc0] sm:$0xff]  ;;  %v3401_v21 = vsel %vm6820_vm14, %v5686_v11, %v3400_v9  ;;  %v4297_v9 = vsel %vm6393_vm11, %v4292_v10, %v7569_v7 }
 0x254   : > { %3619 = vmatmul.bf16.gmra.mxu1 %v3491_v32  ;;  %v4813_v32 = vrot.slane %v7552_v14, 5  ;;  %v3966_v53 = vadd.f32 %v3889_v49, %v3652_v25  ;;  %v4318_v49 = vshll.u32 %v7588_v42, 16  ;;  %v4464_v7 = vunpack.c.l.b16 %v4297_v9 }
 0x255   : > { %v4567_v48 = vpop.f32.mrf.mxu3 }
 0x256   : > { %v4646_v26 = vadd.f32 %v4567_v48, %v3965_v58  ;;  %v3403_v58 = vrot.slane %v6204_v54, 5  ;;  %v4687_v48 = vld [vmem:[#allocation2 + $0xc0] sm:$0xe]  ;;  %v7833_v54 = vld [vmem:[#allocation6_spill] sm:$0xff] }
 0x257   : > { %v3653_v31 = vadd.f32 %v7550_v13, %v7833_v54  ;;  %v5861_v11 = vrot.slane %v4687_v48, 9  ;;  %v7612_v13 = vrot.slane %v4318_v49, 5 }
 0x258   : > { %v4992_v60 = vpop.f32.mrf.mxu0  ;;  %v3404_v24 = vsel %vm6820_vm14, %v3402_v44, %v3403_v58 }
 0x259   : > { %v5071_v6 = vadd.f32 %v4992_v60, %v4646_v26  ;;  %v7586_v20 = vpop.f32.mrf.mxu1  ;;  %v4312_v26 = vshll.u32 %v4029_v16, 16  ;;  %v3471_v60 = vunpack.c.l.b16 %v3401_v21  ;;  %v3472_v18 = vunpack.c.l.b16 %v3404_v24 }
 0x25a   : > { %4609 = vmatmul.bf16.gmra.mxu3 %v4485_v62  ;;  %v4307_v16 = vsel %vm6393_vm11, %v4302_v55, %v4306_v46 }
 0x25b   : > { %v6026_v15 = vpack.c.bf16 %v5071_v6, %v5070_v36  ;;  %v5166_v39 = vadd.f32 %v5071_v6, %v5070_v36  ;;  %v5204_v14 = vmul.f32 %v5071_v6, %v5071_v6  ;;  %v3891_v45 = vpop.f32.mrf.mxu2  ;;  %v4322_v36 = vshrl.u32 %v7588_v42, 16 }
 0x25c   : > { %v4910_v6 = vpack.c.b16 %v4888_v52, %v4887_v35  ;;  %v3492_v58 = vpack.c.b16 %v3472_v18, %v3471_v60  ;;  %v4816_v35 = vrot.slane %v7574_v4, 5  ;;  %v3967_v24 = vadd.f32 %v3891_v45, %v3653_v31 }
 0x25d   : > { %6027 = vst [vmem:[%s7593_s27] sm:$0xff] %v6026_v15   ;;  %v5235_v62 = vadd.f32 %v5204_v14, %v5203_v50  ;;  %v4570_v25 = vpop.f32.mrf.mxu3  ;;  %v4815_v50 = vrot.slane %v4813_v32, 4  ;;  %v4311_v15 = vrot.slane %v4309_v43, 4  ;;  %v4314_v14 = vrot.slane %v4312_v26, 5 }
 0x25e   : > { %v4647_v57 = vadd.f32 %v4570_v25, %v3966_v53  ;;  %v4324_v53 = vrot.slane %v4322_v36, 4  ;;  %v4465_v10 = vunpack.c.l.b16 %v4307_v16  ;;  %v7614_v25 = vld [vmem:[#allocation2 + $0xd8] sm:$0x1]  ;;  %v4814_v43 = vsel %vm6820_vm14, %v5861_v11, %v4813_v32  ;;  %v7834_v36 = vld [vmem:[#allocation7_spill] sm:$0xff]  ;;  %v6205_v16 = vld [vmem:[#allocation2 + $0xd4] sm:$0xf] }
 0x25f   : > { %v4315_v48 = vor.u32 %v4314_v14, %v4311_v15  ;;  %v4817_v49 = vsel %vm6820_vm14, %v4815_v50, %v4816_v35  ;;  %v4328_v45 = vshll.u32 %v7614_v25, 16  ;;  %v4889_v54 = vunpack.c.l.b16 %v4814_v43  ;;  %v3269_v14 = vld [vmem:[#allocation2 + $0xd0] sm:$0xe]  ;;  %v7626_v35 = vld [vmem:[#allocation2 + $0xe4] sm:$0xf] }
 0x260   : > { %v4995_v44 = vpop.f32.mrf.mxu0  ;;  %3933 = vmatmul.bf16.gmra.mxu2 %v5993_v17  ;;  %v4325_v31 = vor.u32 %v4324_v53, %v7612_v13  ;;  %v4486_v18 = vpack.c.b16 %v4465_v10, %v4464_v7  ;;  %v4890_v32 = vunpack.c.l.b16 %v4817_v49  ;;  %v5687_v53 = vrot.slane %v3269_v14, 9  ;;  %v7835_v14 = vld [vmem:[#allocation8_spill] sm:$0xff] }
 0x261   : > { %v5072_v21 = vadd.f32 %v4995_v44, %v4647_v57  ;;  %v7610_v52 = vpop.f32.mrf.mxu1  ;;  %v4316_v9 = vrot.slane %v4315_v48, 4  ;;  %v4330_v50 = vrot.slane %v4328_v45, 5 }
 0x263   : > { %5034 = vmatmul.bf16.gmra.mxu0 %v4910_v6  ;;  %v5167_v55 = vadd.f32 %v5166_v39, %v5072_v21  ;;  %v5205_v46 = vmul.f32 %v5072_v21, %v5072_v21  ;;  %v3894_v17 = vpop.f32.mrf.mxu2  ;;  %v3654_v39 = vadd.f32 %v7572_v23, %v7834_v36  ;;  %v4032_v6 = vld [vmem:[#allocation2 + $0xe0] sm:$0xf] }
 0x264   : > { %3624 = vmatmul.bf16.gmra.mxu1 %v3492_v58  ;;  %v4326_v58 = vrot.slane %v4325_v31, 4  ;;  %v4333_v10 = vshrl.u32 %v4032_v6, 16  ;;  %v4336_v49 = vshll.u32 %v4032_v6, 16  ;;  %v4321_v6 = vsel %vm6393_vm11, %v4316_v9, %v7612_v13 }
 0x265   : > { %v5236_v4 = vadd.f32 %v5235_v62, %v5205_v46  ;;  %v4572_v26 = vpop.f32.mrf.mxu3  ;;  %v3407_v62 = vrot.slane %v6205_v16, 5  ;;  %v3968_v44 = vadd.f32 %v3894_v17, %v3654_v39  ;;  %v5994_v17 = vld [vmem:[#allocation2 + $0xd0] sm:$0xff]  ;;  %v4466_v13 = vunpack.c.l.b16 %v4321_v6 }
 0x266   : > { %v4648_v60 = vadd.f32 %v4572_v26, %v3967_v24  ;;  %v6206_v24 = vld [vmem:[#allocation2 + $0xd8] sm:$0x1]  ;;  %v4688_v16 = vld [vmem:[#allocation2 + $0xd0] sm:$0xe] }
 0x267   : > { %v3409_v23 = vrot.slane %v3407_v62, 4  ;;  %v3410_v7 = vrot.slane %v6206_v24, 5  ;;  %v3408_v31 = vsel %vm6820_vm14, %v5687_v53, %v3407_v62  ;;  %v4820_v62 = vrot.slane %v7588_v42, 5  ;;  %v7836_v6 = vld [vmem:[#allocation9_spill] sm:$0xff] }
 0x268   : > { %v4997_v57 = vpop.f32.mrf.mxu0  ;;  %v3655_v53 = vadd.f32 %v7586_v20, %v7835_v14  ;;  %v4335_v24 = vrot.slane %v4333_v10, 4  ;;  %v5862_v9 = vrot.slane %v4688_v16, 9  ;;  %v4823_v20 = vrot.slane %v7614_v25, 5 }
 0x269   : > { %v5073_v11 = vadd.f32 %v4997_v57, %v4648_v60  ;;  %v7624_v15 = vpop.f32.mrf.mxu1  ;;  %v3411_v45 = vsel %vm6820_vm14, %v3409_v23, %v3410_v7  ;;  %v4342_v60 = vshll.u32 %v7626_v35, 16  ;;  %v3473_v57 = vunpack.c.l.b16 %v3408_v31 }
 0x26a   : > { %4614 = vmatmul.bf16.gmra.mxu3 %v4486_v18  ;;  %v4346_v18 = vshrl.u32 %v7626_v35, 16  ;;  %v4331_v23 = vsel %vm6393_vm11, %v4326_v58, %v4330_v50 }
 0x26b   : > { %v6031_v46 = vpack.c.bf16 %v5073_v11, %v5072_v21  ;;  %v5168_v43 = vadd.f32 %v5167_v55, %v5073_v11  ;;  %v5206_v48 = vmul.f32 %v5073_v11, %v5073_v11  ;;  %v3896_v26 = vpop.f32.mrf.mxu2  ;;  %v3474_v21 = vunpack.c.l.b16 %v3411_v45 }
 0x26c   : > { %v4911_v11 = vpack.c.b16 %v4890_v32, %v4889_v54  ;;  %v3969_v42 = vadd.f32 %v3896_v26, %v3655_v53  ;;  %v4467_v54 = vunpack.c.l.b16 %v4331_v23  ;;  %v4822_v32 = vrot.slane %v4820_v62, 4  ;;  %v6207_v23 = vld [vmem:[#allocation2 + $0xe4] sm:$0xf] }
 0x26d   : > { %6103 = vst [vmem:[%s7593_s27 + $0x8] sm:$0xff] %v6031_v46   ;;  %v5237_v36 = vadd.f32 %v5236_v4, %v5206_v48  ;;  %v4575_v39 = vpop.f32.mrf.mxu3  ;;  %v3493_v7 = vpack.c.b16 %v3474_v21, %v3473_v57  ;;  %v4338_v46 = vrot.slane %v4336_v49, 5  ;;  %v4348_v48 = vrot.slane %v4346_v18, 4 }
 0x26e   : > { %v4649_v55 = vadd.f32 %v4575_v39, %v3968_v44  ;;  %v7643_v44 = vrot.slane %v4342_v60, 5  ;;  %v7648_v39 = vld [vmem:[#allocation2 + $0xe8] sm:$0x1]  ;;  %v4821_v57 = vsel %vm6820_vm14, %v5862_v9, %v4820_v62  ;;  %v4824_v25 = vsel %vm6820_vm14, %v4822_v32, %v4823_v20  ;;  %v7661_v9 = vld [vmem:[#allocation2 + $0xf4] sm:$0xf] }
 0x26f   : > { %v4339_v49 = vor.u32 %v4338_v46, %v4335_v24  ;;  %v4352_v26 = vshll.u32 %v7648_v39, 16  ;;  %v4035_v24 = vld [vmem:[#allocation2 + $0xf0] sm:$0xf]  ;;  %v4827_v46 = vrot.slane %v7626_v35, 5  ;;  %v6208_v32 = vld [vmem:[#allocation2 + $0xe8] sm:$0x1] }
 0x270   : > { %v5000_v4 = vpop.f32.mrf.mxu0  ;;  %3938 = vmatmul.bf16.gmra.mxu2 %v5994_v17  ;;  %v4349_v17 = vor.u32 %v4348_v48, %v7643_v44  ;;  %v3417_v20 = vrot.slane %v6208_v32, 5 }
 0x271   : > { %v5074_v31 = vadd.f32 %v5000_v4, %v4649_v55  ;;  %v7645_v45 = vpop.f32.mrf.mxu1  ;;  %v4487_v55 = vpack.c.b16 %v4467_v54, %v4466_v13  ;;  %v4340_v14 = vrot.slane %v4339_v49, 4  ;;  %v4354_v62 = vrot.slane %v4352_v26, 5  ;;  %v3270_v13 = vld [vmem:[#allocation2 + $0xe0] sm:$0xe] }
 0x272   : > { %v4350_v53 = vrot.slane %v4349_v17, 4  ;;  %v5995_v26 = vld [vmem:[#allocation2 + $0xe0] sm:$0xff] }
 0x273   : > { %5039 = vmatmul.bf16.gmra.mxu0 %v4911_v11  ;;  %v5169_v58 = vadd.f32 %v5168_v43, %v5074_v31  ;;  %v5207_v50 = vmul.f32 %v5074_v31, %v5074_v31  ;;  %v3899_v10 = vpop.f32.mrf.mxu2  ;;  %v3656_v43 = vadd.f32 %v7610_v52, %v7836_v6  ;;  %v4891_v11 = vunpack.c.l.b16 %v4821_v57 }
 0x274   : > { %3629 = vmatmul.bf16.gmra.mxu1 %v3493_v7  ;;  %v4892_v7 = vunpack.c.l.b16 %v4824_v25  ;;  %v5688_v52 = vrot.slane %v3270_v13, 9  ;;  %v4357_v57 = vshrl.u32 %v4035_v24, 16  ;;  %v7837_v13 = vld [vmem:[#allocation10_spill] sm:$0xff] }
 0x275   : > { %v5238_v60 = vadd.f32 %v5237_v36, %v5207_v50  ;;  %v4577_v18 = vpop.f32.mrf.mxu3  ;;  %v3414_v36 = vrot.slane %v6207_v23, 5  ;;  %v3657_v32 = vadd.f32 %v7624_v15, %v7837_v13 }
 0x276   : > { %v4650_v21 = vadd.f32 %v4577_v18, %v3969_v42  ;;  %v3970_v42 = vadd.f32 %v3899_v10, %v3656_v43  ;;  %v4366_v10 = vshll.u32 %v7661_v9, 16  ;;  %v4912_v23 = vpack.c.b16 %v4892_v7, %v4891_v11 }
 0x277   : > { %v3416_v54 = vrot.slane %v3414_v36, 4  ;;  %v3415_v35 = vsel %vm6820_vm14, %v5688_v52, %v3414_v36  ;;  %v4345_v36 = vsel %vm6393_vm11, %v4340_v14, %v7643_v44  ;;  %v4829_v7 = vrot.slane %v4827_v46, 4 }
 0x278   : > { %v5002_v16 = vpop.f32.mrf.mxu0  ;;  %v7680_v15 = vrot.slane %v4366_v10, 5  ;;  %v4468_v44 = vunpack.c.l.b16 %v4345_v36  ;;  %v6209_v36 = vld [vmem:[#allocation2 + $0xf4] sm:$0xf] }
 0x279   : > { %v5075_v4 = vadd.f32 %v5002_v16, %v4650_v21  ;;  %v7659_v48 = vpop.f32.mrf.mxu1  ;;  %v4689_v21 = vld [vmem:[#allocation2 + $0xe0] sm:$0xe]  ;;  %v3418_v25 = vsel %vm6820_vm14, %v3416_v54, %v3417_v20  ;;  %v3475_v16 = vunpack.c.l.b16 %v3415_v35 }
 0x27a   : > { %4619 = vmatmul.bf16.gmra.mxu3 %v4487_v55  ;;  %v4360_v55 = vshll.u32 %v4035_v24, 16  ;;  %v4355_v24 = vsel %vm6393_vm11, %v4350_v53, %v4354_v62  ;;  %v5863_v52 = vrot.slane %v4689_v21, 9 }
 0x27b   : > { %v6036_v50 = vpack.c.bf16 %v5075_v4, %v5074_v31  ;;  %v5170_v49 = vadd.f32 %v5169_v58, %v5075_v4  ;;  %v5208_v17 = vmul.f32 %v5075_v4, %v5075_v4  ;;  %v3901_v18 = vpop.f32.mrf.mxu2  ;;  %v3476_v31 = vunpack.c.l.b16 %v3418_v25 }
 0x27c   : > { %v4370_v58 = vshrl.u32 %v7661_v9, 16  ;;  %v3971_v25 = vadd.f32 %v3901_v18, %v3657_v32  ;;  %v4469_v14 = vunpack.c.l.b16 %v4355_v24 }
 0x27d   : > { %6104 = vst [vmem:[%s7593_s27 + $0x10] sm:$0xff] %v6036_v50   ;;  %v5239_v6 = vadd.f32 %v5238_v60, %v5208_v17  ;;  %v4580_v43 = vpop.f32.mrf.mxu3  ;;  %v4830_v60 = vrot.slane %v7648_v39, 5  ;;  %v3494_v20 = vpack.c.b16 %v3476_v31, %v3475_v16  ;;  %v4359_v50 = vrot.slane %v4357_v57, 4 }
 0x27e   : > { %v4651_v4 = vadd.f32 %v4580_v43, %v3970_v42  ;;  %v4362_v17 = vrot.slane %v4360_v55, 5  ;;  %v4372_v35 = vrot.slane %v4370_v58, 4  ;;  %v7682_v43 = vld [vmem:[#allocation2 + $0xf8] sm:$0x1]  ;;  %v4828_v39 = vsel %vm6820_vm14, %v5863_v52, %v4827_v46 }
 0x27f   : > { %v4831_v10 = vsel %vm6820_vm14, %v4829_v7, %v4830_v60  ;;  %v4376_v16 = vshll.u32 %v7682_v43, 16  ;;  %v4488_v58 = vpack.c.b16 %v4469_v14, %v4468_v44  ;;  %v4893_v13 = vunpack.c.l.b16 %v4828_v39 }
 0x280   : > { %v5005_v54 = vpop.f32.mrf.mxu0  ;;  %3943 = vmatmul.bf16.gmra.mxu2 %v5995_v26  ;;  %v4363_v57 = vor.u32 %v4362_v17, %v4359_v50  ;;  %v4373_v18 = vor.u32 %v4372_v35, %v7680_v15  ;;  %v4894_v46 = vunpack.c.l.b16 %v4831_v10  ;;  %v3271_v50 = vld [vmem:[#allocation2 + $0xf0] sm:$0xe]  ;;  %v7694_v17 = vld [vmem:[#allocation2 + $0x104] sm:$0xf] }
 0x281   : > { %v5076_v11 = vadd.f32 %v5005_v54, %v4651_v4  ;;  %v7678_v42 = vpop.f32.mrf.mxu1  ;;  %v4378_v60 = vrot.slane %v4376_v16, 5  ;;  %v5689_v7 = vrot.slane %v3271_v50, 9  ;;  %v4394_v16 = vshrl.u32 %v7694_v17, 16 }
 0x282   : > { %v4364_v32 = vrot.slane %v4363_v57, 4  ;;  %v4374_v54 = vrot.slane %v4373_v18, 4  ;;  %v4390_v18 = vshll.u32 %v7694_v17, 16  ;;  %v4834_v50 = vrot.slane %v7661_v9, 5 }
 0x283   : > { %5044 = vmatmul.bf16.gmra.mxu0 %v4912_v23  ;;  %v5171_v53 = vadd.f32 %v5170_v49, %v5076_v11  ;;  %v5209_v62 = vmul.f32 %v5076_v11, %v5076_v11  ;;  %v3904_v26 = vpop.f32.mrf.mxu2  ;;  %v3658_v49 = vadd.f32 %v7645_v45, %v7177_v41  ;;  %v4038_v23 = vld [vmem:[#allocation2 + $0x100] sm:$0xf]  ;;  %v6210_v45 = vld [vmem:[#allocation2 + $0xf8] sm:$0x1] }
 0x284   : > { %3634 = vmatmul.bf16.gmra.mxu1 %v3494_v20  ;;  %v3424_v35 = vrot.slane %v6210_v45, 5  ;;  %v4384_v57 = vshll.u32 %v4038_v23, 16 }
 0x285   : > { %v5240_v21 = vadd.f32 %v5239_v6, %v5209_v62  ;;  %v4582_v55 = vpop.f32.mrf.mxu3  ;;  %v3421_v6 = vrot.slane %v6209_v36, 5  ;;  %v3972_v52 = vadd.f32 %v3904_v26, %v3658_v49  ;;  %v5996_v26 = vld [vmem:[#allocation2 + $0xf0] sm:$0xff]  ;;  %v4369_v36 = vsel %vm6393_vm11, %v4364_v32, %v7680_v15 }
 0x286   : > { %v4652_v31 = vadd.f32 %v4582_v55, %v3971_v25  ;;  %v4381_v25 = vshrl.u32 %v4038_v23, 16  ;;  %v3659_v23 = vadd.f32 %v7659_v48, %v7205_v30  ;;  %v4386_v45 = vrot.slane %v4384_v57, 5  ;;  %v7715_v48 = vld [vmem:[#allocation2 + $0x108] sm:$0x1] }
 0x287   : > { %v3423_v41 = vrot.slane %v3421_v6, 4  ;;  %v3422_v55 = vsel %vm6820_vm14, %v5689_v7, %v3421_v6  ;;  %v4379_v6 = vsel %vm6393_vm11, %v4374_v54, %v4378_v60  ;;  %v4470_v32 = vunpack.c.l.b16 %v4369_v36 }
 0x288   : > { %v5007_v4 = vpop.f32.mrf.mxu0  ;;  %v3477_v49 = vunpack.c.l.b16 %v3422_v55  ;;  %v4383_v7 = vrot.slane %v4381_v25, 4  ;;  %v4836_v25 = vrot.slane %v4834_v50, 4  ;;  %v4400_v55 = vshll.u32 %v7715_v48, 16 }
 0x289   : > { %v5077_v24 = vadd.f32 %v5007_v4, %v4652_v31  ;;  %v7692_v20 = vpop.f32.mrf.mxu1  ;;  %v3425_v10 = vsel %vm6820_vm14, %v3423_v41, %v3424_v35  ;;  %v4471_v35 = vunpack.c.l.b16 %v4379_v6 }
 0x28a   : > { %4624 = vmatmul.bf16.gmra.mxu3 %v4488_v58  ;;  %v4387_v57 = vor.u32 %v4386_v45, %v4383_v7  ;;  %v3272_v7 = vld [vmem:[#allocation2 + $0x100] sm:$0xe]  ;;  %v4041_v45 = vld [vmem:[#allocation2 + $0x110] sm:$0xf] }
 0x28b   : > { %v6041_v44 = vpack.c.bf16 %v5077_v24, %v5076_v11  ;;  %v5172_v14 = vadd.f32 %v5171_v53, %v5077_v24  ;;  %v5210_v62 = vmul.f32 %v5077_v24, %v5077_v24  ;;  %v3906_v39 = vpop.f32.mrf.mxu2  ;;  %v3478_v11 = vunpack.c.l.b16 %v3425_v10  ;;  %v4690_v24 = vld [vmem:[#allocation2 + $0xf0] sm:$0xe] }
 0x28c   : > { %v4913_v53 = vpack.c.b16 %v4894_v46, %v4893_v13  ;;  %v7711_v13 = vrot.slane %v4390_v18, 5  ;;  %v4396_v46 = vrot.slane %v4394_v16, 4  ;;  %v3973_v15 = vadd.f32 %v3906_v39, %v3659_v23  ;;  %v6211_v23 = vld [vmem:[#allocation2 + $0x104] sm:$0xf] }
 0x28d   : > { %6105 = vst [vmem:[%s7593_s27 + $0x18] sm:$0xff] %v6041_v44   ;;  %v5241_v31 = vadd.f32 %v5240_v21, %v5210_v62  ;;  %v4585_v58 = vpop.f32.mrf.mxu3  ;;  %v3495_v41 = vpack.c.b16 %v3478_v11, %v3477_v49  ;;  %v5864_v54 = vrot.slane %v4690_v24, 9  ;;  %v4837_v44 = vrot.slane %v7682_v43, 5 }
 0x28e   : > { %v4653_v4 = vadd.f32 %v4585_v58, %v3972_v52  ;;  %v4489_v39 = vpack.c.b16 %v4471_v35, %v4470_v32  ;;  %v4388_v11 = vrot.slane %v4387_v57, 4  ;;  %v3428_v36 = vrot.slane %v6211_v23, 5 }
 0x28f   : > { %v4835_v58 = vsel %vm6820_vm14, %v5864_v54, %v4834_v50  ;;  %v4838_v43 = vsel %vm6820_vm14, %v4836_v25, %v4837_v44  ;;  %v5690_v50 = vrot.slane %v3272_v7, 9  ;;  %v5997_v25 = vld [vmem:[#allocation2 + $0x100] sm:$0xff] }
 0x290   : > { %v5010_v21 = vpop.f32.mrf.mxu0  ;;  %3948 = vmatmul.bf16.gmra.mxu2 %v5996_v26  ;;  %v4397_v26 = vor.u32 %v4396_v46, %v7711_v13  ;;  %v4896_v35 = vunpack.c.l.b16 %v4838_v43  ;;  %v4393_v44 = vsel %vm6393_vm11, %v4388_v11, %v7711_v13  ;;  %v4841_v11 = vrot.slane %v7694_v17, 5 }
 0x291   : > { %v5078_v52 = vadd.f32 %v5010_v21, %v4653_v4  ;;  %v7713_v30 = vpop.f32.mrf.mxu1  ;;  %v4402_v4 = vrot.slane %v4400_v55, 5  ;;  %v3429_v57 = vsel %vm6820_vm14, %v5690_v50, %v3428_v36 }
 0x292   : > { %v3479_v55 = vunpack.c.l.b16 %v3429_v57 }
 0x293   : > { %5049 = vmatmul.bf16.gmra.mxu0 %v4913_v53  ;;  %v5173_v60 = vadd.f32 %v5172_v14, %v5078_v52  ;;  %v5211_v9 = vmul.f32 %v5078_v52, %v5078_v52  ;;  %v3909_v62 = vpop.f32.mrf.mxu2  ;;  %v3660_v14 = vadd.f32 %v7678_v42, %v7211_v37  ;;  %v4398_v53 = vrot.slane %v4397_v26, 4  ;;  %v6212_v37 = vld [vmem:[#allocation2 + $0x108] sm:$0x1] }
 0x294   : > { %3639 = vmatmul.bf16.gmra.mxu1 %v3495_v41  ;;  %v3430_v41 = vrot.slane %v3428_v36, 4  ;;  %v3431_v42 = vrot.slane %v6212_v37, 5 }
 0x295   : > { %v5242_v10 = vadd.f32 %v5241_v31, %v5211_v9  ;;  %v4587_v18 = vpop.f32.mrf.mxu3  ;;  %v4895_v31 = vunpack.c.l.b16 %v4835_v58  ;;  %v3974_v21 = vadd.f32 %v3909_v62, %v3660_v14  ;;  %v7728_v9 = vld [vmem:[#allocation2 + $0x114] sm:$0xf]  ;;  %v4403_v62 = vsel %vm6393_vm11, %v4398_v53, %v4402_v4  ;;  %v4691_v58 = vld [vmem:[#allocation2 + $0x100] sm:$0xe] }
 0x296   : > { %v4654_v16 = vadd.f32 %v4587_v18, %v3973_v15  ;;  %v4408_v14 = vshll.u32 %v4041_v45, 16  ;;  %v4414_v13 = vshll.u32 %v7728_v9, 16  ;;  %v4418_v43 = vshrl.u32 %v7728_v9, 16 }
 0x297   : > { %v3661_v4 = vadd.f32 %v7692_v20, %v7223_v3  ;;  %v5865_v7 = vrot.slane %v4691_v58, 9  ;;  %v4043_v20 = vld [vmem:[#allocation2 + $0x118] sm:$0x1] }
 0x298   : > { %v5012_v49 = vpop.f32.mrf.mxu0  ;;  %v4410_v37 = vrot.slane %v4408_v14, 5 }
 0x299   : > { %v5079_v6 = vadd.f32 %v5012_v49, %v4654_v16  ;;  %v7726_v24 = vpop.f32.mrf.mxu1  ;;  %v4405_v16 = vshrl.u32 %v4041_v45, 16  ;;  %v4914_v49 = vpack.c.b16 %v4896_v35, %v4895_v31  ;;  %v4420_v45 = vrot.slane %v4418_v43, 4 }
 0x29a   : > { %4629 = vmatmul.bf16.gmra.mxu3 %v4489_v39 }
 0x29b   : > { %v6046_v46 = vpack.c.bf16 %v5079_v6, %v5078_v52  ;;  %v5174_v15 = vadd.f32 %v5173_v60, %v5079_v6  ;;  %v5212_v32 = vmul.f32 %v5079_v6, %v5079_v6  ;;  %v3911_v54 = vpop.f32.mrf.mxu2  ;;  %v3432_v52 = vsel %vm6820_vm14, %v3430_v41, %v3431_v42 }
 0x29c   : > { %v3480_v18 = vunpack.c.l.b16 %v3432_v52  ;;  %v4473_v6 = vunpack.c.l.b16 %v4403_v62  ;;  %v4407_v50 = vrot.slane %v4405_v16, 4  ;;  %v3975_v41 = vadd.f32 %v3911_v54, %v3661_v4 }
 0x29d   : > { %6106 = vst [vmem:[%s7593_s27 + $0x20] sm:$0xff] %v6046_v46   ;;  %v5243_v60 = vadd.f32 %v5242_v10, %v5212_v32  ;;  %v4590_v26 = vpop.f32.mrf.mxu3  ;;  %v4472_v10 = vunpack.c.l.b16 %v4393_v44  ;;  %v4416_v42 = vrot.slane %v4414_v13, 5  ;;  %v4843_v46 = vrot.slane %v4841_v11, 4 }
 0x29e   : > { %v4655_v39 = vadd.f32 %v4590_v26, %v3974_v21  ;;  %v3496_v23 = vpack.c.b16 %v3480_v18, %v3479_v55  ;;  %v4844_v32 = vrot.slane %v7715_v48, 5  ;;  %v4842_v44 = vsel %vm6820_vm14, %v5865_v7, %v4841_v11 }
 0x29f   : > { %v4490_v57 = vpack.c.b16 %v4473_v6, %v4472_v10  ;;  %v4411_v54 = vor.u32 %v4410_v37, %v4407_v50  ;;  %v4421_v52 = vor.u32 %v4420_v45, %v4416_v42  ;;  %v3662_v48 = vadd.f32 %v7713_v30, %v7237_v2  ;;  %v5998_v10 = vld [vmem:[#allocation2 + $0x110] sm:$0xff] }
 0x2a0   : > { %v5015_v53 = vpop.f32.mrf.mxu0  ;;  %3953 = vmatmul.bf16.gmra.mxu2 %v5997_v25  ;;  %v4845_v26 = vsel %vm6820_vm14, %v4843_v46, %v4844_v32  ;;  %v4897_v16 = vunpack.c.l.b16 %v4842_v44  ;;  %v4692_v37 = vld [vmem:[#allocation2 + $0x110] sm:$0xe]  ;;  %v4848_v45 = vrot.slane %v7728_v9, 5 }
 0x2a1   : > { %v5080_v36 = vadd.f32 %v5015_v53, %v4655_v39  ;;  %v7745_v21 = vpop.f32.mrf.mxu1  ;;  %v4898_v39 = vunpack.c.l.b16 %v4845_v26  ;;  %v4412_v14 = vrot.slane %v4411_v54, 4  ;;  %v4422_v13 = vrot.slane %v4421_v52, 4 }
 0x2a2   : > { %v4850_v61 = vrot.slane %v4848_v45, 4  ;;  %v3664_v26 = vadd.f32 %v7745_v21, %v7268_v0 }
 0x2a3   : > { %5054 = vmatmul.bf16.gmra.mxu0 %v4914_v49  ;;  %v5175_v31 = vadd.f32 %v5174_v15, %v5080_v36  ;;  %v5213_v17 = vmul.f32 %v5080_v36, %v5080_v36  ;;  %v3914_v3 = vpop.f32.mrf.mxu2  ;;  %v4424_v15 = vshll.u32 %v4043_v20, 16  ;;  %v4915_v50 = vpack.c.b16 %v4898_v39, %v4897_v16 }
 0x2a4   : > { %3644 = vmatmul.bf16.gmra.mxu1 %v3496_v23  ;;  %v3976_v58 = vadd.f32 %v3914_v3, %v3662_v48  ;;  %v4417_v2 = vsel %vm6393_vm11, %v4412_v14, %v4416_v42  ;;  %v5866_v42 = vrot.slane %v4692_v37, 9 }
 0x2a5   : > { %v5244_v35 = vadd.f32 %v5243_v60, %v5213_v17  ;;  %v4592_v25 = vpop.f32.mrf.mxu3  ;;  %v4426_v4 = vrot.slane %v4424_v15, 5  ;;  %v4474_v32 = vunpack.c.l.b16 %v4417_v2 }
 0x2a6   : > { %v4656_v62 = vadd.f32 %v4592_v25, %v3975_v41 }
 0x2a7   : > { %v4427_v30 = vsel %vm6393_vm11, %v4422_v13, %v4426_v4 }
 0x2a8   : > { %v5017_v55 = vpop.f32.mrf.mxu0  ;;  %v4475_v3 = vunpack.c.l.b16 %v4427_v30 }
 0x2a9   : > { %v5081_v18 = vadd.f32 %v5017_v55, %v4656_v62  ;;  %v3607_v60 = vpop.f32.mrf.mxu1  ;;  %v4851_v62 = vrot.slane %v4043_v20, 5 }
 0x2aa   : > { %4634 = vmatmul.bf16.gmra.mxu3 %v4490_v57  ;;  %v3665_v0 = vadd.f32 %v3607_v60, %v7287_v47 }
 0x2ab   : > { %v6051_v43 = vpack.c.bf16 %v5081_v18, %v5080_v36  ;;  %v5176_v49 = vadd.f32 %v5175_v31, %v5081_v18  ;;  %v5214_v11 = vmul.f32 %v5081_v18, %v5081_v18  ;;  %v3916_v53 = vpop.f32.mrf.mxu2  ;;  %v3663_v36 = vadd.f32 %v7726_v24, %v7251_v63 }
 0x2ac   : > { %v4491_v63 = vpack.c.b16 %v4475_v3, %v4474_v32  ;;  %v4849_v24 = vsel %vm6820_vm14, %v5866_v42, %v4848_v45  ;;  %v4852_v15 = vsel %vm6820_vm14, %v4850_v61, %v4851_v62 }
 0x2ad   : > { %6107 = vst [vmem:[%s7593_s27 + $0x28] sm:$0xff] %v6051_v43   ;;  %v5245_v23 = vadd.f32 %v5244_v35, %v5214_v11  ;;  %v4595_v6 = vpop.f32.mrf.mxu3  ;;  %v3977_v46 = vadd.f32 %v3916_v53, %v3663_v36  ;;  %v4899_v18 = vunpack.c.l.b16 %v4849_v24  ;;  %v4900_v14 = vunpack.c.l.b16 %v4852_v15 }
 0x2ae   : > { %v4657_v7 = vadd.f32 %v4595_v6, %v3976_v58 }
 0x2af   : > { %v4916_v53 = vpack.c.b16 %v4900_v14, %v4899_v18 }
 0x2b0   : > { %v5020_v41 = vpop.f32.mrf.mxu0  ;;  %3958 = vmatmul.bf16.gmra.mxu2 %v5998_v10 }
 0x2b1   : > { %v5082_v31 = vadd.f32 %v5020_v41, %v4657_v7  ;;  %v3610_v17 = vpop.f32.mrf.mxu1 }
 0x2b2   : > { %v3666_v36 = vadd.f32 %v3610_v17, %v7306_v51 }
 0x2b3   : > { %5059 = vmatmul.bf16.gmra.mxu0 %v4915_v50  ;;  %v5177_v35 = vadd.f32 %v5176_v49, %v5082_v31  ;;  %v5215_v25 = vmul.f32 %v5082_v31, %v5082_v31  ;;  %v3919_v44 = vpop.f32.mrf.mxu2 }
 0x2b4   : > { %v3978_v20 = vadd.f32 %v3919_v44, %v3664_v26 }
 0x2b5   : > { %v5246_v57 = vadd.f32 %v5245_v23, %v5215_v25  ;;  %v4597_v54 = vpop.f32.mrf.mxu3 }
 0x2b6   : > { %v4658_v52 = vadd.f32 %v4597_v54, %v3977_v46 }
 0x2b8   : > { %v5022_v9 = vpop.f32.mrf.mxu0 }
 0x2b9   : > { %v5083_v55 = vadd.f32 %v5022_v9, %v4658_v52  ;;  %v3612_v48 = vpop.f32.mrf.mxu1 }
 0x2ba   : > { %4639 = vmatmul.bf16.gmra.mxu3 %v4491_v63  ;;  %v3667_v44 = vadd.f32 %v3612_v48, %v7321_v22 }
 0x2bb   : > { %v6056_v16 = vpack.c.bf16 %v5083_v55, %v5082_v31  ;;  %v5178_v39 = vadd.f32 %v5177_v35, %v5083_v55  ;;  %v5216_v58 = vmul.f32 %v5083_v55, %v5083_v55  ;;  %v3921_v13 = vpop.f32.mrf.mxu2 }
 0x2bc   : > { %v3979_v10 = vadd.f32 %v3921_v13, %v3665_v0 }
 0x2bd   : > { %6108 = vst [vmem:[%s7593_s27 + $0x30] sm:$0xff] %v6056_v16   ;;  %v5247_v43 = vadd.f32 %v5246_v57, %v5216_v58  ;;  %v4600_v49 = vpop.f32.mrf.mxu3 }
 0x2be   : > { %v4659_v11 = vadd.f32 %v4600_v49, %v3978_v20 }
 0x2c0   : > { %v5025_v4 = vpop.f32.mrf.mxu0 }
 0x2c1   : > { %v5084_v33 = vadd.f32 %v5025_v4, %v4659_v11  ;;  %v3615_v21 = vpop.f32.mrf.mxu1 }
 0x2c2   : > { %v3668_v26 = vadd.f32 %v3615_v21, %v7338_v27 }
 0x2c3   : > { %5064 = vmatmul.bf16.gmra.mxu0 %v4916_v53  ;;  %v5179_v23 = vadd.f32 %v5178_v39, %v5084_v33  ;;  %v5217_v6 = vmul.f32 %v5084_v33, %v5084_v33  ;;  %v3924_v7 = vpop.f32.mrf.mxu2 }
 0x2c4   : > { %v3980_v31 = vadd.f32 %v3924_v7, %v3666_v36 }
 0x2c5   : > { %v5248_v50 = vadd.f32 %v5247_v43, %v5217_v6  ;;  %v4602_v2 = vpop.f32.mrf.mxu3 }
 0x2c6   : > { %v4660_v30 = vadd.f32 %v4602_v2, %v3979_v10 }
 0x2c8   : > { %v5027_v41 = vpop.f32.mrf.mxu0 }
 0x2c9   : > { %v5085_v37 = vadd.f32 %v5027_v41, %v4660_v30  ;;  %v3617_v45 = vpop.f32.mrf.mxu1 }
 0x2ca   : > { %v3669_v43 = vadd.f32 %v3617_v45, %v7350_v40 }
 0x2cb   : > { %v6061_v46 = vpack.c.bf16 %v5085_v37, %v5084_v33  ;;  %v5180_v32 = vadd.f32 %v5179_v23, %v5085_v37  ;;  %v5218_v47 = vmul.f32 %v5085_v37, %v5085_v37  ;;  %v3926_v60 = vpop.f32.mrf.mxu2 }
 0x2cc   : > { %v3981_v57 = vadd.f32 %v3926_v60, %v3667_v44 }
 0x2cd   : > { %6109 = vst [vmem:[%s7593_s27 + $0x38] sm:$0xff] %v6061_v46   ;;  %v5249_v3 = vadd.f32 %v5248_v50, %v5218_v47  ;;  %v4605_v35 = vpop.f32.mrf.mxu3 }
 0x2ce   : > { %v4661_v25 = vadd.f32 %v4605_v35, %v3980_v31 }
 0x2d0   : > { %v5030_v42 = vpop.f32.mrf.mxu0 }
 0x2d1   : > { %v5086_v61 = vadd.f32 %v5030_v42, %v4661_v25  ;;  %v3620_v62 = vpop.f32.mrf.mxu1 }
 0x2d2   : > { %v3670_v6 = vadd.f32 %v3620_v62, %v7371_v19 }
 0x2d3   : > { %v5181_v54 = vadd.f32 %v5180_v32, %v5086_v61  ;;  %v5219_v51 = vmul.f32 %v5086_v61, %v5086_v61  ;;  %v3929_v17 = vpop.f32.mrf.mxu2 }
 0x2d4   : > { %v3982_v18 = vadd.f32 %v3929_v17, %v3668_v26 }
 0x2d5   : > { %v5250_v52 = vadd.f32 %v5249_v3, %v5219_v51  ;;  %v4607_v63 = vpop.f32.mrf.mxu3 }
 0x2d6   : > { %v4662_v24 = vadd.f32 %v4607_v63, %v3981_v57 }
 0x2d8   : > { %v5032_v9 = vpop.f32.mrf.mxu0 }
 0x2d9   : > { %v5087_v15 = vadd.f32 %v5032_v9, %v4662_v24  ;;  %v3622_v55 = vpop.f32.mrf.mxu1 }
 0x2da   : > { %v3671_v32 = vadd.f32 %v3622_v55, %v7387_v29 }
 0x2db   : > { %v6066_v20 = vpack.c.bf16 %v5087_v15, %v5086_v61  ;;  %v5182_v16 = vadd.f32 %v5181_v54, %v5087_v15  ;;  %v5220_v39 = vmul.f32 %v5087_v15, %v5087_v15  ;;  %v3931_v22 = vpop.f32.mrf.mxu2 }
 0x2dc   : > { %v3983_v11 = vadd.f32 %v3931_v22, %v3669_v43 }
 0x2dd   : > { %6110 = vst [vmem:[%s7593_s27 + $0x40] sm:$0xff] %v6066_v20   ;;  %v5251_v48 = vadd.f32 %v5250_v52, %v5220_v39  ;;  %v4610_v58 = vpop.f32.mrf.mxu3 }
 0x2de   : > { %v4663_v14 = vadd.f32 %v4610_v58, %v3982_v18 }
 0x2e0   : > { %v5035_v13 = vpop.f32.mrf.mxu0 }
 0x2e1   : > { %v5088_v49 = vadd.f32 %v5035_v13, %v4663_v14  ;;  %v3625_v0 = vpop.f32.mrf.mxu1 }
 0x2e2   : > { %v3672_v57 = vadd.f32 %v3625_v0, %v7405_v56 }
 0x2e3   : > { %v5183_v53 = vadd.f32 %v5182_v16, %v5088_v49  ;;  %v5221_v4 = vmul.f32 %v5088_v49, %v5088_v49  ;;  %v3934_v27 = vpop.f32.mrf.mxu2 }
 0x2e4   : > { %v3984_v50 = vadd.f32 %v3934_v27, %v3670_v6 }
 0x2e5   : > { %v5252_v33 = vadd.f32 %v5251_v48, %v5221_v4  ;;  %v4612_v21 = vpop.f32.mrf.mxu3 }
 0x2e6   : > { %v4664_v10 = vadd.f32 %v4612_v21, %v3983_v11 }
 0x2e8   : > { %v5037_v23 = vpop.f32.mrf.mxu0 }
 0x2e9   : > { %v5089_v7 = vadd.f32 %v5037_v23, %v4664_v10  ;;  %v3627_v45 = vpop.f32.mrf.mxu1 }
 0x2ea   : > { %v3673_v55 = vadd.f32 %v3627_v45, %v7424_v59 }
 0x2eb   : > { %v6071_v2 = vpack.c.bf16 %v5089_v7, %v5088_v49  ;;  %v5184_v30 = vadd.f32 %v5183_v53, %v5089_v7  ;;  %v5222_v41 = vmul.f32 %v5089_v7, %v5089_v7  ;;  %v3936_v36 = vpop.f32.mrf.mxu2 }
 0x2ec   : > { %v3985_v60 = vadd.f32 %v3936_v36, %v3671_v32 }
 0x2ed   : > { %6111 = vst [vmem:[%s7593_s27 + $0x48] sm:$0xff] %v6071_v2   ;;  %v5253_v40 = vadd.f32 %v5252_v33, %v5222_v41  ;;  %v4615_v37 = vpop.f32.mrf.mxu3 }
 0x2ee   : > { %v4665_v31 = vadd.f32 %v4615_v37, %v3984_v50 }
 0x2f0   : > { %v5040_v46 = vpop.f32.mrf.mxu0 }
 0x2f1   : > { %v5090_v47 = vadd.f32 %v5040_v46, %v4665_v31  ;;  %v3630_v61 = vpop.f32.mrf.mxu1 }
 0x2f2   : > { %v3674_v43 = vadd.f32 %v3630_v61, %v7443_v12 }
 0x2f3   : > { %v5185_v3 = vadd.f32 %v5184_v30, %v5090_v47  ;;  %v5223_v35 = vmul.f32 %v5090_v47, %v5090_v47  ;;  %v3939_v19 = vpop.f32.mrf.mxu2 }
 0x2f4   : > { %v3986_v51 = vadd.f32 %v3939_v19, %v3672_v57 }
 0x2f5   : > { %v5254_v25 = vadd.f32 %v5253_v40, %v5223_v35  ;;  %v4617_v42 = vpop.f32.mrf.mxu3 }
 0x2f6   : > { %v4666_v44 = vadd.f32 %v4617_v42, %v3985_v60 }
 0x2f8   : > { %v5042_v62 = vpop.f32.mrf.mxu0 }
 0x2f9   : > { %v5091_v54 = vadd.f32 %v5042_v62, %v4666_v44  ;;  %v3632_v20 = vpop.f32.mrf.mxu1 }
 0x2fa   : > { %v3675_v6 = vadd.f32 %v3632_v20, %v7458_v8 }
 0x2fb   : > { %v6076_v17 = vpack.c.bf16 %v5091_v54, %v5090_v47  ;;  %v5186_v52 = vadd.f32 %v5185_v3, %v5091_v54  ;;  %v5224_v63 = vmul.f32 %v5091_v54, %v5091_v54  ;;  %v3941_v24 = vpop.f32.mrf.mxu2 }
 0x2fc   : > { %v3987_v16 = vadd.f32 %v3941_v24, %v3673_v55 }
 0x2fd   : > { %6112 = vst [vmem:[%s7593_s27 + $0x50] sm:$0xff] %v6076_v17   ;;  %v5255_v29 = vadd.f32 %v5254_v25, %v5224_v63  ;;  %v4620_v9 = vpop.f32.mrf.mxu3 }
 0x2fe   : > { %v4667_v26 = vadd.f32 %v4620_v9, %v3986_v51 }
 0x300   : > { %v5045_v15 = vpop.f32.mrf.mxu0 }
 0x301   : > { %v5092_v18 = vadd.f32 %v5045_v15, %v4667_v26  ;;  %v3635_v59 = vpop.f32.mrf.mxu1 }
 0x302   : > { %v3676_v31 = vadd.f32 %v3635_v59, %v7475_v38 }
 0x303   : > { %v5187_v39 = vadd.f32 %v5186_v52, %v5092_v18  ;;  %v5225_v22 = vmul.f32 %v5092_v18, %v5092_v18  ;;  %v3944_v56 = vpop.f32.mrf.mxu2 }
 0x304   : > { %v3988_v11 = vadd.f32 %v3944_v56, %v3674_v43 }
 0x305   : > { %v5256_v48 = vadd.f32 %v5255_v29, %v5225_v22  ;;  %v4622_v58 = vpop.f32.mrf.mxu3 }
 0x306   : > { %v4668_v14 = vadd.f32 %v4622_v58, %v3987_v16 }
 0x308   : > { %v5047_v13 = vpop.f32.mrf.mxu0 }
 0x309   : > { %v5093_v49 = vadd.f32 %v5047_v13, %v4668_v14  ;;  %v3637_v40 = vpop.f32.mrf.mxu1 }
 0x30a   : > { %v3677_v61 = vadd.f32 %v3637_v40, %v7487_v34 }
 0x30b   : > { %v6081_v53 = vpack.c.bf16 %v5093_v49, %v5092_v18  ;;  %v5188_v4 = vadd.f32 %v5187_v39, %v5093_v49  ;;  %v5226_v27 = vmul.f32 %v5093_v49, %v5093_v49  ;;  %v3946_v0 = vpop.f32.mrf.mxu2 }
 0x30c   : > { %v3989_v50 = vadd.f32 %v3946_v0, %v3675_v6 }
 0x30d   : > { %6113 = vst [vmem:[%s7593_s27 + $0x58] sm:$0xff] %v6081_v53   ;;  %v5257_v33 = vadd.f32 %v5256_v48, %v5226_v27  ;;  %v4625_v21 = vpop.f32.mrf.mxu3 }
 0x30e   : > { %v4669_v10 = vadd.f32 %v4625_v21, %v3988_v11 }
 0x310   : > { %v5050_v23 = vpop.f32.mrf.mxu0 }
 0x311   : > { %v5094_v7 = vadd.f32 %v5050_v23, %v4669_v10  ;;  %v3640_v42 = vpop.f32.mrf.mxu1 }
 0x312   : > { %v3678_v29 = vadd.f32 %v3640_v42, %v7506_v5 }
 0x313   : > { %v5189_v2 = vadd.f32 %v5188_v4, %v5094_v7  ;;  %v5227_v30 = vmul.f32 %v5094_v7, %v5094_v7  ;;  %v3949_v12 = vpop.f32.mrf.mxu2 }
 0x314   : > { %v3990_v32 = vadd.f32 %v3949_v12, %v3676_v31  ;;  %v7838_v12 = vld [vmem:[#allocation3_spill] sm:$0xff] }
 0x315   : > { %v5258_v41 = vadd.f32 %v5257_v33, %v5227_v30  ;;  %v4627_v36 = vpop.f32.mrf.mxu3 }
 0x316   : > { %v4670_v37 = vadd.f32 %v4627_v36, %v3989_v50 }
 0x318   : > { %v5052_v45 = vpop.f32.mrf.mxu0 }
 0x319   : > { %v5095_v46 = vadd.f32 %v5052_v45, %v4670_v37  ;;  %v3642_v26 = vpop.f32.mrf.mxu1 }
 0x31a   : > { %v3679_v48 = vadd.f32 %v3642_v26, %v7521_v1 }
 0x31b   : > { %v6086_v47 = vpack.c.bf16 %v5095_v46, %v5094_v7  ;;  %v5190_v60 = vadd.f32 %v5189_v2, %v5095_v46  ;;  %v5228_v3 = vmul.f32 %v5095_v46, %v5095_v46  ;;  %v3951_v35 = vpop.f32.mrf.mxu2 }
 0x31c   : > { %v3991_v57 = vadd.f32 %v3951_v35, %v3677_v61 }
 0x31d   : > { %6114 = vst [vmem:[%s7593_s27 + $0x60] sm:$0xff] %v6086_v47   ;;  %v5259_v8 = vadd.f32 %v5258_v41, %v5228_v3  ;;  %v4630_v19 = vpop.f32.mrf.mxu3 }
 0x31e   : > { %v4671_v25 = vadd.f32 %v4630_v19, %v3990_v32 }
 0x320   : > { %v5055_v44 = vpop.f32.mrf.mxu0 }
 0x321   : > { %v5096_v62 = vadd.f32 %v5055_v44, %v4671_v25  ;;  %v3645_v5 = vpop.f32.mrf.mxu1 }
 0x322   : > { %v3680_v0 = vadd.f32 %v3645_v5, %v7538_v28 }
 0x323   : > { %v5191_v54 = vadd.f32 %v5190_v60, %v5096_v62  ;;  %v5229_v51 = vmul.f32 %v5096_v62, %v5096_v62  ;;  %v3954_v38 = vpop.f32.mrf.mxu2 }
 0x324   : > { %v3992_v15 = vadd.f32 %v3954_v38, %v3678_v29 }
 0x325   : > { %v5260_v17 = vadd.f32 %v5259_v8, %v5229_v51  ;;  %v4632_v52 = vpop.f32.mrf.mxu3 }
 0x326   : > { %v4672_v63 = vadd.f32 %v4632_v52, %v3991_v57 }
 0x328   : > { %v5057_v24 = vpop.f32.mrf.mxu0 }
 0x329   : > { %v5097_v9 = vadd.f32 %v5057_v24, %v4672_v63  ;;  %v3647_v7 = vpop.f32.mrf.mxu1 }
 0x32a   : > { %v3681_v41 = vadd.f32 %v3647_v7, %v7838_v12 }
 0x32b   : > { %v6091_v55 = vpack.c.bf16 %v5097_v9, %v5096_v62  ;;  %v5192_v18 = vadd.f32 %v5191_v54, %v5097_v9  ;;  %v5230_v20 = vmul.f32 %v5097_v9, %v5097_v9  ;;  %v3956_v16 = vpop.f32.mrf.mxu2 }
 0x32c   : > { %v3993_v14 = vadd.f32 %v3956_v16, %v3679_v48 }
 0x32d   : > { %6115 = vst [vmem:[%s7593_s27 + $0x68] sm:$0xff] %v6091_v55   ;;  %v5261_v34 = vadd.f32 %v5260_v17, %v5230_v20  ;;  %v4635_v39 = vpop.f32.mrf.mxu3 }
 0x32e   : > { %v4673_v22 = vadd.f32 %v4635_v39, %v3992_v15 }
 0x330   : > { %v5060_v56 = vpop.f32.mrf.mxu0 }
 0x331   : > { %v5098_v58 = vadd.f32 %v5060_v56, %v4673_v22 }
 0x333   : > { %v5193_v13 = vadd.f32 %v5192_v18, %v5098_v58  ;;  %v5231_v43 = vmul.f32 %v5098_v58, %v5098_v58  ;;  %v3959_v53 = vpop.f32.mrf.mxu2 }
 0x334   : > { %v3994_v33 = vadd.f32 %v3959_v53, %v3680_v0 }
 0x335   : > { %v5262_v49 = vadd.f32 %v5261_v34, %v5231_v43  ;;  %v4637_v11 = vpop.f32.mrf.mxu3 }
 0x336   : > { %v4674_v4 = vadd.f32 %v4637_v11, %v3993_v14 }
 0x338   : > { %v5062_v27 = vpop.f32.mrf.mxu0 }
 0x339   : > { %v5099_v59 = vadd.f32 %v5062_v27, %v4674_v4 }
 0x33b   : > { %v6096_v21 = vpack.c.bf16 %v5099_v59, %v5098_v58  ;;  %v5194_v10 = vadd.f32 %v5193_v13, %v5099_v59  ;;  %v5232_v23 = vmul.f32 %v5099_v59, %v5099_v59  ;;  %v3961_v2 = vpop.f32.mrf.mxu2 }
 0x33c   : > { %v3995_v40 = vadd.f32 %v3961_v2, %v3681_v41 }
 0x33d   : > { %6116 = vst [vmem:[%s7593_s27 + $0x70] sm:$0xff] %v6096_v21   ;;  %v5263_v1 = vadd.f32 %v5262_v49, %v5232_v23  ;;  %v4640_v6 = vpop.f32.mrf.mxu3 }
 0x33e   : > { %v4675_v50 = vadd.f32 %v4640_v6, %v3994_v33 }
 0x340   : > { %v5065_v30 = vpop.f32.mrf.mxu0 }
 0x341   : > { %v5100_v36 = vadd.f32 %v5065_v30, %v4675_v50 }
 0x343   : > { %v5195_v37 = vadd.f32 %v5194_v10, %v5100_v36  ;;  %v5233_v45 = vmul.f32 %v5100_v36, %v5100_v36 }
 0x345   : > { %v5264_v28 = vadd.f32 %v5263_v1, %v5233_v45  ;;  %v4642_v31 = vpop.f32.mrf.mxu3 }
 0x346   : > { %v4676_v46 = vadd.f32 %v4642_v31, %v3995_v40 }
 0x348   : > { %v5067_v32 = vpop.f32.mrf.mxu0 }
 0x349   : > { %v5101_v47 = vadd.f32 %v5067_v32, %v4676_v46 }
 0x34b   : > { %v6101_v60 = vpack.c.bf16 %v5101_v47, %v5100_v36  ;;  %v5196_v3 = vadd.f32 %v5195_v37, %v5101_v47  ;;  %v5234_v35 = vmul.f32 %v5101_v47, %v5101_v47 }
 0x34d   : > { %6117 = vst [vmem:[%s7593_s27 + $0x78] sm:$0xff] %v6101_v60   ;;  %v5197_v8 = vrot.slane %v5196_v3, 4  ;;  %v5265_v19 = vadd.f32 %v5264_v28, %v5234_v35 }
 0x34f   : > { %v5198_v25 = vadd.f32 %v5197_v8, %v5196_v3  ;;  %v5266_v42 = vrot.slane %v5265_v19, 4 }
 0x351   : > { %v5199_v44 = vrot.slane %v5198_v25, 2  ;;  %v5267_v61 = vadd.f32 %v5266_v42, %v5265_v19 }
 0x353   : > { %v5200_v62 = vadd.f32 %v5199_v44, %v5198_v25  ;;  %v5268_v57 = vrot.slane %v5267_v61, 2 }
 0x355   : > { %v5201_v54 = vrot.slane %v5200_v62, 1  ;;  %v5269_v51 = vadd.f32 %v5268_v57, %v5267_v61 }
 0x357   : > { %v5270_v38 = vrot.slane %v5269_v51, 1  ;;  %v5202_v17 = vadd.f32 %v5201_v54, %v5200_v62 }
 0x359   : > { %v5271_v52 = vadd.f32 %v5270_v38, %v5269_v51 }
 0x35b   : > { %v5273_v63 = vsel %vm413_vm0, %v5202_v17, %v5271_v52 }
 0x35c   : > { %5274 = vst [vmem:[%s235_s7] sm:$0x3] %v5273_v63 }
 0x35d PF: > { %s16_s18 = sadd.s32 1, %s6219_s18  }
 0x35e   : > { %p13_p4 = scmp.ge.s32.totalorder %s16_s18, 4  }
 0x360   :  { %15 = sbr.rel (!%p13_p4) target bundleno = 1 (0x1), region = 81 }

// kernel: basic_block_v2.3
= control target key start
LH: loop header
LB: loop body
LE: loop exit
PB: predicated region body
PF: predicated region fallthrough
CT: control target
= control target key end

     0   :  { %s6185_s18 = smov 0   ;;  %s7820_s0 = inlined_call_operand.vmem [shape: bf16[2,16,16,128], index: 0, kind: input, shape index: {}]   ;;  %s7821_s1 = inlined_call_operand.vmem [shape: f32[2,16,16,128], index: 1, kind: input, shape index: {}, may-alias: {1,5}]   ;;  %s7822_s2 = inlined_call_operand.vmem [shape: f32[1,128], index: 2, kind: input, shape index: {}]   ;;  %s7823_s3 = inlined_call_operand.vmem [shape: f32[1,128], index: 3, kind: input, shape index: {}]   ;;  %s7824_s4 = inlined_call_operand.vmem [shape: bf16[1152,128], index: 4, kind: input, shape index: {}]   ;;  %s7825_s5 = inlined_call_operand.vmem [shape: f32[2,16,16,128], index: 5, kind: output, shape index: {}, may-alias: {1,5}]  }
   0x1 LB: > { %s5306_s19 = sadd.s32 4294967295, %s6152_s18   ;;  %p5310_p0 = scmp.ge.s32.totalorder %s6152_s18, 1  ;;  %s6152_s18 = sphi %s6185_s18, %s15_s18  }
   0x2   : > { %p197_p1 = scmp.lt.s32.totalorder %s6152_s18, 3 }
   0x4   : > { %p198_p2 = pnand %p5310_p0, %p197_p1 }
   0x6   : > { %201 = sbr.rel (%p198_p2) target bundleno = 854 (0x356), region = 40 }
   0xb   : > { %v5881_v0 = vld [vmem:[%s7824_s4 + $0x78] sm:$0xff]  ;;  %p230_p3 = scmp.lt.s32.totalorder %s5306_s19, 1  ;;  %vm454_vm0 = vcmask 1040384   ;;  %vm455_vm1 = vsmask.f32 256  ;;  %v5880_v1 = vld [vmem:[%s7824_s4 + $0x70] sm:$0xff] }
   0xc   : > { %6049 = vmatpush.bf16.msra.mxu1 %v5881_v0  ;;  %6050 = vmatpush.bf16.msra.mxu2 %v5881_v0  ;;  %vm6204_vm2 = vmand %vm454_vm0, %vm455_vm1  ;;  %v466_v3 = vld [vmem:[#allocation2 + $0x40] sm:$0x1]  ;;  %vm505_vm3 = vsmask.f32 7938  ;;  %v516_v7 = vld [vmem:[#allocation2 + $0x48] sm:$0x1] }
   0xd   : > { %s7913_s19 = smov (!%p230_p3, %s5306_s19), 1  ;;  %6051 = vmatpush.bf16.msra.mxu3 %v5881_v0  ;;  %1570 = vmatpush.bf16.msra.mxu0 %v5881_v0  ;;  %v6216_v4 = vld [vmem:[%s7822_s2] ss:$0 sm:$0xff]  ;;  %v467_v5 = vsel %vm6204_vm2, 0, %v466_v3  ;;  %vm6222_vm4 = vmand %vm454_vm0, %vm505_vm3  ;;  %v5879_v8 = vld [vmem:[%s7824_s4 + $0x68] sm:$0xff]  ;;  %v6154_v22 = vmov 0  }
   0xe   : > { %s5847_s24 = sshll.u32 %s7913_s19, 7  ;;  %468 = vst [vmem:[#allocation2 + $0x40] sm:$0x1] %v467_v5  ;;  %v517_v10 = vsel %vm6222_vm4, 0, %v516_v7  ;;  %v6235_v13 = vld [vmem:[%s7823_s3] ss:$0 sm:$0xff] }
   0xf   : > { %s6211_s27 = scalar_lea.vmem %s7820_s0, %s5847_s24  ;;  %518 = vst [vmem:[#allocation2 + $0x48] sm:$0x1] %v517_v10  ;;  %v478_v18 = vld [vmem:[#allocation2 + $0x80] sm:$0x1]  ;;  %v528_v19 = vld [vmem:[#allocation2 + $0x88] sm:$0x1] }
  0x10   : > { %6052 = vmatpush.bf16.msra.mxu1 %v5880_v1  ;;  %6053 = vmatpush.bf16.msra.mxu2 %v5880_v1  ;;  %v6036_v9 = vld [vmem:[%s6211_s27 + $0x18] sm:$0xff]   ;;  %446 = vst [vmem:[#allocation2] sm:$0xf] %v6154_v22  ;;  %v479_v25 = vsel %vm6204_vm2, 0, %v478_v18  ;;  %v529_v26 = vsel %vm6222_vm4, 0, %v528_v19  ;;  %v5878_v28 = vld [vmem:[%s7824_s4 + $0x60] sm:$0xff] }
  0x11   : > { %6054 = vmatpush.bf16.msra.mxu3 %v5880_v1  ;;  %1571 = vmatpush.bf16.msra.mxu0 %v5880_v1  ;;  %v5984_v11 = vunpack.c.l.bf16 %v6036_v9  ;;  %v5985_v12 = vunpack.c.h.bf16 %v6036_v9  ;;  %v6040_v14 = vld [vmem:[%s6211_s27 + $0x38] sm:$0xff]   ;;  %v490_v27 = vld [vmem:[#allocation2 + $0xc0] sm:$0x1]  ;;  %vm877_vm5 = vcmask 1043456   ;;  %480 = vst [vmem:[#allocation2 + $0x80] sm:$0x1] %v479_v25 }
  0x12   : > { %v6044_v15 = vld [vmem:[%s6211_s27 + $0x58] sm:$0xff]   ;;  %v6000_v16 = vunpack.c.l.bf16 %v6040_v14  ;;  %v6001_v17 = vunpack.c.h.bf16 %v6040_v14  ;;  %v6253_v32 = vld [vmem:[%s6211_s27 + $0x20] sm:$0xff]   ;;  %vm555_vm6 = vsmask.f32 4368  ;;  %530 = vst [vmem:[#allocation2 + $0x88] sm:$0x1] %v529_v26  ;;  %vm6295_vm8 = vmand %vm877_vm5, %vm505_vm3 }
  0x13   : > { %v6016_v20 = vunpack.c.l.bf16 %v6044_v15  ;;  %v6017_v21 = vunpack.c.h.bf16 %v6044_v15  ;;  %v321_v23 = vmul.f32 %v6216_v4, %v5984_v11  ;;  %v322_v24 = vmul.f32 %v6216_v4, %v5985_v12  ;;  %v540_v36 = vld [vmem:[#allocation2 + $0xc8] sm:$0x1]  ;;  %447 = vst [vmem:[#allocation2 + $0x4] sm:$0xf] %v6154_v22  ;;  %v5877_v45 = vld [vmem:[%s7824_s4 + $0x58] sm:$0xff]  ;;  %v5876_v59 = vld [vmem:[%s7824_s4 + $0x50] sm:$0xff] }
  0x14   : > { %6055 = vmatpush.bf16.msra.mxu1 %v5879_v8  ;;  %6056 = vmatpush.bf16.msra.mxu2 %v5879_v8  ;;  %v329_v29 = vmul.f32 %v6216_v4, %v6000_v16  ;;  %v330_v30 = vmul.f32 %v6216_v4, %v6001_v17  ;;  %v491_v40 = vsel %vm6204_vm2, 0, %v490_v27  ;;  %v5988_v44 = vunpack.c.l.bf16 %v6253_v32  ;;  %448 = vst [vmem:[#allocation2 + $0x8] sm:$0x1] %v6154_v22  ;;  %vm6283_vm7 = vmor %vm455_vm1, %vm555_vm6  ;;  %v5875_v15 = vld [vmem:[%s7824_s4 + $0x48] sm:$0xff]  ;;  %v5954_v6 = vld [vmem:[%s7824_s4 + $0x1c0] sm:$0xff]  ;;  %s5848_s24 = sshll.u32 %s7913_s19, 8 }
  0x15   : > { %v337_v31 = vmul.f32 %v6216_v4, %v6016_v20  ;;  %6057 = vmatpush.bf16.msra.mxu3 %v5879_v8  ;;  %1572 = vmatpush.bf16.msra.mxu0 %v5879_v8  ;;  %v356_v33 = vadd.f32 %v6235_v13, %v321_v23  ;;  %v357_v34 = vadd.f32 %v6235_v13, %v322_v24  ;;  %v541_v49 = vsel %vm6222_vm4, 0, %v540_v36  ;;  %v900_v0 = vld [vmem:[#allocation2 + $0x40] sm:$0xf]  ;;  %s7425_s28 = scalar_lea.vmem %s7821_s1, %s5848_s24  ;;  %s7536_s6 = scalar_lea.vmem %s7825_s5, %s5848_s24 }
  0x16   : > { %v338_v35 = vmul.f32 %v6216_v4, %v6017_v21  ;;  %v364_v37 = vadd.f32 %v6235_v13, %v329_v29  ;;  %v365_v38 = vadd.f32 %v6235_v13, %v330_v30  ;;  %492 = vst [vmem:[#allocation2 + $0xc0] sm:$0x1] %v491_v40  ;;  %v5989_v54 = vunpack.c.h.bf16 %v6253_v32  ;;  %v904_v11 = vld [vmem:[#allocation2 + $0x48] sm:$0x1]  ;;  %v5888_v32 = vld [vmem:[%s7824_s4 + $0xb0] sm:$0xff] }
  0x17   : > { %v372_v39 = vadd.f32 %v6235_v13, %v337_v31  ;;  %v388_v41 = vmax.f32 %v356_v33, 0.0  ;;  %v389_v42 = vmax.f32 %v357_v34, 0.0  ;;  %542 = vst [vmem:[#allocation2 + $0xc8] sm:$0x1] %v541_v49  ;;  %v6271_v53 = vld [vmem:[#allocation2] sm:$0xf] }
  0x18   : > { %v373_v43 = vadd.f32 %v6235_v13, %v338_v35  ;;  %6058 = vmatpush.bf16.msra.mxu1 %v5878_v28  ;;  %6059 = vmatpush.bf16.msra.mxu2 %v5878_v28  ;;  %v396_v46 = vmax.f32 %v364_v37, 0.0  ;;  %v397_v47 = vmax.f32 %v365_v38, 0.0  ;;  %v1059_v58 = vshrl.u32 %v6271_v53, 16  ;;  %v928_v19 = vld [vmem:[#allocation2 + $0x80] sm:$0xf] }
  0x19   : > { %v404_v48 = vmax.f32 %v372_v39, 0.0  ;;  %6060 = vmatpush.bf16.msra.mxu3 %v5878_v28  ;;  %1573 = vmatpush.bf16.msra.mxu0 %v5878_v28  ;;  %v420_v50 = vpack.c.bf16 %v388_v41, %v388_v41  ;;  %v421_v51 = vpack.c.bf16 %v389_v42, %v389_v42  ;;  %vm1055_vm9 = vsmask.f32 3328  ;;  %v932_v27 = vld [vmem:[#allocation2 + $0x88] sm:$0x1] }
  0x1a   : > { %v405_v52 = vmax.f32 %v373_v43, 0.0  ;;  %v428_v55 = vpack.c.bf16 %v396_v46, %v396_v46  ;;  %v429_v56 = vpack.c.bf16 %v397_v47, %v397_v47  ;;  %v6300_v21 = vrot.slane %v1059_v58, 4  ;;  %450 = vst [vmem:[#allocation2 + $0x110] sm:$0xf] %v6154_v22  ;;  %v6304_v33 = vld [vmem:[#allocation2 + $0x50] sm:$0x1] }
  0x1b   : > { %v6274_v57 = vpack.c.bf16 %v404_v48, %v404_v48  ;;  %v609_v60 = vshrl.u32 %v420_v50, 16  ;;  %v612_v61 = vshll.u32 %v420_v50, 16  ;;  %v617_v62 = vshrl.u32 %v421_v51, 16  ;;  %451 = vst [vmem:[#allocation2 + $0x114] sm:$0xf] %v6154_v22  ;;  %v5874_v46 = vld [vmem:[%s7824_s4 + $0x40] sm:$0xff] }
  0x1c   : > { %v620_v63 = vshll.u32 %v421_v51, 16  ;;  %6061 = vmatpush.bf16.msra.mxu1 %v5877_v45  ;;  %6062 = vmatpush.bf16.msra.mxu2 %v5877_v45  ;;  %v677_v1 = vshrl.u32 %v428_v55, 16  ;;  %v680_v3 = vshll.u32 %v428_v55, 16  ;;  %v685_v5 = vshrl.u32 %v429_v56, 16  ;;  %v992_v38 = vld [vmem:[#allocation2 + $0x4] sm:$0xf] }
  0x1d   : > { %v688_v7 = vshll.u32 %v429_v56, 16  ;;  %6063 = vmatpush.bf16.msra.mxu3 %v5877_v45  ;;  %1574 = vmatpush.bf16.msra.mxu0 %v5877_v45  ;;  %v611_v9 = vrot.slane %v609_v60, 7  ;;  %v619_v10 = vrot.slane %v617_v62, 7  ;;  %v6287_v12 = vpack.c.bf16 %v405_v52, %v405_v52  ;;  %v1039_v39 = vld [vmem:[#allocation2 + $0x8] sm:$0x1]  ;;  %v6336_v62 = vld [vmem:[%s6211_s27 + $0x40] sm:$0xff]  }
  0x1e   : > { %v745_v14 = vshrl.u32 %v6274_v57, 16  ;;  %v679_v17 = vrot.slane %v677_v1, 7  ;;  %v687_v18 = vrot.slane %v685_v5, 7  ;;  %v748_v20 = vshll.u32 %v6274_v57, 16  ;;  %v956_v45 = vld [vmem:[#allocation2 + $0xc0] sm:$0xf] }
  0x1f   : > { %v614_v23 = vor.u32 %v612_v61, %v611_v9  ;;  %v615_v24 = vrot.slane %v611_v9, 4  ;;  %v622_v25 = vor.u32 %v620_v63, %v619_v10  ;;  %v624_v26 = vrot.slane %v619_v10, 4  ;;  %v960_v50 = vld [vmem:[#allocation2 + $0xc8] sm:$0x1]  ;;  %v5913_v5 = vld [vmem:[%s7824_s4 + $0xf8] sm:$0xff] }
  0x20   : > { %vm1056_vm10 = vsmask.f32 7440  ;;  %6064 = vmatpush.bf16.msra.mxu1 %v5876_v59  ;;  %6065 = vmatpush.bf16.msra.mxu2 %v5876_v59  ;;  %v682_v28 = vor.u32 %v680_v3, %v679_v17  ;;  %v683_v29 = vrot.slane %v679_v17, 4  ;;  %v690_v30 = vor.u32 %v688_v7, %v687_v18  ;;  %v5873_v9 = vld [vmem:[%s7824_s4 + $0x38] sm:$0xff]  ;;  %452 = vst [vmem:[#allocation2 + $0x118] sm:$0x1] %v6154_v22 }
  0x21   : > { %v692_v31 = vrot.slane %v687_v18, 4  ;;  %6066 = vmatpush.bf16.msra.mxu3 %v5876_v59  ;;  %1575 = vmatpush.bf16.msra.mxu0 %v5876_v59  ;;  %v623_v34 = vsel %vm6283_vm7, %v615_v24, %v622_v25  ;;  %v901_v35 = vsel %vm6295_vm8, %v614_v23, %v900_v0  ;;  %v905_v36 = vsel %vm6204_vm2, %v624_v26, %v904_v11  ;;  %v5889_v59 = vld [vmem:[%s7824_s4 + $0xb8] sm:$0xff]  ;;  %vm6376_vm11 = vmor %vm1055_vm9, %vm1056_vm10 }
  0x22   : > { %v747_v37 = vrot.slane %v745_v14, 7  ;;  %902 = vst [vmem:[#allocation2 + $0x40] sm:$0xf] %v901_v35  ;;  %v691_v40 = vsel %vm6283_vm7, %v683_v29, %v690_v30  ;;  %v929_v41 = vsel %vm6295_vm8, %v682_v28, %v928_v19  ;;  %v753_v43 = vshrl.u32 %v6287_v12, 16  ;;  %v5921_v10 = vld [vmem:[%s7824_s4 + $0x138] sm:$0xff]  ;;  %v6357_v14 = vld [vmem:[%s6211_s27 + $0x60] sm:$0xff]  }
  0x23   : > { %v933_v42 = vsel %vm6204_vm2, %v692_v31, %v932_v27  ;;  %903 = vst [vmem:[#allocation2 + $0x44] sm:$0xf] %v623_v34  ;;  %v756_v49 = vshll.u32 %v6287_v12, 16  ;;  %v1062_v51 = vshll.u32 %v6271_v53, 16  ;;  %v1068_v55 = vshll.u32 %v992_v38, 16 }
  0x24   : > { %v750_v47 = vor.u32 %v748_v20, %v747_v37  ;;  %v751_v48 = vrot.slane %v747_v37, 4  ;;  %6067 = vmatpush.bf16.msra.mxu1 %v5875_v15  ;;  %6068 = vmatpush.bf16.msra.mxu2 %v5875_v15  ;;  %906 = vst [vmem:[#allocation2 + $0x48] sm:$0x1] %v905_v36  ;;  %v755_v52 = vrot.slane %v753_v43, 7  ;;  %v1072_v56 = vshrl.u32 %v992_v38, 16  ;;  %v5872_v38 = vld [vmem:[%s7824_s4 + $0x30] sm:$0xff] }
  0x25   : > { %v1078_v57 = vshll.u32 %v1039_v39, 16  ;;  %6069 = vmatpush.bf16.msra.mxu3 %v5875_v15  ;;  %1576 = vmatpush.bf16.msra.mxu0 %v5875_v15  ;;  %930 = vst [vmem:[#allocation2 + $0x80] sm:$0xf] %v929_v41  ;;  %v1064_v60 = vrot.slane %v1062_v51, 5  ;;  %v323_v53 = vmul.f32 %v6216_v4, %v5988_v44  ;;  %v470_v61 = vsel %vm6204_vm2, 0, %v6304_v33 }
  0x26   : > { %v957_v58 = vsel %vm6295_vm8, %v750_v47, %v956_v45  ;;  %931 = vst [vmem:[#allocation2 + $0x84] sm:$0xf] %v691_v40  ;;  %v758_v63 = vor.u32 %v756_v49, %v755_v52  ;;  %v760_v0 = vrot.slane %v755_v52, 4  ;;  %v1070_v1 = vrot.slane %v1068_v55, 5 }
  0x27   : > { %v1074_v3 = vrot.slane %v1072_v56, 4  ;;  %934 = vst [vmem:[#allocation2 + $0x88] sm:$0x1] %v933_v42  ;;  %v1065_v7 = vor.u32 %v1064_v60, %v6300_v21  ;;  %v6342_v44 = vrot.slane %v1078_v57, 5  ;;  %v324_v11 = vmul.f32 %v6216_v4, %v5989_v54  ;;  %v5912_v54 = vld [vmem:[%s7824_s4 + $0xf0] sm:$0xff] }
  0x28   : > { %v6354_v12 = vadd.f32 %v6235_v13, %v323_v53  ;;  %6070 = vmatpush.bf16.msra.mxu1 %v5874_v46  ;;  %6071 = vmatpush.bf16.msra.mxu2 %v5874_v46  ;;  %v759_v15 = vsel %vm6283_vm7, %v751_v48, %v758_v63  ;;  %958 = vst [vmem:[#allocation2 + $0xc0] sm:$0xf] %v957_v58  ;;  %v6004_v24 = vunpack.c.l.bf16 %v6336_v62  ;;  %v6005_v29 = vunpack.c.h.bf16 %v6336_v62 }
  0x29   : > { %v961_v17 = vsel %vm6204_vm2, %v760_v0, %v960_v50  ;;  %v1075_v18 = vor.u32 %v1074_v3, %v1070_v1  ;;  %6072 = vmatpush.bf16.msra.mxu3 %v5874_v46  ;;  %1577 = vmatpush.bf16.msra.mxu0 %v5874_v46  ;;  %v999_v19 = vld [vmem:[#allocation2 + $0x40] sm:$0xf]  ;;  %959 = vst [vmem:[#allocation2 + $0xc4] sm:$0xf] %v759_v15  ;;  %v1066_v20 = vrot.slane %v1065_v7, 4  ;;  %v6020_v30 = vunpack.c.l.bf16 %v6357_v14 }
  0x2a   : > { %v6370_v21 = vadd.f32 %v6235_v13, %v324_v11  ;;  %v390_v23 = vmax.f32 %v6354_v12, 0.0  ;;  %v1000_v25 = vld [vmem:[#allocation2 + $0x44] sm:$0xf]  ;;  %v1155_v27 = vshrl.u32 %v999_v19, 16  ;;  %v1158_v28 = vshll.u32 %v999_v19, 16 }
  0x2b   : > { %962 = vst [vmem:[#allocation2 + $0xc8] sm:$0x1] %v961_v17  ;;  %v1043_v31 = vld [vmem:[#allocation2 + $0x48] sm:$0x1]  ;;  %v1164_v34 = vshll.u32 %v1000_v25, 16  ;;  %v1168_v35 = vshrl.u32 %v1000_v25, 16  ;;  %v1071_v36 = vsel %vm6376_vm11, %v1066_v20, %v1070_v1 }
  0x2c   : > { %2183 = vmatpush.bf16.msrb.mxu2 %v5889_v59  ;;  %v6384_v37 = vrot.slane %v1075_v18, 4  ;;  %1803 = vmatpush.bf16.msrb.mxu1 %v5873_v9  ;;  %v1157_v39 = vrot.slane %v1155_v27, 4  ;;  %v1160_v40 = vrot.slane %v1158_v28, 5  ;;  %v1174_v41 = vshll.u32 %v1043_v31, 16  ;;  %v1007_v42 = vld [vmem:[#allocation2 + $0x80] sm:$0xf] }
  0x2d   : > { %2496 = vmatpush.bf16.msrb.mxu3 %v5913_v5  ;;  %3177 = vmatpush.bf16.msrb.mxu0 %v5921_v10  ;;  %v6389_v43 = vunpack.c.l.b16 %v1071_v36  ;;  %v1166_v45 = vrot.slane %v1164_v34, 5  ;;  %v1170_v46 = vrot.slane %v1168_v35, 4  ;;  %v1008_v47 = vld [vmem:[#allocation2 + $0x84] sm:$0xf]  ;;  %v1251_v48 = vshrl.u32 %v1007_v42, 16 }
  0x2e   : > { %v1254_v49 = vshll.u32 %v1007_v42, 16  ;;  %v1161_v50 = vor.u32 %v1160_v40, %v1157_v39  ;;  %v1176_v51 = vrot.slane %v1174_v41, 5  ;;  %v1047_v52 = vld [vmem:[#allocation2 + $0x88] sm:$0x1]  ;;  %v1260_v55 = vshll.u32 %v1008_v47, 16 }
  0x2f   : > { %v1264_v56 = vshrl.u32 %v1008_v47, 16  ;;  %v1171_v57 = vor.u32 %v1170_v46, %v1166_v45  ;;  %v1253_v58 = vrot.slane %v1251_v48, 4  ;;  %v1270_v60 = vshll.u32 %v1047_v52, 16  ;;  %v1015_v53 = vld [vmem:[#allocation2 + $0xc0] sm:$0xf] }
  0x30   : > { %2184 = vmatpush.bf16.msrb.mxu2 %v5888_v32  ;;  %v1256_v59 = vrot.slane %v1254_v49, 5  ;;  %1804 = vmatpush.bf16.msrb.mxu1 %v5872_v38  ;;  %v1162_v63 = vrot.slane %v1161_v50, 4  ;;  %v1262_v0 = vrot.slane %v1260_v55, 5  ;;  %v1016_v3 = vld [vmem:[#allocation2 + $0xc4] sm:$0xf]  ;;  %v1347_v5 = vshrl.u32 %v1015_v53, 16 }
  0x31   : > { %2497 = vmatpush.bf16.msrb.mxu3 %v5912_v54  ;;  %v1266_v1 = vrot.slane %v1264_v56, 4  ;;  %v1172_v7 = vrot.slane %v1171_v57, 4  ;;  %v1272_v10 = vrot.slane %v1270_v60, 5  ;;  %v1350_v11 = vshll.u32 %v1015_v53, 16  ;;  %471 = vst [vmem:[#allocation2 + $0x50] sm:$0x1] %v470_v61 }
  0x32   : > { %v1257_v9 = vor.u32 %v1256_v59, %v1253_v58  ;;  %v1167_v15 = vsel %vm6376_vm11, %v1162_v63, %v1166_v45  ;;  %v1051_v18 = vld [vmem:[#allocation2 + $0xc8] sm:$0x1]  ;;  %v1349_v32 = vrot.slane %v1347_v5, 4  ;;  %v1356_v54 = vshll.u32 %v1016_v3, 16  ;;  %v519_v40 = vld [vmem:[#allocation2 + $0x58] sm:$0x1] }
  0x33   : > { %v1267_v17 = vor.u32 %v1266_v1, %v1262_v0  ;;  %v1177_v19 = vsel %vm6376_vm11, %v1172_v7, %v1176_v51  ;;  %v1466_v20 = vunpack.c.l.b16 %v1167_v15  ;;  %v1352_v27 = vrot.slane %v1350_v11, 5 }
  0x34   : > { %v1258_v25 = vrot.slane %v1257_v9, 4  ;;  %v1467_v28 = vunpack.c.l.b16 %v1177_v19  ;;  %v1358_v34 = vrot.slane %v1356_v54, 5  ;;  %v1360_v35 = vshrl.u32 %v1016_v3, 16 }
  0x35   : > { %v1268_v31 = vrot.slane %v1267_v17, 4  ;;  %v1353_v38 = vor.u32 %v1352_v27, %v1349_v32  ;;  %v1366_v22 = vshll.u32 %v1051_v18, 16  ;;  %v1081_v39 = vsel %vm6376_vm11, %v6384_v37, %v6342_v44  ;;  %v481_v37 = vld [vmem:[#allocation2 + $0x90] sm:$0x1] }
  0x36   : > { %v1263_v36 = vsel %vm6376_vm11, %v1258_v25, %v1262_v0  ;;  %v1494_v41 = vpack.c.b16 %v1467_v28, %v1466_v20  ;;  %v1362_v42 = vrot.slane %v1360_v35, 4  ;;  %v1459_v48 = vunpack.c.l.b16 %v1081_v39  ;;  %v493_v20 = vld [vmem:[#allocation2 + $0xd0] sm:$0x1]  ;;  %v5971_v35 = vld [vmem:[%s6211_s27] sm:$0xff]  }
  0x37   : > { %v1273_v33 = vsel %vm6376_vm11, %v1268_v31, %v1272_v10  ;;  %v1474_v61 = vunpack.c.l.b16 %v1263_v36  ;;  %v1354_v46 = vrot.slane %v1353_v38, 4  ;;  %v1368_v47 = vrot.slane %v1366_v22, 5 }
  0x38   : > { %v1475_v45 = vunpack.c.l.b16 %v1273_v33  ;;  %1598 = vmatmul.bf16.vlgmr.msra.gmra.mxu1 %v1494_v41  ;;  %v1363_v49 = vor.u32 %v1362_v42, %v1358_v34  ;;  %v391_v50 = vmax.f32 %v6370_v21, 0.0  ;;  %v422_v51 = vpack.c.bf16 %v390_v23, %v390_v23  ;;  %v531_v23 = vld [vmem:[#allocation2 + $0x98] sm:$0x1]  ;;  %v907_v7 = vld [vmem:[#allocation2 + $0x50] sm:$0xf] }
  0x39   : > { %v520_v44 = vsel %vm6222_vm4, 0, %v519_v40  ;;  %v1359_v55 = vsel %vm6376_vm11, %v1354_v46, %v1358_v34  ;;  %v1490_v56 = vpack.c.b16 %v1459_v48, %v6389_v43  ;;  %v331_v57 = vmul.f32 %v6216_v4, %v6004_v24 }
  0x3a   : > { %v1498_v52 = vpack.c.b16 %v1475_v45, %v1474_v61  ;;  %521 = vst [vmem:[#allocation2 + $0x58] sm:$0x1] %v520_v44  ;;  %v1364_v21 = vrot.slane %v1363_v49, 4  ;;  %v1482_v58 = vunpack.c.l.b16 %v1359_v55  ;;  %v423_v12 = vpack.c.bf16 %v391_v50, %v391_v50  ;;  %v457_v61 = vld [vmem:[#allocation2 + $0x10] sm:$0x1] }
  0x3b   : > { %v626_v59 = vshrl.u32 %v422_v51, 16  ;;  %1578 = vmatmul.bf16.vlgmr.msra.gmra.mxu0 %v1490_v56  ;;  %v629_v60 = vshll.u32 %v422_v51, 16  ;;  %v332_v53 = vmul.f32 %v6216_v4, %v6005_v29  ;;  %v366_v63 = vadd.f32 %v6235_v13, %v331_v57 }
  0x3c   : > { %1618 = vmatmul.bf16.vlgmr.msra.gmra.mxu2 %v1498_v52  ;;  %v482_v43 = vsel %vm6204_vm2, 0, %v481_v37  ;;  %v1369_v24 = vsel %vm6376_vm11, %v1364_v21, %v1368_v47  ;;  %v634_v1 = vshrl.u32 %v423_v12, 16  ;;  %v637_v3 = vshll.u32 %v423_v12, 16 }
  0x3d   : > { %v628_v0 = vrot.slane %v626_v59, 7  ;;  %483 = vst [vmem:[#allocation2 + $0x90] sm:$0x1] %v482_v43  ;;  %v1483_v5 = vunpack.c.l.b16 %v1369_v24  ;;  %v367_v9 = vadd.f32 %v6235_v13, %v332_v53  ;;  %v398_v10 = vmax.f32 %v366_v63, 0.0  ;;  %v5887_v43 = vld [vmem:[%s7824_s4 + $0xa8] sm:$0xff] }
  0x3e   : > { %v532_v62 = vsel %vm6222_vm4, 0, %v531_v23  ;;  %v636_v15 = vrot.slane %v634_v1, 7  ;;  %v6021_v17 = vunpack.c.h.bf16 %v6357_v14  ;;  %v339_v19 = vmul.f32 %v6216_v4, %v6020_v30  ;;  %v543_v14 = vld [vmem:[#allocation2 + $0xd8] sm:$0x1]  ;;  %v6459_v24 = vld [vmem:[%s6211_s27 + $0x28] sm:$0xff]   ;;  %2185 = vmatpush.bf16.msrb.mxu2 %v5887_v43 }
  0x3f   : > { %v631_v29 = vor.u32 %v629_v60, %v628_v0  ;;  %v632_v11 = vrot.slane %v628_v0, 4  ;;  %533 = vst [vmem:[#allocation2 + $0x98] sm:$0x1] %v532_v62  ;;  %v1502_v18 = vpack.c.b16 %v1483_v5, %v1482_v58  ;;  %v399_v32 = vmax.f32 %v367_v9, 0.0 }
  0x40   : > { %v430_v54 = vpack.c.bf16 %v398_v10, %v398_v10  ;;  %v639_v25 = vor.u32 %v637_v3, %v636_v15  ;;  %v641_v27 = vrot.slane %v636_v15, 4  ;;  %v340_v34 = vmul.f32 %v6216_v4, %v6021_v17 }
  0x41   : > { %v908_v28 = vsel %vm6295_vm8, %v631_v29, %v907_v7  ;;  %v911_v31 = vld [vmem:[#allocation2 + $0x58] sm:$0x1]  ;;  %1638 = vmatmul.bf16.vlgmr.msra.gmra.mxu3 %v1502_v18  ;;  %v431_v36 = vpack.c.bf16 %v399_v32, %v399_v32  ;;  %v374_v39 = vadd.f32 %v6235_v13, %v339_v19  ;;  %v494_v33 = vsel %vm6204_vm2, 0, %v493_v20 }
  0x42   : > { %909 = vst [vmem:[#allocation2 + $0x50] sm:$0xf] %v908_v28  ;;  %v694_v38 = vshrl.u32 %v430_v54, 16  ;;  %v697_v22 = vshll.u32 %v430_v54, 16  ;;  %v640_v30 = vsel %vm6283_vm7, %v632_v11, %v639_v25  ;;  %v912_v40 = vsel %vm6204_vm2, %v641_v27, %v911_v31 }
  0x43   : > { %v375_v41 = vadd.f32 %v6235_v13, %v340_v34  ;;  %910 = vst [vmem:[#allocation2 + $0x54] sm:$0xf] %v640_v30  ;;  %v702_v45 = vshrl.u32 %v431_v36, 16  ;;  %v705_v46 = vshll.u32 %v431_v36, 16  ;;  %v406_v47 = vmax.f32 %v374_v39, 0.0 }
  0x44   : > { %v696_v42 = vrot.slane %v694_v38, 7  ;;  %913 = vst [vmem:[#allocation2 + $0x58] sm:$0x1] %v912_v40  ;;  %v935_v48 = vld [vmem:[#allocation2 + $0x90] sm:$0xf]  ;;  %v544_v50 = vsel %vm6222_vm4, 0, %v543_v14  ;;  %v5972_v51 = vunpack.c.l.bf16 %v5971_v35  ;;  %v5973_v44 = vunpack.c.h.bf16 %v5971_v35 }
  0x45   : > { %v407_v49 = vmax.f32 %v375_v41, 0.0  ;;  %v704_v55 = vrot.slane %v702_v45, 7  ;;  %v438_v56 = vpack.c.bf16 %v406_v47, %v406_v47  ;;  %495 = vst [vmem:[#allocation2 + $0xd0] sm:$0x1] %v494_v33  ;;  %v458_v59 = vsel %vm6204_vm2, 0, %v457_v61 }
  0x46   : > { %v699_v37 = vor.u32 %v697_v22, %v696_v42  ;;  %v700_v52 = vrot.slane %v696_v42, 4  ;;  %v939_v57 = vld [vmem:[#allocation2 + $0x98] sm:$0x1]  ;;  %545 = vst [vmem:[#allocation2 + $0xd8] sm:$0x1] %v544_v50  ;;  %v315_v58 = vmul.f32 %v6216_v4, %v5972_v51  ;;  %v316_v12 = vmul.f32 %v6216_v4, %v5973_v44 }
  0x47   : > { %v439_v21 = vpack.c.bf16 %v407_v49, %v407_v49  ;;  %v707_v23 = vor.u32 %v705_v46, %v704_v55  ;;  %v709_v60 = vrot.slane %v704_v55, 4  ;;  %v762_v63 = vshrl.u32 %v438_v56, 16  ;;  %459 = vst [vmem:[#allocation2 + $0x10] sm:$0x1] %v458_v59  ;;  %v507_v42 = vld [vmem:[#allocation2 + $0x18] sm:$0x1] }
  0x48   : > { %v936_v53 = vsel %vm6295_vm8, %v699_v37, %v935_v48  ;;  %v765_v1 = vshll.u32 %v438_v56, 16  ;;  %v350_v5 = vadd.f32 %v6235_v13, %v315_v58  ;;  %v351_v7 = vadd.f32 %v6235_v13, %v316_v12 }
  0x49   : > { %v1001_v0 = vld [vmem:[#allocation2 + $0x50] sm:$0xf]  ;;  %937 = vst [vmem:[#allocation2 + $0x90] sm:$0xf] %v936_v53  ;;  %v770_v3 = vshrl.u32 %v439_v21, 16  ;;  %v708_v62 = vsel %vm6283_vm7, %v700_v52, %v707_v23  ;;  %v940_v29 = vsel %vm6204_vm2, %v709_v60, %v939_v57  ;;  %v764_v15 = vrot.slane %v762_v63, 7 }
  0x4a   : > { %v1179_v9 = vshrl.u32 %v1001_v0, 16  ;;  %v1182_v10 = vshll.u32 %v1001_v0, 16  ;;  %v1002_v11 = vld [vmem:[#allocation2 + $0x54] sm:$0xf]  ;;  %938 = vst [vmem:[#allocation2 + $0x94] sm:$0xf] %v708_v62  ;;  %v5992_v18 = vunpack.c.l.bf16 %v6459_v24  ;;  %v5993_v32 = vunpack.c.h.bf16 %v6459_v24 }
  0x4b   : > { %v772_v17 = vrot.slane %v770_v3, 7  ;;  %v1044_v54 = vld [vmem:[#allocation2 + $0x58] sm:$0x1]  ;;  %v1188_v25 = vshll.u32 %v1002_v11, 16  ;;  %v1192_v27 = vshrl.u32 %v1002_v11, 16  ;;  %v767_v31 = vor.u32 %v765_v1, %v764_v15  ;;  %v5911_v60 = vld [vmem:[%s7824_s4 + $0xe8] sm:$0xff] }
  0x4c   : > { %v1181_v19 = vrot.slane %v1179_v9, 4  ;;  %v1184_v20 = vrot.slane %v1182_v10, 5  ;;  %v1198_v28 = vshll.u32 %v1044_v54, 16  ;;  %941 = vst [vmem:[#allocation2 + $0x98] sm:$0x1] %v940_v29  ;;  %v768_v34 = vrot.slane %v764_v15, 4  ;;  %2498 = vmatpush.bf16.msrb.mxu3 %v5911_v60 }
  0x4d   : > { %v773_v35 = vshll.u32 %v439_v21, 16  ;;  %v1190_v38 = vrot.slane %v1188_v25, 5  ;;  %v1194_v22 = vrot.slane %v1192_v27, 4  ;;  %v777_v39 = vrot.slane %v772_v17, 4  ;;  %v963_v14 = vld [vmem:[#allocation2 + $0xd0] sm:$0xf] }
  0x4e   : > { %v1185_v36 = vor.u32 %v1184_v20, %v1181_v19  ;;  %v1200_v30 = vrot.slane %v1198_v28, 5  ;;  %v964_v41 = vsel %vm6295_vm8, %v767_v31, %v963_v14  ;;  %v967_v33 = vld [vmem:[#allocation2 + $0xd8] sm:$0x1]  ;;  %v382_v61 = vmax.f32 %v350_v5, 0.0  ;;  %v5920_v3 = vld [vmem:[%s7824_s4 + $0x130] sm:$0xff]  ;;  %v5871_v62 = vld [vmem:[%s7824_s4 + $0x28] sm:$0xff] }
  0x4f   : > { %v775_v40 = vor.u32 %v773_v35, %v772_v17  ;;  %v1195_v46 = vor.u32 %v1194_v22, %v1190_v38  ;;  %965 = vst [vmem:[#allocation2 + $0xd0] sm:$0xf] %v964_v41  ;;  %v968_v48 = vsel %vm6204_vm2, %v777_v39, %v967_v33  ;;  %v383_v49 = vmax.f32 %v351_v7, 0.0  ;;  %v5886_v29 = vld [vmem:[%s7824_s4 + $0xa0] sm:$0xff]  ;;  %3178 = vmatpush.bf16.msrb.mxu0 %v5920_v3  ;;  %v5919_v20 = vld [vmem:[%s7824_s4 + $0x128] sm:$0xff] }
  0x50   : > { %v1186_v45 = vrot.slane %v1185_v36, 4  ;;  %v1009_v47 = vld [vmem:[#allocation2 + $0x90] sm:$0xf]  ;;  %969 = vst [vmem:[#allocation2 + $0xd8] sm:$0x1] %v968_v48  ;;  %v414_v37 = vpack.c.bf16 %v382_v61, %v382_v61  ;;  %v508_v21 = vsel %vm6222_vm4, 0, %v507_v42  ;;  %1805 = vmatpush.bf16.msrb.mxu1 %v5871_v62  ;;  %2186 = vmatpush.bf16.msrb.mxu2 %v5886_v29  ;;  %v325_v35 = vmul.f32 %v6216_v4, %v5992_v18 }
  0x51   : > { %v1275_v50 = vshrl.u32 %v1009_v47, 16  ;;  %v1278_v51 = vshll.u32 %v1009_v47, 16  ;;  %v776_v44 = vsel %vm6283_vm7, %v768_v34, %v775_v40  ;;  %v1196_v55 = vrot.slane %v1195_v46, 4  ;;  %v1010_v56 = vld [vmem:[#allocation2 + $0x94] sm:$0xf]  ;;  %v5910_v11 = vld [vmem:[%s7824_s4 + $0xe0] sm:$0xff] }
  0x52   : > { %v1191_v52 = vsel %vm6376_vm11, %v1186_v45, %v1190_v38  ;;  %966 = vst [vmem:[#allocation2 + $0xd4] sm:$0xf] %v776_v44  ;;  %v415_v57 = vpack.c.bf16 %v383_v49, %v383_v49  ;;  %v1284_v23 = vshll.u32 %v1010_v56, 16  ;;  %v1288_v43 = vshrl.u32 %v1010_v56, 16  ;;  %v5870_v34 = vld [vmem:[%s7824_s4 + $0x20] sm:$0xff]  ;;  %2499 = vmatpush.bf16.msrb.mxu3 %v5910_v11  ;;  %v6042_v60 = vld [vmem:[%s6211_s27 + $0x48] sm:$0xff]  }
  0x53   : > { %v1468_v58 = vunpack.c.l.b16 %v1191_v52  ;;  %v1277_v12 = vrot.slane %v1275_v50, 4  ;;  %v1280_v59 = vrot.slane %v1278_v51, 5  ;;  %509 = vst [vmem:[#allocation2 + $0x18] sm:$0x1] %v508_v21  ;;  %v1201_v53 = vsel %vm6376_vm11, %v1196_v55, %v1200_v30  ;;  %v1048_v63 = vld [vmem:[#allocation2 + $0x98] sm:$0x1]  ;;  %3179 = vmatpush.bf16.msrb.mxu0 %v5919_v20 }
  0x54   : > { %v558_v0 = vshrl.u32 %v414_v37, 16  ;;  %v561_v1 = vshll.u32 %v414_v37, 16  ;;  %v1469_v5 = vunpack.c.l.b16 %v1201_v53  ;;  %v1286_v9 = vrot.slane %v1284_v23, 5  ;;  %v879_v30 = vld [vmem:[#allocation2 + $0x10] sm:$0xf]  ;;  %1806 = vmatpush.bf16.msrb.mxu1 %v5870_v34  ;;  %v6046_v11 = vld [vmem:[%s6211_s27 + $0x68] sm:$0xff]  }
  0x55   : > { %v1281_v7 = vor.u32 %v1280_v59, %v1277_v12  ;;  %v1294_v10 = vshll.u32 %v1048_v63, 16  ;;  %v1290_v15 = vrot.slane %v1288_v43, 4  ;;  %v566_v54 = vshrl.u32 %v415_v57, 16  ;;  %v522_v21 = vld [vmem:[#allocation2 + $0x68] sm:$0x1] }
  0x56   : > { %v560_v17 = vrot.slane %v558_v0, 7  ;;  %v569_v19 = vshll.u32 %v415_v57, 16  ;;  %v1495_v25 = vpack.c.b16 %v1469_v5, %v1468_v58  ;;  %v1017_v31 = vld [vmem:[#allocation2 + $0xd0] sm:$0xf]  ;;  %v472_v57 = vld [vmem:[#allocation2 + $0x60] sm:$0x1]  ;;  %v326_v43 = vmul.f32 %v6216_v4, %v5993_v32 }
  0x57   : > { %v1282_v27 = vrot.slane %v1281_v7, 4  ;;  %v1296_v28 = vrot.slane %v1294_v10, 5  ;;  %v1291_v36 = vor.u32 %v1290_v15, %v1286_v9  ;;  %v1052_v38 = vld [vmem:[#allocation2 + $0xd8] sm:$0x1]  ;;  %v1371_v22 = vshrl.u32 %v1017_v31, 16 }
  0x58   : > { %v1374_v39 = vshll.u32 %v1017_v31, 16  ;;  %v563_v14 = vor.u32 %v561_v1, %v560_v17  ;;  %1603 = vmatmul.bf16.gmra.mxu1 %v1495_v25  ;;  %v1390_v33 = vshll.u32 %v1052_v38, 16  ;;  %v564_v61 = vrot.slane %v560_v17, 4  ;;  %v484_v1 = vld [vmem:[#allocation2 + $0xa0] sm:$0x1] }
  0x59   : > { %v1287_v40 = vsel %vm6376_vm11, %v1282_v27, %v1286_v9  ;;  %v1018_v41 = vld [vmem:[#allocation2 + $0xd4] sm:$0xf]  ;;  %v568_v42 = vrot.slane %v566_v54, 7  ;;  %v1292_v45 = vrot.slane %v1291_v36, 4  ;;  %v1373_v47 = vrot.slane %v1371_v22, 4 }
  0x5a   : > { %v1476_v46 = vunpack.c.l.b16 %v1287_v40  ;;  %v1376_v48 = vrot.slane %v1374_v39, 5  ;;  %v1380_v18 = vshll.u32 %v1018_v41, 16  ;;  %v1384_v49 = vshrl.u32 %v1018_v41, 16  ;;  %v883_v44 = vld [vmem:[#allocation2 + $0x18] sm:$0x1] }
  0x5b   : > { %v1392_v50 = vrot.slane %v1390_v33, 5  ;;  %v571_v51 = vor.u32 %v569_v19, %v568_v42  ;;  %v1297_v37 = vsel %vm6376_vm11, %v1292_v45, %v1296_v28  ;;  %v573_v55 = vrot.slane %v568_v42, 4  ;;  %v534_v10 = vld [vmem:[#allocation2 + $0xa8] sm:$0x1] }
  0x5c   : > { %v1377_v52 = vor.u32 %v1376_v48, %v1373_v47  ;;  %v880_v56 = vsel %vm6295_vm8, %v563_v14, %v879_v30  ;;  %v1477_v58 = vunpack.c.l.b16 %v1297_v37  ;;  %v1382_v12 = vrot.slane %v1380_v18, 5 }
  0x5d   : > { %v1386_v59 = vrot.slane %v1384_v49, 4  ;;  %v572_v23 = vsel %vm6283_vm7, %v564_v61, %v571_v51  ;;  %881 = vst [vmem:[#allocation2 + $0x10] sm:$0xf] %v880_v56  ;;  %v884_v63 = vsel %vm6204_vm2, %v573_v55, %v883_v44  ;;  %v360_v0 = vadd.f32 %v6235_v13, %v325_v35 }
  0x5e   : > { %v1378_v53 = vrot.slane %v1377_v52, 4  ;;  %882 = vst [vmem:[#allocation2 + $0x14] sm:$0xf] %v572_v23  ;;  %v1499_v3 = vpack.c.b16 %v1477_v58, %v1476_v46  ;;  %v473_v7 = vsel %vm6204_vm2, 0, %v472_v57  ;;  %v523_v9 = vsel %vm6222_vm4, 0, %v522_v21 }
  0x5f   : > { %v1387_v5 = vor.u32 %v1386_v59, %v1382_v12  ;;  %885 = vst [vmem:[#allocation2 + $0x18] sm:$0x1] %v884_v63  ;;  %v361_v24 = vadd.f32 %v6235_v13, %v326_v43  ;;  %v392_v29 = vmax.f32 %v360_v0, 0.0  ;;  %v6008_v32 = vunpack.c.l.bf16 %v6042_v60 }
  0x60   : > { %v1383_v62 = vsel %vm6376_vm11, %v1378_v53, %v1382_v12  ;;  %474 = vst [vmem:[#allocation2 + $0x60] sm:$0x1] %v473_v7  ;;  %1623 = vmatmul.bf16.gmra.mxu2 %v1499_v3  ;;  %v6009_v54 = vunpack.c.h.bf16 %v6042_v60  ;;  %v485_v19 = vsel %vm6204_vm2, 0, %v484_v1  ;;  %v535_v28 = vsel %vm6222_vm4, 0, %v534_v10  ;;  %v6543_v1 = vld [vmem:[%s7822_s2] ss:$0 sm:$0xff] }
  0x61   : > { %v1388_v15 = vrot.slane %v1387_v5, 4  ;;  %v1484_v17 = vunpack.c.l.b16 %v1383_v62  ;;  %524 = vst [vmem:[#allocation2 + $0x68] sm:$0x1] %v523_v9  ;;  %v393_v20 = vmax.f32 %v361_v24, 0.0  ;;  %v424_v25 = vpack.c.bf16 %v392_v29, %v392_v29 }
  0x62   : > { %v333_v27 = vmul.f32 %v6216_v4, %v6008_v32  ;;  %486 = vst [vmem:[#allocation2 + $0xa0] sm:$0x1] %v485_v19  ;;  %v334_v34 = vmul.f32 %v6216_v4, %v6009_v54  ;;  %v6024_v35 = vunpack.c.l.bf16 %v6046_v11  ;;  %v6025_v36 = vunpack.c.h.bf16 %v6046_v11  ;;  %v6556_v32 = vld [vmem:[%s7823_s3] ss:$0 sm:$0xff] }
  0x63   : > { %v1393_v31 = vsel %vm6376_vm11, %v1388_v15, %v1392_v50  ;;  %536 = vst [vmem:[#allocation2 + $0xa8] sm:$0x1] %v535_v28  ;;  %v425_v39 = vpack.c.bf16 %v393_v20, %v393_v20  ;;  %v643_v14 = vshrl.u32 %v424_v25, 16  ;;  %v646_v30 = vshll.u32 %v424_v25, 16  ;;  %v496_v15 = vld [vmem:[#allocation2 + $0xe0] sm:$0x1] }
  0x64   : > { %v1485_v38 = vunpack.c.l.b16 %v1393_v31  ;;  %v993_v22 = vld [vmem:[#allocation2 + $0x10] sm:$0xf]  ;;  %v368_v61 = vadd.f32 %v6235_v13, %v333_v27  ;;  %v369_v42 = vadd.f32 %v6235_v13, %v334_v34  ;;  %v341_v3 = vmul.f32 %v6543_v1, %v6024_v35  ;;  %v6034_v27 = vld [vmem:[%s6211_s27 + $0x8] sm:$0xff]  }
  0x65   : > { %v994_v40 = vld [vmem:[#allocation2 + $0x14] sm:$0xf]  ;;  %v1083_v41 = vshrl.u32 %v993_v22, 16  ;;  %v1086_v33 = vshll.u32 %v993_v22, 16  ;;  %v645_v4 = vrot.slane %v643_v14, 7  ;;  %v651_v51 = vshrl.u32 %v425_v39, 16 }
  0x66   : > { %v1503_v45 = vpack.c.b16 %v1485_v38, %v1484_v17  ;;  %v1040_v46 = vld [vmem:[#allocation2 + $0x18] sm:$0x1]  ;;  %v1092_v47 = vshll.u32 %v994_v40, 16  ;;  %v1096_v48 = vshrl.u32 %v994_v40, 16  ;;  %v654_v12 = vshll.u32 %v425_v39, 16 }
  0x67   : > { %v1085_v18 = vrot.slane %v1083_v41, 4  ;;  %v1088_v49 = vrot.slane %v1086_v33, 5  ;;  %v1102_v50 = vshll.u32 %v1040_v46, 16  ;;  %v914_v44 = vld [vmem:[#allocation2 + $0x60] sm:$0xf]  ;;  %v648_v55 = vor.u32 %v646_v30, %v645_v4 }
  0x68   : > { %1643 = vmatmul.bf16.gmra.mxu3 %v1503_v45  ;;  %v1094_v37 = vrot.slane %v1092_v47, 5  ;;  %v1098_v52 = vrot.slane %v1096_v48, 4  ;;  %v649_v56 = vrot.slane %v645_v4, 4  ;;  %v653_v58 = vrot.slane %v651_v51, 7  ;;  %v918_v23 = vld [vmem:[#allocation2 + $0x68] sm:$0x1] }
  0x69   : > { %v1089_v57 = vor.u32 %v1088_v49, %v1085_v18  ;;  %v1104_v21 = vrot.slane %v1102_v50, 5  ;;  %v915_v59 = vsel %vm6295_vm8, %v648_v55, %v914_v44  ;;  %v400_v60 = vmax.f32 %v368_v61, 0.0  ;;  %v546_v17 = vld [vmem:[#allocation2 + $0xe8] sm:$0x1]  ;;  %v942_v38 = vld [vmem:[#allocation2 + $0xa0] sm:$0xf] }
  0x6a   : > { %v1099_v13 = vor.u32 %v1098_v52, %v1094_v37  ;;  %v401_v53 = vmax.f32 %v369_v42, 0.0  ;;  %v656_v43 = vor.u32 %v654_v12, %v653_v58  ;;  %v658_v0 = vrot.slane %v653_v58, 4  ;;  %916 = vst [vmem:[#allocation2 + $0x60] sm:$0xf] %v915_v59  ;;  %v946_v41 = vld [vmem:[#allocation2 + $0xa8] sm:$0x1] }
  0x6b   : > { %v1090_v63 = vrot.slane %v1089_v57, 4  ;;  %v432_v7 = vpack.c.bf16 %v400_v60, %v400_v60  ;;  %v342_v10 = vmul.f32 %v6543_v1, %v6025_v36  ;;  %v376_v11 = vadd.f32 %v6556_v32, %v341_v3  ;;  %v5885_v55 = vld [vmem:[%s7824_s4 + $0x98] sm:$0xff] }
  0x6c   : > { %v1100_v5 = vrot.slane %v1099_v13, 4  ;;  %v433_v9 = vpack.c.bf16 %v401_v53, %v401_v53  ;;  %v657_v24 = vsel %vm6283_vm7, %v649_v56, %v656_v43  ;;  %v919_v29 = vsel %vm6204_vm2, %v658_v0, %v918_v23  ;;  %2187 = vmatpush.bf16.msrb.mxu2 %v5885_v55  ;;  %v510_v43 = vld [vmem:[#allocation2 + $0x28] sm:$0x1] }
  0x6d   : > { %v1095_v62 = vsel %vm6376_vm11, %v1090_v63, %v1094_v37  ;;  %917 = vst [vmem:[#allocation2 + $0x64] sm:$0xf] %v657_v24  ;;  %v711_v20 = vshrl.u32 %v432_v7, 16  ;;  %v714_v25 = vshll.u32 %v432_v7, 16  ;;  %v377_v35 = vadd.f32 %v6556_v32, %v342_v10  ;;  %v460_v63 = vld [vmem:[#allocation2 + $0x20] sm:$0x1] }
  0x6e   : > { %v1105_v54 = vsel %vm6376_vm11, %v1100_v5, %v1104_v21  ;;  %v1460_v19 = vunpack.c.l.b16 %v1095_v62  ;;  %920 = vst [vmem:[#allocation2 + $0x68] sm:$0x1] %v919_v29  ;;  %v719_v31 = vshrl.u32 %v433_v9, 16  ;;  %v722_v34 = vshll.u32 %v433_v9, 16 }
  0x6f   : > { %v1461_v28 = vunpack.c.l.b16 %v1105_v54  ;;  %v713_v36 = vrot.slane %v711_v20, 7  ;;  %v408_v22 = vmax.f32 %v376_v11, 0.0  ;;  %v497_v39 = vsel %vm6204_vm2, 0, %v496_v15 }
  0x70   : > { %v547_v14 = vsel %vm6222_vm4, 0, %v546_v17  ;;  %v721_v40 = vrot.slane %v719_v31, 7  ;;  %v409_v33 = vmax.f32 %v377_v35, 0.0  ;;  %498 = vst [vmem:[#allocation2 + $0xe0] sm:$0x1] %v497_v39  ;;  %v5976_v61 = vunpack.c.l.bf16 %v6034_v27 }
  0x71   : > { %v1491_v30 = vpack.c.b16 %v1461_v28, %v1460_v19  ;;  %v1003_v42 = vld [vmem:[#allocation2 + $0x60] sm:$0xf]  ;;  %v716_v45 = vor.u32 %v714_v25, %v713_v36  ;;  %v717_v46 = vrot.slane %v713_v36, 4  ;;  %v440_v47 = vpack.c.bf16 %v408_v22, %v408_v22  ;;  %548 = vst [vmem:[#allocation2 + $0xe8] sm:$0x1] %v547_v14 }
  0x72   : > { %v5977_v48 = vunpack.c.h.bf16 %v6034_v27  ;;  %v1203_v4 = vshrl.u32 %v1003_v42, 16  ;;  %v1206_v18 = vshll.u32 %v1003_v42, 16  ;;  %v724_v49 = vor.u32 %v722_v34, %v721_v40 }
  0x73   : > { %1583 = vmatmul.bf16.gmra.mxu0 %v1491_v30  ;;  %v726_v50 = vrot.slane %v721_v40, 4  ;;  %v943_v51 = vsel %vm6295_vm8, %v716_v45, %v942_v38  ;;  %v441_v44 = vpack.c.bf16 %v409_v33, %v409_v33  ;;  %v779_v37 = vshrl.u32 %v440_v47, 16 }
  0x74   : > { %v782_v52 = vshll.u32 %v440_v47, 16  ;;  %v1004_v56 = vld [vmem:[#allocation2 + $0x64] sm:$0xf]  ;;  %v1205_v57 = vrot.slane %v1203_v4, 4  ;;  %v1208_v21 = vrot.slane %v1206_v18, 5  ;;  %v725_v58 = vsel %vm6283_vm7, %v717_v46, %v724_v49 }
  0x75   : > { %944 = vst [vmem:[#allocation2 + $0xa0] sm:$0xf] %v943_v51  ;;  %v947_v12 = vsel %vm6204_vm2, %v726_v50, %v946_v41  ;;  %v1045_v13 = vld [vmem:[#allocation2 + $0x68] sm:$0x1]  ;;  %v1212_v59 = vshll.u32 %v1004_v56, 16  ;;  %v1216_v23 = vshrl.u32 %v1004_v56, 16  ;;  %v317_v60 = vmul.f32 %v6543_v1, %v5976_v61 }
  0x76   : > { %945 = vst [vmem:[#allocation2 + $0xa4] sm:$0xf] %v725_v58  ;;  %v318_v53 = vmul.f32 %v6543_v1, %v5977_v48  ;;  %v1209_v0 = vor.u32 %v1208_v21, %v1205_v57  ;;  %v1222_v3 = vshll.u32 %v1045_v13, 16  ;;  %v781_v5 = vrot.slane %v779_v37, 7  ;;  %v5909_v57 = vld [vmem:[%s7824_s4 + $0xd8] sm:$0xff]  ;;  %v5918_v21 = vld [vmem:[%s7824_s4 + $0x120] sm:$0xff] }
  0x77   : > { %948 = vst [vmem:[#allocation2 + $0xa8] sm:$0x1] %v947_v12  ;;  %v787_v7 = vshrl.u32 %v441_v44, 16  ;;  %v1214_v9 = vrot.slane %v1212_v59, 5  ;;  %v1218_v10 = vrot.slane %v1216_v23, 4  ;;  %v790_v62 = vshll.u32 %v441_v44, 16  ;;  %2500 = vmatpush.bf16.msrb.mxu3 %v5909_v57  ;;  %3180 = vmatpush.bf16.msrb.mxu0 %v5918_v21 }
  0x78   : > { %v970_v24 = vld [vmem:[#allocation2 + $0xe0] sm:$0xf]  ;;  %v352_v29 = vadd.f32 %v6556_v32, %v317_v60  ;;  %v1210_v11 = vrot.slane %v1209_v0, 4  ;;  %v1224_v15 = vrot.slane %v1222_v3, 5  ;;  %v784_v17 = vor.u32 %v782_v52, %v781_v5  ;;  %v974_v34 = vld [vmem:[#allocation2 + $0xe8] sm:$0x1] }
  0x79   : > { %v785_v54 = vrot.slane %v781_v5, 4  ;;  %v1219_v19 = vor.u32 %v1218_v10, %v1214_v9  ;;  %v789_v20 = vrot.slane %v787_v7, 7  ;;  %v353_v25 = vadd.f32 %v6556_v32, %v318_v53  ;;  %v6039_v44 = vld [vmem:[%s6211_s27 + $0x30] sm:$0xff]   ;;  %v5869_v23 = vld [vmem:[%s7824_s4 + $0x18] sm:$0xff] }
  0x7a   : > { %v384_v27 = vmax.f32 %v352_v29, 0.0  ;;  %v1215_v28 = vsel %vm6376_vm11, %v1210_v11, %v1214_v9  ;;  %v971_v31 = vsel %vm6295_vm8, %v784_v17, %v970_v24  ;;  %v461_v35 = vsel %vm6204_vm2, 0, %v460_v63  ;;  %v5884_v60 = vld [vmem:[%s7824_s4 + $0x90] sm:$0xff]  ;;  %v5917_v5 = vld [vmem:[%s7824_s4 + $0x118] sm:$0xff]  ;;  %1807 = vmatpush.bf16.msrb.mxu1 %v5869_v23 }
  0x7b   : > { %v511_v36 = vsel %vm6222_vm4, 0, %v510_v43  ;;  %v1220_v38 = vrot.slane %v1219_v19, 4  ;;  %v1470_v22 = vunpack.c.l.b16 %v1215_v28  ;;  %v792_v14 = vor.u32 %v790_v62, %v789_v20  ;;  %972 = vst [vmem:[#allocation2 + $0xe0] sm:$0xf] %v971_v31  ;;  %v5908_v3 = vld [vmem:[%s7824_s4 + $0xd0] sm:$0xff]  ;;  %2188 = vmatpush.bf16.msrb.mxu2 %v5884_v60  ;;  %3181 = vmatpush.bf16.msrb.mxu0 %v5917_v5 }
  0x7c   : > { %v1011_v39 = vld [vmem:[#allocation2 + $0xa0] sm:$0xf]  ;;  %v794_v30 = vrot.slane %v789_v20, 4  ;;  %v385_v61 = vmax.f32 %v353_v25, 0.0  ;;  %v416_v42 = vpack.c.bf16 %v384_v27, %v384_v27  ;;  %462 = vst [vmem:[#allocation2 + $0x20] sm:$0x1] %v461_v35  ;;  %v5996_v62 = vunpack.c.l.bf16 %v6039_v44  ;;  %2501 = vmatpush.bf16.msrb.mxu3 %v5908_v3 }
  0x7d   : > { %v1012_v40 = vld [vmem:[#allocation2 + $0xa4] sm:$0xf]  ;;  %v1299_v41 = vshrl.u32 %v1011_v39, 16  ;;  %v1302_v33 = vshll.u32 %v1011_v39, 16  ;;  %v1225_v45 = vsel %vm6376_vm11, %v1220_v38, %v1224_v15  ;;  %v793_v4 = vsel %vm6283_vm7, %v785_v54, %v792_v14  ;;  %512 = vst [vmem:[#allocation2 + $0x28] sm:$0x1] %v511_v36 }
  0x7e   : > { %v1049_v46 = vld [vmem:[#allocation2 + $0xa8] sm:$0x1]  ;;  %v1308_v47 = vshll.u32 %v1012_v40, 16  ;;  %v1312_v48 = vshrl.u32 %v1012_v40, 16  ;;  %v1471_v18 = vunpack.c.l.b16 %v1225_v45  ;;  %973 = vst [vmem:[#allocation2 + $0xe4] sm:$0xf] %v793_v4  ;;  %v975_v55 = vsel %vm6204_vm2, %v794_v30, %v974_v34 }
  0x7f   : > { %v1301_v49 = vrot.slane %v1299_v41, 4  ;;  %v1304_v50 = vrot.slane %v1302_v33, 5  ;;  %v1318_v51 = vshll.u32 %v1049_v46, 16  ;;  %v417_v56 = vpack.c.bf16 %v385_v61, %v385_v61  ;;  %976 = vst [vmem:[#allocation2 + $0xe8] sm:$0x1] %v975_v55  ;;  %v5868_v54 = vld [vmem:[%s7824_s4 + $0x10] sm:$0xff] }
  0x80   : > { %v1310_v37 = vrot.slane %v1308_v47, 5  ;;  %v1314_v52 = vrot.slane %v1312_v48, 4  ;;  %v1496_v58 = vpack.c.b16 %v1471_v18, %v1470_v22  ;;  %v575_v59 = vshrl.u32 %v416_v42, 16  ;;  %v475_v41 = vld [vmem:[#allocation2 + $0x70] sm:$0x1]  ;;  %1808 = vmatpush.bf16.msrb.mxu1 %v5868_v54 }
  0x81   : > { %v1305_v12 = vor.u32 %v1304_v50, %v1301_v49  ;;  %v1320_v13 = vrot.slane %v1318_v51, 5  ;;  %v578_v63 = vshll.u32 %v416_v42, 16  ;;  %v583_v43 = vshrl.u32 %v417_v56, 16  ;;  %v525_v47 = vld [vmem:[#allocation2 + $0x78] sm:$0x1]  ;;  %v6043_v50 = vld [vmem:[%s6211_s27 + $0x50] sm:$0xff]  }
  0x82   : > { %v1315_v53 = vor.u32 %v1314_v52, %v1310_v37  ;;  %v586_v0 = vshll.u32 %v417_v56, 16  ;;  %1608 = vmatmul.bf16.gmra.mxu1 %v1496_v58  ;;  %v1019_v9 = vld [vmem:[#allocation2 + $0xe0] sm:$0xf]  ;;  %v577_v10 = vrot.slane %v575_v59, 7  ;;  %v5997_v24 = vunpack.c.h.bf16 %v6039_v44  ;;  %v487_v55 = vld [vmem:[#allocation2 + $0xb0] sm:$0x1] }
  0x83   : > { %v1306_v7 = vrot.slane %v1305_v12, 4  ;;  %v1395_v11 = vshrl.u32 %v1019_v9, 16  ;;  %v1398_v15 = vshll.u32 %v1019_v9, 16  ;;  %v585_v17 = vrot.slane %v583_v43, 7  ;;  %v886_v27 = vld [vmem:[#allocation2 + $0x20] sm:$0xf] }
  0x84   : > { %v1316_v29 = vrot.slane %v1315_v53, 4  ;;  %v580_v20 = vor.u32 %v578_v63, %v577_v10  ;;  %v581_v25 = vrot.slane %v577_v10, 4  ;;  %v327_v28 = vmul.f32 %v6543_v1, %v5996_v62  ;;  %v890_v40 = vld [vmem:[#allocation2 + $0x28] sm:$0x1]  ;;  %v537_v12 = vld [vmem:[#allocation2 + $0xb8] sm:$0x1] }
  0x85   : > { %v1311_v19 = vsel %vm6376_vm11, %v1306_v7, %v1310_v37  ;;  %v1020_v35 = vld [vmem:[#allocation2 + $0xe4] sm:$0xf]  ;;  %v1397_v36 = vrot.slane %v1395_v11, 4  ;;  %v1400_v38 = vrot.slane %v1398_v15, 5  ;;  %v588_v30 = vor.u32 %v586_v0, %v585_v17  ;;  %v6638_v53 = vld [vmem:[%s6211_s27 + $0x70] sm:$0xff]  }
  0x86   : > { %v1321_v31 = vsel %vm6376_vm11, %v1316_v29, %v1320_v13  ;;  %v1478_v34 = vunpack.c.l.b16 %v1311_v19  ;;  %v1404_v39 = vshll.u32 %v1020_v35, 16  ;;  %v1408_v14 = vshrl.u32 %v1020_v35, 16  ;;  %v1053_v33 = vld [vmem:[#allocation2 + $0xe8] sm:$0x1] }
  0x87   : > { %v1479_v22 = vunpack.c.l.b16 %v1321_v31  ;;  %v1401_v61 = vor.u32 %v1400_v38, %v1397_v36  ;;  %v590_v42 = vrot.slane %v585_v17, 4  ;;  %v887_v45 = vsel %vm6295_vm8, %v580_v20, %v886_v27 }
  0x88   : > { %v328_v46 = vmul.f32 %v6543_v1, %v5997_v24  ;;  %v1406_v4 = vrot.slane %v1404_v39, 5  ;;  %v1410_v18 = vrot.slane %v1408_v14, 4  ;;  %v1414_v49 = vshll.u32 %v1053_v33, 16  ;;  %888 = vst [vmem:[#allocation2 + $0x20] sm:$0xf] %v887_v45 }
  0x89   : > { %v1500_v48 = vpack.c.b16 %v1479_v22, %v1478_v34  ;;  %v1402_v51 = vrot.slane %v1401_v61, 4  ;;  %v589_v44 = vsel %vm6283_vm7, %v581_v25, %v588_v30  ;;  %v891_v37 = vsel %vm6204_vm2, %v590_v42, %v890_v40 }
  0x8a   : > { %v362_v52 = vadd.f32 %v6556_v32, %v327_v28  ;;  %v1411_v56 = vor.u32 %v1410_v18, %v1406_v4  ;;  %v1416_v57 = vrot.slane %v1414_v49, 5  ;;  %889 = vst [vmem:[#allocation2 + $0x24] sm:$0xf] %v589_v44  ;;  %v363_v21 = vadd.f32 %v6556_v32, %v328_v46 }
  0x8b   : > { %1628 = vmatmul.bf16.gmra.mxu2 %v1500_v48  ;;  %v476_v58 = vsel %vm6204_vm2, 0, %v475_v41  ;;  %v1407_v13 = vsel %vm6376_vm11, %v1402_v51, %v1406_v4  ;;  %892 = vst [vmem:[#allocation2 + $0x28] sm:$0x1] %v891_v37  ;;  %v526_v23 = vsel %vm6222_vm4, 0, %v525_v47  ;;  %v6012_v60 = vunpack.c.l.bf16 %v6043_v50 }
  0x8c   : > { %v394_v59 = vmax.f32 %v362_v52, 0.0  ;;  %v1412_v63 = vrot.slane %v1411_v56, 4  ;;  %v1486_v43 = vunpack.c.l.b16 %v1407_v13  ;;  %v395_v0 = vmax.f32 %v363_v21, 0.0  ;;  %477 = vst [vmem:[#allocation2 + $0x70] sm:$0x1] %v476_v58 }
  0x8d   : > { %v6013_v3 = vunpack.c.h.bf16 %v6043_v50  ;;  %527 = vst [vmem:[#allocation2 + $0x78] sm:$0x1] %v526_v23  ;;  %v335_v7 = vmul.f32 %v6543_v1, %v6012_v60  ;;  %v488_v9 = vsel %vm6204_vm2, 0, %v487_v55  ;;  %v538_v10 = vsel %vm6222_vm4, 0, %v537_v12  ;;  %v549_v23 = vld [vmem:[#allocation2 + $0xf8] sm:$0x1] }
  0x8e   : > { %v426_v5 = vpack.c.bf16 %v394_v59, %v394_v59  ;;  %v1417_v62 = vsel %vm6376_vm11, %v1412_v63, %v1416_v57  ;;  %v427_v24 = vpack.c.bf16 %v395_v0, %v395_v0  ;;  %489 = vst [vmem:[#allocation2 + $0xb0] sm:$0x1] %v488_v9  ;;  %v6028_v11 = vunpack.c.l.bf16 %v6638_v53  ;;  %v499_v59 = vld [vmem:[#allocation2 + $0xf0] sm:$0x1] }
  0x8f   : > { %v336_v29 = vmul.f32 %v6543_v1, %v6013_v3  ;;  %v1487_v15 = vunpack.c.l.b16 %v1417_v62  ;;  %v995_v17 = vld [vmem:[#allocation2 + $0x20] sm:$0xf]  ;;  %v370_v20 = vadd.f32 %v6556_v32, %v335_v7  ;;  %539 = vst [vmem:[#allocation2 + $0xb8] sm:$0x1] %v538_v10  ;;  %v6029_v12 = vunpack.c.h.bf16 %v6638_v53  ;;  %v6035_v10 = vld [vmem:[%s6211_s27 + $0x10] sm:$0xff]  }
  0x90   : > { %v660_v54 = vshrl.u32 %v426_v5, 16  ;;  %v663_v19 = vshll.u32 %v426_v5, 16  ;;  %v1107_v25 = vshrl.u32 %v995_v17, 16  ;;  %v1110_v27 = vshll.u32 %v995_v17, 16 }
  0x91   : > { %v668_v28 = vshrl.u32 %v427_v24, 16  ;;  %v671_v31 = vshll.u32 %v427_v24, 16  ;;  %v1504_v34 = vpack.c.b16 %v1487_v15, %v1486_v43  ;;  %v6650_v35 = vld [vmem:[#allocation2 + $0x24] sm:$0xf]  ;;  %v371_v38 = vadd.f32 %v6556_v32, %v336_v29 }
  0x92   : > { %v662_v36 = vrot.slane %v660_v54, 7  ;;  %v402_v22 = vmax.f32 %v370_v20, 0.0  ;;  %v6653_v39 = vld [vmem:[#allocation2 + $0x28] sm:$0x1]  ;;  %v1109_v14 = vrot.slane %v1107_v25, 4  ;;  %v1112_v30 = vrot.slane %v1110_v27, 5 }
  0x93   : > { %v1116_v40 = vshll.u32 %v6650_v35, 16  ;;  %v1120_v41 = vshrl.u32 %v6650_v35, 16  ;;  %1648 = vmatmul.bf16.gmra.mxu3 %v1504_v34  ;;  %v1126_v33 = vshll.u32 %v6653_v39, 16  ;;  %v670_v45 = vrot.slane %v668_v28, 7  ;;  %v921_v46 = vld [vmem:[#allocation2 + $0x70] sm:$0xf] }
  0x94   : > { %v665_v61 = vor.u32 %v663_v19, %v662_v36  ;;  %v666_v42 = vrot.slane %v662_v36, 4  ;;  %v1113_v47 = vor.u32 %v1112_v30, %v1109_v14  ;;  %v925_v18 = vld [vmem:[#allocation2 + $0x78] sm:$0x1]  ;;  %v403_v49 = vmax.f32 %v371_v38, 0.0 }
  0x95   : > { %v1118_v48 = vrot.slane %v1116_v40, 5  ;;  %v1122_v4 = vrot.slane %v1120_v41, 4  ;;  %v1128_v50 = vrot.slane %v1126_v33, 5  ;;  %v673_v51 = vor.u32 %v671_v31, %v670_v45  ;;  %v949_v17 = vld [vmem:[#allocation2 + $0xb0] sm:$0xf] }
  0x96   : > { %v675_v44 = vrot.slane %v670_v45, 4  ;;  %v922_v37 = vsel %vm6295_vm8, %v665_v61, %v921_v46  ;;  %v1114_v52 = vrot.slane %v1113_v47, 4  ;;  %v434_v56 = vpack.c.bf16 %v402_v22, %v402_v22  ;;  %v953_v27 = vld [vmem:[#allocation2 + $0xb8] sm:$0x1]  ;;  %v5883_v47 = vld [vmem:[%s7824_s4 + $0x88] sm:$0xff] }
  0x97   : > { %v1123_v55 = vor.u32 %v1122_v4, %v1118_v48  ;;  %923 = vst [vmem:[#allocation2 + $0x70] sm:$0xf] %v922_v37  ;;  %v435_v57 = vpack.c.bf16 %v403_v49, %v403_v49  ;;  %v674_v21 = vsel %vm6283_vm7, %v666_v42, %v673_v51  ;;  %v343_v13 = vmul.f32 %v6543_v1, %v6028_v11  ;;  %v463_v4 = vld [vmem:[#allocation2 + $0x30] sm:$0x1] }
  0x98   : > { %v926_v58 = vsel %vm6204_vm2, %v675_v44, %v925_v18  ;;  %v1119_v60 = vsel %vm6376_vm11, %v1114_v52, %v1118_v48  ;;  %924 = vst [vmem:[#allocation2 + $0x74] sm:$0xf] %v674_v21  ;;  %v728_v43 = vshrl.u32 %v434_v56, 16  ;;  %v731_v0 = vshll.u32 %v434_v56, 16  ;;  %2189 = vmatpush.bf16.msrb.mxu2 %v5883_v47 }
  0x99   : > { %v1124_v63 = vrot.slane %v1123_v55, 4  ;;  %v1462_v3 = vunpack.c.l.b16 %v1119_v60  ;;  %927 = vst [vmem:[#allocation2 + $0x78] sm:$0x1] %v926_v58  ;;  %v736_v5 = vshrl.u32 %v435_v57, 16  ;;  %v739_v7 = vshll.u32 %v435_v57, 16 }
  0x9a   : > { %v344_v9 = vmul.f32 %v6543_v1, %v6029_v12  ;;  %v730_v62 = vrot.slane %v728_v43, 7  ;;  %v378_v24 = vadd.f32 %v6556_v32, %v343_v13  ;;  %v500_v29 = vsel %vm6204_vm2, 0, %v499_v59 }
  0x9b   : > { %v1129_v53 = vsel %vm6376_vm11, %v1124_v63, %v1128_v50  ;;  %v738_v15 = vrot.slane %v736_v5, 7  ;;  %501 = vst [vmem:[#allocation2 + $0xf0] sm:$0x1] %v500_v29  ;;  %v550_v19 = vsel %vm6222_vm4, 0, %v549_v23  ;;  %v5980_v31 = vunpack.c.l.bf16 %v6035_v10 }
  0x9c   : > { %v1463_v11 = vunpack.c.l.b16 %v1129_v53  ;;  %v379_v54 = vadd.f32 %v6556_v32, %v344_v9  ;;  %v733_v20 = vor.u32 %v731_v0, %v730_v62  ;;  %v734_v25 = vrot.slane %v730_v62, 4  ;;  %551 = vst [vmem:[#allocation2 + $0xf8] sm:$0x1] %v550_v19 }
  0x9d   : > { %v410_v28 = vmax.f32 %v378_v24, 0.0  ;;  %v741_v38 = vor.u32 %v739_v7, %v738_v15  ;;  %v743_v22 = vrot.slane %v738_v15, 4  ;;  %v5981_v48 = vunpack.c.h.bf16 %v6035_v10 }
  0x9e   : > { %v1492_v34 = vpack.c.b16 %v1463_v11, %v1462_v3  ;;  %v1005_v36 = vld [vmem:[#allocation2 + $0x70] sm:$0xf]  ;;  %v411_v14 = vmax.f32 %v379_v54, 0.0  ;;  %v950_v41 = vsel %vm6295_vm8, %v733_v20, %v949_v17  ;;  %v319_v60 = vmul.f32 %v6543_v1, %v5980_v31 }
  0x9f   : > { %v1227_v30 = vshrl.u32 %v1005_v36, 16  ;;  %v1230_v40 = vshll.u32 %v1005_v36, 16  ;;  %v442_v33 = vpack.c.bf16 %v410_v28, %v410_v28  ;;  %v6680_v61 = vld [vmem:[#allocation2 + $0x74] sm:$0xf]  ;;  %v742_v42 = vsel %vm6283_vm7, %v734_v25, %v741_v38  ;;  %951 = vst [vmem:[#allocation2 + $0xb0] sm:$0xf] %v950_v41 }
  0xa0   : > { %1588 = vmatmul.bf16.gmra.mxu0 %v1492_v34  ;;  %v954_v45 = vsel %vm6204_vm2, %v743_v22, %v953_v27  ;;  %v443_v46 = vpack.c.bf16 %v411_v14, %v411_v14  ;;  %v6689_v18 = vld [vmem:[#allocation2 + $0x78] sm:$0x1]  ;;  %v1236_v51 = vshll.u32 %v6680_v61, 16  ;;  %v1240_v44 = vshrl.u32 %v6680_v61, 16  ;;  %952 = vst [vmem:[#allocation2 + $0xb4] sm:$0xf] %v742_v42 }
  0xa1   : > { %v1229_v49 = vrot.slane %v1227_v30, 4  ;;  %v1232_v50 = vrot.slane %v1230_v40, 5  ;;  %v1246_v37 = vshll.u32 %v6689_v18, 16  ;;  %v796_v52 = vshrl.u32 %v442_v33, 16  ;;  %955 = vst [vmem:[#allocation2 + $0xb8] sm:$0x1] %v954_v45 }
  0xa2   : > { %v799_v55 = vshll.u32 %v442_v33, 16  ;;  %v804_v56 = vshrl.u32 %v443_v46, 16  ;;  %v1238_v21 = vrot.slane %v1236_v51, 5  ;;  %v1242_v58 = vrot.slane %v1240_v44, 4  ;;  %v977_v0 = vld [vmem:[#allocation2 + $0xf0] sm:$0xf] }
  0xa3   : > { %v1233_v57 = vor.u32 %v1232_v50, %v1229_v49  ;;  %v807_v12 = vshll.u32 %v443_v46, 16  ;;  %v1248_v13 = vrot.slane %v1246_v37, 5  ;;  %v798_v59 = vrot.slane %v796_v52, 7  ;;  %v981_v62 = vld [vmem:[#allocation2 + $0xf8] sm:$0x1]  ;;  %v5916_v49 = vld [vmem:[%s7824_s4 + $0x110] sm:$0xff] }
  0xa4   : > { %v806_v23 = vrot.slane %v804_v56, 7  ;;  %v1243_v43 = vor.u32 %v1242_v58, %v1238_v21  ;;  %v320_v3 = vmul.f32 %v6543_v1, %v5981_v48  ;;  %v464_v5 = vsel %vm6204_vm2, 0, %v463_v4  ;;  %v513_v25 = vld [vmem:[#allocation2 + $0x38] sm:$0x1]  ;;  %v5907_v4 = vld [vmem:[%s7824_s4 + $0xc8] sm:$0xff]  ;;  %v5882_v56 = vld [vmem:[%s7824_s4 + $0x80] sm:$0xff]  ;;  %3182 = vmatpush.bf16.msrb.mxu0 %v5916_v49 }
  0xa5   : > { %v1234_v63 = vrot.slane %v1233_v57, 4  ;;  %v801_v7 = vor.u32 %v799_v55, %v798_v59  ;;  %v802_v9 = vrot.slane %v798_v59, 4  ;;  %465 = vst [vmem:[#allocation2 + $0x30] sm:$0x1] %v464_v5  ;;  %v354_v15 = vadd.f32 %v6556_v32, %v319_v60  ;;  %v5867_v37 = vld [vmem:[%s7824_s4 + $0x8] sm:$0xff]  ;;  %2502 = vmatpush.bf16.msrb.mxu3 %v5907_v4  ;;  %v5906_v57 = vld [vmem:[%s7824_s4 + $0xc0] sm:$0xff]  ;;  %2190 = vmatpush.bf16.msrb.mxu2 %v5882_v56 }
  0xa6   : > { %v809_v10 = vor.u32 %v807_v12, %v806_v23  ;;  %v811_v53 = vrot.slane %v806_v23, 4  ;;  %v1244_v29 = vrot.slane %v1243_v43, 4  ;;  %v1013_v11 = vld [vmem:[#allocation2 + $0xb0] sm:$0xf]  ;;  %v355_v17 = vadd.f32 %v6556_v32, %v320_v3  ;;  %1809 = vmatpush.bf16.msrb.mxu1 %v5867_v37  ;;  %v5915_v59 = vld [vmem:[%s7824_s4 + $0x108] sm:$0xff]  ;;  %v5866_v23 = vld [vmem:[%s7824_s4] sm:$0xff] }
  0xa7   : > { %v1239_v24 = vsel %vm6376_vm11, %v1234_v63, %v1238_v21  ;;  %v1323_v1 = vshrl.u32 %v1013_v11, 16  ;;  %v1326_v19 = vshll.u32 %v1013_v11, 16  ;;  %v1014_v28 = vld [vmem:[#allocation2 + $0xb4] sm:$0xf]  ;;  %v978_v31 = vsel %vm6295_vm8, %v801_v7, %v977_v0 }
  0xa8   : > { %v1472_v54 = vunpack.c.l.b16 %v1239_v24  ;;  %v810_v20 = vsel %vm6283_vm7, %v802_v9, %v809_v10  ;;  %v1249_v27 = vsel %vm6376_vm11, %v1244_v29, %v1248_v13  ;;  %v982_v34 = vsel %vm6204_vm2, %v811_v53, %v981_v62  ;;  %v1050_v38 = vld [vmem:[#allocation2 + $0xb8] sm:$0x1]  ;;  %979 = vst [vmem:[#allocation2 + $0xf0] sm:$0xf] %v978_v31  ;;  %3183 = vmatpush.bf16.msrb.mxu0 %v5915_v59 }
  0xa9   : > { %980 = vst [vmem:[#allocation2 + $0xf4] sm:$0xf] %v810_v20  ;;  %v386_v36 = vmax.f32 %v354_v15, 0.0  ;;  %v1473_v32 = vunpack.c.l.b16 %v1249_v27  ;;  %v1325_v22 = vrot.slane %v1323_v1, 4  ;;  %v1328_v14 = vrot.slane %v1326_v19, 5  ;;  %v5953_v10 = vld [vmem:[%s7824_s4 + $0x1b8] sm:$0xff]  ;;  %2503 = vmatpush.bf16.msrb.mxu3 %v5906_v57 }
  0xaa   : > { %v1332_v30 = vshll.u32 %v1014_v28, 16  ;;  %v1336_v40 = vshrl.u32 %v1014_v28, 16  ;;  %v1342_v41 = vshll.u32 %v1050_v38, 16  ;;  %v387_v33 = vmax.f32 %v355_v17, 0.0  ;;  %983 = vst [vmem:[#allocation2 + $0xf8] sm:$0x1] %v982_v34  ;;  %1810 = vmatpush.bf16.msrb.mxu1 %v5866_v23  ;;  %3916 = vmatpush.bf16.msra.mxu2 %v5953_v10 }
  0xab   : > { %v418_v42 = vpack.c.bf16 %v386_v36, %v386_v36  ;;  %v1497_v45 = vpack.c.b16 %v1473_v32, %v1472_v54  ;;  %v1329_v46 = vor.u32 %v1328_v14, %v1325_v22  ;;  %v514_v48 = vsel %vm6222_vm4, 0, %v513_v25  ;;  %v5914_v19 = vld [vmem:[%s7824_s4 + $0x100] sm:$0xff]  ;;  %v2617_v57 = vld [vmem:[#allocation2 + $0x10] sm:$0xf]  ;;  %v5969_v59 = vld [vmem:[%s7824_s4 + $0x238] sm:$0xff] }
  0xac   : > { %v1334_v47 = vrot.slane %v1332_v30, 5  ;;  %v1338_v50 = vrot.slane %v1336_v40, 4  ;;  %v419_v51 = vpack.c.bf16 %v387_v33, %v387_v33  ;;  %515 = vst [vmem:[#allocation2 + $0x38] sm:$0x1] %v514_v48  ;;  %v1344_v58 = vrot.slane %v1342_v41, 5  ;;  %3184 = vmatpush.bf16.msrb.mxu0 %v5914_v19 }
  0xad   : > { %v592_v44 = vshrl.u32 %v418_v42, 16  ;;  %1613 = vmatmul.bf16.gmra.mxu1 %v1497_v45  ;;  %v1330_v52 = vrot.slane %v1329_v46, 4  ;;  %v595_v55 = vshll.u32 %v418_v42, 16  ;;  %vm1940_vm12 = vcmask 1042432   ;;  %v893_v9 = vld [vmem:[#allocation2 + $0x30] sm:$0xf] }
  0xae   : > { %v1339_v21 = vor.u32 %v1338_v50, %v1334_v47  ;;  %v600_v13 = vshrl.u32 %v419_v51, 16  ;;  %v603_v43 = vshll.u32 %v419_v51, 16  ;;  %vm1941_vm13 = vcmask 1046532   ;;  %v1892_v22 = vld [vmem:[#allocation2] sm:$0xe] }
  0xaf   : > { %v594_v12 = vrot.slane %v592_v44, 7  ;;  %v1335_v60 = vsel %vm6376_vm11, %v1330_v52, %v1334_v47  ;;  %v1021_v53 = vld [vmem:[#allocation2 + $0xf0] sm:$0xf]  ;;  %v6086_v45 = vld [vmem:[#allocation2 + $0x4] sm:$0xf]  ;;  %v5445_v48 = vrot.slane %v1892_v22, 9  ;;  %vm6751_vm14 = vmor %vm1940_vm12, %vm1941_vm13 }
  0xb0   : > { %v1022_v63 = vld [vmem:[#allocation2 + $0xf4] sm:$0xf]  ;;  %v1340_v0 = vrot.slane %v1339_v21, 4  ;;  %v1480_v3 = vunpack.c.l.b16 %v1335_v60  ;;  %v602_v29 = vrot.slane %v600_v13, 7  ;;  %v1419_v17 = vshrl.u32 %v1021_v53, 16  ;;  %v5850_v52 = vld [vmem:[#allocation2] sm:$0xff]  ;;  %5022 = vmatpush.bf16.msra.mxu0 %v5969_v59 }
  0xb1   : > { %v1428_v5 = vshll.u32 %v1022_v63, 16  ;;  %v1432_v7 = vshrl.u32 %v1022_v63, 16  ;;  %v597_v62 = vor.u32 %v595_v55, %v594_v12  ;;  %v598_v24 = vrot.slane %v594_v12, 4  ;;  %v1054_v15 = vld [vmem:[#allocation2 + $0xf8] sm:$0x1] }
  0xb2   : > { %v1345_v11 = vsel %vm6376_vm11, %v1340_v0, %v1344_v58  ;;  %v1422_v54 = vshll.u32 %v1021_v53, 16  ;;  %v1438_v27 = vshll.u32 %v1054_v15, 16  ;;  %v605_v28 = vor.u32 %v603_v43, %v602_v29  ;;  %v6087_v51 = vld [vmem:[#allocation2 + $0x8] sm:$0x1]  ;;  %v5961_v12 = vld [vmem:[%s7824_s4 + $0x1f8] sm:$0xff] }
  0xb3   : > { %v1430_v1 = vrot.slane %v1428_v5, 5  ;;  %v1481_v20 = vunpack.c.l.b16 %v1345_v11  ;;  %v1434_v25 = vrot.slane %v1432_v7, 4  ;;  %v897_v31 = vld [vmem:[#allocation2 + $0x38] sm:$0x1]  ;;  %v1421_v34 = vrot.slane %v1419_v17, 4  ;;  %4597 = vmatpush.bf16.msra.mxu3 %v5961_v12 }
  0xb4   : > { %v1424_v36 = vrot.slane %v1422_v54, 5  ;;  %v607_v32 = vrot.slane %v602_v29, 4  ;;  %v894_v38 = vsel %vm6295_vm8, %v597_v62, %v893_v9  ;;  %v1440_v40 = vrot.slane %v1438_v27, 5  ;;  %v5929_v13 = vld [vmem:[%s7824_s4 + $0x178] sm:$0xff]  ;;  %v2618_v63 = vld [vmem:[#allocation2 + $0x14] sm:$0xf] }
  0xb5   : > { %v1501_v14 = vpack.c.b16 %v1481_v20, %v1480_v3  ;;  %v1435_v30 = vor.u32 %v1434_v25, %v1430_v1  ;;  %v606_v41 = vsel %vm6283_vm7, %v598_v24, %v605_v28  ;;  %895 = vst [vmem:[#allocation2 + $0x30] sm:$0xf] %v894_v38  ;;  %v1945_v46 = vrot.slane %v6086_v45, 5  ;;  %3602 = vmatpush.bf16.msra.mxu1 %v5929_v13  ;;  %v2619_v38 = vld [vmem:[#allocation2 + $0x18] sm:$0x1] }
  0xb6   : > { %v1425_v33 = vor.u32 %v1424_v36, %v1421_v34  ;;  %896 = vst [vmem:[#allocation2 + $0x34] sm:$0xf] %v606_v41  ;;  %v898_v42 = vsel %vm6204_vm2, %v607_v32, %v897_v31  ;;  %v1948_v44 = vrot.slane %v6087_v51, 5  ;;  %v2666_v7 = vshrl.u32 %v2617_v57, 16  ;;  %v2620_v12 = vld [vmem:[#allocation2 + $0x20] sm:$0xf] }
  0xb7   : > { %1633 = vmatmul.bf16.gmra.mxu2 %v1501_v14  ;;  %v1436_v47 = vrot.slane %v1435_v30, 4  ;;  %899 = vst [vmem:[#allocation2 + $0x38] sm:$0x1] %v898_v42  ;;  %v1947_v50 = vrot.slane %v1945_v46, 4  ;;  %v1946_v58 = vsel %vm6751_vm14, %v5445_v48, %v1945_v46  ;;  %v2669_v24 = vshll.u32 %v2617_v57, 16  ;;  %v5890_v57 = vld [vmem:[#allocation2 + $0x10] sm:$0xff] }
  0xb8   : > { %v1426_v4 = vrot.slane %v1425_v33, 4  ;;  %v2071_v62 = vunpack.c.l.b16 %v1946_v58  ;;  %v2675_v19 = vshll.u32 %v2618_v63, 16  ;;  %v2679_v20 = vshrl.u32 %v2618_v63, 16  ;;  %v1893_v42 = vld [vmem:[#allocation2 + $0x10] sm:$0xe] }
  0xb9   : > { %v1441_v37 = vsel %vm6376_vm11, %v1436_v47, %v1440_v40  ;;  %v1949_v60 = vsel %vm6751_vm14, %v1947_v50, %v1948_v44  ;;  %v2668_v31 = vrot.slane %v2666_v7, 4  ;;  %v2671_v34 = vrot.slane %v2669_v24, 5  ;;  %v6088_v40 = vld [vmem:[#allocation2 + $0x14] sm:$0xf]  ;;  %v1894_v13 = vld [vmem:[#allocation2 + $0x20] sm:$0xe] }
  0xba   : > { %v1431_v55 = vsel %vm6376_vm11, %v1426_v4, %v1430_v1  ;;  %v1489_v56 = vunpack.c.l.b16 %v1441_v37  ;;  %v2072_v17 = vunpack.c.l.b16 %v1949_v60  ;;  %v2677_v14 = vrot.slane %v2675_v19, 5  ;;  %v6089_v37 = vld [vmem:[#allocation2 + $0x18] sm:$0x1] }
  0xbb   : > { %v1488_v21 = vunpack.c.l.b16 %v1431_v55  ;;  %v2681_v30 = vrot.slane %v2679_v20, 4  ;;  %v1952_v41 = vrot.slane %v6088_v40, 5  ;;  %v2672_v47 = vor.u32 %v2671_v34, %v2668_v31  ;;  %v6113_v2 = vld [vmem:[#allocation2 + $0xf8] sm:$0x1] }
  0xbc   : > { %v997_v23 = vld [vmem:[#allocation2 + $0x30] sm:$0xf]  ;;  %v2103_v32 = vpack.c.b16 %v2072_v17, %v2071_v62  ;;  %v2685_v48 = vshll.u32 %v2619_v38, 16  ;;  %v5446_v51 = vrot.slane %v1893_v42, 9  ;;  %v1959_v59 = vrot.slane %v6650_v35, 5 }
  0xbd   : > { %v1505_v43 = vpack.c.b16 %v1489_v56, %v1488_v21  ;;  %v6772_v0 = vld [vmem:[#allocation2 + $0x34] sm:$0xf]  ;;  %v1131_v3 = vshrl.u32 %v997_v23, 16  ;;  %v1134_v5 = vshll.u32 %v997_v23, 16  ;;  %1811 = vmatmul.bf16.vlgmr.msrb.gmra.mxu1 %v5850_v52  ;;  %v2682_v50 = vor.u32 %v2681_v30, %v2677_v14  ;;  %v2622_v38 = vld [vmem:[#allocation2 + $0x28] sm:$0x1] }
  0xbe   : > { %v6774_v9 = vld [vmem:[#allocation2 + $0x38] sm:$0x1]  ;;  %v1140_v10 = vshll.u32 %v6772_v0, 16  ;;  %v1144_v53 = vshrl.u32 %v6772_v0, 16  ;;  %v1954_v44 = vrot.slane %v1952_v41, 4  ;;  %v1955_v52 = vrot.slane %v6089_v37, 5 }
  0xbf   : > { %1653 = vmatmul.bf16.gmra.mxu3 %v1505_v43  ;;  %v1133_v29 = vrot.slane %v1131_v3, 4  ;;  %v1136_v11 = vrot.slane %v1134_v5, 5  ;;  %v1150_v15 = vshll.u32 %v6774_v9, 16  ;;  %v5851_v56 = vld [vmem:[#allocation2 + $0x10] sm:$0xff]  ;;  %v2673_v21 = vrot.slane %v2672_v47, 4 }
  0xc0   : > { %v1142_v54 = vrot.slane %v1140_v10, 5  ;;  %v1146_v1 = vrot.slane %v1144_v53, 4  ;;  %v2687_v58 = vrot.slane %v2685_v48, 5  ;;  %v1962_v23 = vrot.slane %v6653_v39, 5  ;;  %v2621_v5 = vld [vmem:[#allocation2 + $0x24] sm:$0xf] }
  0xc1   : > { %v1137_v25 = vor.u32 %v1136_v11, %v1133_v29  ;;  %v1152_v28 = vrot.slane %v1150_v15, 5  ;;  %v2683_v60 = vrot.slane %v2682_v50, 4  ;;  %v1953_v63 = vsel %vm6751_vm14, %v5446_v51, %v1952_v41  ;;  %v5952_v15 = vld [vmem:[%s7824_s4 + $0x1b0] sm:$0xff]  ;;  %v5852_v41 = vld [vmem:[#allocation2 + $0x20] sm:$0xff] }
  0xc2   : > { %v1147_v27 = vor.u32 %v1146_v1, %v1142_v54  ;;  %v1956_v43 = vsel %vm6751_vm14, %v1954_v44, %v1955_v52  ;;  %v5447_v3 = vrot.slane %v1894_v13, 9  ;;  %v1961_v7 = vrot.slane %v1959_v59, 4  ;;  %3917 = vmatpush.bf16.msra.mxu2 %v5952_v15  ;;  %v2623_v42 = vld [vmem:[#allocation2 + $0x30] sm:$0xf]  ;;  %v2624_v51 = vld [vmem:[#allocation2 + $0x34] sm:$0xf] }
  0xc3   : > { %v1138_v36 = vrot.slane %v1137_v25, 4  ;;  %v2678_v10 = vsel %vm6376_vm11, %v2673_v21, %v2677_v14  ;;  %v2690_v53 = vshrl.u32 %v2620_v12, 16  ;;  %v2693_v62 = vshll.u32 %v2620_v12, 16  ;;  %v5968_v47 = vld [vmem:[%s7824_s4 + $0x230] sm:$0xff] }
  0xc4   : > { %v1148_v22 = vrot.slane %v1147_v27, 4  ;;  %v1960_v35 = vsel %vm6751_vm14, %v5447_v3, %v1959_v59  ;;  %v2073_v39 = vunpack.c.l.b16 %v1953_v63  ;;  %v2074_v24 = vunpack.c.l.b16 %v1956_v43  ;;  %5023 = vmatpush.bf16.msra.mxu0 %v5968_v47  ;;  %v2625_v59 = vld [vmem:[#allocation2 + $0x38] sm:$0x1]  ;;  %v1895_v43 = vld [vmem:[#allocation2 + $0x30] sm:$0xe] }
  0xc5   : > { %v1143_v33 = vsel %vm6376_vm11, %v1138_v36, %v1142_v54  ;;  %v1963_v29 = vsel %vm6751_vm14, %v1961_v7, %v1962_v23  ;;  %v2075_v11 = vunpack.c.l.b16 %v1960_v35  ;;  %v2688_v17 = vsel %vm6376_vm11, %v2683_v60, %v2687_v58  ;;  %v1896_v47 = vld [vmem:[#allocation2 + $0x40] sm:$0xe] }
  0xc6   : > { %v1153_v45 = vsel %vm6376_vm11, %v1148_v22, %v1152_v28  ;;  %v1464_v46 = vunpack.c.l.b16 %v1143_v33  ;;  %v2699_v54 = vshll.u32 %v2621_v5, 16  ;;  %v2703_v1 = vshrl.u32 %v2621_v5, 16  ;;  %v5891_v33 = vld [vmem:[#allocation2 + $0x20] sm:$0xff] }
  0xc7   : > { %v1465_v4 = vunpack.c.l.b16 %v1153_v45  ;;  %2191 = vmatmul.bf16.vlgmr.msrb.gmra.mxu2 %v2103_v32  ;;  %v2076_v19 = vunpack.c.l.b16 %v1963_v29  ;;  %v3065_v25 = vunpack.c.l.b16 %v2678_v10  ;;  %v3066_v27 = vunpack.c.l.b16 %v2688_v17  ;;  %v5960_v45 = vld [vmem:[%s7824_s4 + $0x1f0] sm:$0xff] }
  0xc8   : > { %v2104_v28 = vpack.c.b16 %v2074_v24, %v2073_v39  ;;  %v2692_v31 = vrot.slane %v2690_v53, 4  ;;  %v2695_v34 = vrot.slane %v2693_v62, 5  ;;  %v2701_v36 = vrot.slane %v2699_v54, 5  ;;  %4598 = vmatpush.bf16.msra.mxu3 %v5960_v45  ;;  %v5853_v39 = vld [vmem:[#allocation2 + $0x30] sm:$0xff]  ;;  %v2626_v54 = vld [vmem:[#allocation2 + $0x40] sm:$0xf] }
  0xc9   : > { %v1493_v55 = vpack.c.b16 %v1465_v4, %v1464_v46  ;;  %v2105_v20 = vpack.c.b16 %v2076_v19, %v2075_v11  ;;  %v2705_v32 = vrot.slane %v2703_v1, 4  ;;  %v3097_v22 = vpack.c.b16 %v3066_v27, %v3065_v25  ;;  %v5928_v46 = vld [vmem:[%s7824_s4 + $0x170] sm:$0xff]  ;;  %v2627_v1 = vld [vmem:[#allocation2 + $0x44] sm:$0xf] }
  0xca   : > { %v2696_v14 = vor.u32 %v2695_v34, %v2692_v31  ;;  %v2709_v40 = vshll.u32 %v2622_v38, 16  ;;  %v2714_v44 = vshrl.u32 %v2623_v42, 16  ;;  %v2717_v37 = vshll.u32 %v2623_v42, 16  ;;  %3603 = vmatpush.bf16.msra.mxu1 %v5928_v46  ;;  %v5892_v29 = vld [vmem:[#allocation2 + $0x30] sm:$0xff]  ;;  %v6826_v38 = vpop.f32.mrf.mxu1  ;;  %v6090_v45 = vld [vmem:[#allocation2 + $0x44] sm:$0xf] }
  0xcb   : > { %1593 = vmatmul.bf16.gmra.mxu0 %v1493_v55  ;;  %v2706_v30 = vor.u32 %v2705_v32, %v2701_v36  ;;  %v1966_v63 = vrot.slane %v6772_v0, 5  ;;  %v2733_v7 = vshll.u32 %v2625_v59, 16  ;;  %v5448_v53 = vrot.slane %v1895_v43, 9  ;;  %v5967_v59 = vld [vmem:[%s7824_s4 + $0x228] sm:$0xff] }
  0xcc   : > { %v2697_v48 = vrot.slane %v2696_v14, 4  ;;  %v2711_v50 = vrot.slane %v2709_v40, 5  ;;  %v2716_v21 = vrot.slane %v2714_v44, 4  ;;  %v2719_v58 = vrot.slane %v2717_v37, 5  ;;  %5024 = vmatpush.bf16.msra.mxu0 %v5967_v59 }
  0xcd   : > { %1816 = vmatmul.bf16.gmra.mxu1 %v5851_v56  ;;  %v2707_v4 = vrot.slane %v2706_v30, 4  ;;  %v2723_v56 = vshll.u32 %v2624_v51, 16  ;;  %v1968_v62 = vrot.slane %v1966_v63, 4  ;;  %v1969_v35 = vrot.slane %v6774_v9, 5 }
  0xce   : > { %v2702_v52 = vsel %vm6376_vm11, %v2697_v48, %v2701_v36  ;;  %v2720_v3 = vor.u32 %v2719_v58, %v2716_v21  ;;  %v2735_v15 = vrot.slane %v2733_v7, 5  ;;  %v1967_v17 = vsel %vm6751_vm14, %v5448_v53, %v1966_v63  ;;  %v2629_v21 = vld [vmem:[#allocation2 + $0x50] sm:$0xf]  ;;  %v6843_v53 = vpop.f32.mrf.mxu2 }
  0xcf   : > { %2504 = vmatmul.bf16.vlgmr.msrb.gmra.mxu3 %v5890_v57  ;;  %v2712_v55 = vsel %vm6376_vm11, %v2707_v4, %v2711_v50  ;;  %v2727_v57 = vshrl.u32 %v2624_v51, 16  ;;  %v3067_v12 = vunpack.c.l.b16 %v2702_v52  ;;  %v2725_v23 = vrot.slane %v2723_v56, 5  ;;  %v6091_v52 = vld [vmem:[#allocation2 + $0x48] sm:$0x1]  ;;  %v5854_v56 = vld [vmem:[#allocation2 + $0x40] sm:$0xff] }
  0xd0   : > { %v3068_v13 = vunpack.c.l.b16 %v2712_v55  ;;  %v2721_v24 = vrot.slane %v2720_v3, 4  ;;  %v1970_v0 = vsel %vm6751_vm14, %v1968_v62, %v1969_v35  ;;  %v2077_v9 = vunpack.c.l.b16 %v1967_v17 }
  0xd1   : > { %v2729_v60 = vrot.slane %v2727_v57, 4  ;;  %v2738_v25 = vshrl.u32 %v2626_v54, 16  ;;  %v2741_v27 = vshll.u32 %v2626_v54, 16  ;;  %v2747_v34 = vshll.u32 %v2627_v1, 16  ;;  %v5893_v57 = vld [vmem:[#allocation2 + $0x40] sm:$0xff] }
  0xd2   : > { %v3098_v5 = vpack.c.b16 %v3068_v13, %v3067_v12  ;;  %v2726_v19 = vsel %vm6376_vm11, %v2721_v24, %v2725_v23  ;;  %v2751_v36 = vshrl.u32 %v2627_v1, 16  ;;  %v1973_v46 = vrot.slane %v6090_v45, 5  ;;  %v5959_v12 = vld [vmem:[%s7824_s4 + $0x1e8] sm:$0xff]  ;;  %v6841_v3 = vpop.f32.mrf.mxu1  ;;  %v5855_v45 = vld [vmem:[#allocation2 + $0x50] sm:$0xff] }
  0xd3   : > { %v2730_v10 = vor.u32 %v2729_v60, %v2725_v23  ;;  %v3069_v32 = vunpack.c.l.b16 %v2726_v19  ;;  %v2740_v30 = vrot.slane %v2738_v25, 4  ;;  %v2743_v40 = vrot.slane %v2741_v27, 5  ;;  %v5927_v13 = vld [vmem:[%s7824_s4 + $0x168] sm:$0xff]  ;;  %4599 = vmatpush.bf16.msra.mxu3 %v5959_v12  ;;  %v2631_v19 = vld [vmem:[#allocation2 + $0x58] sm:$0x1] }
  0xd4   : > { %v2753_v42 = vrot.slane %v2751_v36, 4  ;;  %v5449_v44 = vrot.slane %v1896_v47, 9  ;;  %v1975_v37 = vrot.slane %v1973_v46, 4  ;;  %v1976_v55 = vrot.slane %v6091_v52, 5  ;;  %3604 = vmatpush.bf16.msra.mxu1 %v5927_v13  ;;  %v6092_v27 = vld [vmem:[#allocation2 + $0x54] sm:$0xf]  ;;  %v6851_v36 = vpop.f32.mrf.mxu3 }
  0xd5   : > { %v2731_v11 = vrot.slane %v2730_v10, 4  ;;  %v2744_v4 = vor.u32 %v2743_v40, %v2740_v30  ;;  %v2762_v7 = vshrl.u32 %v2629_v21, 16  ;;  %v2765_v10 = vshll.u32 %v2629_v21, 16  ;;  %v5894_v47 = vld [vmem:[#allocation2 + $0x50] sm:$0xff]  ;;  %v5950_v13 = vld [vmem:[%s7824_s4 + $0x1a0] sm:$0xff] }
  0xd6   : > { %v1974_v63 = vsel %vm6751_vm14, %v5449_v44, %v1973_v46  ;;  %v1977_v43 = vsel %vm6751_vm14, %v1975_v37, %v1976_v55  ;;  %v6853_v30 = vpop.f32.mrf.mxu2  ;;  %v2632_v37 = vld [vmem:[#allocation2 + $0x60] sm:$0xf]  ;;  %v2633_v55 = vld [vmem:[#allocation2 + $0x64] sm:$0xf] }
  0xd7   : > { %2196 = vmatmul.bf16.gmra.mxu2 %v2104_v28  ;;  %v5951_v28 = vld [vmem:[%s7824_s4 + $0x1a8] sm:$0xff]  ;;  %v2736_v31 = vsel %vm6376_vm11, %v2731_v11, %v2735_v15  ;;  %v2745_v23 = vrot.slane %v2744_v4, 4  ;;  %v2079_v62 = vunpack.c.l.b16 %v1974_v63  ;;  %v2080_v35 = vunpack.c.l.b16 %v1977_v43 }
  0xd8   : > { %3918 = vmatpush.bf16.msra.mxu2 %v5951_v28  ;;  %v2764_v15 = vrot.slane %v2762_v7, 4  ;;  %v2767_v17 = vrot.slane %v2765_v10, 5  ;;  %v1980_v28 = vrot.slane %v6092_v27, 5  ;;  %v2789_v12 = vshll.u32 %v2632_v37, 16 }
  0xd9   : > { %v2107_v1 = vpack.c.b16 %v2080_v35, %v2079_v62  ;;  %v2799_v63 = vshrl.u32 %v2633_v55, 16 }
  0xda   : > { %v6849_v25 = vpop.f32.mrf.mxu1  ;;  %v2791_v35 = vrot.slane %v2789_v12, 5 }
  0xdb   : > { %3185 = vmatmul.bf16.vlgmr.msrb.gmra.mxu0 %v3097_v22  ;;  %v3070_v22 = vunpack.c.l.b16 %v2736_v31  ;;  %v1897_v31 = vld [vmem:[#allocation2 + $0x50] sm:$0xe] }
  0xdc   : > { %v5450_v40 = vrot.slane %v1897_v31, 9  ;;  %3919 = vmatpush.bf16.msra.mxu2 %v5950_v13  ;;  %v6095_v31 = vld [vmem:[#allocation2 + $0x68] sm:$0x1] }
  0xdd   : > { %1821 = vmatmul.bf16.gmra.mxu1 %v5852_v41  ;;  %v2628_v41 = vld [vmem:[#allocation2 + $0x48] sm:$0x1]  ;;  %v3099_v48 = vpack.c.b16 %v3070_v22, %v3069_v32  ;;  %v2781_v22 = vshll.u32 %v2631_v19, 16 }
  0xde   : > { %v2757_v50 = vshll.u32 %v2628_v41, 16  ;;  %v1982_v41 = vrot.slane %v1980_v28, 4 }
  0xdf   : > { %2509 = vmatmul.bf16.gmra.mxu3 %v5891_v33  ;;  %v2749_v33 = vrot.slane %v2747_v34, 5  ;;  %v2768_v34 = vor.u32 %v2767_v17, %v2764_v15  ;;  %v1898_v17 = vld [vmem:[#allocation2 + $0x60] sm:$0xe] }
  0xe0   : > { %v2759_v58 = vrot.slane %v2757_v50, 5  ;;  %v2783_v50 = vrot.slane %v2781_v22, 5  ;;  %v5451_v27 = vrot.slane %v1898_v17, 9  ;;  %v5895_v22 = vld [vmem:[#allocation2 + $0x60] sm:$0xff]  ;;  %v1899_v17 = vld [vmem:[#allocation2 + $0x70] sm:$0xe] }
  0xe1   : > { %v2754_v51 = vor.u32 %v2753_v42, %v2749_v33  ;;  %v2769_v46 = vrot.slane %v2768_v34, 4  ;;  %v1990_v34 = vrot.slane %v6095_v31, 5  ;;  %v1997_v31 = vrot.slane %v6689_v18, 5 }
  0xe2   : > { %v6861_v52 = vpop.f32.mrf.mxu1 }
  0xe3   : > { %v2755_v60 = vrot.slane %v2754_v51, 4  ;;  %v1981_v51 = vsel %vm6751_vm14, %v5450_v40, %v1980_v28  ;;  %v2635_v40 = vld [vmem:[#allocation2 + $0x70] sm:$0xf] }
  0xe5   : > { %v2760_v24 = vsel %vm6376_vm11, %v2755_v60, %v2759_v58  ;;  %v2786_v58 = vshrl.u32 %v2632_v37, 16  ;;  %v2795_v60 = vshll.u32 %v2633_v55, 16  ;;  %v2810_v37 = vshrl.u32 %v2635_v40, 16 }
  0xe6   : > { %v3072_v54 = vunpack.c.l.b16 %v2760_v24  ;;  %v2813_v55 = vshll.u32 %v2635_v40, 16 }
  0xe7   : > { %2201 = vmatmul.bf16.gmra.mxu2 %v2105_v20  ;;  %v2078_v20 = vunpack.c.l.b16 %v1970_v0  ;;  %v2788_v62 = vrot.slane %v2786_v58, 4  ;;  %v2797_v24 = vrot.slane %v2795_v60, 5 }
  0xe9   : > { %v2106_v14 = vpack.c.b16 %v2078_v20, %v2077_v9  ;;  %v2792_v19 = vor.u32 %v2791_v35, %v2788_v62 }
  0xeb   : > { %3190 = vmatmul.bf16.gmra.mxu0 %v3098_v5  ;;  %v2630_v5 = vld [vmem:[#allocation2 + $0x54] sm:$0xf] }
  0xec   : > { %v2775_v11 = vshrl.u32 %v2630_v5, 16 }
  0xed   : > { %1826 = vmatmul.bf16.gmra.mxu1 %v5853_v39  ;;  %v2750_v39 = vsel %vm6376_vm11, %v2745_v23, %v2749_v33  ;;  %v6093_v33 = vld [vmem:[#allocation2 + $0x58] sm:$0x1]  ;;  %v6870_v23 = vpop.f32.mrf.mxu3 }
  0xee   : > { %v3071_v0 = vunpack.c.l.b16 %v2750_v39  ;;  %v2777_v20 = vrot.slane %v2775_v11, 4  ;;  %v1983_v42 = vrot.slane %v6093_v33, 5  ;;  %v2634_v39 = vld [vmem:[#allocation2 + $0x68] sm:$0x1]  ;;  %v6094_v11 = vld [vmem:[#allocation2 + $0x64] sm:$0xf] }
  0xef   : > { %2514 = vmatmul.bf16.gmra.mxu3 %v5892_v29  ;;  %v2771_v29 = vshll.u32 %v2630_v5, 16  ;;  %v6872_v5 = vpop.f32.mrf.mxu2  ;;  %v1987_v15 = vrot.slane %v6094_v11, 5 }
  0xf0   : > { %v3100_v32 = vpack.c.b16 %v3072_v54, %v3071_v0  ;;  %v1984_v44 = vsel %vm6751_vm14, %v1982_v41, %v1983_v42  ;;  %v2636_v41 = vld [vmem:[#allocation2 + $0x74] sm:$0xf]  ;;  %v5958_v42 = vld [vmem:[%s7824_s4 + $0x1e0] sm:$0xff] }
  0xf1   : > { %v2773_v9 = vrot.slane %v2771_v29, 5  ;;  %v2082_v21 = vunpack.c.l.b16 %v1984_v44  ;;  %v2801_v29 = vrot.slane %v2799_v63, 4  ;;  %v1989_v28 = vrot.slane %v1987_v15, 4  ;;  %4600 = vmatpush.bf16.msra.mxu3 %v5958_v42  ;;  %v2638_v42 = vld [vmem:[#allocation2 + $0x80] sm:$0xf] }
  0xf2   : > { %v2812_v63 = vrot.slane %v2810_v37, 4  ;;  %v2837_v37 = vshll.u32 %v2638_v42, 16 }
  0xf3   : > { %v1991_v44 = vsel %vm6751_vm14, %v1989_v28, %v1990_v34  ;;  %v5857_v34 = vld [vmem:[#allocation2 + $0x70] sm:$0xff] }
  0xf4   : > { %v2084_v58 = vunpack.c.l.b16 %v1991_v44  ;;  %v2834_v44 = vshrl.u32 %v2638_v42, 16  ;;  %v5897_v42 = vld [vmem:[#allocation2 + $0x80] sm:$0xff] }
  0xf7   : > { %2206 = vmatmul.bf16.gmra.mxu2 %v2106_v14  ;;  %v2778_v14 = vor.u32 %v2777_v20, %v2773_v9  ;;  %v2802_v20 = vor.u32 %v2801_v29, %v2797_v24  ;;  %v2637_v29 = vld [vmem:[#allocation2 + $0x78] sm:$0x1] }
  0xf9   : > { %v2779_v4 = vrot.slane %v2778_v14, 4  ;;  %v6878_v14 = vpop.f32.mrf.mxu3 }
  0xfb   : > { %3195 = vmatmul.bf16.gmra.mxu0 %v3099_v48  ;;  %v6855_v48 = vpop.f32.mrf.mxu0  ;;  %v2784_v59 = vsel %vm6376_vm11, %v2779_v4, %v2783_v50  ;;  %v2803_v4 = vrot.slane %v2802_v20, 4  ;;  %v6889_v50 = vpop.f32.mrf.mxu2 }
  0xfc   : > { %v3074_v7 = vunpack.c.l.b16 %v2784_v59 }
  0xfd   : > { %1831 = vmatmul.bf16.gmra.mxu1 %v5854_v56  ;;  %v2774_v56 = vsel %vm6376_vm11, %v2769_v46, %v2773_v9  ;;  %v2805_v9 = vshll.u32 %v2634_v39, 16  ;;  %v5966_v46 = vld [vmem:[%s7824_s4 + $0x220] sm:$0xff] }
  0xfe   : > { %v3073_v43 = vunpack.c.l.b16 %v2774_v56  ;;  %v2819_v56 = vshll.u32 %v2636_v41, 16  ;;  %5025 = vmatpush.bf16.msra.mxu0 %v5966_v46 }
  0xff   : > { %2519 = vmatmul.bf16.gmra.mxu3 %v5893_v57  ;;  %v2081_v57 = vunpack.c.l.b16 %v1981_v51  ;;  %v6876_v54 = vpop.f32.mrf.mxu1  ;;  %v2807_v33 = vrot.slane %v2805_v9, 5  ;;  %v1988_v51 = vsel %vm6751_vm14, %v5451_v27, %v1987_v15  ;;  %v1994_v15 = vrot.slane %v6680_v61, 5  ;;  %v5896_v61 = vld [vmem:[#allocation2 + $0x70] sm:$0xff] }
 0x100   : > { %v5452_v27 = vrot.slane %v1899_v17, 9  ;;  %v2640_v17 = vld [vmem:[#allocation2 + $0x88] sm:$0x1] }
 0x101   : > { %v2108_v10 = vpack.c.b16 %v2082_v21, %v2081_v57  ;;  %v2823_v57 = vshrl.u32 %v2636_v41, 16  ;;  %v2083_v21 = vunpack.c.l.b16 %v1988_v51  ;;  %v2808_v59 = vsel %vm6376_vm11, %v2803_v4, %v2807_v33  ;;  %v6903_v11 = vpop.f32.mrf.mxu3 }
 0x102   : > { %v3076_v35 = vunpack.c.l.b16 %v2808_v59  ;;  %v1996_v28 = vrot.slane %v1994_v15, 4 }
 0x103   : > { %v6874_v0 = vpop.f32.mrf.mxu0  ;;  %v2109_v39 = vpack.c.b16 %v2084_v58, %v2083_v21 }
 0x104   : > { %v1998_v46 = vsel %vm6751_vm14, %v1996_v28, %v1997_v31  ;;  %v2853_v28 = vshll.u32 %v2640_v17, 16 }
 0x107   : > { %2211 = vmatmul.bf16.gmra.mxu2 %v2107_v1  ;;  %v3101_v1 = vpack.c.b16 %v3074_v7, %v3073_v43  ;;  %v6901_v60 = vpop.f32.mrf.mxu1  ;;  %v2815_v43 = vrot.slane %v2813_v55, 5  ;;  %v2821_v7 = vrot.slane %v2819_v56, 5  ;;  %v2086_v56 = vunpack.c.l.b16 %v1998_v46 }
 0x10b   : > { %3200 = vmatmul.bf16.gmra.mxu0 %v3100_v32  ;;  %v5856_v32 = vld [vmem:[#allocation2 + $0x60] sm:$0xff]  ;;  %v6895_v12 = vpop.f32.mrf.mxu0 }
 0x10d   : > { %1836 = vmatmul.bf16.gmra.mxu1 %v5855_v45  ;;  %v5926_v45 = vld [vmem:[%s7824_s4 + $0x160] sm:$0xff] }
 0x10e   : > { %3605 = vmatpush.bf16.msra.mxu1 %v5926_v45  ;;  %v6906_v9 = vpop.f32.mrf.mxu2  ;;  %v1995_v45 = vsel %vm6751_vm14, %v5452_v27, %v1994_v15 }
 0x10f   : > { %2524 = vmatmul.bf16.gmra.mxu3 %v5894_v47  ;;  %v2793_v47 = vrot.slane %v2792_v19, 4  ;;  %v2829_v19 = vshll.u32 %v2637_v29, 16  ;;  %v2085_v55 = vunpack.c.l.b16 %v1995_v45  ;;  %v6096_v29 = vld [vmem:[#allocation2 + $0x84] sm:$0xf] }
 0x110   : > { %v2001_v15 = vrot.slane %v6096_v29, 5 }
 0x111   : > { %v2798_v13 = vsel %vm6376_vm11, %v2793_v47, %v2797_v24  ;;  %v2831_v41 = vrot.slane %v2829_v19, 5  ;;  %v2639_v47 = vld [vmem:[#allocation2 + $0x84] sm:$0xf] }
 0x112   : > { %v3075_v62 = vunpack.c.l.b16 %v2798_v13  ;;  %v2847_v21 = vshrl.u32 %v2639_v47, 16 }
 0x114   : > { %v3102_v20 = vpack.c.b16 %v3076_v35, %v3075_v62  ;;  %v2849_v35 = vrot.slane %v2847_v21, 4 }
 0x116   : > { %v6921_v51 = vpop.f32.mrf.mxu3  ;;  %v6923_v58 = vpop.f32.mrf.mxu2 }
 0x117   : > { %2216 = vmatmul.bf16.gmra.mxu2 %v2108_v10  ;;  %v2825_v10 = vrot.slane %v2823_v57, 4  ;;  %v2843_v57 = vshll.u32 %v2639_v47, 16  ;;  %v2641_v47 = vld [vmem:[#allocation2 + $0x90] sm:$0xf] }
 0x119   : > { %v2826_v24 = vor.u32 %v2825_v10, %v2821_v7  ;;  %v2839_v10 = vrot.slane %v2837_v37, 5  ;;  %v2845_v62 = vrot.slane %v2843_v57, 5  ;;  %v5957_v37 = vld [vmem:[%s7824_s4 + $0x1d8] sm:$0xff]  ;;  %v2855_v57 = vrot.slane %v2853_v28, 5 }
 0x11a   : > { %4601 = vmatpush.bf16.msra.mxu3 %v5957_v37 }
 0x11b   : > { %3205 = vmatmul.bf16.gmra.mxu0 %v3101_v1  ;;  %v2816_v1 = vor.u32 %v2815_v43, %v2812_v63  ;;  %v2827_v40 = vrot.slane %v2826_v24, 4  ;;  %v2836_v63 = vrot.slane %v2834_v44, 4  ;;  %v2642_v44 = vld [vmem:[#allocation2 + $0x94] sm:$0xf] }
 0x11d   : > { %1841 = vmatmul.bf16.gmra.mxu1 %v5856_v32  ;;  %v6909_v32 = vpop.f32.mrf.mxu0  ;;  %v2832_v4 = vsel %vm6376_vm11, %v2827_v40, %v2831_v41  ;;  %v2840_v19 = vor.u32 %v2839_v10, %v2836_v63  ;;  %v5949_v41 = vld [vmem:[%s7824_s4 + $0x198] sm:$0xff]  ;;  %v2861_v63 = vshll.u32 %v2641_v47, 16  ;;  %v2871_v10 = vshrl.u32 %v2642_v44, 16 }
 0x11e   : > { %v3078_v59 = vunpack.c.l.b16 %v2832_v4  ;;  %v6929_v27 = vpop.f32.mrf.mxu3  ;;  %3920 = vmatpush.bf16.msra.mxu2 %v5949_v41 }
 0x11f   : > { %2529 = vmatmul.bf16.gmra.mxu3 %v5895_v22  ;;  %v2817_v22 = vrot.slane %v2816_v1, 4  ;;  %v1900_v1 = vld [vmem:[#allocation2 + $0x80] sm:$0xe]  ;;  %7838 = vst [vmem:[#allocation3_spill] sm:$0xff] %v6929_v27  ;;  %v2863_v28 = vrot.slane %v2861_v63, 5  ;;  %v5859_v63 = vld [vmem:[#allocation2 + $0x90] sm:$0xff] }
 0x120   : > { %v5453_v31 = vrot.slane %v1900_v1, 9  ;;  %v5965_v1 = vld [vmem:[%s7824_s4 + $0x218] sm:$0xff] }
 0x121   : > { %v2822_v18 = vsel %vm6376_vm11, %v2817_v22, %v2821_v7  ;;  %v2110_v7 = vpack.c.b16 %v2086_v56, %v2085_v55  ;;  %v6097_v22 = vld [vmem:[#allocation2 + $0x88] sm:$0x1]  ;;  %v5925_v55 = vld [vmem:[%s7824_s4 + $0x158] sm:$0xff]  ;;  %5026 = vmatpush.bf16.msra.mxu0 %v5965_v1 }
 0x122   : > { %v3077_v13 = vunpack.c.l.b16 %v2822_v18  ;;  %v2004_v40 = vrot.slane %v6097_v22, 5  ;;  %v2841_v18 = vrot.slane %v2840_v19, 4  ;;  %v2002_v21 = vsel %vm6751_vm14, %v5453_v31, %v2001_v15  ;;  %3606 = vmatpush.bf16.msra.mxu1 %v5925_v55 }
 0x124   : > { %v3103_v24 = vpack.c.b16 %v3078_v59, %v3077_v13  ;;  %v2858_v59 = vshrl.u32 %v2641_v47, 16  ;;  %v2846_v17 = vsel %vm6376_vm11, %v2841_v18, %v2845_v62  ;;  %v1901_v47 = vld [vmem:[#allocation2 + $0x90] sm:$0xe] }
 0x125   : > { %v3079_v22 = vunpack.c.l.b16 %v2846_v17  ;;  %v5898_v17 = vld [vmem:[#allocation2 + $0x90] sm:$0xff] }
 0x127   : > { %2221 = vmatmul.bf16.gmra.mxu2 %v2109_v39  ;;  %v6927_v39 = vpop.f32.mrf.mxu0 }
 0x12a   : > { %v6911_v33 = vpop.f32.mrf.mxu1 }
 0x12b   : > { %3210 = vmatmul.bf16.gmra.mxu0 %v3102_v20  ;;  %v2850_v20 = vor.u32 %v2849_v35, %v2845_v62  ;;  %v2087_v35 = vunpack.c.l.b16 %v2002_v21 }
 0x12d   : > { %1846 = vmatmul.bf16.gmra.mxu1 %v5857_v34  ;;  %v2003_v34 = vrot.slane %v2001_v15, 4  ;;  %v2851_v56 = vrot.slane %v2850_v20, 4  ;;  %v2860_v20 = vrot.slane %v2858_v59, 4 }
 0x12f   : > { %2534 = vmatmul.bf16.gmra.mxu3 %v5896_v61  ;;  %v5858_v61 = vld [vmem:[#allocation2 + $0x80] sm:$0xff]  ;;  %v2005_v13 = vsel %vm6751_vm14, %v2003_v34, %v2004_v40  ;;  %v2856_v15 = vsel %vm6376_vm11, %v2851_v56, %v2855_v57  ;;  %v2873_v34 = vrot.slane %v2871_v10, 4  ;;  %v2864_v18 = vor.u32 %v2863_v28, %v2860_v20 }
 0x130   : > { %v2088_v29 = vunpack.c.l.b16 %v2005_v13  ;;  %v3080_v40 = vunpack.c.l.b16 %v2856_v15  ;;  %v5454_v57 = vrot.slane %v1901_v47, 9  ;;  %v6099_v13 = vld [vmem:[#allocation2 + $0x98] sm:$0x1]  ;;  %v2644_v28 = vld [vmem:[#allocation2 + $0xa0] sm:$0xf] }
 0x131   : > { %v2011_v59 = vrot.slane %v6099_v13, 5  ;;  %v2865_v10 = vrot.slane %v2864_v18, 4  ;;  %v2885_v47 = vshll.u32 %v2644_v28, 16 }
 0x132   : > { %v6925_v43 = vpop.f32.mrf.mxu1  ;;  %v2111_v41 = vpack.c.b16 %v2088_v29, %v2087_v35  ;;  %v3104_v37 = vpack.c.b16 %v3080_v40, %v3079_v22 }
 0x137   : > { %2226 = vmatmul.bf16.gmra.mxu2 %v2110_v7  ;;  %v2867_v7 = vshll.u32 %v2642_v44, 16 }
 0x139   : > { %v2869_v31 = vrot.slane %v2867_v7, 5 }
 0x13a   : > { %v6934_v45 = vpop.f32.mrf.mxu2  ;;  %v1812_v46 = vpop.f32.mrf.mxu1 }
 0x13b   : > { %3215 = vmatmul.bf16.gmra.mxu0 %v3103_v24  ;;  %v1813_v4 = vadd.f32 %v1812_v46, %v6855_v48  ;;  %v6947_v48 = vpop.f32.mrf.mxu0  ;;  %v2874_v44 = vor.u32 %v2873_v34, %v2869_v31  ;;  %v2645_v34 = vld [vmem:[#allocation2 + $0xa4] sm:$0xf] }
 0x13c   : > { %v2891_v18 = vshll.u32 %v2645_v34, 16 }
 0x13d   : > { %1851 = vmatmul.bf16.gmra.mxu1 %v5858_v61  ;;  %v2643_v61 = vld [vmem:[#allocation2 + $0x98] sm:$0x1]  ;;  %v2875_v35 = vrot.slane %v2874_v44, 4 }
 0x13e   : > { %v2877_v55 = vshll.u32 %v2643_v61, 16  ;;  %v2870_v61 = vsel %vm6376_vm11, %v2865_v10, %v2869_v31  ;;  %v2887_v31 = vrot.slane %v2885_v47, 5  ;;  %v2893_v10 = vrot.slane %v2891_v18, 5  ;;  %v5860_v18 = vld [vmem:[#allocation2 + $0xa0] sm:$0xff] }
 0x13f   : > { %2539 = vmatmul.bf16.gmra.mxu3 %v5897_v42  ;;  %v6098_v42 = vld [vmem:[#allocation2 + $0x94] sm:$0xf] }
 0x140   : > { %v2008_v46 = vrot.slane %v6098_v42, 5  ;;  %v2879_v15 = vrot.slane %v2877_v55, 5  ;;  %v2882_v42 = vshrl.u32 %v2644_v28, 16 }
 0x142   : > { %v6956_v24 = vpop.f32.mrf.mxu3  ;;  %v6958_v19 = vpop.f32.mrf.mxu2  ;;  %v2010_v21 = vrot.slane %v2008_v46, 4  ;;  %v2009_v40 = vsel %vm6751_vm14, %v5454_v57, %v2008_v46  ;;  %v3081_v46 = vunpack.c.l.b16 %v2870_v61 }
 0x143   : > { %7839 = vst [vmem:[#allocation4_spill] sm:$0xff] %v6956_v24  ;;  %v1814_v62 = vpop.f32.mrf.mxu1  ;;  %v2089_v44 = vunpack.c.l.b16 %v2009_v40 }
 0x144   : > { %v1815_v57 = vadd.f32 %v1814_v62, %v6874_v0 }
 0x147   : > { %2231 = vmatmul.bf16.gmra.mxu2 %v2111_v41  ;;  %v2012_v41 = vsel %vm6751_vm14, %v2010_v21, %v2011_v59 }
 0x148   : > { %v6960_v56 = vpop.f32.mrf.mxu0 }
 0x14a   : > { %v6962_v7 = vpop.f32.mrf.mxu3  ;;  %v2192_v29 = vpop.f32.mrf.mxu2 }
 0x14b   : > { %7840 = vst [vmem:[#allocation5_spill] sm:$0xff] %v6962_v7  ;;  %3220 = vmatmul.bf16.gmra.mxu0 %v3104_v37  ;;  %v2272_v1 = vadd.f32 %v2192_v29, %v1813_v4  ;;  %v1817_v20 = vpop.f32.mrf.mxu1  ;;  %v2880_v4 = vsel %vm6376_vm11, %v2875_v35, %v2879_v15  ;;  %v2090_v37 = vunpack.c.l.b16 %v2012_v41  ;;  %v2646_v35 = vld [vmem:[#allocation2 + $0xa8] sm:$0x1]  ;;  %v6100_v15 = vld [vmem:[#allocation2 + $0xa4] sm:$0xf] }
 0x14c   : > { %v1818_v22 = vadd.f32 %v1817_v20, %v6895_v12  ;;  %v2895_v12 = vshrl.u32 %v2645_v34, 16  ;;  %v3082_v21 = vunpack.c.l.b16 %v2880_v4  ;;  %v2015_v40 = vrot.slane %v6100_v15, 5  ;;  %v1902_v34 = vld [vmem:[#allocation2 + $0xa0] sm:$0xe] }
 0x14d   : > { %1856 = vmatmul.bf16.gmra.mxu1 %v5859_v63  ;;  %v2884_v63 = vrot.slane %v2882_v42, 4  ;;  %v2901_v0 = vshll.u32 %v2646_v35, 16  ;;  %v5455_v4 = vrot.slane %v1902_v34, 9  ;;  %v6101_v42 = vld [vmem:[#allocation2 + $0xa8] sm:$0x1]  ;;  %v5956_v35 = vld [vmem:[%s7824_s4 + $0x1d0] sm:$0xff] }
 0x14e   : > { %v2897_v28 = vrot.slane %v2895_v12, 4  ;;  %v3105_v24 = vpack.c.b16 %v3082_v21, %v3081_v46  ;;  %v2017_v27 = vrot.slane %v2015_v40, 4  ;;  %v2018_v47 = vrot.slane %v6101_v42, 5  ;;  %v5899_v12 = vld [vmem:[#allocation2 + $0xa0] sm:$0xff]  ;;  %v2647_v46 = vld [vmem:[#allocation2 + $0xb0] sm:$0xf]  ;;  %4602 = vmatpush.bf16.msra.mxu3 %v5956_v35 }
 0x14f   : > { %2544 = vmatmul.bf16.gmra.mxu3 %v5898_v17  ;;  %v2112_v17 = vpack.c.b16 %v2090_v37, %v2089_v44  ;;  %v2888_v41 = vor.u32 %v2887_v31, %v2884_v63  ;;  %v2903_v63 = vrot.slane %v2901_v0, 5  ;;  %v2016_v34 = vsel %vm6751_vm14, %v5455_v4, %v2015_v40 }
 0x150   : > { %v6973_v55 = vpop.f32.mrf.mxu0  ;;  %v2898_v61 = vor.u32 %v2897_v28, %v2893_v10  ;;  %v2648_v28 = vld [vmem:[#allocation2 + $0xb4] sm:$0xf] }
 0x151   : > { %v2919_v42 = vshrl.u32 %v2648_v28, 16 }
 0x152   : > { %v2505_v13 = vpop.f32.mrf.mxu3  ;;  %v2194_v59 = vpop.f32.mrf.mxu2 }
 0x153   : > { %v2585_v29 = vadd.f32 %v2505_v13, %v2272_v1  ;;  %v2273_v20 = vadd.f32 %v2194_v59, %v1815_v57  ;;  %v1819_v7 = vpop.f32.mrf.mxu1  ;;  %v5948_v1 = vld [vmem:[%s7824_s4 + $0x190] sm:$0xff]  ;;  %v2889_v57 = vrot.slane %v2888_v41, 4  ;;  %v2899_v59 = vrot.slane %v2898_v61, 4 }
 0x154   : > { %3921 = vmatpush.bf16.msra.mxu2 %v5948_v1  ;;  %v2915_v61 = vshll.u32 %v2648_v28, 16  ;;  %v1820_v4 = vadd.f32 %v1819_v7, %v6909_v32  ;;  %v2649_v32 = vld [vmem:[#allocation2 + $0xb8] sm:$0x1] }
 0x155   : > { %v2894_v41 = vsel %vm6376_vm11, %v2889_v57, %v2893_v10  ;;  %v2904_v0 = vsel %vm6376_vm11, %v2899_v59, %v2903_v63 }
 0x156   : > { %v3083_v10 = vunpack.c.l.b16 %v2894_v41  ;;  %v2925_v41 = vshll.u32 %v2649_v32, 16 }
 0x157   : > { %2236 = vmatmul.bf16.gmra.mxu2 %v2112_v17 }
 0x158   : > { %v3186_v62 = vpop.f32.mrf.mxu0 }
 0x159   : > { %v6979_v44 = vadd.f32 %v3186_v62, %v2585_v29  ;;  %v5924_v29 = vld [vmem:[%s7824_s4 + $0x150] sm:$0xff] }
 0x15a   : > { %v2507_v37 = vpop.f32.mrf.mxu3  ;;  %v2197_v13 = vpop.f32.mrf.mxu2  ;;  %3607 = vmatpush.bf16.msra.mxu1 %v5924_v29  ;;  %v6102_v29 = vld [vmem:[#allocation2 + $0xb4] sm:$0xf] }
 0x15b   : > { %3225 = vmatmul.bf16.gmra.mxu0 %v3105_v24  ;;  %v2586_v21 = vadd.f32 %v2507_v37, %v2273_v20  ;;  %v2274_v31 = vadd.f32 %v2197_v13, %v1818_v22  ;;  %v1822_v17 = vpop.f32.mrf.mxu1  ;;  %v2019_v24 = vsel %vm6751_vm14, %v2017_v27, %v2018_v47  ;;  %v2906_v22 = vshrl.u32 %v2647_v46, 16  ;;  %v5964_v27 = vld [vmem:[%s7824_s4 + $0x210] sm:$0xff] }
 0x15c   : > { %v1823_v15 = vadd.f32 %v1822_v17, %v6927_v39  ;;  %v2909_v20 = vshll.u32 %v2647_v46, 16  ;;  %v2091_v39 = vunpack.c.l.b16 %v2016_v34  ;;  %v2092_v62 = vunpack.c.l.b16 %v2019_v24  ;;  %5027 = vmatpush.bf16.msra.mxu0 %v5964_v27  ;;  %v1903_v24 = vld [vmem:[#allocation2 + $0xb0] sm:$0xe] }
 0x15d   : > { %1861 = vmatmul.bf16.gmra.mxu1 %v5860_v18  ;;  %v2908_v47 = vrot.slane %v2906_v22, 4  ;;  %v3084_v37 = vunpack.c.l.b16 %v2904_v0  ;;  %v2917_v13 = vrot.slane %v2915_v61, 5  ;;  %v2921_v17 = vrot.slane %v2919_v42, 4 }
 0x15e   : > { %v2911_v1 = vrot.slane %v2909_v20, 5  ;;  %v2113_v63 = vpack.c.b16 %v2092_v62, %v2091_v39  ;;  %v2022_v34 = vrot.slane %v6102_v29, 5  ;;  %v5456_v0 = vrot.slane %v1903_v24, 9  ;;  %v5861_v39 = vld [vmem:[#allocation2 + $0xb0] sm:$0xff] }
 0x15f   : > { %2549 = vmatmul.bf16.gmra.mxu3 %v5899_v12  ;;  %v2922_v22 = vor.u32 %v2921_v17, %v2917_v13 }
 0x160   : > { %v3188_v40 = vpop.f32.mrf.mxu0  ;;  %v2912_v7 = vor.u32 %v2911_v1, %v2908_v47  ;;  %v2024_v61 = vrot.slane %v2022_v34, 4 }
 0x161   : > { %v7000_v18 = vadd.f32 %v3188_v40, %v2586_v21  ;;  %v3106_v21 = vpack.c.b16 %v3084_v37, %v3083_v10  ;;  %v6103_v40 = vld [vmem:[#allocation2 + $0xb8] sm:$0x1]  ;;  %v2923_v47 = vrot.slane %v2922_v22, 4  ;;  %v2650_v37 = vld [vmem:[#allocation2 + $0xc0] sm:$0xf] }
 0x162   : > { %v2510_v12 = vpop.f32.mrf.mxu3  ;;  %v2199_v57 = vpop.f32.mrf.mxu2  ;;  %v2913_v27 = vrot.slane %v2912_v7, 4  ;;  %v2933_v32 = vshll.u32 %v2650_v37, 16 }
 0x163   : > { %v2587_v46 = vadd.f32 %v2510_v12, %v2274_v31  ;;  %v2275_v59 = vadd.f32 %v2199_v57, %v1820_v4  ;;  %v1824_v28 = vpop.f32.mrf.mxu1  ;;  %v2025_v31 = vrot.slane %v6103_v40, 5  ;;  %v5900_v12 = vld [vmem:[#allocation2 + $0xb0] sm:$0xff]  ;;  %v2651_v57 = vld [vmem:[#allocation2 + $0xc4] sm:$0xf] }
 0x164   : > { %v1825_v35 = vadd.f32 %v1824_v28, %v6947_v48  ;;  %v2023_v28 = vsel %vm6751_vm14, %v5456_v0, %v2022_v34  ;;  %v2918_v29 = vsel %vm6376_vm11, %v2913_v27, %v2917_v13  ;;  %v2939_v7 = vshll.u32 %v2651_v57, 16 }
 0x165   : > { %v2093_v24 = vunpack.c.l.b16 %v2023_v28  ;;  %v2935_v40 = vrot.slane %v2933_v32, 5 }
 0x166   : > { %v2941_v13 = vrot.slane %v2939_v7, 5 }
 0x167   : > { %2241 = vmatmul.bf16.gmra.mxu2 %v2113_v63  ;;  %v2927_v63 = vrot.slane %v2925_v41, 5 }
 0x168   : > { %v3191_v20 = vpop.f32.mrf.mxu0 }
 0x169   : > { %v7003_v62 = vadd.f32 %v3191_v20, %v2587_v46  ;;  %v2026_v46 = vsel %vm6751_vm14, %v2024_v61, %v2025_v31  ;;  %v3085_v20 = vunpack.c.l.b16 %v2918_v29 }
 0x16a   : > { %v2512_v42 = vpop.f32.mrf.mxu3  ;;  %v2202_v48 = vpop.f32.mrf.mxu2 }
 0x16b   : > { %3230 = vmatmul.bf16.gmra.mxu0 %v3106_v21  ;;  %v2588_v4 = vadd.f32 %v2512_v42, %v2275_v59  ;;  %v2276_v1 = vadd.f32 %v2202_v48, %v1823_v15  ;;  %v1827_v10 = vpop.f32.mrf.mxu1  ;;  %v2930_v59 = vshrl.u32 %v2650_v37, 16  ;;  %v2943_v15 = vshrl.u32 %v2651_v57, 16  ;;  %v6104_v57 = vld [vmem:[#allocation2 + $0xc4] sm:$0xf] }
 0x16c   : > { %v1828_v17 = vadd.f32 %v1827_v10, %v6960_v56  ;;  %v2094_v21 = vunpack.c.l.b16 %v2026_v46  ;;  %v2928_v56 = vsel %vm6376_vm11, %v2923_v47, %v2927_v63  ;;  %v2029_v28 = vrot.slane %v6104_v57, 5  ;;  %v1904_v47 = vld [vmem:[#allocation2 + $0xc0] sm:$0xe]  ;;  %v5955_v57 = vld [vmem:[%s7824_s4 + $0x1c8] sm:$0xff] }
 0x16d   : > { %1866 = vmatmul.bf16.gmra.mxu1 %v5861_v39  ;;  %v2932_v61 = vrot.slane %v2930_v59, 4  ;;  %v2945_v31 = vrot.slane %v2943_v15, 4  ;;  %v3086_v27 = vunpack.c.l.b16 %v2928_v56  ;;  %v5457_v32 = vrot.slane %v1904_v47, 9  ;;  %v6105_v15 = vld [vmem:[#allocation2 + $0xc8] sm:$0x1]  ;;  %4603 = vmatpush.bf16.msra.mxu3 %v5955_v57 }
 0x16e   : > { %v2114_v48 = vpack.c.b16 %v2094_v21, %v2093_v24  ;;  %v2031_v7 = vrot.slane %v2029_v28, 4  ;;  %v5862_v24 = vld [vmem:[#allocation2 + $0xc0] sm:$0xff]  ;;  %v6106_v57 = vld [vmem:[#allocation2 + $0xd4] sm:$0xf] }
 0x16f   : > { %2554 = vmatmul.bf16.gmra.mxu3 %v5900_v12  ;;  %v2652_v12 = vld [vmem:[#allocation2 + $0xc8] sm:$0x1]  ;;  %v2936_v63 = vor.u32 %v2935_v40, %v2932_v61  ;;  %v3107_v29 = vpack.c.b16 %v3086_v27, %v3085_v20  ;;  %v2654_v20 = vld [vmem:[#allocation2 + $0xd4] sm:$0xf]  ;;  %v2030_v47 = vsel %vm6751_vm14, %v5457_v32, %v2029_v28 }
 0x170   : > { %v3193_v22 = vpop.f32.mrf.mxu0  ;;  %v2949_v46 = vshll.u32 %v2652_v12, 16  ;;  %v5963_v32 = vld [vmem:[%s7824_s4 + $0x208] sm:$0xff] }
 0x171   : > { %v7014_v34 = vadd.f32 %v3193_v22, %v2588_v4  ;;  %v2946_v4 = vor.u32 %v2945_v31, %v2941_v13  ;;  %v2032_v22 = vrot.slane %v6105_v15, 5  ;;  %v2937_v56 = vrot.slane %v2936_v63, 4  ;;  %v5901_v31 = vld [vmem:[#allocation2 + $0xc0] sm:$0xff]  ;;  %5028 = vmatpush.bf16.msra.mxu0 %v5963_v32  ;;  %4604 = vmatpush.bf16.msra.mxu3 %v5954_v6 }
 0x172   : > { %v2515_v41 = vpop.f32.mrf.mxu3  ;;  %v2204_v0 = vpop.f32.mrf.mxu2 }
 0x173   : > { %v2589_v39 = vadd.f32 %v2515_v41, %v2276_v1  ;;  %v2277_v42 = vadd.f32 %v2204_v0, %v1825_v35  ;;  %v1829_v10 = vpop.f32.mrf.mxu1  ;;  %v5947_v35 = vld [vmem:[%s7824_s4 + $0x188] sm:$0xff]  ;;  %v2653_v1 = vld [vmem:[#allocation2 + $0xd0] sm:$0xf]  ;;  %v2947_v41 = vrot.slane %v2946_v4, 4  ;;  %v2951_v0 = vrot.slane %v2949_v46, 5 }
 0x174   : > { %v1830_v37 = vadd.f32 %v1829_v10, %v6973_v55  ;;  %3922 = vmatpush.bf16.msra.mxu2 %v5947_v35  ;;  %v2954_v12 = vshrl.u32 %v2653_v1, 16  ;;  %v2957_v10 = vshll.u32 %v2653_v1, 16  ;;  %v2033_v63 = vsel %vm6751_vm14, %v2031_v7, %v2032_v22 }
 0x175   : > { %v2942_v4 = vsel %vm6376_vm11, %v2937_v56, %v2941_v13  ;;  %v2952_v46 = vsel %vm6376_vm11, %v2947_v41, %v2951_v0  ;;  %v2655_v41 = vld [vmem:[#allocation2 + $0xd8] sm:$0x1] }
 0x176   : > { %v2956_v15 = vrot.slane %v2954_v12, 4  ;;  %v2959_v35 = vrot.slane %v2957_v10, 5  ;;  %v3087_v13 = vunpack.c.l.b16 %v2942_v4  ;;  %v1905_v10 = vld [vmem:[#allocation2 + $0xd0] sm:$0xe] }
 0x177   : > { %2246 = vmatmul.bf16.gmra.mxu2 %v2114_v48 }
 0x178   : > { %v3196_v59 = vpop.f32.mrf.mxu0 }
 0x179   : > { %v7020_v55 = vadd.f32 %v3196_v59, %v2589_v39  ;;  %v5923_v39 = vld [vmem:[%s7824_s4 + $0x148] sm:$0xff]  ;;  %v2096_v59 = vunpack.c.l.b16 %v2033_v63 }
 0x17a   : > { %v2517_v21 = vpop.f32.mrf.mxu3  ;;  %v2207_v61 = vpop.f32.mrf.mxu2  ;;  %3608 = vmatpush.bf16.msra.mxu1 %v5923_v39  ;;  %v2036_v39 = vrot.slane %v6106_v57, 5 }
 0x17b   : > { %7841 = vst [vmem:[#allocation6_spill] sm:$0xff] %v7020_v55  ;;  %3235 = vmatmul.bf16.gmra.mxu0 %v3107_v29  ;;  %v2590_v40 = vadd.f32 %v2517_v21, %v2277_v42  ;;  %v2278_v27 = vadd.f32 %v2207_v61, %v1828_v17  ;;  %v1832_v48 = vpop.f32.mrf.mxu1  ;;  %v2963_v42 = vshll.u32 %v2654_v20, 16  ;;  %v2967_v17 = vshrl.u32 %v2654_v20, 16 }
 0x17c   : > { %v2095_v29 = vunpack.c.l.b16 %v2030_v47  ;;  %v6048_v47 = vld [vmem:[%s6211_s27 + $0x78] sm:$0xff]  }
 0x17d   : > { %1871 = vmatmul.bf16.gmra.mxu1 %v5862_v24  ;;  %v7039_v7 = vrot.slane %v2963_v42, 5  ;;  %v2969_v22 = vrot.slane %v2967_v17, 4  ;;  %v3088_v24 = vunpack.c.l.b16 %v2952_v46  ;;  %v2973_v42 = vshll.u32 %v2655_v41, 16  ;;  %v5863_v41 = vld [vmem:[#allocation2 + $0xd0] sm:$0xff] }
 0x17e   : > { %v2115_v20 = vpack.c.b16 %v2096_v59, %v2095_v29  ;;  %v6033_v17 = vunpack.c.h.bf16 %v6048_v47  ;;  %v6108_v59 = vld [vmem:[%s7822_s2] ss:$0 sm:$0xff] }
 0x17f   : > { %2559 = vmatmul.bf16.gmra.mxu3 %v5901_v31  ;;  %v2960_v31 = vor.u32 %v2959_v35, %v2956_v15  ;;  %v2970_v63 = vor.u32 %v2969_v22, %v7039_v7  ;;  %v3108_v4 = vpack.c.b16 %v3088_v24, %v3087_v13  ;;  %v1833_v22 = vadd.f32 %v1832_v48, %v6826_v38 }
 0x180   : > { %v3198_v28 = vpop.f32.mrf.mxu0  ;;  %v346_v35 = vmul.f32 %v6108_v59, %v6033_v17  ;;  %v5902_v17 = vld [vmem:[#allocation2 + $0xd0] sm:$0xff] }
 0x181   : > { %v7041_v1 = vadd.f32 %v3198_v28, %v2590_v40  ;;  %v6032_v40 = vunpack.c.l.bf16 %v6048_v47  ;;  %v2961_v46 = vrot.slane %v2960_v31, 4  ;;  %v5458_v28 = vrot.slane %v1905_v10, 9  ;;  %v2657_v31 = vld [vmem:[#allocation2 + $0xe4] sm:$0xf]  ;;  %v6109_v47 = vld [vmem:[%s7823_s3] ss:$0 sm:$0xff] }
 0x182   : > { %v2520_v21 = vpop.f32.mrf.mxu3  ;;  %v2209_v56 = vpop.f32.mrf.mxu2  ;;  %v381_v55 = vadd.f32 %v6109_v47, %v346_v35 }
 0x183   : > { %7842 = vst [vmem:[#allocation7_spill] sm:$0xff] %v7041_v1  ;;  %v2591_v0 = vadd.f32 %v2520_v21, %v2278_v27  ;;  %v2279_v61 = vadd.f32 %v2209_v56, %v1830_v37  ;;  %v1834_v12 = vpop.f32.mrf.mxu1  ;;  %v2656_v1 = vld [vmem:[#allocation2 + $0xe0] sm:$0xf]  ;;  %v2038_v27 = vrot.slane %v2036_v39, 4  ;;  %v6107_v37 = vld [vmem:[#allocation2 + $0xd8] sm:$0x1]  ;;  %v345_v15 = vmul.f32 %v6108_v59, %v6032_v40 }
 0x184   : > { %v2039_v29 = vrot.slane %v6107_v37, 5  ;;  %v2971_v21 = vrot.slane %v2970_v63, 4  ;;  %v2975_v56 = vrot.slane %v2973_v42, 5  ;;  %v2978_v10 = vshrl.u32 %v2656_v1, 16  ;;  %v502_v63 = vld [vmem:[#allocation2 + $0x100] sm:$0x1] }
 0x185   : > { %v2981_v57 = vshll.u32 %v2656_v1, 16  ;;  %v380_v37 = vadd.f32 %v6109_v47, %v345_v15  ;;  %v503_v1 = vsel %vm6204_vm2, 0, %v502_v63  ;;  %v2966_v59 = vsel %vm6376_vm11, %v2961_v46, %v7039_v7 }
 0x186   : > { %v2040_v42 = vsel %vm6751_vm14, %v2038_v27, %v2039_v29  ;;  %v2991_v15 = vshrl.u32 %v2657_v31, 16  ;;  %504 = vst [vmem:[#allocation2 + $0x100] sm:$0x1] %v503_v1  ;;  %v2980_v35 = vrot.slane %v2978_v10, 4 }
 0x187   : > { %2251 = vmatmul.bf16.gmra.mxu2 %v2115_v20  ;;  %v2098_v29 = vunpack.c.l.b16 %v2040_v42 }
 0x188   : > { %v3201_v32 = vpop.f32.mrf.mxu0  ;;  %v2993_v46 = vrot.slane %v2991_v15, 4 }
 0x189   : > { %v7049_v13 = vadd.f32 %v3201_v32, %v2591_v0  ;;  %v2037_v0 = vsel %vm6751_vm14, %v5458_v28, %v2036_v39  ;;  %v412_v32 = vmax.f32 %v380_v37, 0.0  ;;  %v2983_v39 = vrot.slane %v2981_v57, 5 }
 0x18a   : > { %v2522_v24 = vpop.f32.mrf.mxu3  ;;  %v2212_v20 = vpop.f32.mrf.mxu2  ;;  %v413_v28 = vmax.f32 %v381_v55, 0.0  ;;  %v2097_v27 = vunpack.c.l.b16 %v2037_v0  ;;  %v1835_v37 = vadd.f32 %v1834_v12, %v6841_v3  ;;  %v2658_v0 = vld [vmem:[#allocation2 + $0xe8] sm:$0x1] }
 0x18b   : > { %7843 = vst [vmem:[#allocation8_spill] sm:$0xff] %v7049_v13  ;;  %3240 = vmatmul.bf16.gmra.mxu0 %v3108_v4  ;;  %v2592_v40 = vadd.f32 %v2522_v24, %v2279_v61  ;;  %v2280_v38 = vadd.f32 %v2212_v20, %v1833_v22  ;;  %v1837_v48 = vpop.f32.mrf.mxu1  ;;  %v2976_v61 = vsel %vm6376_vm11, %v2971_v21, %v2975_v56  ;;  %v2987_v4 = vshll.u32 %v2657_v31, 16 }
 0x18c   : > { %v444_v22 = vpack.c.bf16 %v412_v32, %v412_v32  ;;  %v3089_v20 = vunpack.c.l.b16 %v2966_v59  ;;  %v3090_v47 = vunpack.c.l.b16 %v2976_v61  ;;  %v2984_v31 = vor.u32 %v2983_v39, %v2980_v35  ;;  %v6110_v32 = vld [vmem:[#allocation2 + $0xe4] sm:$0xf]  ;;  %v1906_v59 = vld [vmem:[#allocation2 + $0xe0] sm:$0xe] }
 0x18d   : > { %1876 = vmatmul.bf16.gmra.mxu1 %v5863_v41  ;;  %v7066_v7 = vrot.slane %v2987_v4, 5  ;;  %v445_v10 = vpack.c.bf16 %v413_v28, %v413_v28  ;;  %v2116_v63 = vpack.c.b16 %v2098_v29, %v2097_v27  ;;  %v2043_v1 = vrot.slane %v6110_v32, 5  ;;  %v984_v27 = vld [vmem:[#allocation2 + $0x100] sm:$0xf] }
 0x18e   : > { %v813_v57 = vshrl.u32 %v444_v22, 16  ;;  %v3109_v3 = vpack.c.b16 %v3090_v47, %v3089_v20  ;;  %v2997_v61 = vshll.u32 %v2658_v0, 16  ;;  %v816_v4 = vshll.u32 %v444_v22, 16  ;;  %v5946_v20 = vld [vmem:[%s7824_s4 + $0x180] sm:$0xff] }
 0x18f   : > { %2564 = vmatmul.bf16.gmra.mxu3 %v5902_v17  ;;  %v2994_v12 = vor.u32 %v2993_v46, %v7066_v7  ;;  %v821_v15 = vshrl.u32 %v445_v10, 16  ;;  %v2985_v35 = vrot.slane %v2984_v31, 4  ;;  %v5459_v39 = vrot.slane %v1906_v59, 9  ;;  %v5864_v0 = vld [vmem:[#allocation2 + $0xe0] sm:$0xff]  ;;  %3923 = vmatpush.bf16.msra.mxu2 %v5946_v20 }
 0x190   : > { %v3203_v24 = vpop.f32.mrf.mxu0  ;;  %v824_v28 = vshll.u32 %v445_v10, 16  ;;  %v1838_v22 = vadd.f32 %v1837_v48, %v6849_v25  ;;  %v5903_v32 = vld [vmem:[#allocation2 + $0xe0] sm:$0xff]  ;;  %v2999_v59 = vrot.slane %v2997_v61, 5 }
 0x191   : > { %v7068_v21 = vadd.f32 %v3203_v24, %v2592_v40  ;;  %v815_v40 = vrot.slane %v813_v57, 7  ;;  %v552_v24 = vld [vmem:[#allocation2 + $0x108] sm:$0x1]  ;;  %v2995_v57 = vrot.slane %v2994_v12, 4  ;;  %v2044_v61 = vsel %vm6751_vm14, %v5459_v39, %v2043_v1 }
 0x192   : > { %v2525_v56 = vpop.f32.mrf.mxu3  ;;  %v2214_v41 = vpop.f32.mrf.mxu2  ;;  %v553_v31 = vsel %vm6222_vm4, 0, %v552_v24  ;;  %v2990_v24 = vsel %vm6376_vm11, %v2985_v35, %v7066_v7  ;;  %v2099_v39 = vunpack.c.l.b16 %v2044_v61 }
 0x193   : > { %7844 = vst [vmem:[#allocation9_spill] sm:$0xff] %v7068_v21  ;;  %v2593_v55 = vadd.f32 %v2525_v56, %v2280_v38  ;;  %v2281_v17 = vadd.f32 %v2214_v41, %v1835_v37  ;;  %v7070_v42 = vpop.f32.mrf.mxu1  ;;  %v2045_v38 = vrot.slane %v2043_v1, 4  ;;  %v6111_v37 = vld [vmem:[#allocation2 + $0xe8] sm:$0x1]  ;;  %v818_v47 = vor.u32 %v816_v4, %v815_v40  ;;  %v2659_v21 = vld [vmem:[#allocation2 + $0xf0] sm:$0xf] }
 0x194   : > { %v2046_v56 = vrot.slane %v6111_v37, 5  ;;  %v819_v46 = vrot.slane %v815_v40, 4  ;;  %v823_v41 = vrot.slane %v821_v15, 7  ;;  %554 = vst [vmem:[#allocation2 + $0x108] sm:$0x1] %v553_v31  ;;  %v3005_v15 = vshll.u32 %v2659_v21, 16 }
 0x195   : > { %v985_v40 = vsel %vm6295_vm8, %v818_v47, %v984_v27  ;;  %v2660_v4 = vld [vmem:[#allocation2 + $0xf4] sm:$0xf]  ;;  %v3000_v1 = vsel %vm6376_vm11, %v2995_v57, %v2999_v59  ;;  %v3091_v47 = vunpack.c.l.b16 %v2990_v24 }
 0x196   : > { %v826_v13 = vor.u32 %v824_v28, %v823_v41  ;;  %986 = vst [vmem:[#allocation2 + $0x100] sm:$0xf] %v985_v40  ;;  %v2047_v16 = vsel %vm6751_vm14, %v2045_v38, %v2046_v56  ;;  %v3011_v28 = vshll.u32 %v2660_v4, 16  ;;  %v828_v27 = vrot.slane %v823_v41, 4 }
 0x197   : > { %2256 = vmatmul.bf16.gmra.mxu2 %v2116_v63  ;;  %v2100_v38 = vunpack.c.l.b16 %v2047_v16  ;;  %v3015_v8 = vshrl.u32 %v2660_v4, 16  ;;  %v3007_v7 = vrot.slane %v3005_v15, 5  ;;  %v1907_v4 = vld [vmem:[#allocation2 + $0xf0] sm:$0xe]  ;;  %v2053_v15 = vrot.slane %v6113_v2, 5 }
 0x198   : > { %v3206_v29 = vpop.f32.mrf.mxu0  ;;  %v3013_v57 = vrot.slane %v3011_v28, 5  ;;  %v5865_v28 = vld [vmem:[#allocation2 + $0xf0] sm:$0xff] }
 0x199   : > { %v7079_v63 = vadd.f32 %v3206_v29, %v2593_v55  ;;  %v5922_v55 = vld [vmem:[%s7824_s4 + $0x140] sm:$0xff]  ;;  %v1840_v29 = vadd.f32 %v7070_v42, %v6861_v52  ;;  %v3017_v59 = vrot.slane %v3015_v8, 4  ;;  %v2661_v52 = vld [vmem:[#allocation2 + $0xf8] sm:$0x1]  ;;  %v6112_v42 = vld [vmem:[#allocation2 + $0xf4] sm:$0xf] }
 0x19a   : > { %v2527_v10 = vpop.f32.mrf.mxu3  ;;  %v2217_v37 = vpop.f32.mrf.mxu2  ;;  %3609 = vmatpush.bf16.msra.mxu1 %v5922_v55  ;;  %v2050_v40 = vrot.slane %v6112_v42, 5  ;;  %v3021_v61 = vshll.u32 %v2661_v52, 16  ;;  %v4037_v52 = vld [vmem:[#allocation2 + $0x20] sm:$0xf]  ;;  %v3298_v2 = vld [vmem:[#allocation2 + $0x10] sm:$0xe] }
 0x19b   : > { %3245 = vmatmul.bf16.gmra.mxu0 %v3109_v3  ;;  %v2594_v25 = vadd.f32 %v2527_v10, %v2281_v17  ;;  %v2282_v48 = vadd.f32 %v2217_v37, %v1838_v22  ;;  %v1842_v12 = vpop.f32.mrf.mxu1  ;;  %v827_v17 = vsel %vm6283_vm7, %v819_v46, %v826_v13  ;;  %v3002_v3 = vshrl.u32 %v2659_v21, 16  ;;  %v5962_v21 = vld [vmem:[%s7824_s4 + $0x200] sm:$0xff]  ;;  %v988_v35 = vld [vmem:[#allocation2 + $0x108] sm:$0x1] }
 0x19c   : > { %987 = vst [vmem:[#allocation2 + $0x104] sm:$0xf] %v827_v17  ;;  %v3092_v46 = vunpack.c.l.b16 %v3000_v1  ;;  %5029 = vmatpush.bf16.msra.mxu0 %v5962_v21  ;;  %v3018_v55 = vor.u32 %v3017_v59, %v3013_v57  ;;  %v5460_v17 = vrot.slane %v1907_v4, 9 }
 0x19d   : > { %1881 = vmatmul.bf16.gmra.mxu1 %v5864_v0  ;;  %v3004_v56 = vrot.slane %v3002_v3, 4  ;;  %v989_v0 = vsel %vm6204_vm2, %v828_v27, %v988_v35  ;;  %v2052_v3 = vrot.slane %v2050_v40, 4  ;;  %v2662_v27 = vld [vmem:[#allocation2 + $0x100] sm:$0xf]  ;;  %v3023_v35 = vrot.slane %v3021_v61, 5 }
 0x19e   : > { %990 = vst [vmem:[#allocation2 + $0x108] sm:$0x1] %v989_v0  ;;  %v3110_v6 = vpack.c.b16 %v3092_v46, %v3091_v47 }
 0x19f   : > { %2569 = vmatmul.bf16.gmra.mxu3 %v5903_v32  ;;  %v2117_v32 = vpack.c.b16 %v2100_v38, %v2099_v39  ;;  %v6114_v39 = vld [vmem:[#allocation2 + $0x14] sm:$0xf] }
 0x1a0   : > { %v3208_v13 = vpop.f32.mrf.mxu0  ;;  %v3364_v38 = vrot.slane %v6114_v39, 5 }
 0x1a1   : > { %v7105_v20 = vadd.f32 %v3208_v13, %v2594_v25  ;;  %v3008_v25 = vor.u32 %v3007_v7, %v3004_v56  ;;  %v5904_v56 = vld [vmem:[#allocation2 + $0xf0] sm:$0xff]  ;;  %v3019_v7 = vrot.slane %v3018_v55, 4 }
 0x1a2   : > { %v2530_v41 = vpop.f32.mrf.mxu3  ;;  %v2219_v22 = vpop.f32.mrf.mxu2  ;;  %v3366_v42 = vrot.slane %v3364_v38, 4 }
 0x1a3   : > { %v2595_v31 = vadd.f32 %v2530_v41, %v2282_v48  ;;  %v2283_v10 = vadd.f32 %v2219_v22, %v1840_v29  ;;  %v1844_v37 = vpop.f32.mrf.mxu1  ;;  %v1843_v48 = vadd.f32 %v1842_v12, %v6876_v54  ;;  %v3009_v24 = vrot.slane %v3008_v25, 4  ;;  %v2663_v21 = vld [vmem:[#allocation2 + $0x104] sm:$0xf] }
 0x1a4   : > { %v2051_v54 = vsel %vm6751_vm14, %v5460_v17, %v2050_v40  ;;  %v2054_v12 = vsel %vm6751_vm14, %v2052_v3, %v2053_v15  ;;  %v3026_v41 = vshrl.u32 %v2662_v27, 16  ;;  %v3029_v22 = vshll.u32 %v2662_v27, 16 }
 0x1a5   : > { %v3014_v0 = vsel %vm6376_vm11, %v3009_v24, %v3013_v57  ;;  %v3039_v59 = vshrl.u32 %v2663_v21, 16  ;;  %v3024_v25 = vsel %vm6376_vm11, %v3019_v7, %v3023_v35  ;;  %v2101_v40 = vunpack.c.l.b16 %v2051_v54 }
 0x1a6   : > { %v2102_v4 = vunpack.c.l.b16 %v2054_v12  ;;  %v3093_v61 = vunpack.c.l.b16 %v3014_v0  ;;  %v3028_v57 = vrot.slane %v3026_v41, 4  ;;  %v3031_v17 = vrot.slane %v3029_v22, 5 }
 0x1a7   : > { %2261 = vmatmul.bf16.gmra.mxu2 %v2117_v32  ;;  %v6115_v32 = vld [vmem:[#allocation2 + $0x18] sm:$0x1]  ;;  %v4086_v15 = vshrl.u32 %v4037_v52, 16  ;;  %v3041_v39 = vrot.slane %v3039_v59, 4 }
 0x1a8   : > { %v3211_v16 = vpop.f32.mrf.mxu0  ;;  %v3032_v12 = vor.u32 %v3031_v17, %v3028_v57 }
 0x1a9   : > { %v7110_v1 = vadd.f32 %v3211_v16, %v2595_v31  ;;  %v3035_v31 = vshll.u32 %v2663_v21, 16  ;;  %v1845_v16 = vadd.f32 %v1844_v37, %v6901_v60  ;;  %v2118_v60 = vpack.c.b16 %v2102_v4, %v2101_v40  ;;  %v2664_v37 = vld [vmem:[#allocation2 + $0x108] sm:$0x1] }
 0x1aa   : > { %v2532_v8 = vpop.f32.mrf.mxu3  ;;  %v2222_v13 = vpop.f32.mrf.mxu2  ;;  %v7131_v4 = vld [vmem:[#allocation2 + $0x28] sm:$0x1] }
 0x1ab   : > { %3250 = vmatmul.bf16.gmra.mxu0 %v3110_v6  ;;  %v2596_v29 = vadd.f32 %v2532_v8, %v2283_v10  ;;  %v2284_v47 = vadd.f32 %v2222_v13, %v1843_v48  ;;  %v1847_v46 = vpop.f32.mrf.mxu1  ;;  %v3367_v10 = vrot.slane %v6115_v32, 5  ;;  %v7120_v6 = vld [vmem:[#allocation2 + $0x24] sm:$0xf]  ;;  %v3037_v3 = vrot.slane %v3035_v31, 5 }
 0x1ac   : > { %v4089_v48 = vshll.u32 %v4037_v52, 16  ;;  %v5621_v8 = vrot.slane %v3298_v2, 9  ;;  %v4095_v13 = vshll.u32 %v7120_v6, 16  ;;  %v4099_v21 = vshrl.u32 %v7120_v6, 16 }
 0x1ad   : > { %1886 = vmatmul.bf16.gmra.mxu1 %v5865_v28  ;;  %v4088_v31 = vrot.slane %v4086_v15, 4  ;;  %v3042_v59 = vor.u32 %v3041_v39, %v3037_v3  ;;  %v3045_v52 = vshll.u32 %v2664_v37, 16  ;;  %v1848_v57 = vadd.f32 %v1847_v46, %v6911_v33  ;;  %v5905_v39 = vld [vmem:[#allocation2 + $0x100] sm:$0xff] }
 0x1ae   : > { %v3365_v41 = vsel %vm6751_vm14, %v5621_v8, %v3364_v38  ;;  %v4091_v32 = vrot.slane %v4089_v48, 5  ;;  %v3033_v38 = vrot.slane %v3032_v12, 4  ;;  %v6116_v12 = vld [vmem:[#allocation2 + $0x24] sm:$0xf] }
 0x1af   : > { %2574 = vmatmul.bf16.gmra.mxu3 %v5904_v56  ;;  %v3094_v56 = vunpack.c.l.b16 %v3024_v25  ;;  %v3490_v22 = vunpack.c.l.b16 %v3365_v41  ;;  %v4101_v25 = vrot.slane %v4099_v21, 4  ;;  %v3047_v15 = vrot.slane %v3045_v52, 5 }
 0x1b0   : > { %v3213_v55 = vpop.f32.mrf.mxu0  ;;  %v4092_v17 = vor.u32 %v4091_v32, %v4088_v31  ;;  %v3038_v21 = vsel %vm6376_vm11, %v3033_v38, %v3037_v3  ;;  %v3371_v41 = vrot.slane %v6116_v12, 5  ;;  %v3299_v3 = vld [vmem:[#allocation2 + $0x20] sm:$0xe]  ;;  %v7144_v31 = vld [vmem:[#allocation2 + $0x34] sm:$0xf] }
 0x1b1   : > { %v7123_v24 = vadd.f32 %v3213_v55, %v2596_v29  ;;  %v3368_v29 = vsel %vm6751_vm14, %v3366_v42, %v3367_v10  ;;  %v4097_v55 = vrot.slane %v4095_v13, 5  ;;  %v3043_v42 = vrot.slane %v3042_v59, 4 }
 0x1b2   : > { %v2535_v28 = vpop.f32.mrf.mxu3  ;;  %v2224_v27 = vpop.f32.mrf.mxu2  ;;  %v3491_v0 = vunpack.c.l.b16 %v3368_v29  ;;  %v4093_v33 = vrot.slane %v4092_v17, 4  ;;  %v3095_v37 = vunpack.c.l.b16 %v3038_v21  ;;  %v4040_v29 = vld [vmem:[#allocation2 + $0x30] sm:$0xf] }
 0x1b3   : > { %v2597_v7 = vadd.f32 %v2535_v28, %v2284_v47  ;;  %v2285_v35 = vadd.f32 %v2224_v27, %v1845_v16  ;;  %v1849_v54 = vpop.f32.mrf.mxu1  ;;  %v3111_v47 = vpack.c.b16 %v3094_v56, %v3093_v61  ;;  %v4102_v28 = vor.u32 %v4101_v25, %v4097_v55 }
 0x1b4   : > { %v3522_v40 = vpack.c.b16 %v3491_v0, %v3490_v22  ;;  %v4105_v27 = vshll.u32 %v7131_v4, 16  ;;  %v3048_v46 = vsel %vm6376_vm11, %v3043_v42, %v3047_v15  ;;  %v1850_v22 = vadd.f32 %v1849_v54, %v6925_v43  ;;  %v5930_v43 = vld [vmem:[#allocation2 + $0x20] sm:$0xff] }
 0x1b5   : > { %v4103_v56 = vrot.slane %v4102_v28, 4  ;;  %v4098_v0 = vsel %vm6376_vm11, %v4093_v33, %v4097_v55  ;;  %v4113_v55 = vshll.u32 %v4040_v29, 16  ;;  %v4123_v28 = vshrl.u32 %v7144_v31, 16 }
 0x1b6   : > { %v4485_v21 = vunpack.c.l.b16 %v4098_v0  ;;  %v4787_v0 = vrot.slane %v7131_v4, 5 }
 0x1b7   : > { %2266 = vmatmul.bf16.gmra.mxu2 %v2118_v60 }
 0x1b8   : > { %v3216_v16 = vpop.f32.mrf.mxu0 }
 0x1b9   : > { %v7134_v2 = vadd.f32 %v3216_v16, %v2597_v7  ;;  %v4107_v7 = vrot.slane %v4105_v27, 5  ;;  %v6117_v16 = vld [vmem:[#allocation2 + $0x28] sm:$0x1] }
 0x1ba   : > { %v2537_v10 = vpop.f32.mrf.mxu3  ;;  %v2227_v48 = vpop.f32.mrf.mxu2 }
 0x1bb   : > { %3255 = vmatmul.bf16.gmra.mxu0 %v3111_v47  ;;  %v2598_v61 = vadd.f32 %v2537_v10, %v2285_v35  ;;  %v2286_v8 = vadd.f32 %v2227_v48, %v1848_v57  ;;  %v1852_v13 = vpop.f32.mrf.mxu1  ;;  %v3096_v35 = vunpack.c.l.b16 %v3048_v46  ;;  %v4108_v25 = vsel %vm6376_vm11, %v4103_v56, %v4107_v7  ;;  %v4718_v46 = vld [vmem:[#allocation2 + $0x20] sm:$0xe] }
 0x1bc   : > { %v5622_v47 = vrot.slane %v3299_v3, 9  ;;  %v3374_v57 = vrot.slane %v6117_v16, 5  ;;  %v4110_v10 = vshrl.u32 %v4040_v29, 16  ;;  %v4119_v48 = vshll.u32 %v7144_v31, 16  ;;  %v7160_v3 = vld [vmem:[#allocation2 + $0x38] sm:$0x1] }
 0x1bd   : > { %3610 = vmatmul.bf16.vlgmr.msra.gmra.mxu1 %v3522_v40  ;;  %v3373_v40 = vrot.slane %v3371_v41, 4  ;;  %v4486_v33 = vunpack.c.l.b16 %v4108_v25  ;;  %v4115_v7 = vrot.slane %v4113_v55, 5  ;;  %v1853_v29 = vadd.f32 %v1852_v13, %v6843_v53  ;;  %v4043_v13 = vld [vmem:[#allocation2 + $0x40] sm:$0xf] }
 0x1be   : > { %v3372_v42 = vsel %vm6751_vm14, %v5622_v47, %v3371_v41  ;;  %v4112_v56 = vrot.slane %v4110_v10, 4  ;;  %v7157_v12 = vrot.slane %v4119_v48, 5  ;;  %v4125_v41 = vrot.slane %v4123_v28, 4  ;;  %v6118_v28 = vld [vmem:[#allocation2 + $0x34] sm:$0xf] }
 0x1bf   : > { %2579 = vmatmul.bf16.gmra.mxu3 %v5905_v39  ;;  %v3375_v15 = vsel %vm6751_vm14, %v3373_v40, %v3374_v57  ;;  %v3492_v27 = vunpack.c.l.b16 %v3372_v42  ;;  %v3112_v39 = vpack.c.b16 %v3096_v35, %v3095_v37  ;;  %v5797_v35 = vrot.slane %v4718_v46, 9 }
 0x1c0   : > { %v3218_v60 = vpop.f32.mrf.mxu0  ;;  %v4517_v47 = vpack.c.b16 %v4486_v33, %v4485_v21  ;;  %v4116_v57 = vor.u32 %v4115_v7, %v4112_v56  ;;  %v4129_v53 = vshll.u32 %v7160_v3, 16  ;;  %v4137_v21 = vshll.u32 %v4043_v13, 16 }
 0x1c1   : > { %v7146_v32 = vadd.f32 %v3218_v60, %v2598_v61  ;;  %v3493_v61 = vunpack.c.l.b16 %v3375_v15 }
 0x1c2   : > { %v2540_v59 = vpop.f32.mrf.mxu3  ;;  %v2229_v52 = vpop.f32.mrf.mxu2  ;;  %v4131_v48 = vrot.slane %v4129_v53, 5 }
 0x1c3   : > { %v2599_v38 = vadd.f32 %v2540_v59, %v2286_v8  ;;  %v2287_v17 = vadd.f32 %v2229_v52, %v1850_v22  ;;  %v1854_v54 = vpop.f32.mrf.mxu1  ;;  %v4784_v8 = vrot.slane %v7120_v6, 5  ;;  %v3523_v22 = vpack.c.b16 %v3493_v61, %v3492_v27  ;;  %v3300_v61 = vld [vmem:[#allocation2 + $0x30] sm:$0xe] }
 0x1c4   : > { %v1855_v42 = vadd.f32 %v1854_v54, %v6853_v30  ;;  %v3378_v27 = vrot.slane %v6118_v28, 5  ;;  %v5623_v7 = vrot.slane %v3300_v61, 9 }
 0x1c5   : > { %v4786_v6 = vrot.slane %v4784_v8, 4  ;;  %v4785_v10 = vsel %vm6751_vm14, %v5797_v35, %v4784_v8 }
 0x1c6   : > { %v4910_v30 = vunpack.c.l.b16 %v4785_v10  ;;  %v4139_v10 = vrot.slane %v4137_v21, 5 }
 0x1c7   : > { %3924 = vmatmul.bf16.vlgmr.msra.gmra.mxu2 %v5930_v43  ;;  %v4126_v43 = vor.u32 %v4125_v41, %v7157_v12  ;;  %v4788_v4 = vsel %vm6751_vm14, %v4786_v6, %v4787_v0  ;;  %v6119_v41 = vld [vmem:[#allocation2 + $0x38] sm:$0x1]  ;;  %v5931_v6 = vld [vmem:[#allocation2 + $0x30] sm:$0xff] }
 0x1c8   : > { %v3221_v60 = vpop.f32.mrf.mxu0  ;;  %v4911_v54 = vunpack.c.l.b16 %v4788_v4  ;;  %v4791_v4 = vrot.slane %v7144_v31, 5  ;;  %v4794_v31 = vrot.slane %v7160_v3, 5 }
 0x1c9   : > { %v7162_v59 = vadd.f32 %v3221_v60, %v2599_v38  ;;  %v7167_v38 = vld [vmem:[#allocation2 + $0x44] sm:$0xf]  ;;  %v4127_v15 = vrot.slane %v4126_v43, 4  ;;  %v3380_v60 = vrot.slane %v3378_v27, 4  ;;  %v4719_v43 = vld [vmem:[#allocation2 + $0x30] sm:$0xe] }
 0x1ca   : > { %v2542_v37 = vpop.f32.mrf.mxu3  ;;  %v2232_v52 = vpop.f32.mrf.mxu2  ;;  %v4143_v33 = vshll.u32 %v7167_v38, 16  ;;  %v4942_v28 = vpack.c.b16 %v4911_v54, %v4910_v30  ;;  %v4793_v21 = vrot.slane %v4791_v4, 4 }
 0x1cb   : > { %3260 = vmatmul.bf16.gmra.mxu0 %v3112_v39  ;;  %v2600_v25 = vadd.f32 %v2542_v37, %v2287_v17  ;;  %v2288_v40 = vadd.f32 %v2232_v52, %v1853_v29  ;;  %v1857_v16 = vpop.f32.mrf.mxu1  ;;  %v4117_v17 = vrot.slane %v4116_v57, 4  ;;  %v4134_v39 = vshrl.u32 %v4043_v13, 16 }
 0x1cc   : > { %v3381_v29 = vrot.slane %v6119_v41, 5  ;;  %v1858_v61 = vadd.f32 %v1857_v16, %v6872_v5 }
 0x1cd   : > { %3615 = vmatmul.bf16.gmra.mxu1 %v3523_v22  ;;  %v4147_v22 = vshrl.u32 %v7167_v38, 16  ;;  %v4122_v52 = vsel %vm6376_vm11, %v4117_v17, %v7157_v12 }
 0x1ce   : > { %v3382_v57 = vsel %vm6751_vm14, %v3380_v60, %v3381_v29  ;;  %v4487_v12 = vunpack.c.l.b16 %v4122_v52 }
 0x1cf   : > { %4605 = vmatmul.bf16.vlgmr.msra.gmra.mxu3 %v4517_v47  ;;  %v3379_v47 = vsel %vm6751_vm14, %v5623_v7, %v3378_v27  ;;  %v3495_v13 = vunpack.c.l.b16 %v3382_v57  ;;  %v5798_v27 = vrot.slane %v4719_v43, 9  ;;  %v4046_v43 = vld [vmem:[#allocation2 + $0x50] sm:$0xf] }
 0x1d0   : > { %v3223_v55 = vpop.f32.mrf.mxu0  ;;  %v3494_v53 = vunpack.c.l.b16 %v3379_v47  ;;  %v6120_v47 = vld [vmem:[#allocation2 + $0x44] sm:$0xf] }
 0x1d1   : > { %v7175_v46 = vadd.f32 %v3223_v55, %v2600_v25  ;;  %v4132_v25 = vsel %vm6376_vm11, %v4127_v15, %v4131_v48  ;;  %v4145_v55 = vrot.slane %v4143_v33, 5  ;;  %v7188_v15 = vld [vmem:[#allocation2 + $0x48] sm:$0x1]  ;;  %v4792_v5 = vsel %vm6751_vm14, %v5798_v27, %v4791_v4 }
 0x1d2   : > { %v2545_v56 = vpop.f32.mrf.mxu3  ;;  %v2234_v8 = vpop.f32.mrf.mxu2  ;;  %v4488_v17 = vunpack.c.l.b16 %v4132_v25  ;;  %v4153_v41 = vshll.u32 %v7188_v15, 16  ;;  %v4912_v25 = vunpack.c.l.b16 %v4792_v5  ;;  %v3385_v57 = vrot.slane %v6120_v47, 5  ;;  %v6121_v27 = vld [vmem:[#allocation2 + $0x48] sm:$0x1] }
 0x1d3   : > { %v2601_v37 = vadd.f32 %v2545_v56, %v2288_v40  ;;  %v2289_v35 = vadd.f32 %v2234_v8, %v1855_v42  ;;  %v1859_v0 = vpop.f32.mrf.mxu1  ;;  %v4136_v40 = vrot.slane %v4134_v39, 4  ;;  %v4149_v42 = vrot.slane %v4147_v22, 4 }
 0x1d4   : > { %v3524_v56 = vpack.c.b16 %v3495_v13, %v3494_v53  ;;  %v4518_v22 = vpack.c.b16 %v4488_v17, %v4487_v12  ;;  %v4155_v52 = vrot.slane %v4153_v41, 5  ;;  %v1860_v53 = vadd.f32 %v1859_v0, %v6889_v50  ;;  %v5932_v50 = vld [vmem:[#allocation2 + $0x40] sm:$0xff] }
 0x1d5   : > { %v4140_v8 = vor.u32 %v4139_v10, %v4136_v40  ;;  %v4150_v60 = vor.u32 %v4149_v42, %v4145_v55  ;;  %v3301_v40 = vld [vmem:[#allocation2 + $0x40] sm:$0xe]  ;;  %v7202_v10 = vld [vmem:[#allocation2 + $0x54] sm:$0xf] }
 0x1d6   : > { %v5624_v17 = vrot.slane %v3301_v40, 9  ;;  %v7218_v40 = vld [vmem:[#allocation2 + $0x58] sm:$0x1] }
 0x1d7   : > { %3929 = vmatmul.bf16.gmra.mxu2 %v5931_v6  ;;  %v4141_v16 = vrot.slane %v4140_v8, 4  ;;  %v4151_v6 = vrot.slane %v4150_v60, 4  ;;  %v4171_v60 = vshrl.u32 %v7202_v10, 16 }
 0x1d8   : > { %v3226_v48 = vpop.f32.mrf.mxu0 }
 0x1d9   : > { %v7191_v7 = vadd.f32 %v3226_v48, %v2601_v37  ;;  %v4795_v37 = vsel %vm6751_vm14, %v4793_v21, %v4794_v31  ;;  %v4146_v13 = vsel %vm6376_vm11, %v4141_v16, %v4145_v55  ;;  %v4156_v12 = vsel %vm6376_vm11, %v4151_v6, %v4155_v52  ;;  %v4720_v16 = vld [vmem:[#allocation2 + $0x40] sm:$0xe] }
 0x1da   : > { %v2547_v39 = vpop.f32.mrf.mxu3  ;;  %v2237_v33 = vpop.f32.mrf.mxu2  ;;  %v3387_v48 = vrot.slane %v3385_v57, 4  ;;  %v4161_v55 = vshll.u32 %v4046_v43, 16  ;;  %v3386_v21 = vsel %vm6751_vm14, %v5624_v17, %v3385_v57  ;;  %v4490_v5 = vunpack.c.l.b16 %v4156_v12 }
 0x1db   : > { %5030 = vmatmul.bf16.vlgmr.msra.gmra.mxu0 %v4942_v28  ;;  %v2602_v29 = vadd.f32 %v2547_v39, %v2289_v35  ;;  %v2290_v30 = vadd.f32 %v2237_v33, %v1858_v61  ;;  %v1862_v54 = vpop.f32.mrf.mxu1  ;;  %v4913_v35 = vunpack.c.l.b16 %v4795_v37  ;;  %v3388_v61 = vrot.slane %v6121_v27, 5 }
 0x1dc   : > { %v4158_v39 = vshrl.u32 %v4046_v43, 16  ;;  %v4167_v33 = vshll.u32 %v7202_v10, 16  ;;  %v3496_v41 = vunpack.c.l.b16 %v3386_v21  ;;  %v4798_v37 = vrot.slane %v7167_v38, 5 }
 0x1dd   : > { %3620 = vmatmul.bf16.gmra.mxu1 %v3524_v56  ;;  %v3389_v31 = vsel %vm6751_vm14, %v3387_v48, %v3388_v61  ;;  %v4163_v52 = vrot.slane %v4161_v55, 5  ;;  %v4173_v57 = vrot.slane %v4171_v60, 4  ;;  %v1863_v43 = vadd.f32 %v1862_v54, %v6906_v9  ;;  %v4049_v54 = vld [vmem:[#allocation2 + $0x60] sm:$0xf]  ;;  %v6122_v60 = vld [vmem:[#allocation2 + $0x54] sm:$0xf] }
 0x1de   : > { %v4160_v6 = vrot.slane %v4158_v39, 4  ;;  %v7215_v47 = vrot.slane %v4167_v33, 5  ;;  %v4800_v17 = vrot.slane %v4798_v37, 4  ;;  %v4177_v9 = vshll.u32 %v7218_v40, 16 }
 0x1df   : > { %4610 = vmatmul.bf16.gmra.mxu3 %v4518_v22  ;;  %v4489_v22 = vunpack.c.l.b16 %v4146_v13 }
 0x1e0   : > { %v3228_v3 = vpop.f32.mrf.mxu0  ;;  %v4164_v61 = vor.u32 %v4163_v52, %v4160_v6  ;;  %v4179_v33 = vrot.slane %v4177_v9, 5 }
 0x1e1   : > { %v7204_v4 = vadd.f32 %v3228_v3, %v2602_v29  ;;  %v3497_v29 = vunpack.c.l.b16 %v3389_v31 }
 0x1e2   : > { %v2550_v42 = vpop.f32.mrf.mxu3  ;;  %v2239_v28 = vpop.f32.mrf.mxu2 }
 0x1e3   : > { %v2603_v56 = vadd.f32 %v2550_v42, %v2290_v30  ;;  %v2291_v8 = vadd.f32 %v2239_v28, %v1860_v53  ;;  %v1864_v0 = vpop.f32.mrf.mxu1  ;;  %v4943_v30 = vpack.c.b16 %v4913_v35, %v4912_v25  ;;  %v3525_v53 = vpack.c.b16 %v3497_v29, %v3496_v41  ;;  %v3302_v29 = vld [vmem:[#allocation2 + $0x50] sm:$0xe] }
 0x1e4   : > { %v4519_v28 = vpack.c.b16 %v4490_v5, %v4489_v22  ;;  %v5799_v25 = vrot.slane %v4720_v16, 9  ;;  %v4801_v35 = vrot.slane %v7188_v15, 5  ;;  %v1865_v21 = vadd.f32 %v1864_v0, %v6923_v58 }
 0x1e5   : > { %v3392_v41 = vrot.slane %v6122_v60, 5  ;;  %v4182_v22 = vshrl.u32 %v4049_v54, 16  ;;  %v4185_v5 = vshll.u32 %v4049_v54, 16  ;;  %v5625_v52 = vrot.slane %v3302_v29, 9 }
 0x1e6   : > { %v4799_v39 = vsel %vm6751_vm14, %v5799_v25, %v4798_v37  ;;  %v4802_v15 = vsel %vm6751_vm14, %v4800_v17, %v4801_v35  ;;  %v5933_v25 = vld [vmem:[#allocation2 + $0x50] sm:$0xff] }
 0x1e7   : > { %3934 = vmatmul.bf16.gmra.mxu2 %v5932_v50  ;;  %v4174_v50 = vor.u32 %v4173_v57, %v7215_v47  ;;  %v6123_v57 = vld [vmem:[#allocation2 + $0x58] sm:$0x1]  ;;  %v4914_v58 = vunpack.c.l.b16 %v4799_v39  ;;  %v4915_v0 = vunpack.c.l.b16 %v4802_v15  ;;  %v3393_v17 = vsel %vm6751_vm14, %v5625_v52, %v3392_v41 }
 0x1e8   : > { %v3231_v3 = vpop.f32.mrf.mxu0  ;;  %v3498_v9 = vunpack.c.l.b16 %v3393_v17  ;;  %v4187_v39 = vrot.slane %v4185_v5, 5  ;;  %v4805_v15 = vrot.slane %v7202_v10, 5  ;;  %v4808_v10 = vrot.slane %v7218_v40, 5  ;;  %v6124_v17 = vld [vmem:[#allocation2 + $0x64] sm:$0xf] }
 0x1e9   : > { %v7220_v42 = vadd.f32 %v3231_v3, %v2603_v56  ;;  %v7225_v56 = vld [vmem:[#allocation2 + $0x64] sm:$0xf]  ;;  %v4175_v31 = vrot.slane %v4174_v50, 4  ;;  %v3394_v3 = vrot.slane %v3392_v41, 4  ;;  %v4721_v50 = vld [vmem:[#allocation2 + $0x50] sm:$0xe]  ;;  %v4944_v60 = vpack.c.b16 %v4915_v0, %v4914_v58 }
 0x1ea   : > { %v2552_v13 = vpop.f32.mrf.mxu3  ;;  %v2242_v12 = vpop.f32.mrf.mxu2  ;;  %v5800_v41 = vrot.slane %v4721_v50, 9  ;;  %v4807_v5 = vrot.slane %v4805_v15, 4  ;;  %v4052_v50 = vld [vmem:[#allocation2 + $0x70] sm:$0xf] }
 0x1eb   : > { %7845 = vst [vmem:[#allocation10_spill] sm:$0xff] %v7220_v42  ;;  %5035 = vmatmul.bf16.gmra.mxu0 %v4943_v30  ;;  %v2604_v38 = vadd.f32 %v2552_v13, %v2291_v8  ;;  %v2292_v48 = vadd.f32 %v2242_v12, %v1863_v43  ;;  %v1867_v27 = vpop.f32.mrf.mxu1  ;;  %v4165_v8 = vrot.slane %v4164_v61, 4  ;;  %v4191_v30 = vshll.u32 %v7225_v56, 16 }
 0x1ec   : > { %v3395_v43 = vrot.slane %v6123_v57, 5  ;;  %v1868_v29 = vadd.f32 %v1867_v27, %v6934_v45  ;;  %v4806_v45 = vsel %vm6751_vm14, %v5800_v41, %v4805_v15  ;;  %v6125_v41 = vld [vmem:[#allocation2 + $0x68] sm:$0x1] }
 0x1ed   : > { %3625 = vmatmul.bf16.gmra.mxu1 %v3525_v53  ;;  %v4195_v53 = vshrl.u32 %v7225_v56, 16  ;;  %v4170_v12 = vsel %vm6376_vm11, %v4165_v8, %v7215_v47 }
 0x1ee   : > { %v3396_v61 = vsel %vm6751_vm14, %v3394_v3, %v3395_v43  ;;  %v4491_v47 = vunpack.c.l.b16 %v4170_v12 }
 0x1ef   : > { %4615 = vmatmul.bf16.gmra.mxu3 %v4519_v28  ;;  %v3499_v54 = vunpack.c.l.b16 %v3396_v61  ;;  %v3399_v61 = vrot.slane %v6124_v17, 5 }
 0x1f0   : > { %v3233_v55 = vpop.f32.mrf.mxu0 }
 0x1f1   : > { %v7233_v16 = vadd.f32 %v3233_v55, %v2604_v38  ;;  %v4180_v38 = vsel %vm6376_vm11, %v4175_v31, %v4179_v33  ;;  %v4193_v55 = vrot.slane %v4191_v30, 5  ;;  %v7246_v31 = vld [vmem:[#allocation2 + $0x68] sm:$0x1] }
 0x1f2   : > { %v2555_v6 = vpop.f32.mrf.mxu3  ;;  %v2244_v37 = vpop.f32.mrf.mxu2  ;;  %v4492_v8 = vunpack.c.l.b16 %v4180_v38  ;;  %v4201_v57 = vshll.u32 %v7246_v31, 16  ;;  %v4916_v38 = vunpack.c.l.b16 %v4806_v45 }
 0x1f3   : > { %7846 = vst [vmem:[#allocation11_spill] sm:$0xff] %v7233_v16  ;;  %v2605_v13 = vadd.f32 %v2555_v6, %v2292_v48  ;;  %v2293_v28 = vadd.f32 %v2244_v37, %v1865_v21  ;;  %v1869_v35 = vpop.f32.mrf.mxu1  ;;  %v4184_v48 = vrot.slane %v4182_v22, 4  ;;  %v4197_v21 = vrot.slane %v4195_v53, 4  ;;  %v7523_v16 = vld [vmem:[%s7425_s28 + $0xd0] sm:$0xff] }
 0x1f4   : > { %v3526_v6 = vpack.c.b16 %v3499_v54, %v3498_v9  ;;  %v4520_v53 = vpack.c.b16 %v4492_v8, %v4491_v47  ;;  %v4203_v12 = vrot.slane %v4201_v57, 5  ;;  %v1870_v9 = vadd.f32 %v1869_v35, %v6958_v19  ;;  %v5934_v19 = vld [vmem:[#allocation2 + $0x60] sm:$0xff]  ;;  %7871 = vst [vmem:[#allocation30_spill] sm:$0xff] %v7523_v16 }
 0x1f5   : > { %v4188_v37 = vor.u32 %v4187_v39, %v4184_v48  ;;  %v4198_v3 = vor.u32 %v4197_v21, %v4193_v55  ;;  %v3303_v48 = vld [vmem:[#allocation2 + $0x60] sm:$0xe]  ;;  %v7260_v39 = vld [vmem:[#allocation2 + $0x74] sm:$0xf] }
 0x1f6   : > { %v5626_v8 = vrot.slane %v3303_v48, 9  ;;  %v7276_v48 = vld [vmem:[#allocation2 + $0x78] sm:$0x1] }
 0x1f7   : > { %3939 = vmatmul.bf16.gmra.mxu2 %v5933_v25  ;;  %v4189_v27 = vrot.slane %v4188_v37, 4  ;;  %v4199_v25 = vrot.slane %v4198_v3, 4  ;;  %v4219_v3 = vshrl.u32 %v7260_v39, 16 }
 0x1f8   : > { %v3236_v33 = vpop.f32.mrf.mxu0 }
 0x1f9   : > { %v7249_v52 = vadd.f32 %v3236_v33, %v2605_v13  ;;  %v4809_v13 = vsel %vm6751_vm14, %v4807_v5, %v4808_v10  ;;  %v4194_v54 = vsel %vm6376_vm11, %v4189_v27, %v4193_v55  ;;  %v4204_v47 = vsel %vm6376_vm11, %v4199_v25, %v4203_v12  ;;  %v4722_v27 = vld [vmem:[#allocation2 + $0x60] sm:$0xe] }
 0x1fa   : > { %v2557_v22 = vpop.f32.mrf.mxu3  ;;  %v2247_v30 = vpop.f32.mrf.mxu2  ;;  %v3401_v33 = vrot.slane %v3399_v61, 4  ;;  %v4209_v55 = vshll.u32 %v4052_v50, 16  ;;  %v3400_v5 = vsel %vm6751_vm14, %v5626_v8, %v3399_v61  ;;  %v4494_v45 = vunpack.c.l.b16 %v4204_v47 }
 0x1fb   : > { %7847 = vst [vmem:[#allocation12_spill] sm:$0xff] %v7249_v52  ;;  %5040 = vmatmul.bf16.gmra.mxu0 %v4944_v60  ;;  %v2606_v43 = vadd.f32 %v2557_v22, %v2293_v28  ;;  %v2294_v58 = vadd.f32 %v2247_v30, %v1868_v29  ;;  %v1872_v0 = vpop.f32.mrf.mxu1  ;;  %v4917_v28 = vunpack.c.l.b16 %v4809_v13  ;;  %v3402_v29 = vrot.slane %v6125_v41, 5 }
 0x1fc   : > { %v4206_v22 = vshrl.u32 %v4052_v50, 16  ;;  %v4215_v30 = vshll.u32 %v7260_v39, 16  ;;  %v3500_v57 = vunpack.c.l.b16 %v3400_v5  ;;  %v4812_v13 = vrot.slane %v7225_v56, 5 }
 0x1fd   : > { %3630 = vmatmul.bf16.gmra.mxu1 %v3526_v6  ;;  %v3403_v10 = vsel %vm6751_vm14, %v3401_v33, %v3402_v29  ;;  %v4211_v12 = vrot.slane %v4209_v55, 5  ;;  %v4221_v61 = vrot.slane %v4219_v3, 4  ;;  %v1873_v50 = vadd.f32 %v1872_v0, %v6851_v36  ;;  %v4055_v0 = vld [vmem:[#allocation2 + $0x80] sm:$0xf]  ;;  %v6126_v3 = vld [vmem:[#allocation2 + $0x74] sm:$0xf] }
 0x1fe   : > { %v4208_v25 = vrot.slane %v4206_v22, 4  ;;  %v7273_v17 = vrot.slane %v4215_v30, 5  ;;  %v4814_v8 = vrot.slane %v4812_v13, 4  ;;  %v4225_v36 = vshll.u32 %v7276_v48, 16 }
 0x1ff   : > { %4620 = vmatmul.bf16.gmra.mxu3 %v4520_v53  ;;  %v4493_v53 = vunpack.c.l.b16 %v4194_v54 }
 0x200   : > { %v3238_v40 = vpop.f32.mrf.mxu0  ;;  %v4212_v29 = vor.u32 %v4211_v12, %v4208_v25  ;;  %v4227_v30 = vrot.slane %v4225_v36, 5 }
 0x201   : > { %v7262_v15 = vadd.f32 %v3238_v40, %v2606_v43  ;;  %v3501_v43 = vunpack.c.l.b16 %v3403_v10 }
 0x202   : > { %v2560_v21 = vpop.f32.mrf.mxu3  ;;  %v2249_v60 = vpop.f32.mrf.mxu2 }
 0x203   : > { %7848 = vst [vmem:[#allocation13_spill] sm:$0xff] %v7262_v15  ;;  %v2607_v6 = vadd.f32 %v2560_v21, %v2294_v58  ;;  %v2295_v37 = vadd.f32 %v2249_v60, %v1870_v9  ;;  %v1874_v35 = vpop.f32.mrf.mxu1  ;;  %v4945_v58 = vpack.c.b16 %v4917_v28, %v4916_v38  ;;  %v3527_v9 = vpack.c.b16 %v3501_v43, %v3500_v57  ;;  %v3304_v43 = vld [vmem:[#allocation2 + $0x70] sm:$0xe] }
 0x204   : > { %v4521_v60 = vpack.c.b16 %v4494_v45, %v4493_v53  ;;  %v5801_v38 = vrot.slane %v4722_v27, 9  ;;  %v4815_v28 = vrot.slane %v7246_v31, 5  ;;  %v1875_v5 = vadd.f32 %v1874_v35, %v6870_v23 }
 0x205   : > { %v3406_v57 = vrot.slane %v6126_v3, 5  ;;  %v4230_v53 = vshrl.u32 %v4055_v0, 16  ;;  %v4233_v45 = vshll.u32 %v4055_v0, 16  ;;  %v5627_v12 = vrot.slane %v3304_v43, 9 }
 0x206   : > { %v4813_v22 = vsel %vm6751_vm14, %v5801_v38, %v4812_v13  ;;  %v4816_v31 = vsel %vm6751_vm14, %v4814_v8, %v4815_v28  ;;  %v5935_v38 = vld [vmem:[#allocation2 + $0x70] sm:$0xff] }
 0x207   : > { %3944 = vmatmul.bf16.gmra.mxu2 %v5934_v19  ;;  %v4222_v19 = vor.u32 %v4221_v61, %v7273_v17  ;;  %v6127_v61 = vld [vmem:[#allocation2 + $0x78] sm:$0x1]  ;;  %v4918_v23 = vunpack.c.l.b16 %v4813_v22  ;;  %v4919_v35 = vunpack.c.l.b16 %v4816_v31  ;;  %v3407_v8 = vsel %vm6751_vm14, %v5627_v12, %v3406_v57 }
 0x208   : > { %v3241_v40 = vpop.f32.mrf.mxu0  ;;  %v3502_v36 = vunpack.c.l.b16 %v3407_v8  ;;  %v4235_v22 = vrot.slane %v4233_v45, 5  ;;  %v4819_v31 = vrot.slane %v7260_v39, 5  ;;  %v4822_v39 = vrot.slane %v7276_v48, 5  ;;  %v6128_v8 = vld [vmem:[#allocation2 + $0x84] sm:$0xf] }
 0x209   : > { %v7278_v21 = vadd.f32 %v3241_v40, %v2607_v6  ;;  %v7283_v6 = vld [vmem:[#allocation2 + $0x84] sm:$0xf]  ;;  %v4223_v10 = vrot.slane %v4222_v19, 4  ;;  %v3408_v40 = vrot.slane %v3406_v57, 4  ;;  %v4723_v19 = vld [vmem:[#allocation2 + $0x70] sm:$0xe]  ;;  %v4946_v3 = vpack.c.b16 %v4919_v35, %v4918_v23 }
 0x20a   : > { %v2562_v54 = vpop.f32.mrf.mxu3  ;;  %v2252_v47 = vpop.f32.mrf.mxu2  ;;  %v5802_v57 = vrot.slane %v4723_v19, 9  ;;  %v4821_v45 = vrot.slane %v4819_v31, 4  ;;  %v4058_v19 = vld [vmem:[#allocation2 + $0x90] sm:$0xf] }
 0x20b   : > { %7849 = vst [vmem:[#allocation14_spill] sm:$0xff] %v7278_v21  ;;  %5045 = vmatmul.bf16.gmra.mxu0 %v4945_v58  ;;  %v2608_v56 = vadd.f32 %v2562_v54, %v2295_v37  ;;  %v2296_v33 = vadd.f32 %v2252_v47, %v1873_v50  ;;  %v1877_v41 = vpop.f32.mrf.mxu1  ;;  %v4213_v37 = vrot.slane %v4212_v29, 4  ;;  %v4239_v58 = vshll.u32 %v7283_v6, 16  ;;  %v7520_v21 = vld [vmem:[%s7425_s28 + $0xc8] sm:$0xff] }
 0x20c   : > { %v3409_v50 = vrot.slane %v6127_v61, 5  ;;  %v1878_v43 = vadd.f32 %v1877_v41, %v6878_v14  ;;  %v4820_v14 = vsel %vm6751_vm14, %v5802_v57, %v4819_v31  ;;  %v6129_v57 = vld [vmem:[#allocation2 + $0x88] sm:$0x1]  ;;  %7870 = vst [vmem:[#allocation29_spill] sm:$0xff] %v7520_v21 }
 0x20d   : > { %3635 = vmatmul.bf16.gmra.mxu1 %v3527_v9  ;;  %v4243_v9 = vshrl.u32 %v7283_v6, 16  ;;  %v4218_v47 = vsel %vm6376_vm11, %v4213_v37, %v7273_v17 }
 0x20e   : > { %v3410_v29 = vsel %vm6751_vm14, %v3408_v40, %v3409_v50  ;;  %v4495_v17 = vunpack.c.l.b16 %v4218_v47 }
 0x20f   : > { %4625 = vmatmul.bf16.gmra.mxu3 %v4521_v60  ;;  %v3503_v0 = vunpack.c.l.b16 %v3410_v29  ;;  %v3413_v29 = vrot.slane %v6128_v8, 5 }
 0x210   : > { %v3243_v55 = vpop.f32.mrf.mxu0 }
 0x211   : > { %v7291_v27 = vadd.f32 %v3243_v55, %v2608_v56  ;;  %v4228_v56 = vsel %vm6376_vm11, %v4223_v10, %v4227_v30  ;;  %v4241_v55 = vrot.slane %v4239_v58, 5  ;;  %v7304_v10 = vld [vmem:[#allocation2 + $0x88] sm:$0x1] }
 0x212   : > { %v2565_v25 = vpop.f32.mrf.mxu3  ;;  %v2254_v13 = vpop.f32.mrf.mxu2  ;;  %v4496_v37 = vunpack.c.l.b16 %v4228_v56  ;;  %v4249_v61 = vshll.u32 %v7304_v10, 16  ;;  %v4920_v56 = vunpack.c.l.b16 %v4820_v14 }
 0x213   : > { %7850 = vst [vmem:[#allocation15_spill] sm:$0xff] %v7291_v27  ;;  %v2609_v54 = vadd.f32 %v2565_v25, %v2296_v33  ;;  %v2297_v60 = vadd.f32 %v2254_v13, %v1875_v5  ;;  %v1879_v28 = vpop.f32.mrf.mxu1  ;;  %v4232_v33 = vrot.slane %v4230_v53, 4  ;;  %v4245_v5 = vrot.slane %v4243_v9, 4  ;;  %v7517_v27 = vld [vmem:[%s7425_s28 + $0xc0] sm:$0xff] }
 0x214   : > { %v3528_v25 = vpack.c.b16 %v3503_v0, %v3502_v36  ;;  %v4522_v9 = vpack.c.b16 %v4496_v37, %v4495_v17  ;;  %v4251_v47 = vrot.slane %v4249_v61, 5  ;;  %v1880_v36 = vadd.f32 %v1879_v28, %v6903_v11  ;;  %v5936_v11 = vld [vmem:[#allocation2 + $0x80] sm:$0xff]  ;;  %7869 = vst [vmem:[#allocation28_spill] sm:$0xff] %v7517_v27 }
 0x215   : > { %v4236_v13 = vor.u32 %v4235_v22, %v4232_v33  ;;  %v4246_v40 = vor.u32 %v4245_v5, %v4241_v55  ;;  %v3305_v33 = vld [vmem:[#allocation2 + $0x80] sm:$0xe]  ;;  %v7318_v22 = vld [vmem:[#allocation2 + $0x94] sm:$0xf] }
 0x216   : > { %v5628_v37 = vrot.slane %v3305_v33, 9  ;;  %v7334_v33 = vld [vmem:[#allocation2 + $0x98] sm:$0x1] }
 0x217   : > { %3949 = vmatmul.bf16.gmra.mxu2 %v5935_v38  ;;  %v4237_v41 = vrot.slane %v4236_v13, 4  ;;  %v4247_v38 = vrot.slane %v4246_v40, 4  ;;  %v4267_v40 = vshrl.u32 %v7318_v22, 16 }
 0x218   : > { %v3246_v30 = vpop.f32.mrf.mxu0 }
 0x219   : > { %v7307_v12 = vadd.f32 %v3246_v30, %v2609_v54  ;;  %v4823_v54 = vsel %vm6751_vm14, %v4821_v45, %v4822_v39  ;;  %v4242_v0 = vsel %vm6376_vm11, %v4237_v41, %v4241_v55  ;;  %v4252_v17 = vsel %vm6376_vm11, %v4247_v38, %v4251_v47  ;;  %v4724_v41 = vld [vmem:[#allocation2 + $0x80] sm:$0xe] }
 0x21a   : > { %v2567_v53 = vpop.f32.mrf.mxu3  ;;  %v2257_v58 = vpop.f32.mrf.mxu2  ;;  %v3415_v30 = vrot.slane %v3413_v29, 4  ;;  %v4257_v55 = vshll.u32 %v4058_v19, 16  ;;  %v3414_v45 = vsel %vm6751_vm14, %v5628_v37, %v3413_v29  ;;  %v4498_v14 = vunpack.c.l.b16 %v4252_v17 }
 0x21b   : > { %7851 = vst [vmem:[#allocation16_spill] sm:$0xff] %v7307_v12  ;;  %5050 = vmatmul.bf16.gmra.mxu0 %v4946_v3  ;;  %v2610_v50 = vadd.f32 %v2567_v53, %v2297_v60  ;;  %v2298_v23 = vadd.f32 %v2257_v58, %v1878_v43  ;;  %v1882_v35 = vpop.f32.mrf.mxu1  ;;  %v4921_v60 = vunpack.c.l.b16 %v4823_v54  ;;  %v3416_v43 = vrot.slane %v6129_v57, 5  ;;  %v7514_v12 = vld [vmem:[%s7425_s28 + $0xb8] sm:$0xff] }
 0x21c   : > { %v4254_v53 = vshrl.u32 %v4058_v19, 16  ;;  %v4263_v58 = vshll.u32 %v7318_v22, 16  ;;  %v3504_v61 = vunpack.c.l.b16 %v3414_v45  ;;  %v4826_v54 = vrot.slane %v7283_v6, 5  ;;  %v7854_v45 = vld [vmem:[#allocation3_spill] sm:$0xff]  ;;  %7868 = vst [vmem:[#allocation27_spill] sm:$0xff] %v7514_v12 }
 0x21d   : > { %3640 = vmatmul.bf16.gmra.mxu1 %v3528_v25  ;;  %v3417_v39 = vsel %vm6751_vm14, %v3415_v30, %v3416_v43  ;;  %v4259_v47 = vrot.slane %v4257_v55, 5  ;;  %v4269_v29 = vrot.slane %v4267_v40, 4  ;;  %v1883_v19 = vadd.f32 %v1882_v35, %v6921_v51  ;;  %v4061_v35 = vld [vmem:[#allocation2 + $0xa0] sm:$0xf] }
 0x21e   : > { %v4256_v38 = vrot.slane %v4254_v53, 4  ;;  %v7331_v8 = vrot.slane %v4263_v58, 5  ;;  %v4828_v37 = vrot.slane %v4826_v54, 4  ;;  %v4273_v51 = vshll.u32 %v7334_v33, 16 }
 0x21f   : > { %4630 = vmatmul.bf16.gmra.mxu3 %v4522_v9  ;;  %v4497_v9 = vunpack.c.l.b16 %v4242_v0 }
 0x220   : > { %v3248_v48 = vpop.f32.mrf.mxu0  ;;  %v4260_v43 = vor.u32 %v4259_v47, %v4256_v38  ;;  %v4275_v40 = vrot.slane %v4273_v51, 5 }
 0x221   : > { %v7320_v31 = vadd.f32 %v3248_v48, %v2610_v50  ;;  %v3505_v50 = vunpack.c.l.b16 %v3417_v39 }
 0x222   : > { %v2570_v5 = vpop.f32.mrf.mxu3  ;;  %v2259_v3 = vpop.f32.mrf.mxu2 }
 0x223   : > { %7852 = vst [vmem:[#allocation17_spill] sm:$0xff] %v7320_v31  ;;  %v2611_v25 = vadd.f32 %v2570_v5, %v2298_v23  ;;  %v2299_v13 = vadd.f32 %v2259_v3, %v1880_v36  ;;  %v1884_v28 = vpop.f32.mrf.mxu1  ;;  %v4947_v23 = vpack.c.b16 %v4921_v60, %v4920_v56  ;;  %v3529_v36 = vpack.c.b16 %v3505_v50, %v3504_v61  ;;  %v6130_v61 = vld [vmem:[#allocation2 + $0x94] sm:$0xf] }
 0x224   : > { %v4523_v3 = vpack.c.b16 %v4498_v14, %v4497_v9  ;;  %v5803_v56 = vrot.slane %v4724_v41, 9  ;;  %v4829_v60 = vrot.slane %v7304_v10, 5  ;;  %v1885_v39 = vadd.f32 %v1884_v28, %v7854_v45  ;;  %v3306_v9 = vld [vmem:[#allocation2 + $0x90] sm:$0xe] }
 0x225   : > { %v3420_v50 = vrot.slane %v6130_v61, 5  ;;  %v4278_v14 = vshrl.u32 %v4061_v35, 16  ;;  %v4833_v45 = vrot.slane %v7318_v22, 5  ;;  %v4836_v22 = vrot.slane %v7334_v33, 5  ;;  %v7511_v31 = vld [vmem:[%s7425_s28 + $0xb0] sm:$0xff] }
 0x226   : > { %v4827_v53 = vsel %vm6751_vm14, %v5803_v56, %v4826_v54  ;;  %v4830_v10 = vsel %vm6751_vm14, %v4828_v37, %v4829_v60  ;;  %7867 = vst [vmem:[#allocation26_spill] sm:$0xff] %v7511_v31 }
 0x227   : > { %3954 = vmatmul.bf16.gmra.mxu2 %v5936_v11  ;;  %v4270_v11 = vor.u32 %v4269_v29, %v7331_v8  ;;  %v3422_v29 = vrot.slane %v3420_v50, 4  ;;  %v4922_v28 = vunpack.c.l.b16 %v4827_v53 }
 0x228   : > { %v3251_v48 = vpop.f32.mrf.mxu0 }
 0x229   : > { %v7336_v5 = vadd.f32 %v3251_v48, %v2611_v25  ;;  %v7341_v25 = vld [vmem:[#allocation2 + $0xa4] sm:$0xf]  ;;  %v4271_v58 = vrot.slane %v4270_v11, 4  ;;  %v5629_v48 = vrot.slane %v3306_v9, 9 }
 0x22a   : > { %v2572_v0 = vpop.f32.mrf.mxu3  ;;  %v2262_v17 = vpop.f32.mrf.mxu2  ;;  %v4287_v41 = vshll.u32 %v7341_v25, 16 }
 0x22b   : > { %7853 = vst [vmem:[#allocation18_spill] sm:$0xff] %v7336_v5  ;;  %5055 = vmatmul.bf16.gmra.mxu0 %v4947_v23  ;;  %v2612_v6 = vadd.f32 %v2572_v0, %v2299_v13  ;;  %v2300_v30 = vadd.f32 %v2262_v17, %v1883_v19  ;;  %v1887_v57 = vpop.f32.mrf.mxu1  ;;  %v4261_v13 = vrot.slane %v4260_v43, 4  ;;  %v4281_v23 = vshll.u32 %v4061_v35, 16  ;;  %v6131_v19 = vld [vmem:[#allocation2 + $0x98] sm:$0x1]  ;;  %v5937_v17 = vld [vmem:[#allocation2 + $0x90] sm:$0xff] }
 0x22c   : > { %v4291_v0 = vshrl.u32 %v7341_v25, 16  ;;  %v3421_v11 = vsel %vm6751_vm14, %v5629_v48, %v3420_v50  ;;  %v4725_v35 = vld [vmem:[#allocation2 + $0x90] sm:$0xe]  ;;  %v7508_v5 = vld [vmem:[%s7425_s28 + $0xa8] sm:$0xff] }
 0x22d   : > { %3645 = vmatmul.bf16.gmra.mxu1 %v3529_v36  ;;  %v3423_v36 = vrot.slane %v6131_v19, 5  ;;  %v4266_v43 = vsel %vm6376_vm11, %v4261_v13, %v7331_v8  ;;  %v3506_v53 = vunpack.c.l.b16 %v3421_v11  ;;  %v5804_v9 = vrot.slane %v4725_v35, 9  ;;  %7866 = vst [vmem:[#allocation25_spill] sm:$0xff] %v7508_v5 }
 0x22e   : > { %v4293_v61 = vrot.slane %v4291_v0, 4  ;;  %v4499_v13 = vunpack.c.l.b16 %v4266_v43 }
 0x22f   : > { %4635 = vmatmul.bf16.gmra.mxu3 %v4523_v3  ;;  %v4923_v3 = vunpack.c.l.b16 %v4830_v10  ;;  %v3424_v51 = vsel %vm6751_vm14, %v3422_v29, %v3423_v36 }
 0x230   : > { %v3253_v55 = vpop.f32.mrf.mxu0  ;;  %v3507_v10 = vunpack.c.l.b16 %v3424_v51 }
 0x231   : > { %v7349_v38 = vadd.f32 %v3253_v55, %v2612_v6  ;;  %v4276_v6 = vsel %vm6376_vm11, %v4271_v58, %v4275_v40  ;;  %v4283_v55 = vrot.slane %v4281_v23, 5  ;;  %v4948_v8 = vpack.c.b16 %v4923_v3, %v4922_v28  ;;  %v7364_v40 = vld [vmem:[#allocation2 + $0xa8] sm:$0x1] }
 0x232   : > { %v2575_v47 = vpop.f32.mrf.mxu3  ;;  %v2264_v54 = vpop.f32.mrf.mxu2  ;;  %v4500_v58 = vunpack.c.l.b16 %v4276_v6  ;;  %v3530_v48 = vpack.c.b16 %v3507_v10, %v3506_v53  ;;  %v4835_v23 = vrot.slane %v4833_v45, 4  ;;  %v4297_v0 = vshll.u32 %v7364_v40, 16  ;;  %v6132_v53 = vld [vmem:[#allocation2 + $0xa4] sm:$0xf] }
 0x233   : > { %7855 = vst [vmem:[#allocation3_spill] sm:$0xff] %v7349_v38  ;;  %v2613_v56 = vadd.f32 %v2575_v47, %v2300_v30  ;;  %v2301_v60 = vadd.f32 %v2264_v54, %v1885_v39  ;;  %v1889_v37 = vpop.f32.mrf.mxu1  ;;  %v4280_v30 = vrot.slane %v4278_v14, 4  ;;  %v7362_v39 = vrot.slane %v4287_v41, 5  ;;  %v7856_v47 = vld [vmem:[#allocation4_spill] sm:$0xff]  ;;  %v7505_v38 = vld [vmem:[%s7425_s28 + $0xa0] sm:$0xff] }
 0x234   : > { %v1888_v54 = vadd.f32 %v1887_v57, %v7856_v47  ;;  %v4524_v3 = vpack.c.b16 %v4500_v58, %v4499_v13  ;;  %v4834_v57 = vsel %vm6751_vm14, %v5804_v9, %v4833_v45  ;;  %v4837_v6 = vsel %vm6751_vm14, %v4835_v23, %v4836_v22  ;;  %v7382_v13 = vld [vmem:[#allocation2 + $0xb4] sm:$0xf]  ;;  %v5938_v22 = vld [vmem:[#allocation2 + $0xa0] sm:$0xff]  ;;  %7865 = vst [vmem:[#allocation24_spill] sm:$0xff] %v7505_v38 }
 0x235   : > { %v4284_v29 = vor.u32 %v4283_v55, %v4280_v30  ;;  %v4294_v36 = vor.u32 %v4293_v61, %v7362_v39  ;;  %v4299_v11 = vrot.slane %v4297_v0, 5  ;;  %v4924_v35 = vunpack.c.l.b16 %v4834_v57  ;;  %v7858_v55 = vld [vmem:[#allocation5_spill] sm:$0xff]  ;;  %v4726_v0 = vld [vmem:[#allocation2 + $0xa0] sm:$0xe] }
 0x236   : > { %v3427_v10 = vrot.slane %v6132_v53, 5  ;;  %v4925_v30 = vunpack.c.l.b16 %v4837_v6  ;;  %v1890_v61 = vadd.f32 %v1889_v37, %v7858_v55  ;;  %v4311_v57 = vshll.u32 %v7382_v13, 16  ;;  %v7529_v38 = vld [vmem:[%s7425_s28 + $0xe0] sm:$0xff] }
 0x237   : > { %3959 = vmatmul.bf16.gmra.mxu2 %v5937_v17  ;;  %v4295_v33 = vrot.slane %v4294_v36, 4  ;;  %7873 = vst [vmem:[#allocation32_spill] sm:$0xff] %v7529_v38  ;;  %v7874_v21 = vrot.slane %v7382_v13, 5  ;;  %v7550_v38 = vld [vmem:[%s7425_s28 + $0xf8] sm:$0xff] }
 0x238   : > { %v3256_v50 = vpop.f32.mrf.mxu0  ;;  %7877 = vst [vmem:[#allocation35_spill] sm:$0xff] %v7550_v38 }
 0x239   : > { %v7367_v19 = vadd.f32 %v3256_v50, %v2613_v56  ;;  %v4285_v56 = vrot.slane %v4284_v29, 4  ;;  %v4300_v47 = vsel %vm6376_vm11, %v4295_v33, %v4299_v11  ;;  %v6133_v29 = vld [vmem:[#allocation2 + $0xa8] sm:$0x1]  ;;  %v4949_v11 = vpack.c.b16 %v4925_v30, %v4924_v35 }
 0x23a   : > { %v2577_v14 = vpop.f32.mrf.mxu3  ;;  %v2267_v41 = vpop.f32.mrf.mxu2  ;;  %v4502_v53 = vunpack.c.l.b16 %v4300_v47 }
 0x23b   : > { %7857 = vst [vmem:[#allocation4_spill] sm:$0xff] %v7367_v19  ;;  %5060 = vmatmul.bf16.gmra.mxu0 %v4948_v8  ;;  %v2614_v28 = vadd.f32 %v2577_v14, %v2301_v60  ;;  %v2302_v17 = vadd.f32 %v2267_v41, %v1888_v54  ;;  %v7372_v43 = vpop.f32.mrf.mxu1  ;;  %v4064_v60 = vld [vmem:[#allocation2 + $0xb0] sm:$0xf]  ;;  %v4290_v45 = vsel %vm6376_vm11, %v4285_v56, %v7362_v39  ;;  %v3307_v8 = vld [vmem:[#allocation2 + $0xa0] sm:$0xe]  ;;  %v3430_v14 = vrot.slane %v6133_v29, 5 }
 0x23c   : > { %v5630_v54 = vrot.slane %v3307_v8, 9  ;;  %v4302_v39 = vshrl.u32 %v4064_v60, 16  ;;  %v4305_v36 = vshll.u32 %v4064_v60, 16  ;;  %v4315_v56 = vshrl.u32 %v7382_v13, 16  ;;  %v7502_v19 = vld [vmem:[%s7425_s28 + $0x98] sm:$0xff] }
 0x23d   : > { %3650 = vmatmul.bf16.gmra.mxu1 %v3530_v48  ;;  %v3429_v48 = vrot.slane %v3427_v10, 4  ;;  %v5805_v60 = vrot.slane %v4726_v0, 9  ;;  %v4067_v0 = vld [vmem:[#allocation2 + $0xc0] sm:$0xf]  ;;  %7864 = vst [vmem:[#allocation23_spill] sm:$0xff] %v7502_v19  ;;  %v7526_v19 = vld [vmem:[%s7425_s28 + $0xd8] sm:$0xff] }
 0x23e   : > { %v4307_v8 = vrot.slane %v4305_v36, 5  ;;  %7872 = vst [vmem:[#allocation31_spill] sm:$0xff] %v7526_v19 }
 0x23f   : > { %4640 = vmatmul.bf16.gmra.mxu3 %v4524_v3  ;;  %v3431_v3 = vsel %vm6751_vm14, %v3429_v48, %v3430_v14 }
 0x240   : > { %v3258_v51 = vpop.f32.mrf.mxu0  ;;  %v3509_v33 = vunpack.c.l.b16 %v3431_v3 }
 0x241   : > { %v7384_v58 = vadd.f32 %v3258_v51, %v2614_v28  ;;  %v3428_v28 = vsel %vm6751_vm14, %v5630_v54, %v3427_v10  ;;  %v4501_v51 = vunpack.c.l.b16 %v4290_v45  ;;  %v4313_v10 = vrot.slane %v4311_v57, 5  ;;  %v7397_v54 = vld [vmem:[#allocation2 + $0xb8] sm:$0x1] }
 0x242   : > { %v2580_v50 = vpop.f32.mrf.mxu3  ;;  %v2269_v9 = vpop.f32.mrf.mxu2  ;;  %v3508_v6 = vunpack.c.l.b16 %v3428_v28  ;;  %v4843_v28 = vrot.slane %v7364_v40, 5  ;;  %v4321_v36 = vshll.u32 %v7397_v54, 16  ;;  %v3691_v40 = vadd.f32 %v7372_v43, %v6979_v44 }
 0x243   : > { %7859 = vst [vmem:[#allocation5_spill] sm:$0xff] %v7384_v58  ;;  %v2615_v23 = vadd.f32 %v2580_v50, %v2302_v17  ;;  %v2303_v37 = vadd.f32 %v2269_v9, %v1890_v61  ;;  %v7388_v41 = vpop.f32.mrf.mxu1  ;;  %v4840_v17 = vrot.slane %v7341_v25, 5  ;;  %v4304_v61 = vrot.slane %v4302_v39, 4  ;;  %v7499_v58 = vld [vmem:[%s7425_s28 + $0x90] sm:$0xff] }
 0x244   : > { %v4317_v50 = vrot.slane %v4315_v56, 4  ;;  %v3531_v9 = vpack.c.b16 %v3509_v33, %v3508_v6  ;;  %v4525_v30 = vpack.c.b16 %v4502_v53, %v4501_v51  ;;  %v4323_v6 = vrot.slane %v4321_v36, 5  ;;  %v6134_v33 = vld [vmem:[#allocation2 + $0xb4] sm:$0xf]  ;;  %7863 = vst [vmem:[#allocation22_spill] sm:$0xff] %v7499_v58 }
 0x245   : > { %v4842_v14 = vrot.slane %v4840_v17, 4  ;;  %v4841_v47 = vsel %vm6751_vm14, %v5805_v60, %v4840_v17  ;;  %v3434_v17 = vrot.slane %v6134_v33, 5  ;;  %v3308_v60 = vld [vmem:[#allocation2 + $0xb0] sm:$0xe]  ;;  %v3692_v33 = vadd.f32 %v7388_v41, %v7000_v18 }
 0x246   : > { %v4318_v39 = vor.u32 %v4317_v50, %v4313_v10  ;;  %v5631_v43 = vrot.slane %v3308_v60, 9  ;;  %v7446_v60 = vld [vmem:[%s7425_s28 + $0x8] sm:$0xff] }
 0x247   : > { %3964 = vmatmul.bf16.gmra.mxu2 %v5938_v22  ;;  %v4308_v22 = vor.u32 %v4307_v8, %v4304_v61  ;;  %v3436_v50 = vrot.slane %v3434_v17, 4 }
 0x248   : > { %v3261_v55 = vpop.f32.mrf.mxu0  ;;  %v4319_v56 = vrot.slane %v4318_v39, 4  ;;  %v3435_v39 = vsel %vm6751_vm14, %v5631_v43, %v3434_v17  ;;  %v7454_v43 = vld [vmem:[#allocation2 + $0xc8] sm:$0x1] }
 0x249   : > { %v7399_v48 = vadd.f32 %v3261_v55, %v2615_v23  ;;  %v4844_v23 = vsel %vm6751_vm14, %v4842_v14, %v4843_v28  ;;  %v4309_v57 = vrot.slane %v4308_v22, 4  ;;  %v4326_v55 = vshrl.u32 %v4067_v0, 16  ;;  %v5939_v28 = vld [vmem:[#allocation2 + $0xb0] sm:$0xff] }
 0x24a   : > { %v2582_v29 = vpop.f32.mrf.mxu3  ;;  %v3925_v25 = vpop.f32.mrf.mxu2  ;;  %v4927_v51 = vunpack.c.l.b16 %v4844_v23  ;;  %v4329_v14 = vshll.u32 %v4067_v0, 16 }
 0x24b   : > { %7860 = vst [vmem:[#allocation19_spill] sm:$0xff] %v7399_v48  ;;  %5065 = vmatmul.bf16.gmra.mxu0 %v4949_v11  ;;  %v2616_v35 = vadd.f32 %v2582_v29, %v2303_v37  ;;  %v7402_v45 = vpop.f32.mrf.mxu1  ;;  %v4926_v37 = vunpack.c.l.b16 %v4841_v47  ;;  %v7411_v11 = vld [vmem:[#allocation2 + $0xc4] sm:$0xf]  ;;  %v4005_v53 = vadd.f32 %v3925_v25, %v3691_v40  ;;  %v4314_v25 = vsel %vm6376_vm11, %v4309_v57, %v4313_v10  ;;  %v7490_v10 = vld [vmem:[%s7425_s28 + $0x78] sm:$0xff]  ;;  %v7496_v48 = vld [vmem:[%s7425_s28 + $0x88] sm:$0xff] }
 0x24c   : > { %v4335_v47 = vshll.u32 %v7411_v11, 16  ;;  %v4339_v22 = vshrl.u32 %v7411_v11, 16  ;;  %v3510_v40 = vunpack.c.l.b16 %v3435_v39  ;;  %v7438_v57 = vrot.slane %v4326_v55, 4  ;;  %v7449_v55 = vld [vmem:[%s7425_s28 + $0x10] sm:$0xff]  ;;  %v7484_v39 = vld [vmem:[%s7425_s28 + $0x68] sm:$0xff]  ;;  %7862 = vst [vmem:[#allocation21_spill] sm:$0xff] %v7496_v48 }
 0x24d   : > { %3655 = vmatmul.bf16.gmra.mxu1 %v3531_v9  ;;  %v6135_v9 = vld [vmem:[#allocation2 + $0xb8] sm:$0x1]  ;;  %v4950_v23 = vpack.c.b16 %v4927_v51, %v4926_v37  ;;  %v5143_v37 = vld [vmem:[%s7425_s28] sm:$0xff]  ;;  %v4727_v51 = vld [vmem:[#allocation2 + $0xb0] sm:$0xe] }
 0x24e   : > { %v3437_v29 = vrot.slane %v6135_v9, 5  ;;  %v7443_v18 = vrot.slane %v4335_v47, 5  ;;  %v4341_v41 = vrot.slane %v4339_v22, 4  ;;  %v7460_v9 = vld [vmem:[%s7425_s28 + $0x28] sm:$0xff]  ;;  %v7475_v22 = vld [vmem:[%s7425_s28 + $0x50] sm:$0xff]  ;;  %v5806_v12 = vrot.slane %v4727_v51, 9 }
 0x24f   : > { %4645 = vmatmul.bf16.gmra.mxu3 %v4525_v30  ;;  %v7472_v47 = vld [vmem:[%s7425_s28 + $0x48] sm:$0xff] }
 0x250   : > { %v3263_v3 = vpop.f32.mrf.mxu0  ;;  %v3438_v36 = vsel %vm6751_vm14, %v3436_v50, %v3437_v29  ;;  %v7457_v50 = vld [vmem:[%s7425_s28 + $0x20] sm:$0xff]  ;;  %v7463_v29 = vld [vmem:[%s7425_s28 + $0x30] sm:$0xff]  ;;  %v4342_v31 = vor.u32 %v4341_v41, %v7443_v18 }
 0x251   : > { %v7414_v61 = vadd.f32 %v3263_v3, %v2616_v35  ;;  %v4324_v35 = vsel %vm6376_vm11, %v4319_v56, %v4323_v6  ;;  %v3511_v3 = vunpack.c.l.b16 %v3438_v36  ;;  %v7440_v56 = vrot.slane %v4329_v14, 5  ;;  %v7466_v14 = vld [vmem:[%s7425_s28 + $0x38] sm:$0xff]  ;;  %v7487_v36 = vld [vmem:[%s7425_s28 + $0x70] sm:$0xff]  ;;  %v6136_v41 = vld [vmem:[#allocation2 + $0xc4] sm:$0xf] }
 0x252   : > { %v4606_v8 = vpop.f32.mrf.mxu3  ;;  %v3927_v44 = vpop.f32.mrf.mxu2  ;;  %v4503_v6 = vunpack.c.l.b16 %v4314_v25  ;;  %v4504_v17 = vunpack.c.l.b16 %v4324_v35  ;;  %v7478_v25 = vld [vmem:[%s7425_s28 + $0x58] sm:$0xff]  ;;  %v7481_v35 = vld [vmem:[%s7425_s28 + $0x60] sm:$0xff] }
 0x253   : > { %7861 = vst [vmem:[#allocation20_spill] sm:$0xff] %v7414_v61  ;;  %v7416_v30 = vpop.f32.mrf.mxu1  ;;  %v4686_v0 = vadd.f32 %v4606_v8, %v4005_v53  ;;  %v7452_v8 = vld [vmem:[%s7425_s28 + $0x18] sm:$0xff]  ;;  %v7493_v61 = vld [vmem:[%s7425_s28 + $0x80] sm:$0xff]  ;;  %v4006_v52 = vadd.f32 %v3927_v44, %v3692_v33  ;;  %v3532_v58 = vpack.c.b16 %v3511_v3, %v3510_v40  ;;  %v4850_v44 = vrot.slane %v7397_v54, 5  ;;  %v7544_v33 = vld [vmem:[%s7425_s28 + $0xe8] sm:$0xff] }
 0x254   : > { %v4332_v3 = vor.u32 %v7440_v56, %v7438_v57  ;;  %7875 = vst [vmem:[#allocation33_spill] sm:$0xff] %v7544_v33  ;;  %v4526_v16 = vpack.c.b16 %v4504_v17, %v4503_v6  ;;  %v7878_v57 = vrot.slane %v7382_v13, 5  ;;  %v3309_v33 = vld [vmem:[#allocation2 + $0xc0] sm:$0xe] }
 0x256   : > { %v4848_v56 = vsel %vm6751_vm14, %v5806_v12, %v7878_v57  ;;  %v7565_v12 = vld [vmem:[#allocation2 + $0xd4] sm:$0xf] }
 0x257   : > { %3969 = vmatmul.bf16.gmra.mxu2 %v5939_v28  ;;  %v7469_v28 = vld [vmem:[%s7425_s28 + $0x40] sm:$0xff] }
 0x258   : > { %v5031_v53 = vpop.f32.mrf.mxu0 }
 0x259   : > { %v5111_v15 = vadd.f32 %v5031_v53, %v4686_v0  ;;  %v4849_v0 = vrot.slane %v7874_v21, 4  ;;  %v7547_v53 = vld [vmem:[%s7425_s28 + $0xf0] sm:$0xff]  ;;  %v4345_v21 = vshll.u32 %v7454_v43, 16 }
 0x25a   : > { %v4608_v27 = vpop.f32.mrf.mxu3  ;;  %v3930_v40 = vpop.f32.mrf.mxu2  ;;  %7876 = vst [vmem:[#allocation34_spill] sm:$0xff] %v7547_v53 }
 0x25b   : > { %5070 = vmatmul.bf16.gmra.mxu0 %v4950_v23  ;;  %v5175_v19 = vadd.f32 %v5143_v37, %v5111_v15  ;;  %v7552_v51 = vpop.f32.mrf.mxu1  ;;  %v4687_v54 = vadd.f32 %v4608_v27, %v4006_v52  ;;  %v4851_v38 = vsel %vm6751_vm14, %v4849_v0, %v4850_v44  ;;  %v4333_v23 = vrot.slane %v4332_v3, 4  ;;  %v4070_v27 = vld [vmem:[#allocation2 + $0xd0] sm:$0xf] }
 0x25c   : > { %v3693_v15 = vadd.f32 %v7402_v45, %v7003_v62  ;;  %v4343_v37 = vrot.slane %v4342_v31, 4  ;;  %v4347_v6 = vrot.slane %v4345_v21, 5  ;;  %v3441_v52 = vrot.slane %v6136_v41, 5  ;;  %v6137_v45 = vld [vmem:[#allocation2 + $0xc8] sm:$0x1]  ;;  %v5940_v21 = vld [vmem:[#allocation2 + $0xc0] sm:$0xff] }
 0x25d   : > { %3660 = vmatmul.bf16.gmra.mxu1 %v3532_v58  ;;  %5207 = vst [vmem:[%s7536_s6] sm:$0xff] %v5175_v19  ;;  %v4928_v58 = vunpack.c.l.b16 %v4848_v56  ;;  %v4929_v13 = vunpack.c.l.b16 %v4851_v38  ;;  %v4338_v62 = vsel %vm6376_vm11, %v4333_v23, %v7443_v18  ;;  %v3444_v44 = vrot.slane %v6137_v45, 5 }
 0x25e   : > { %v4007_v53 = vadd.f32 %v3930_v40, %v3693_v15  ;;  %v3443_v31 = vrot.slane %v3441_v52, 4  ;;  %v4348_v38 = vsel %vm6376_vm11, %v4343_v37, %v4347_v6  ;;  %v4353_v56 = vshll.u32 %v4070_v27, 16  ;;  %v4728_v15 = vld [vmem:[#allocation2 + $0xc0] sm:$0xe] }
 0x25f   : > { %4650 = vmatmul.bf16.gmra.mxu3 %v4526_v16  ;;  %v5632_v16 = vrot.slane %v3309_v33, 9  ;;  %v4359_v33 = vshll.u32 %v7565_v12, 16  ;;  %v4363_v23 = vshrl.u32 %v7565_v12, 16  ;;  %v4951_v37 = vpack.c.b16 %v4929_v13, %v4928_v58  ;;  %v7587_v58 = vld [vmem:[#allocation2 + $0xd8] sm:$0x1] }
 0x260   : > { %v5033_v17 = vpop.f32.mrf.mxu0  ;;  %v3445_v18 = vsel %vm6751_vm14, %v3443_v31, %v3444_v44  ;;  %v4854_v6 = vrot.slane %v7411_v11, 5  ;;  %v4505_v45 = vunpack.c.l.b16 %v4338_v62  ;;  %v4355_v44 = vrot.slane %v4353_v56, 5 }
 0x261   : > { %v5112_v19 = vadd.f32 %v5033_v17, %v4687_v54  ;;  %v4350_v54 = vshrl.u32 %v4070_v27, 16  ;;  %v3442_v17 = vsel %vm6751_vm14, %v5632_v16, %v3441_v52  ;;  %v3694_v27 = vadd.f32 %v7416_v30, %v7014_v34 }
 0x262   : > { %v4611_v57 = vpop.f32.mrf.mxu3  ;;  %v3932_v0 = vpop.f32.mrf.mxu2  ;;  %v3512_v41 = vunpack.c.l.b16 %v3442_v17  ;;  %v4506_v52 = vunpack.c.l.b16 %v4348_v38  ;;  %v5807_v16 = vrot.slane %v4728_v15, 9  ;;  %v7585_v48 = vrot.slane %v4359_v33, 5  ;;  %v4073_v15 = vld [vmem:[#allocation2 + $0xe0] sm:$0xf] }
 0x263   : > { %v5176_v3 = vadd.f32 %v7446_v60, %v5112_v19  ;;  %v7573_v40 = vpop.f32.mrf.mxu1  ;;  %v4688_v60 = vadd.f32 %v4611_v57, %v4007_v53  ;;  %v3513_v19 = vunpack.c.l.b16 %v3445_v18  ;;  %v4352_v31 = vrot.slane %v4350_v54, 4  ;;  %v7879_v18 = vld [vmem:[#allocation6_spill] sm:$0xff] }
 0x264   : > { %v4365_v42 = vrot.slane %v4363_v23, 4  ;;  %v4008_v57 = vadd.f32 %v3932_v0, %v3694_v27  ;;  %v4856_v13 = vrot.slane %v4854_v6, 4  ;;  %v4857_v34 = vrot.slane %v7454_v43, 5 }
 0x265   : > { %5208 = vst [vmem:[%s7536_s6 + $0x8] sm:$0xff] %v5176_v3  ;;  %v3533_v17 = vpack.c.b16 %v3513_v19, %v3512_v41  ;;  %v4527_v3 = vpack.c.b16 %v4506_v52, %v4505_v45  ;;  %v4855_v38 = vsel %vm6751_vm14, %v5807_v16, %v4854_v6  ;;  %v4369_v54 = vshll.u32 %v7587_v58, 16  ;;  %v7602_v6 = vld [vmem:[#allocation2 + $0xe4] sm:$0xf]  ;;  %v3310_v16 = vld [vmem:[#allocation2 + $0xd0] sm:$0xe] }
 0x266   : > { %v4366_v0 = vor.u32 %v4365_v42, %v7585_v48  ;;  %v4858_v43 = vsel %vm6751_vm14, %v4856_v13, %v4857_v34  ;;  %v4930_v33 = vunpack.c.l.b16 %v4855_v38  ;;  %v4377_v13 = vshll.u32 %v4073_v15, 16 }
 0x267   : > { %3974 = vmatmul.bf16.gmra.mxu2 %v5940_v21  ;;  %v4371_v19 = vrot.slane %v4369_v54, 5  ;;  %v4931_v45 = vunpack.c.l.b16 %v4858_v43  ;;  %v4383_v38 = vshll.u32 %v7602_v6, 16 }
 0x268   : > { %v5036_v5 = vpop.f32.mrf.mxu0  ;;  %v4367_v41 = vrot.slane %v4366_v0, 4 }
 0x269   : > { %v5113_v53 = vadd.f32 %v5036_v5, %v4688_v60  ;;  %v4356_v5 = vor.u32 %v4355_v44, %v4352_v31  ;;  %v4374_v31 = vshrl.u32 %v4073_v15, 16 }
 0x26a   : > { %v4613_v11 = vpop.f32.mrf.mxu3  ;;  %v3935_v30 = vpop.f32.mrf.mxu2  ;;  %v4372_v0 = vsel %vm6376_vm11, %v4367_v41, %v4371_v19 }
 0x26b   : > { %5075 = vmatmul.bf16.gmra.mxu0 %v4951_v37  ;;  %v5177_v62 = vadd.f32 %v7449_v55, %v5113_v53  ;;  %v7591_v21 = vpop.f32.mrf.mxu1  ;;  %v4689_v56 = vadd.f32 %v4613_v11, %v4008_v57  ;;  %v3695_v55 = vadd.f32 %v7552_v51, %v7879_v18  ;;  %v4357_v60 = vrot.slane %v4356_v5, 4  ;;  %v6138_v37 = vld [vmem:[#allocation2 + $0xd4] sm:$0xf]  ;;  %v6139_v51 = vld [vmem:[#allocation2 + $0xd8] sm:$0x1] }
 0x26c   : > { %v3448_v42 = vrot.slane %v6138_v37, 5  ;;  %v5633_v57 = vrot.slane %v3310_v16, 9  ;;  %v3451_v11 = vrot.slane %v6139_v51, 5  ;;  %v4387_v5 = vshrl.u32 %v7602_v6, 16 }
 0x26d   : > { %3665 = vmatmul.bf16.gmra.mxu1 %v3533_v17  ;;  %5209 = vst [vmem:[%s7536_s6 + $0x10] sm:$0xff] %v5177_v62  ;;  %v4009_v52 = vadd.f32 %v3935_v30, %v3695_v55  ;;  %v5941_v62 = vld [vmem:[#allocation2 + $0xd0] sm:$0xff]  ;;  %v4362_v30 = vsel %vm6376_vm11, %v4357_v60, %v7585_v48  ;;  %v7880_v55 = vld [vmem:[#allocation7_spill] sm:$0xff]  ;;  %v4861_v37 = vrot.slane %v7565_v12, 5  ;;  %v4376_v48 = vrot.slane %v4374_v31, 4 }
 0x26e   : > { %v3450_v17 = vrot.slane %v3448_v42, 4  ;;  %v3449_v54 = vsel %vm6751_vm14, %v5633_v57, %v3448_v42  ;;  %v4379_v60 = vrot.slane %v4377_v13, 5  ;;  %v4507_v41 = vunpack.c.l.b16 %v4362_v30 }
 0x26f   : > { %4655 = vmatmul.bf16.gmra.mxu3 %v4527_v3  ;;  %v3514_v15 = vunpack.c.l.b16 %v3449_v54  ;;  %v4508_v19 = vunpack.c.l.b16 %v4372_v0  ;;  %v7622_v42 = vrot.slane %v4383_v38, 5  ;;  %v4389_v16 = vrot.slane %v4387_v5, 4  ;;  %v7881_v54 = vld [vmem:[#allocation8_spill] sm:$0xff] }
 0x270   : > { %v5038_v23 = vpop.f32.mrf.mxu0  ;;  %v4863_v51 = vrot.slane %v4861_v37, 4  ;;  %v4864_v12 = vrot.slane %v7587_v58, 5 }
 0x271   : > { %v5114_v27 = vadd.f32 %v5038_v23, %v4689_v56  ;;  %v4952_v56 = vpack.c.b16 %v4931_v45, %v4930_v33  ;;  %v3696_v23 = vadd.f32 %v7573_v40, %v7880_v55  ;;  %v7624_v33 = vld [vmem:[#allocation2 + $0xe8] sm:$0x1]  ;;  %v4390_v38 = vor.u32 %v4389_v16, %v7622_v42  ;;  %v4076_v55 = vld [vmem:[#allocation2 + $0xf0] sm:$0xf] }
 0x272   : > { %v4616_v44 = vpop.f32.mrf.mxu3  ;;  %v3937_v53 = vpop.f32.mrf.mxu2  ;;  %v4393_v5 = vshll.u32 %v7624_v33, 16  ;;  %v4865_v58 = vsel %vm6751_vm14, %v4863_v51, %v4864_v12 }
 0x273   : > { %v5178_v34 = vadd.f32 %v7452_v8, %v5114_v27  ;;  %v7605_v3 = vpop.f32.mrf.mxu1  ;;  %v3452_v8 = vsel %vm6751_vm14, %v3450_v17, %v3451_v11  ;;  %v4690_v43 = vadd.f32 %v4616_v44, %v4009_v52  ;;  %v4729_v27 = vld [vmem:[#allocation2 + $0xd0] sm:$0xe]  ;;  %v4010_v52 = vadd.f32 %v3937_v53, %v3696_v23 }
 0x274   : > { %v3515_v18 = vunpack.c.l.b16 %v3452_v8  ;;  %v5808_v40 = vrot.slane %v4729_v27, 9  ;;  %v4380_v11 = vor.u32 %v4379_v60, %v4376_v48  ;;  %v4391_v8 = vrot.slane %v4390_v38, 4 }
 0x275   : > { %5210 = vst [vmem:[%s7536_s6 + $0x18] sm:$0xff] %v5178_v34  ;;  %v4528_v34 = vpack.c.b16 %v4508_v19, %v4507_v41  ;;  %v4933_v60 = vunpack.c.l.b16 %v4865_v58  ;;  %v3311_v19 = vld [vmem:[#allocation2 + $0xe0] sm:$0xe] }
 0x276   : > { %v3534_v44 = vpack.c.b16 %v3515_v18, %v3514_v15  ;;  %v4862_v30 = vsel %vm6751_vm14, %v5808_v40, %v4861_v37  ;;  %v4381_v0 = vrot.slane %v4380_v11, 4  ;;  %v6140_v15 = vld [vmem:[#allocation2 + $0xe4] sm:$0xf]  ;;  %v7639_v37 = vld [vmem:[#allocation2 + $0xf4] sm:$0xf]  ;;  %v4401_v11 = vshll.u32 %v4076_v55, 16 }
 0x277   : > { %3979 = vmatmul.bf16.gmra.mxu2 %v5941_v62  ;;  %v3455_v18 = vrot.slane %v6140_v15, 5  ;;  %v4932_v48 = vunpack.c.l.b16 %v4862_v30  ;;  %v5942_v40 = vld [vmem:[#allocation2 + $0xe0] sm:$0xff]  ;;  %v4407_v38 = vshll.u32 %v7639_v37, 16 }
 0x278   : > { %v5041_v57 = vpop.f32.mrf.mxu0 }
 0x279   : > { %v5115_v45 = vadd.f32 %v5041_v57, %v4690_v43  ;;  %v5634_v57 = vrot.slane %v3311_v19, 9  ;;  %v4953_v58 = vpack.c.b16 %v4933_v60, %v4932_v48  ;;  %v7661_v48 = vld [vmem:[#allocation2 + $0xf8] sm:$0x1] }
 0x27a   : > { %v4618_v17 = vpop.f32.mrf.mxu3  ;;  %v3940_v31 = vpop.f32.mrf.mxu2 }
 0x27b   : > { %5080 = vmatmul.bf16.gmra.mxu0 %v4952_v56  ;;  %v5179_v13 = vadd.f32 %v7457_v50, %v5115_v45  ;;  %v7628_v62 = vpop.f32.mrf.mxu1  ;;  %v4691_v53 = vadd.f32 %v4618_v17, %v4010_v52  ;;  %v3697_v50 = vadd.f32 %v7591_v21, %v7881_v54  ;;  %v4395_v56 = vrot.slane %v4393_v5, 5  ;;  %v6141_v52 = vld [vmem:[#allocation2 + $0xe8] sm:$0x1]  ;;  %v7882_v54 = vld [vmem:[#allocation9_spill] sm:$0xff] }
 0x27c   : > { %v4386_v21 = vsel %vm6376_vm11, %v4381_v0, %v7622_v42  ;;  %v3457_v45 = vrot.slane %v3455_v18, 4  ;;  %v4411_v5 = vshrl.u32 %v7639_v37, 16  ;;  %v4868_v0 = vrot.slane %v7602_v6, 5 }
 0x27d   : > { %3670 = vmatmul.bf16.gmra.mxu1 %v3534_v44  ;;  %5211 = vst [vmem:[%s7536_s6 + $0x20] sm:$0xff] %v5179_v13  ;;  %v4011_v41 = vadd.f32 %v3940_v31, %v3697_v50  ;;  %v3458_v44 = vrot.slane %v6141_v52, 5  ;;  %v4396_v51 = vsel %vm6376_vm11, %v4391_v8, %v4395_v56  ;;  %v4398_v31 = vshrl.u32 %v4076_v55, 16  ;;  %v4730_v13 = vld [vmem:[#allocation2 + $0xe0] sm:$0xe] }
 0x27e   : > { %v3698_v50 = vadd.f32 %v7605_v3, %v7882_v54  ;;  %v4509_v8 = vunpack.c.l.b16 %v4386_v21  ;;  %v4510_v56 = vunpack.c.l.b16 %v4396_v51  ;;  %v4403_v55 = vrot.slane %v4401_v11, 5  ;;  %v4079_v11 = vld [vmem:[#allocation2 + $0x100] sm:$0xf] }
 0x27f   : > { %4660 = vmatmul.bf16.gmra.mxu3 %v4528_v34  ;;  %v3456_v34 = vsel %vm6751_vm14, %v5634_v57, %v3455_v18  ;;  %v3459_v42 = vsel %vm6751_vm14, %v3457_v45, %v3458_v44  ;;  %v4400_v18 = vrot.slane %v4398_v31, 4  ;;  %v4413_v19 = vrot.slane %v4411_v5, 4 }
 0x280   : > { %v5043_v43 = vpop.f32.mrf.mxu0  ;;  %v3517_v30 = vunpack.c.l.b16 %v3459_v42  ;;  %v4870_v60 = vrot.slane %v4868_v0, 4  ;;  %v4871_v3 = vrot.slane %v7624_v33, 5  ;;  %v4529_v52 = vpack.c.b16 %v4510_v56, %v4509_v8 }
 0x281   : > { %v5116_v23 = vadd.f32 %v5043_v43, %v4691_v53  ;;  %v3516_v53 = vunpack.c.l.b16 %v3456_v34  ;;  %v5809_v43 = vrot.slane %v4730_v13, 9  ;;  %v4417_v51 = vshll.u32 %v7661_v48, 16 }
 0x282   : > { %v4621_v27 = vpop.f32.mrf.mxu3  ;;  %v3942_v16 = vpop.f32.mrf.mxu2  ;;  %v4872_v33 = vsel %vm6751_vm14, %v4870_v60, %v4871_v3  ;;  %v4422_v8 = vshrl.u32 %v4079_v11, 16 }
 0x283   : > { %v5180_v17 = vadd.f32 %v7460_v9, %v5116_v23  ;;  %v7647_v12 = vpop.f32.mrf.mxu1  ;;  %v4692_v9 = vadd.f32 %v4621_v27, %v4011_v41  ;;  %v7659_v23 = vrot.slane %v4407_v38, 5  ;;  %v4012_v27 = vadd.f32 %v3942_v16, %v3698_v50  ;;  %v3312_v50 = vld [vmem:[#allocation2 + $0xf0] sm:$0xe] }
 0x284   : > { %v3535_v57 = vpack.c.b16 %v3517_v30, %v3516_v53  ;;  %v4419_v5 = vrot.slane %v4417_v51, 5  ;;  %v7676_v30 = vld [vmem:[#allocation2 + $0x104] sm:$0xf]  ;;  %v4875_v51 = vrot.slane %v7639_v37, 5  ;;  %v4878_v37 = vrot.slane %v7661_v48, 5 }
 0x285   : > { %5212 = vst [vmem:[%s7536_s6 + $0x28] sm:$0xff] %v5180_v17  ;;  %v4869_v17 = vsel %vm6751_vm14, %v5809_v43, %v4868_v0  ;;  %v4414_v16 = vor.u32 %v4413_v19, %v7659_v23  ;;  %v4935_v0 = vunpack.c.l.b16 %v4872_v33 }
 0x286   : > { %v4934_v13 = vunpack.c.l.b16 %v4869_v17 }
 0x287   : > { %3984 = vmatmul.bf16.gmra.mxu2 %v5942_v40  ;;  %v4404_v40 = vor.u32 %v4403_v55, %v4400_v18  ;;  %v4415_v38 = vrot.slane %v4414_v16, 4  ;;  %v4425_v55 = vshll.u32 %v4079_v11, 16  ;;  %v3700_v16 = vadd.f32 %v7647_v12, %v7105_v20 }
 0x288   : > { %v5046_v15 = vpop.f32.mrf.mxu0  ;;  %v4877_v12 = vrot.slane %v4875_v51, 4 }
 0x289   : > { %v5117_v41 = vadd.f32 %v5046_v15, %v4692_v9  ;;  %v4405_v42 = vrot.slane %v4404_v40, 4  ;;  %v6142_v9 = vld [vmem:[#allocation2 + $0xf4] sm:$0xf]  ;;  %v5635_v15 = vrot.slane %v3312_v50, 9  ;;  %v4420_v3 = vsel %vm6376_vm11, %v4415_v38, %v4419_v5 }
 0x28a   : > { %v4623_v6 = vpop.f32.mrf.mxu3  ;;  %v3945_v45 = vpop.f32.mrf.mxu2  ;;  %v3462_v53 = vrot.slane %v6142_v9, 5  ;;  %v4512_v11 = vunpack.c.l.b16 %v4420_v3  ;;  %v4879_v48 = vsel %vm6751_vm14, %v4877_v12, %v4878_v37 }
 0x28b   : > { %5085 = vmatmul.bf16.gmra.mxu0 %v4953_v58  ;;  %v5181_v21 = vadd.f32 %v7463_v29, %v5117_v41  ;;  %v7665_v44 = vpop.f32.mrf.mxu1  ;;  %v4693_v31 = vadd.f32 %v4623_v6, %v4012_v27  ;;  %v3699_v29 = vadd.f32 %v7628_v62, %v7079_v63  ;;  %v6143_v63 = vld [vmem:[#allocation2 + $0xf8] sm:$0x1]  ;;  %v5943_v41 = vld [vmem:[#allocation2 + $0xf0] sm:$0xff]  ;;  %v4435_v6 = vshrl.u32 %v7676_v30, 16 }
 0x28c   : > { %v3464_v18 = vrot.slane %v3462_v53, 4  ;;  %v3465_v62 = vrot.slane %v6143_v63, 5  ;;  %v4410_v60 = vsel %vm6376_vm11, %v4405_v42, %v7659_v23  ;;  %v4424_v23 = vrot.slane %v4422_v8, 4 }
 0x28d   : > { %3675 = vmatmul.bf16.gmra.mxu1 %v3535_v57  ;;  %5213 = vst [vmem:[%s7536_s6 + $0x30] sm:$0xff] %v5181_v21  ;;  %v4013_v54 = vadd.f32 %v3945_v45, %v3699_v29  ;;  %v4431_v57 = vshll.u32 %v7676_v30, 16  ;;  %v3463_v45 = vsel %vm6751_vm14, %v5635_v15, %v3462_v53  ;;  %v4954_v21 = vpack.c.b16 %v4935_v0, %v4934_v13  ;;  %v4731_v29 = vld [vmem:[#allocation2 + $0xf0] sm:$0xe]  ;;  %v7698_v13 = vld [vmem:[#allocation2 + $0x108] sm:$0x1] }
 0x28e   : > { %v3518_v17 = vunpack.c.l.b16 %v3463_v45  ;;  %v4511_v33 = vunpack.c.l.b16 %v4410_v60  ;;  %v4437_v42 = vrot.slane %v4435_v6, 4  ;;  %v5810_v20 = vrot.slane %v4731_v29, 9  ;;  %v4082_v60 = vld [vmem:[#allocation2 + $0x110] sm:$0xf] }
 0x28f   : > { %4665 = vmatmul.bf16.gmra.mxu3 %v4529_v52 }
 0x290   : > { %v5048_v34 = vpop.f32.mrf.mxu0  ;;  %v4530_v8 = vpack.c.b16 %v4512_v11, %v4511_v33  ;;  %v4876_v63 = vsel %vm6751_vm14, %v5810_v20, %v4875_v51  ;;  %v5944_v11 = vld [vmem:[#allocation2 + $0x100] sm:$0xff] }
 0x291   : > { %v5118_v58 = vadd.f32 %v5048_v34, %v4693_v31  ;;  %v4427_v31 = vrot.slane %v4425_v55, 5  ;;  %v7696_v34 = vrot.slane %v4431_v57, 5  ;;  %v6144_v57 = vld [vmem:[#allocation2 + $0x104] sm:$0xf]  ;;  %v4936_v45 = vunpack.c.l.b16 %v4876_v63 }
 0x292   : > { %v4626_v56 = vpop.f32.mrf.mxu3  ;;  %v3947_v43 = vpop.f32.mrf.mxu2  ;;  %v3469_v6 = vrot.slane %v6144_v57, 5 }
 0x293   : > { %v5182_v19 = vadd.f32 %v7466_v14, %v5118_v58  ;;  %v7679_v27 = vpop.f32.mrf.mxu1  ;;  %v3466_v14 = vsel %vm6751_vm14, %v3464_v18, %v3465_v62  ;;  %v4694_v52 = vadd.f32 %v4626_v56, %v4013_v54  ;;  %v4014_v9 = vadd.f32 %v3947_v43, %v3700_v16 }
 0x294   : > { %v3519_v40 = vunpack.c.l.b16 %v3466_v14  ;;  %v4428_v54 = vor.u32 %v4427_v31, %v4424_v23  ;;  %v4438_v15 = vor.u32 %v4437_v42, %v7696_v34  ;;  %v4441_v18 = vshll.u32 %v7698_v13, 16  ;;  %v6145_v23 = vld [vmem:[#allocation2 + $0x108] sm:$0x1] }
 0x295   : > { %5214 = vst [vmem:[%s7536_s6 + $0x38] sm:$0xff] %v5182_v19  ;;  %v4937_v14 = vunpack.c.l.b16 %v4879_v48  ;;  %v3471_v51 = vrot.slane %v3469_v6, 4  ;;  %v3472_v31 = vrot.slane %v6145_v23, 5 }
 0x296   : > { %v3536_v53 = vpack.c.b16 %v3519_v40, %v3518_v17  ;;  %v4429_v62 = vrot.slane %v4428_v54, 4  ;;  %v4439_v55 = vrot.slane %v4438_v15, 4  ;;  %v4443_v19 = vrot.slane %v4441_v18, 5  ;;  %v7713_v17 = vld [vmem:[#allocation2 + $0x114] sm:$0xf] }
 0x297   : > { %3989 = vmatmul.bf16.gmra.mxu2 %v5943_v41  ;;  %v4955_v37 = vpack.c.b16 %v4937_v14, %v4936_v45  ;;  %v4732_v18 = vld [vmem:[#allocation2 + $0x100] sm:$0xe] }
 0x298   : > { %v5051_v38 = vpop.f32.mrf.mxu0  ;;  %v4444_v29 = vsel %vm6376_vm11, %v4439_v55, %v4443_v19 }
 0x299   : > { %v5119_v5 = vadd.f32 %v5051_v38, %v4694_v52  ;;  %v3313_v52 = vld [vmem:[#allocation2 + $0x100] sm:$0xe]  ;;  %v4446_v38 = vshrl.u32 %v4082_v60, 16 }
 0x29a   : > { %v4628_v58 = vpop.f32.mrf.mxu3  ;;  %v3950_v0 = vpop.f32.mrf.mxu2 }
 0x29b   : > { %5090 = vmatmul.bf16.gmra.mxu0 %v4954_v21  ;;  %v5183_v50 = vadd.f32 %v7469_v28, %v5119_v5  ;;  %v7702_v56 = vpop.f32.mrf.mxu1  ;;  %v4695_v43 = vadd.f32 %v4628_v58, %v4014_v9  ;;  %v3701_v28 = vadd.f32 %v7665_v44, %v7110_v1  ;;  %v4434_v1 = vsel %vm6376_vm11, %v4429_v62, %v7696_v34 }
 0x29c   : > { %v5636_v44 = vrot.slane %v3313_v52, 9  ;;  %v4449_v5 = vshll.u32 %v4082_v60, 16  ;;  %v3473_v34 = vsel %vm6751_vm14, %v3471_v51, %v3472_v31  ;;  %v4459_v58 = vshrl.u32 %v7713_v17, 16 }
 0x29d   : > { %3680 = vmatmul.bf16.gmra.mxu1 %v3536_v53  ;;  %5215 = vst [vmem:[%s7536_s6 + $0x40] sm:$0xff] %v5183_v50  ;;  %v4015_v21 = vadd.f32 %v3950_v0, %v3701_v28  ;;  %v4455_v53 = vshll.u32 %v7713_v17, 16  ;;  %v3521_v12 = vunpack.c.l.b16 %v3473_v34  ;;  %v3702_v0 = vadd.f32 %v7679_v27, %v7123_v24 }
 0x29e   : > { %v3470_v9 = vsel %vm6751_vm14, %v5636_v44, %v3469_v6  ;;  %v4513_v54 = vunpack.c.l.b16 %v4434_v1  ;;  %v4514_v50 = vunpack.c.l.b16 %v4444_v29  ;;  %v4451_v63 = vrot.slane %v4449_v5, 5 }
 0x29f   : > { %4670 = vmatmul.bf16.gmra.mxu3 %v4530_v8  ;;  %v4882_v8 = vrot.slane %v7676_v30, 5  ;;  %v4457_v48 = vrot.slane %v4455_v53, 5  ;;  %v4461_v62 = vrot.slane %v4459_v58, 4  ;;  %v5811_v60 = vrot.slane %v4732_v18, 9 }
 0x2a0   : > { %v5053_v41 = vpop.f32.mrf.mxu0  ;;  %v4531_v27 = vpack.c.b16 %v4514_v50, %v4513_v54  ;;  %v4885_v30 = vrot.slane %v7698_v13, 5 }
 0x2a1   : > { %v5120_v3 = vadd.f32 %v5053_v41, %v4695_v43  ;;  %v4448_v43 = vrot.slane %v4446_v38, 4  ;;  %v7733_v41 = vld [vmem:[#allocation2 + $0x118] sm:$0x1]  ;;  %v4884_v45 = vrot.slane %v4882_v8, 4 }
 0x2a2   : > { %v4631_v40 = vpop.f32.mrf.mxu3  ;;  %v3952_v16 = vpop.f32.mrf.mxu2  ;;  %v4465_v52 = vshll.u32 %v7733_v41, 16 }
 0x2a3   : > { %v5184_v33 = vadd.f32 %v7472_v47, %v5120_v3  ;;  %v7721_v42 = vpop.f32.mrf.mxu1  ;;  %v4696_v20 = vadd.f32 %v4631_v40, %v4015_v21  ;;  %v3520_v47 = vunpack.c.l.b16 %v3470_v9  ;;  %v4016_v55 = vadd.f32 %v3952_v16, %v3702_v0 }
 0x2a4   : > { %v4452_v14 = vor.u32 %v4451_v63, %v4448_v43  ;;  %v4462_v21 = vor.u32 %v4461_v62, %v4457_v48  ;;  %v3703_v16 = vadd.f32 %v7702_v56, %v7134_v2  ;;  %v4886_v13 = vsel %vm6751_vm14, %v4884_v45, %v4885_v30  ;;  %v5945_v56 = vld [vmem:[#allocation2 + $0x110] sm:$0xff] }
 0x2a5   : > { %5216 = vst [vmem:[%s7536_s6 + $0x48] sm:$0xff] %v5184_v33  ;;  %v3537_v19 = vpack.c.b16 %v3521_v12, %v3520_v47  ;;  %v4467_v23 = vrot.slane %v4465_v52, 5  ;;  %v4939_v2 = vunpack.c.l.b16 %v4886_v13  ;;  %v3704_v47 = vadd.f32 %v7721_v42, %v7146_v32 }
 0x2a6   : > { %v4453_v44 = vrot.slane %v4452_v14, 4  ;;  %v4463_v51 = vrot.slane %v4462_v21, 4  ;;  %v4889_v0 = vrot.slane %v7713_v17, 5  ;;  %v4892_v32 = vrot.slane %v7733_v41, 5 }
 0x2a7   : > { %3994 = vmatmul.bf16.gmra.mxu2 %v5944_v11 }
 0x2a8   : > { %v5056_v15 = vpop.f32.mrf.mxu0  ;;  %v4458_v34 = vsel %vm6376_vm11, %v4453_v44, %v4457_v48  ;;  %v4468_v53 = vsel %vm6376_vm11, %v4463_v51, %v4467_v23  ;;  %v4891_v62 = vrot.slane %v4889_v0, 4 }
 0x2a9   : > { %v5121_v28 = vadd.f32 %v5056_v15, %v4696_v20  ;;  %v4515_v12 = vunpack.c.l.b16 %v4458_v34 }
 0x2aa   : > { %v4633_v57 = vpop.f32.mrf.mxu3  ;;  %v3955_v6 = vpop.f32.mrf.mxu2 }
 0x2ab   : > { %5095 = vmatmul.bf16.gmra.mxu0 %v4955_v37  ;;  %v5185_v24 = vadd.f32 %v7475_v22, %v5121_v28  ;;  %v3646_v3 = vpop.f32.mrf.mxu1  ;;  %v4697_v40 = vadd.f32 %v4633_v57, %v4016_v55  ;;  %v4883_v22 = vsel %vm6751_vm14, %v5811_v60, %v4882_v8  ;;  %v4017_v33 = vadd.f32 %v3955_v6, %v3703_v16  ;;  %v4733_v8 = vld [vmem:[#allocation2 + $0x110] sm:$0xe] }
 0x2ac   : > { %v4938_v5 = vunpack.c.l.b16 %v4883_v22  ;;  %v4516_v37 = vunpack.c.l.b16 %v4468_v53  ;;  %v5812_v48 = vrot.slane %v4733_v8, 9  ;;  %v3705_v28 = vadd.f32 %v3646_v3, %v7162_v59  ;;  %v7883_v53 = vld [vmem:[#allocation10_spill] sm:$0xff] }
 0x2ad   : > { %3685 = vmatmul.bf16.gmra.mxu1 %v3537_v19  ;;  %5217 = vst [vmem:[%s7536_s6 + $0x50] sm:$0xff] %v5185_v24  ;;  %v4893_v19 = vsel %vm6751_vm14, %v4891_v62, %v4892_v32 }
 0x2ae   : > { %v4956_v20 = vpack.c.b16 %v4939_v2, %v4938_v5  ;;  %v4532_v43 = vpack.c.b16 %v4516_v37, %v4515_v12  ;;  %v4890_v55 = vsel %vm6751_vm14, %v5812_v48, %v4889_v0  ;;  %v4941_v60 = vunpack.c.l.b16 %v4893_v19 }
 0x2af   : > { %4675 = vmatmul.bf16.gmra.mxu3 %v4531_v27  ;;  %v4940_v41 = vunpack.c.l.b16 %v4890_v55 }
 0x2b0   : > { %v5058_v1 = vpop.f32.mrf.mxu0 }
 0x2b1   : > { %v5122_v31 = vadd.f32 %v5058_v1, %v4697_v40  ;;  %v4957_v59 = vpack.c.b16 %v4941_v60, %v4940_v41  ;;  %v7889_v60 = vld [vmem:[#allocation13_spill] sm:$0xff] }
 0x2b2   : > { %v4636_v11 = vpop.f32.mrf.mxu3  ;;  %v3957_v29 = vpop.f32.mrf.mxu2 }
 0x2b3   : > { %v5186_v38 = vadd.f32 %v7478_v25, %v5122_v31  ;;  %v3648_v9 = vpop.f32.mrf.mxu1  ;;  %v4698_v58 = vadd.f32 %v4636_v11, %v4017_v33  ;;  %v4018_v50 = vadd.f32 %v3957_v29, %v3704_v47 }
 0x2b4   : > { %v3706_v3 = vadd.f32 %v3648_v9, %v7175_v46 }
 0x2b5   : > { %5218 = vst [vmem:[%s7536_s6 + $0x58] sm:$0xff] %v5186_v38 }
 0x2b7   : > { %3999 = vmatmul.bf16.gmra.mxu2 %v5945_v56 }
 0x2b8   : > { %v5061_v25 = vpop.f32.mrf.mxu0 }
 0x2b9   : > { %v5123_v54 = vadd.f32 %v5061_v25, %v4698_v58 }
 0x2ba   : > { %v4638_v15 = vpop.f32.mrf.mxu3  ;;  %v3960_v18 = vpop.f32.mrf.mxu2 }
 0x2bb   : > { %5100 = vmatmul.bf16.gmra.mxu0 %v4956_v20  ;;  %v5187_v26 = vadd.f32 %v7481_v35, %v5123_v54  ;;  %v3651_v63 = vpop.f32.mrf.mxu1  ;;  %v4699_v42 = vadd.f32 %v4638_v15, %v4018_v50  ;;  %v4019_v57 = vadd.f32 %v3960_v18, %v3705_v28  ;;  %v7885_v50 = vld [vmem:[#allocation11_spill] sm:$0xff] }
 0x2bc   : > { %v3707_v1 = vadd.f32 %v3651_v63, %v7191_v7  ;;  %v7886_v63 = vld [vmem:[#allocation22_spill] sm:$0xff] }
 0x2bd   : > { %5219 = vst [vmem:[%s7536_s6 + $0x60] sm:$0xff] %v5187_v26 }
 0x2bf   : > { %4680 = vmatmul.bf16.gmra.mxu3 %v4532_v43 }
 0x2c0   : > { %v5063_v17 = vpop.f32.mrf.mxu0 }
 0x2c1   : > { %v5124_v35 = vadd.f32 %v5063_v17, %v4699_v42  ;;  %v7887_v42 = vld [vmem:[#allocation12_spill] sm:$0xff] }
 0x2c2   : > { %v4641_v6 = vpop.f32.mrf.mxu3  ;;  %v3962_v24 = vpop.f32.mrf.mxu2 }
 0x2c3   : > { %v5188_v27 = vadd.f32 %v7484_v39, %v5124_v35  ;;  %v3653_v30 = vpop.f32.mrf.mxu1  ;;  %v4700_v45 = vadd.f32 %v4641_v6, %v4019_v57  ;;  %v4020_v52 = vadd.f32 %v3962_v24, %v3706_v3  ;;  %v7888_v6 = vld [vmem:[#allocation23_spill] sm:$0xff] }
 0x2c4   : > { %v3708_v29 = vadd.f32 %v3653_v30, %v7204_v4  ;;  %v7884_v4 = vld [vmem:[#allocation21_spill] sm:$0xff] }
 0x2c5   : > { %5220 = vst [vmem:[%s7536_s6 + $0x68] sm:$0xff] %v5188_v27 }
 0x2c8   : > { %v5066_v14 = vpop.f32.mrf.mxu0 }
 0x2c9   : > { %v5125_v21 = vadd.f32 %v5066_v14, %v4700_v45 }
 0x2ca   : > { %v4643_v49 = vpop.f32.mrf.mxu3  ;;  %v3965_v40 = vpop.f32.mrf.mxu2 }
 0x2cb   : > { %5105 = vmatmul.bf16.gmra.mxu0 %v4957_v59  ;;  %v5189_v16 = vadd.f32 %v7487_v36, %v5125_v21  ;;  %v3656_v22 = vpop.f32.mrf.mxu1  ;;  %v4701_v39 = vadd.f32 %v4643_v49, %v4020_v52  ;;  %v4021_v51 = vadd.f32 %v3965_v40, %v3707_v1  ;;  %v7890_v52 = vld [vmem:[#allocation24_spill] sm:$0xff] }
 0x2cc   : > { %v3709_v58 = vadd.f32 %v3656_v22, %v7883_v53  ;;  %v7891_v22 = vld [vmem:[#allocation14_spill] sm:$0xff] }
 0x2cd   : > { %5221 = vst [vmem:[%s7536_s6 + $0x70] sm:$0xff] %v5189_v16 }
 0x2d0   : > { %v5068_v13 = vpop.f32.mrf.mxu0 }
 0x2d1   : > { %v5126_v44 = vadd.f32 %v5068_v13, %v4701_v39 }
 0x2d2   : > { %v4646_v23 = vpop.f32.mrf.mxu3  ;;  %v3967_v46 = vpop.f32.mrf.mxu2 }
 0x2d3   : > { %v5190_v31 = vadd.f32 %v7490_v10, %v5126_v44  ;;  %v3658_v33 = vpop.f32.mrf.mxu1  ;;  %v4702_v11 = vadd.f32 %v4646_v23, %v4021_v51  ;;  %v4022_v5 = vadd.f32 %v3967_v46, %v3708_v29  ;;  %v7892_v46 = vld [vmem:[#allocation25_spill] sm:$0xff] }
 0x2d4   : > { %v3710_v8 = vadd.f32 %v3658_v33, %v7885_v50 }
 0x2d5   : > { %5222 = vst [vmem:[%s7536_s6 + $0x78] sm:$0xff] %v5190_v31 }
 0x2d8   : > { %v5071_v38 = vpop.f32.mrf.mxu0 }
 0x2d9   : > { %v5127_v36 = vadd.f32 %v5071_v38, %v4702_v11  ;;  %v7893_v11 = vld [vmem:[#allocation15_spill] sm:$0xff] }
 0x2da   : > { %v4648_v2 = vpop.f32.mrf.mxu3  ;;  %v3970_v56 = vpop.f32.mrf.mxu2 }
 0x2db   : > { %v5191_v7 = vadd.f32 %v7493_v61, %v5127_v36  ;;  %v3661_v9 = vpop.f32.mrf.mxu1  ;;  %v4703_v34 = vadd.f32 %v4648_v2, %v4022_v5  ;;  %v4023_v47 = vadd.f32 %v3970_v56, %v3709_v58  ;;  %v7895_v58 = vld [vmem:[#allocation16_spill] sm:$0xff] }
 0x2dc   : > { %v3711_v28 = vadd.f32 %v3661_v9, %v7887_v42  ;;  %v7894_v9 = vld [vmem:[#allocation26_spill] sm:$0xff] }
 0x2dd   : > { %5223 = vst [vmem:[%s7536_s6 + $0x80] sm:$0xff] %v5191_v7 }
 0x2e0   : > { %v5073_v20 = vpop.f32.mrf.mxu0 }
 0x2e1   : > { %v5128_v10 = vadd.f32 %v5073_v20, %v4703_v34 }
 0x2e2   : > { %v4651_v12 = vpop.f32.mrf.mxu3  ;;  %v3972_v37 = vpop.f32.mrf.mxu2 }
 0x2e3   : > { %v5192_v25 = vadd.f32 %v7884_v4, %v5128_v10  ;;  %v3663_v0 = vpop.f32.mrf.mxu1  ;;  %v4704_v54 = vadd.f32 %v4651_v12, %v4023_v47  ;;  %v4024_v18 = vadd.f32 %v3972_v37, %v3710_v8  ;;  %v7897_v8 = vld [vmem:[#allocation17_spill] sm:$0xff] }
 0x2e4   : > { %v3712_v30 = vadd.f32 %v3663_v0, %v7889_v60  ;;  %v7896_v0 = vld [vmem:[#allocation27_spill] sm:$0xff] }
 0x2e5   : > { %5224 = vst [vmem:[%s7536_s6 + $0x88] sm:$0xff] %v5192_v25 }
 0x2e8   : > { %v5076_v15 = vpop.f32.mrf.mxu0 }
 0x2e9   : > { %v5129_v61 = vadd.f32 %v5076_v15, %v4704_v54 }
 0x2ea   : > { %v4653_v26 = vpop.f32.mrf.mxu3  ;;  %v3975_v43 = vpop.f32.mrf.mxu2 }
 0x2eb   : > { %v5193_v48 = vadd.f32 %v7886_v63, %v5129_v61  ;;  %v3666_v62 = vpop.f32.mrf.mxu1  ;;  %v4705_v32 = vadd.f32 %v4653_v26, %v4024_v18  ;;  %v4025_v19 = vadd.f32 %v3975_v43, %v3711_v28  ;;  %v7899_v28 = vld [vmem:[#allocation18_spill] sm:$0xff] }
 0x2ec   : > { %v3713_v39 = vadd.f32 %v3666_v62, %v7891_v22  ;;  %v7903_v22 = vld [vmem:[#allocation4_spill] sm:$0xff] }
 0x2ed   : > { %5225 = vst [vmem:[%s7536_s6 + $0x90] sm:$0xff] %v5193_v48  ;;  %v7898_v48 = vld [vmem:[#allocation28_spill] sm:$0xff] }
 0x2f0   : > { %v5078_v17 = vpop.f32.mrf.mxu0 }
 0x2f1   : > { %v5130_v55 = vadd.f32 %v5078_v17, %v4705_v32 }
 0x2f2   : > { %v4656_v35 = vpop.f32.mrf.mxu3  ;;  %v3977_v57 = vpop.f32.mrf.mxu2 }
 0x2f3   : > { %v5194_v24 = vadd.f32 %v7888_v6, %v5130_v55  ;;  %v3668_v27 = vpop.f32.mrf.mxu1  ;;  %v4706_v41 = vadd.f32 %v4656_v35, %v4025_v19  ;;  %v4026_v3 = vadd.f32 %v3977_v57, %v3712_v30  ;;  %v7901_v30 = vld [vmem:[#allocation3_spill] sm:$0xff] }
 0x2f4   : > { %v3714_v29 = vadd.f32 %v3668_v27, %v7893_v11 }
 0x2f5   : > { %5226 = vst [vmem:[%s7536_s6 + $0x98] sm:$0xff] %v5194_v24  ;;  %v7900_v24 = vld [vmem:[#allocation29_spill] sm:$0xff] }
 0x2f8   : > { %v5081_v45 = vpop.f32.mrf.mxu0 }
 0x2f9   : > { %v5131_v59 = vadd.f32 %v5081_v45, %v4706_v41 }
 0x2fa   : > { %v4658_v14 = vpop.f32.mrf.mxu3  ;;  %v3980_v21 = vpop.f32.mrf.mxu2 }
 0x2fb   : > { %v5195_v49 = vadd.f32 %v7890_v52, %v5131_v59  ;;  %v4707_v40 = vadd.f32 %v4658_v14, %v4026_v3  ;;  %v3671_v16 = vpop.f32.mrf.mxu1  ;;  %v4027_v44 = vadd.f32 %v3980_v21, %v3713_v39 }
 0x2fc   : > { %v3715_v20 = vadd.f32 %v3671_v16, %v7895_v58 }
 0x2fd   : > { %5227 = vst [vmem:[%s7536_s6 + $0xa0] sm:$0xff] %v5195_v49  ;;  %v7902_v49 = vld [vmem:[#allocation30_spill] sm:$0xff] }
 0x300   : > { %v5083_v1 = vpop.f32.mrf.mxu0 }
 0x301   : > { %v5132_v13 = vadd.f32 %v5083_v1, %v4707_v40 }
 0x302   : > { %v4661_v51 = vpop.f32.mrf.mxu3  ;;  %v3982_v23 = vpop.f32.mrf.mxu2 }
 0x303   : > { %v5196_v31 = vadd.f32 %v7892_v46, %v5132_v13  ;;  %v4708_v33 = vadd.f32 %v4661_v51, %v4027_v44  ;;  %v3673_v38 = vpop.f32.mrf.mxu1  ;;  %v4028_v2 = vadd.f32 %v3982_v23, %v3714_v29  ;;  %v7905_v29 = vld [vmem:[#allocation5_spill] sm:$0xff] }
 0x304   : > { %v3716_v15 = vadd.f32 %v3673_v38, %v7897_v8 }
 0x305   : > { %5228 = vst [vmem:[%s7536_s6 + $0xa8] sm:$0xff] %v5196_v31  ;;  %v7904_v31 = vld [vmem:[#allocation31_spill] sm:$0xff] }
 0x308   : > { %v5086_v36 = vpop.f32.mrf.mxu0 }
 0x309   : > { %v5133_v5 = vadd.f32 %v5086_v36, %v4708_v33 }
 0x30a   : > { %v4663_v56 = vpop.f32.mrf.mxu3  ;;  %v3985_v7 = vpop.f32.mrf.mxu2 }
 0x30b   : > { %v5197_v34 = vadd.f32 %v7894_v9, %v5133_v5  ;;  %v4709_v53 = vadd.f32 %v4663_v56, %v4028_v2  ;;  %v4029_v12 = vadd.f32 %v3985_v7, %v3715_v20  ;;  %v3676_v37 = vpop.f32.mrf.mxu1  ;;  %v7906_v9 = vld [vmem:[#allocation32_spill] sm:$0xff]  ;;  %v7907_v20 = vld [vmem:[#allocation19_spill] sm:$0xff] }
 0x30c   : > { %v3717_v17 = vadd.f32 %v3676_v37, %v7899_v28 }
 0x30d   : > { %5229 = vst [vmem:[%s7536_s6 + $0xb0] sm:$0xff] %v5197_v34 }
 0x310   : > { %v5088_v10 = vpop.f32.mrf.mxu0 }
 0x311   : > { %v5134_v47 = vadd.f32 %v5088_v10, %v4709_v53 }
 0x312   : > { %v4666_v4 = vpop.f32.mrf.mxu3  ;;  %v3987_v25 = vpop.f32.mrf.mxu2 }
 0x313   : > { %v5198_v54 = vadd.f32 %v7896_v0, %v5134_v47  ;;  %v4710_v50 = vadd.f32 %v4666_v4, %v4029_v12  ;;  %v4030_v26 = vadd.f32 %v3987_v25, %v3716_v15  ;;  %v3678_v32 = vpop.f32.mrf.mxu1  ;;  %v7908_v25 = vld [vmem:[#allocation33_spill] sm:$0xff]  ;;  %v7909_v15 = vld [vmem:[#allocation20_spill] sm:$0xff] }
 0x314   : > { %v3718_v45 = vadd.f32 %v3678_v32, %v7901_v30 }
 0x315   : > { %5230 = vst [vmem:[%s7536_s6 + $0xb8] sm:$0xff] %v5198_v54 }
 0x318   : > { %v5091_v61 = vpop.f32.mrf.mxu0 }
 0x319   : > { %v5135_v18 = vadd.f32 %v5091_v61, %v4710_v50 }
 0x31a   : > { %v4668_v43 = vpop.f32.mrf.mxu3  ;;  %v3990_v63 = vpop.f32.mrf.mxu2 }
 0x31b   : > { %v5199_v62 = vadd.f32 %v7898_v48, %v5135_v18  ;;  %v4711_v42 = vadd.f32 %v4668_v43, %v4030_v26  ;;  %v4031_v35 = vadd.f32 %v3990_v63, %v3717_v17  ;;  %v3681_v60 = vpop.f32.mrf.mxu1  ;;  %v7910_v63 = vld [vmem:[#allocation34_spill] sm:$0xff]  ;;  %v7911_v17 = vld [vmem:[#allocation35_spill] sm:$0xff] }
 0x31c   : > { %v3719_v39 = vadd.f32 %v3681_v60, %v7903_v22 }
 0x31d   : > { %5231 = vst [vmem:[%s7536_s6 + $0xc0] sm:$0xff] %v5199_v62 }
 0x320   : > { %v5093_v55 = vpop.f32.mrf.mxu0 }
 0x321   : > { %v5136_v19 = vadd.f32 %v5093_v55, %v4711_v42 }
 0x322   : > { %v4671_v57 = vpop.f32.mrf.mxu3  ;;  %v3992_v6 = vpop.f32.mrf.mxu2 }
 0x323   : > { %v5200_v27 = vadd.f32 %v7900_v24, %v5136_v19  ;;  %v4712_v41 = vadd.f32 %v4671_v57, %v4031_v35  ;;  %v4032_v14 = vadd.f32 %v3992_v6, %v3718_v45  ;;  %v3683_v13 = vpop.f32.mrf.mxu1 }
 0x324   : > { %v3720_v38 = vadd.f32 %v3683_v13, %v7905_v29 }
 0x325   : > { %5232 = vst [vmem:[%s7536_s6 + $0xc8] sm:$0xff] %v5200_v27 }
 0x328   : > { %v5096_v59 = vpop.f32.mrf.mxu0 }
 0x329   : > { %v5137_v3 = vadd.f32 %v5096_v59, %v4712_v41 }
 0x32a   : > { %v4673_v21 = vpop.f32.mrf.mxu3  ;;  %v3995_v52 = vpop.f32.mrf.mxu2 }
 0x32b   : > { %v5201_v40 = vadd.f32 %v7902_v49, %v5137_v3  ;;  %v4713_v16 = vadd.f32 %v4673_v21, %v4032_v14  ;;  %v4033_v51 = vadd.f32 %v3995_v52, %v3719_v39  ;;  %v3686_v7 = vpop.f32.mrf.mxu1 }
 0x32c   : > { %v3721_v10 = vadd.f32 %v3686_v7, %v7907_v20 }
 0x32d   : > { %5233 = vst [vmem:[%s7536_s6 + $0xd0] sm:$0xff] %v5201_v40 }
 0x330   : > { %v5098_v1 = vpop.f32.mrf.mxu0 }
 0x331   : > { %v5138_v44 = vadd.f32 %v5098_v1, %v4713_v16 }
 0x332   : > { %v4676_v23 = vpop.f32.mrf.mxu3  ;;  %v3997_v46 = vpop.f32.mrf.mxu2 }
 0x333   : > { %v5202_v33 = vadd.f32 %v7904_v31, %v5138_v44  ;;  %v4714_v11 = vadd.f32 %v4676_v23, %v4033_v51  ;;  %v4034_v2 = vadd.f32 %v3997_v46, %v3720_v38  ;;  %v3688_v54 = vpop.f32.mrf.mxu1 }
 0x334   : > { %v3722_v61 = vadd.f32 %v3688_v54, %v7909_v15 }
 0x335   : > { %5234 = vst [vmem:[%s7536_s6 + $0xd8] sm:$0xff] %v5202_v33 }
 0x338   : > { %v5101_v36 = vpop.f32.mrf.mxu0 }
 0x339   : > { %v5139_v5 = vadd.f32 %v5101_v36, %v4714_v11 }
 0x33a   : > { %v4678_v56 = vpop.f32.mrf.mxu3  ;;  %v4000_v53 = vpop.f32.mrf.mxu2 }
 0x33b   : > { %v5203_v34 = vadd.f32 %v7906_v9, %v5139_v5  ;;  %v4715_v58 = vadd.f32 %v4678_v56, %v4034_v2  ;;  %v4035_v37 = vadd.f32 %v4000_v53, %v3721_v10 }
 0x33d   : > { %5235 = vst [vmem:[%s7536_s6 + $0xe0] sm:$0xff] %v5203_v34 }
 0x340   : > { %v5103_v47 = vpop.f32.mrf.mxu0 }
 0x341   : > { %v5140_v12 = vadd.f32 %v5103_v47, %v4715_v58 }
 0x342   : > { %v4681_v4 = vpop.f32.mrf.mxu3  ;;  %v4002_v8 = vpop.f32.mrf.mxu2 }
 0x343   : > { %v5204_v0 = vadd.f32 %v7908_v25, %v5140_v12  ;;  %v4716_v50 = vadd.f32 %v4681_v4, %v4035_v37  ;;  %v4036_v43 = vadd.f32 %v4002_v8, %v3722_v61 }
 0x345   : > { %5236 = vst [vmem:[%s7536_s6 + $0xe8] sm:$0xff] %v5204_v0 }
 0x348   : > { %v5106_v18 = vpop.f32.mrf.mxu0 }
 0x349   : > { %v5141_v26 = vadd.f32 %v5106_v18, %v4716_v50 }
 0x34a   : > { %v4683_v62 = vpop.f32.mrf.mxu3 }
 0x34b   : > { %v5205_v48 = vadd.f32 %v7910_v63, %v5141_v26  ;;  %v4717_v32 = vadd.f32 %v4683_v62, %v4036_v43 }
 0x34d   : > { %5237 = vst [vmem:[%s7536_s6 + $0xf0] sm:$0xff] %v5205_v48 }
 0x350   : > { %v5108_v42 = vpop.f32.mrf.mxu0 }
 0x351   : > { %v5142_v28 = vadd.f32 %v5108_v42, %v4717_v32 }
 0x353   : > { %v5206_v55 = vadd.f32 %v7911_v17, %v5142_v28 }
 0x355   : > { %5238 = vst [vmem:[%s7536_s6 + $0xf8] sm:$0xff] %v5206_v55 }
 0x356 PF: > { %s15_s18 = sadd.s32 1, %s6152_s18  }
 0x357   : > { %p12_p4 = scmp.ge.s32.totalorder %s15_s18, 4  }
 0x359   :  { %14 = sbr.rel (!%p12_p4) target bundleno = 1 (0x1), region = 76 }

</bundles_post_ra>
